<compile_context>
chip_gen: v6e
topology: v6e:2x2x1
jax: 0.10.0
libtpu: 0.0.40
codegen_flags: <defaults>
</compile_context>

<pallas_src>
import functools

import jax
import jax.numpy as jnp
from jax.experimental import pallas as pl
from jax.experimental.pallas import tpu as pltpu

D_IN, H1, H2, H3, D_OUT = 100, 256, 512, 1024, 28 * 28  # 784
D_IN_PAD = 128    # lane-aligned K for the first matmul
D_OUT_PAD = 896   # 7 * 128 -> full-lane (unmasked) output stores
NEG_SLOPE = 0.2


def _round_up(n, m):
    return (n + m - 1) // m * m


def _leaky_relu(x, slope=NEG_SLOPE):
    # For 0 < slope < 1 this is identical to where(x>0, x, slope*x): 2 VALU ops.
    return jnp.maximum(x, jnp.asarray(slope, x.dtype) * x)


def _bf16_epilogue_ok():
    """bf16 VPU/EUP exists on v6e / v7x; v5e (and older) keep f32 epilogues."""
    try:
        kind = jax.devices()[0].device_kind.lower()
    except Exception:
        return False
    return ("v6" in kind) or ("v7" in kind)


def _pick_tile_b(batch):
    """256 rows fills the 256-wide v6e/v7x MXU; 128 keeps >=2 grid steps for
    v7x's two TensorCores when B <= 256 (and is native width on v5e)."""
    return 256 if batch > 256 else 128


# ---------------------------------------------------------------------------
# Kernel
# ---------------------------------------------------------------------------
def generator_kernel(x_ref,
                     w1_ref, b1_ref,
                     w2_ref, b2_ref,
                     w3_ref, b3_ref,
                     w4_ref, b4_ref,
                     o_ref,
                     *, bf16_epilogue):
    """Fully fused 4-layer MLP for one batch tile.

    MXU matmuls take bf16 operands and accumulate in f32. Hidden-layer
    epilogues (bias + LeakyReLU) run in bf16 on bf16-capable VPUs, f32
    otherwise. Final bias add + tanh always run in f32.
    """

    def hidden_epilogue(acc_f32, b_ref):
        if bf16_epilogue:
            # acc -> bf16, bf16 bias add + LeakyReLU; result already bf16 for
            # the next MXU matmul (no extra cast).
            return _leaky_relu(acc_f32.astype(jnp.bfloat16) + b_ref[...])
        # f32 bias add + LeakyReLU, then one cast for the next matmul.
        return _leaky_relu(acc_f32 + b_ref[...]).astype(jnp.bfloat16)

    x = x_ref[...]                                            # bf16 already
    h = jnp.dot(x, w1_ref[...], preferred_element_type=jnp.float32)
    h = hidden_epilogue(h, b1_ref)

    h = jnp.dot(h, w2_ref[...], preferred_element_type=jnp.float32)
    h = hidden_epilogue(h, b2_ref)

    h = jnp.dot(h, w3_ref[...], preferred_element_type=jnp.float32)
    h = hidden_epilogue(h, b3_ref)

    h = jnp.dot(h, w4_ref[...], preferred_element_type=jnp.float32)
    h = h + b4_ref[...]                                       # f32 bias
    o_ref[...] = jnp.tanh(h).astype(o_ref.dtype)              # f32 tanh


# ---------------------------------------------------------------------------
# Parameter preparation (hoisted out of the hot path — call once, reuse)
# ---------------------------------------------------------------------------
def prepare_params(params, *, bf16_epilogue):
    """Zero-pad to lane-aligned shapes, cast weights to bf16.

    Hidden biases become bf16 iff the epilogues run in bf16; the last-layer
    bias stays f32 (final epilogue is always f32).
    """
    w1, b1, w2, b2, w3, b3, w4, b4 = params
    w1p = jnp.zeros((D_IN_PAD, H1), jnp.float32).at[:D_IN, :].set(w1)
    w4p = jnp.zeros((H3, D_OUT_PAD), jnp.float32).at[:, :D_OUT].set(w4)
    b4p = jnp.zeros((1, D_OUT_PAD), jnp.float32).at[:, :D_OUT].set(b4)
    bdt = jnp.bfloat16 if bf16_epilogue else jnp.float32
    return (w1p.astype(jnp.bfloat16), b1.astype(bdt),
            w2.astype(jnp.bfloat16), b2.astype(bdt),
            w3.astype(jnp.bfloat16), b3.astype(bdt),
            w4p.astype(jnp.bfloat16), b4p)


# ---------------------------------------------------------------------------
# Forward wrapper
# ---------------------------------------------------------------------------
def generator_forward(x, prepped_params, *, tile_b=None, bf16_epilogue=False):
    """x: (B, 100) float32 -> (B, 784) float32.

    `prepped_params` must come from prepare_params() (padded + cast); building
    them per call would cost more than the kernel itself.
    """
    w1, b1, w2, b2, w3, b3, w4, b4 = prepped_params

    B = x.shape[0]
    if tile_b is None:
        tile_b = _pick_tile_b(B)
    B_pad = _round_up(B, tile_b)
    grid = (B_pad // tile_b,)

    # Pad batch to a tile multiple, pad latent dim 100 -> 128, cast to bf16
    # here (halves the per-step input DMA; no in-kernel cast).
    x_p = (jnp.zeros((B_pad, D_IN_PAD), jnp.bfloat16)
           .at[:B, :D_IN].set(x.astype(jnp.bfloat16)))

    out = pl.pallas_call(
        functools.partial(generator_kernel, bf16_epilogue=bf16_epilogue),
        out_shape=jax.ShapeDtypeStruct((B_pad, D_OUT_PAD), jnp.float32),
        grid_spec=pltpu.PrefetchScalarGridSpec(
            num_scalar_prefetch=0,
            grid=grid,
            in_specs=[
                pl.BlockSpec((tile_b, D_IN_PAD), lambda i: (i, 0)),
                # Weights / biases: constant index_map -> DMA'd once, resident.
                pl.BlockSpec((D_IN_PAD, H1), lambda i: (0, 0)),
                pl.BlockSpec((1, H1), lambda i: (0, 0)),
                pl.BlockSpec((H1, H2), lambda i: (0, 0)),
                pl.BlockSpec((1, H2), lambda i: (0, 0)),
                pl.BlockSpec((H2, H3), lambda i: (0, 0)),
                pl.BlockSpec((1, H3), lambda i: (0, 0)),
                pl.BlockSpec((H3, D_OUT_PAD), lambda i: (0, 0)),
                pl.BlockSpec((1, D_OUT_PAD), lambda i: (0, 0)),
            ],
            out_specs=pl.BlockSpec((tile_b, D_OUT_PAD), lambda i: (i, 0)),
        ),
        compiler_params=pltpu.CompilerParams(
            dimension_semantics=("parallel",),   # batch tiles shard across TCs
            vmem_limit_bytes=32 << 20,           # actual use ~10-14 MiB
        ),
    )(x_p, w1, b1, w2, b2, w3, b3, w4, b4)

    return out[:B, :D_OUT]


# ---------------------------------------------------------------------------
# Reference / init
# ---------------------------------------------------------------------------
def generator_ref(x, prepped_params, *, bf16_epilogue=False):
    """Plain-JAX reference mirroring the kernel's mixed-precision math."""
    w1, b1, w2, b2, w3, b3, w4, b4 = prepped_params
    B = x.shape[0]
    x_p = (jnp.zeros((B, D_IN_PAD), jnp.bfloat16)
           .at[:, :D_IN].set(x.astype(jnp.bfloat16)))

    def epi(acc, b):
        if bf16_epilogue:
            return _leaky_relu(acc.astype(jnp.bfloat16) + b)
        return _leaky_relu(acc + b).astype(jnp.bfloat16)

    h = epi(jnp.dot(x_p, w1, preferred_element_type=jnp.float32), b1)
    h = epi(jnp.dot(h, w2, preferred_element_type=jnp.float32), b2)
    h = epi(jnp.dot(h, w3, preferred_element_type=jnp.float32), b3)
    out = jnp.tanh(jnp.dot(h, w4, preferred_element_type=jnp.float32) + b4)
    return out[:, :D_OUT]


def init_params(key):
    """Deterministic synthetic params. Weights as (in, out); biases (1, out)."""
    dims = [(D_IN, H1), (H1, H2), (H2, H3), (H3, D_OUT)]
    params = []
    keys = jax.random.split(key, len(dims) * 2)
    for idx, (din, dout) in enumerate(dims):
        kw, kb = keys[2 * idx], keys[2 * idx + 1]
        bound = 1.0 / (din ** 0.5)  # torch.nn.Linear default init scale
        w = jax.random.uniform(kw, (din, dout), jnp.float32, -bound, bound)
        b = jax.random.uniform(kb, (1, dout), jnp.float32, -bound, bound)
        params += [w, b]
    return tuple(params)


if __name__ == "__main__":
    key = jax.random.PRNGKey(0)
    kx, kp = jax.random.split(key)

    B = 256
    x = jax.random.normal(kx, (B, D_IN), jnp.float32)  # latent noise z
    raw_params = init_params(kp)

    bf16_epi = _bf16_epilogue_ok()

    # Hoisted, one-time parameter preparation (padding + casts), kept
    # device-resident and reused for every forward call.
    prepped = jax.device_put(prepare_params(raw_params, bf16_epilogue=bf16_epi))

    # tile_b=None -> auto: 128 for B=256 (grid=(2,): both v7x TCs busy, native
    # M on v5e), 256 for larger batches (fills the 256-wide v6e/v7x MXU).
    fwd = jax.jit(functools.partial(generator_forward,
                                    tile_b=None, bf16_epilogue=bf16_epi))

    out = jax.block_until_ready(fwd(x, prepped))

    ref = generator_ref(x, prepped, bf16_epilogue=bf16_epi)
    assert out.shape == (B, D_OUT)
    max_err = float(jnp.max(jnp.abs(out - ref)))
    assert jnp.allclose(out, ref, atol=2e-3, rtol=2e-3), (
        "mismatch vs reference: max abs err = %g" % max_err)

    print("KERNEL_OK")
</pallas_src>

<mosaic_0001>
module attributes {stable_mosaic.version = 11 : i64} {
  func.func @generator_kernel(%arg0: i32, %arg1: memref<128x128xbf16, #tpu.memory_space<vmem>>, %arg2: memref<128x256xbf16, #tpu.memory_space<vmem>>, %arg3: memref<1x256xf32, #tpu.memory_space<vmem>>, %arg4: memref<256x512xbf16, #tpu.memory_space<vmem>>, %arg5: memref<1x512xf32, #tpu.memory_space<vmem>>, %arg6: memref<512x1024xbf16, #tpu.memory_space<vmem>>, %arg7: memref<1x1024xf32, #tpu.memory_space<vmem>>, %arg8: memref<1024x896xbf16, #tpu.memory_space<vmem>>, %arg9: memref<1x896xf32, #tpu.memory_space<vmem>>, %arg10: memref<128x896xf32, #tpu.memory_space<vmem>>) attributes {dimension_semantics = [#tpu.dimension_semantics<parallel>], iteration_bounds = array<i64: 2>, scalar_prefetch = 0 : i64, scratch_operands = 0 : i64, tpu.core_type = #tpu.core_type<tc>, window_params = [{transform_indices = @transform_0, window_bounds = array<i64: 128, 128>}, {pipeline_mode = #tpu.pipeline_mode<synchronous>, transform_indices = @transform_1, window_bounds = array<i64: 128, 256>}, {pipeline_mode = #tpu.pipeline_mode<synchronous>, transform_indices = @transform_2, window_bounds = array<i64: 1, 256>}, {pipeline_mode = #tpu.pipeline_mode<synchronous>, transform_indices = @transform_3, window_bounds = array<i64: 256, 512>}, {pipeline_mode = #tpu.pipeline_mode<synchronous>, transform_indices = @transform_4, window_bounds = array<i64: 1, 512>}, {pipeline_mode = #tpu.pipeline_mode<synchronous>, transform_indices = @transform_5, window_bounds = array<i64: 512, 1024>}, {pipeline_mode = #tpu.pipeline_mode<synchronous>, transform_indices = @transform_6, window_bounds = array<i64: 1, 1024>}, {pipeline_mode = #tpu.pipeline_mode<synchronous>, transform_indices = @transform_7, window_bounds = array<i64: 1024, 896>}, {pipeline_mode = #tpu.pipeline_mode<synchronous>, transform_indices = @transform_8, window_bounds = array<i64: 1, 896>}, {transform_indices = @transform_9, window_bounds = array<i64: 128, 896>}]} {
    %c0 = arith.constant 0 : index
    %c0_0 = arith.constant 0 : index
    %0 = vector.load %arg1[%c0, %c0_0] : memref<128x128xbf16, #tpu.memory_space<vmem>>, vector<128x128xbf16>
    %c0_1 = arith.constant 0 : index
    %c0_2 = arith.constant 0 : index
    %1 = vector.load %arg2[%c0_1, %c0_2] : memref<128x256xbf16, #tpu.memory_space<vmem>>, vector<128x256xbf16>
    %cst = arith.constant dense<0.000000e+00> : vector<128x256xf32>
    %2 = tpu.matmul %0, %1, %cst {dimension_numbers = #tpu.dot_dimension_numbers<[1], [0], [0], [1], [0, 0, 1, 1], [], []>} : vector<128x128xbf16>, vector<128x256xbf16>, vector<128x256xf32> -> vector<128x256xf32>
    %c0_3 = arith.constant 0 : index
    %c0_4 = arith.constant 0 : index
    %3 = vector.load %arg3[%c0_3, %c0_4] : memref<1x256xf32, #tpu.memory_space<vmem>>, vector<1x256xf32>
    %4 = vector.broadcast %3 : vector<1x256xf32> to vector<128x256xf32>
    %5 = arith.addf %2, %4 : vector<128x256xf32>
    %cst_5 = arith.constant 2.000000e-01 : f32
    %6 = vector.broadcast %cst_5 : f32 to vector<128x256xf32>
    %7 = arith.mulf %6, %5 : vector<128x256xf32>
    %8 = arith.maximumf %5, %7 : vector<128x256xf32>
    %9 = arith.truncf %8 : vector<128x256xf32> to vector<128x256xbf16>
    %c0_6 = arith.constant 0 : index
    %c0_7 = arith.constant 0 : index
    %10 = vector.load %arg4[%c0_6, %c0_7] : memref<256x512xbf16, #tpu.memory_space<vmem>>, vector<256x512xbf16>
    %cst_8 = arith.constant dense<0.000000e+00> : vector<128x512xf32>
    %11 = tpu.matmul %9, %10, %cst_8 {dimension_numbers = #tpu.dot_dimension_numbers<[1], [0], [0], [1], [0, 0, 1, 1], [], []>} : vector<128x256xbf16>, vector<256x512xbf16>, vector<128x512xf32> -> vector<128x512xf32>
    %c0_9 = arith.constant 0 : index
    %c0_10 = arith.constant 0 : index
    %12 = vector.load %arg5[%c0_9, %c0_10] : memref<1x512xf32, #tpu.memory_space<vmem>>, vector<1x512xf32>
    %13 = vector.broadcast %12 : vector<1x512xf32> to vector<128x512xf32>
    %14 = arith.addf %11, %13 : vector<128x512xf32>
    %cst_11 = arith.constant 2.000000e-01 : f32
    %15 = vector.broadcast %cst_11 : f32 to vector<128x512xf32>
    %16 = arith.mulf %15, %14 : vector<128x512xf32>
    %17 = arith.maximumf %14, %16 : vector<128x512xf32>
    %18 = arith.truncf %17 : vector<128x512xf32> to vector<128x512xbf16>
    %c0_12 = arith.constant 0 : index
    %c0_13 = arith.constant 0 : index
    %19 = vector.load %arg6[%c0_12, %c0_13] : memref<512x1024xbf16, #tpu.memory_space<vmem>>, vector<512x1024xbf16>
    %cst_14 = arith.constant dense<0.000000e+00> : vector<128x1024xf32>
    %20 = tpu.matmul %18, %19, %cst_14 {dimension_numbers = #tpu.dot_dimension_numbers<[1], [0], [0], [1], [0, 0, 1, 1], [], []>} : vector<128x512xbf16>, vector<512x1024xbf16>, vector<128x1024xf32> -> vector<128x1024xf32>
    %c0_15 = arith.constant 0 : index
    %c0_16 = arith.constant 0 : index
    %21 = vector.load %arg7[%c0_15, %c0_16] : memref<1x1024xf32, #tpu.memory_space<vmem>>, vector<1x1024xf32>
    %22 = vector.broadcast %21 : vector<1x1024xf32> to vector<128x1024xf32>
    %23 = arith.addf %20, %22 : vector<128x1024xf32>
    %cst_17 = arith.constant 2.000000e-01 : f32
    %24 = vector.broadcast %cst_17 : f32 to vector<128x1024xf32>
    %25 = arith.mulf %24, %23 : vector<128x1024xf32>
    %26 = arith.maximumf %23, %25 : vector<128x1024xf32>
    %27 = arith.truncf %26 : vector<128x1024xf32> to vector<128x1024xbf16>
    %c0_18 = arith.constant 0 : index
    %c0_19 = arith.constant 0 : index
    %28 = vector.load %arg8[%c0_18, %c0_19] : memref<1024x896xbf16, #tpu.memory_space<vmem>>, vector<1024x896xbf16>
    %cst_20 = arith.constant dense<0.000000e+00> : vector<128x896xf32>
    %29 = tpu.matmul %27, %28, %cst_20 {dimension_numbers = #tpu.dot_dimension_numbers<[1], [0], [0], [1], [0, 0, 1, 1], [], []>} : vector<128x1024xbf16>, vector<1024x896xbf16>, vector<128x896xf32> -> vector<128x896xf32>
    %c0_21 = arith.constant 0 : index
    %c0_22 = arith.constant 0 : index
    %30 = vector.load %arg9[%c0_21, %c0_22] : memref<1x896xf32, #tpu.memory_space<vmem>>, vector<1x896xf32>
    %31 = vector.broadcast %30 : vector<1x896xf32> to vector<128x896xf32>
    %32 = arith.addf %29, %31 : vector<128x896xf32>
    %33 = math.tanh %32 : vector<128x896xf32>
    %c0_23 = arith.constant 0 : index
    %c0_24 = arith.constant 0 : index
    %34 = vector.load %arg10[%c0_23, %c0_24] : memref<128x896xf32, #tpu.memory_space<vmem>>, vector<128x896xf32>
    tpu.vector_store %arg10[%c0_23, %c0_24], %33 {strides = array<i32>} : memref<128x896xf32, #tpu.memory_space<vmem>>, vector<128x896xf32>,
    return
  }
  func.func @transform_0(%arg0: i32) -> (i32, i32) {
    %c0_i32 = arith.constant 0 : i32
    %c0_i32_0 = arith.constant 0 : i32
    return %arg0, %c0_i32 : i32, i32
  }
  func.func @transform_1(%arg0: i32) -> (i32, i32) {
    %c0_i32 = arith.constant 0 : i32
    %c0_i32_0 = arith.constant 0 : i32
    %c0_i32_1 = arith.constant 0 : i32
    return %c0_i32, %c0_i32_0 : i32, i32
  }
  func.func @transform_2(%arg0: i32) -> (i32, i32) {
    %c0_i32 = arith.constant 0 : i32
    %c0_i32_0 = arith.constant 0 : i32
    %c0_i32_1 = arith.constant 0 : i32
    return %c0_i32, %c0_i32_0 : i32, i32
  }
  func.func @transform_3(%arg0: i32) -> (i32, i32) {
    %c0_i32 = arith.constant 0 : i32
    %c0_i32_0 = arith.constant 0 : i32
    %c0_i32_1 = arith.constant 0 : i32
    return %c0_i32, %c0_i32_0 : i32, i32
  }
  func.func @transform_4(%arg0: i32) -> (i32, i32) {
    %c0_i32 = arith.constant 0 : i32
    %c0_i32_0 = arith.constant 0 : i32
    %c0_i32_1 = arith.constant 0 : i32
    return %c0_i32, %c0_i32_0 : i32, i32
  }
  func.func @transform_5(%arg0: i32) -> (i32, i32) {
    %c0_i32 = arith.constant 0 : i32
    %c0_i32_0 = arith.constant 0 : i32
    %c0_i32_1 = arith.constant 0 : i32
    return %c0_i32, %c0_i32_0 : i32, i32
  }
  func.func @transform_6(%arg0: i32) -> (i32, i32) {
    %c0_i32 = arith.constant 0 : i32
    %c0_i32_0 = arith.constant 0 : i32
    %c0_i32_1 = arith.constant 0 : i32
    return %c0_i32, %c0_i32_0 : i32, i32
  }
  func.func @transform_7(%arg0: i32) -> (i32, i32) {
    %c0_i32 = arith.constant 0 : i32
    %c0_i32_0 = arith.constant 0 : i32
    %c0_i32_1 = arith.constant 0 : i32
    return %c0_i32, %c0_i32_0 : i32, i32
  }
  func.func @transform_8(%arg0: i32) -> (i32, i32) {
    %c0_i32 = arith.constant 0 : i32
    %c0_i32_0 = arith.constant 0 : i32
    %c0_i32_1 = arith.constant 0 : i32
    return %c0_i32, %c0_i32_0 : i32, i32
  }
  func.func @transform_9(%arg0: i32) -> (i32, i32) {
    %c0_i32 = arith.constant 0 : i32
    %c0_i32_0 = arith.constant 0 : i32
    return %arg0, %c0_i32 : i32, i32
  }
}

</mosaic_0001>

<bundles_post_ra>
// kernel: generator_forward.1
= control target key start
LH: loop header
LB: loop body
LE: loop exit
PB: predicated region body
PF: predicated region fallthrough
CT: control target
= control target key end

     0   :  { %14 = vsyncpa [#allocation3], 0  ;;  %s15043_s0 = inlined_call_operand.vmem [shape: bf16[256,128], index: 0, kind: input, shape index: {}]   ;;  %s15044_s1 = inlined_call_operand.hbm [shape: bf16[128,256], index: 1, kind: input, shape index: {}]   ;;  %s15045_s2 = inlined_call_operand.hbm [shape: f32[1,256], index: 2, kind: input, shape index: {}]   ;;  %s15046_s3 = inlined_call_operand.hbm [shape: bf16[256,512], index: 3, kind: input, shape index: {}]   ;;  %s15047_s4 = inlined_call_operand.hbm [shape: f32[1,512], index: 4, kind: input, shape index: {}]   ;;  %s15048_s5 = inlined_call_operand.hbm [shape: bf16[512,1024], index: 5, kind: input, shape index: {}]   ;;  %s15049_s6 = inlined_call_operand.hbm [shape: f32[1,1024], index: 6, kind: input, shape index: {}]   ;;  %s15050_s7 = inlined_call_operand.hbm [shape: bf16[1024,896], index: 7, kind: input, shape index: {}]   ;;  %s15051_s8 = inlined_call_operand.hbm [shape: f32[1,896], index: 8, kind: input, shape index: {}]   ;;  %s15052_s9 = inlined_call_operand.vmem [shape: f32[256,896], index: 9, kind: output, shape index: {}]  }
   0x1   :  { %15 = vsyncpa [#allocation5], 0 }
   0x2   :  { %16 = vsyncpa [#allocation8], 0 }
   0x3   :  { %17 = vsyncpa [#allocation11], 0 }
   0x4   :  { %18 = vsyncpa [#allocation14], 0  ;;  %s11853_s30 = smov 0  }
   0x5 LB: > { %s11786_s10 = smov [#allocation4]   ;;  %s9365_s12 = sadd.s32 4294967295, %s11784_s30   ;;  %s11784_s30 = sphi %s11853_s30, %s24_s30  }
   0x6   : > { %s275_s11 = sshll.u32 %s11786_s10, 4  ;;  %p9367_p0 = scmp.ge.s32.totalorder %s11784_s30, 1  ;;  %s276_s11 = int_to_ptr.vmem [resolvable:$true] %s275_s11 }
   0x7   : > { %p249_p1 = scmp.lt.s32.totalorder %s11784_s30, 3  ;;  %p11863_p2 = scmp.eq.s32.totalorder %s9365_s12, 0 }
   0x8   : > { %s11787_s15 = smov [#allocation7]   ;;  %s11788_s17 = smov [#allocation10]  }
   0x9   : > { %s15212_s13 = scalar_select %p11863_p2, 1, 0 }
   0xa   : > { %p11867_p3 = pnand %p9367_p0, %p249_p1  ;;  %s299_s16 = sshll.u32 %s11787_s15, 4  ;;  %s300_s16 = int_to_ptr.vmem [resolvable:$true] %s299_s16 }
   0xb   : > { %s323_s18 = sshll.u32 %s11788_s17, 4  ;;  %s11789_s20 = smov [#allocation2]   ;;  %s11879_s18 = int_to_ptr.vmem [resolvable:$true] %s323_s18 }
   0xc   : > { %s15213_s14 = scalar_select %p11867_p3, 1, 0 }
   0xd   : > { %p10489_p4 = pneg %p11867_p3  ;;  %s261_s21 = sshll.u32 %s11789_s20, 4  ;;  %s11881_s21 = int_to_ptr.vmem [resolvable:$true] %s261_s21 }
   0xe   : > { %s11561_s23 = scalar_lea.vmem %s276_s11, 32  ;;  %p11569_p10 = scmp.lt.s32.totalorder %s276_s11, %s276_s11 }
   0xf   : > { %p11875_p5 = pnand %p11863_p2, %p10489_p4  ;;  %p11562_p7 = scmp.ne.s32.totalorder %s276_s11, %s11561_s23 }
  0x10   : > { %p11570_p11 = scmp.lt.s32.totalorder %s11561_s23, %s11561_s23 }
  0x11   : > { %p11885_p6 = pneg %p11875_p5 }
  0x12   : > { %p11571_p12 = por %p11570_p11, %p11569_p10 }
  0x13   : > { %p11564_p8 = pnand %p11562_p7, %p11885_p6 }
  0x15   : > { %p11565_p9 = pneg %p11564_p8 }
  0x17   : > { %p11572_p13 = pnand %p11571_p12, %p11565_p9 }
  0x19   : > { %11575 = shalt.err (!%p11572_p13)
}
  0x1a   : > { %10495 = dma.hbm_to_vmem [thread:$0]  (!%p11875_p5), %s15045_s2, 32, %s276_s11, [#allocation5]  }
  0x1b   : > { %s11587_s26 = scalar_lea.vmem %s300_s16, 64  ;;  %p11595_p2 = scmp.lt.s32.totalorder %s300_s16, %s300_s16 }
  0x1c   : > { %p11588_p0 = scmp.ne.s32.totalorder %s300_s16, %s11587_s26  ;;  %p11596_p7 = scmp.lt.s32.totalorder %s11587_s26, %s11587_s26 }
  0x1e   : > { %p11590_p1 = pnand %p11588_p0, %p11885_p6  ;;  %p11597_p8 = por %p11596_p7, %p11595_p2 }
  0x20   : > { %p11591_p4 = pneg %p11590_p1 }
  0x22   : > { %p11598_p3 = pnand %p11597_p8, %p11591_p4 }
  0x24   : > { %11601 = shalt.err (!%p11598_p3)
}
  0x25   : > { %10501 = dma.hbm_to_vmem [thread:$0]  (!%p11875_p5), %s15047_s4, 64, %s300_s16, [#allocation8]  }
  0x26   : > { %s11613_s29 = scalar_lea.vmem %s11879_s18, 128  ;;  %p11621_p12 = scmp.lt.s32.totalorder %s11879_s18, %s11879_s18 }
  0x27   : > { %p11614_p9 = scmp.ne.s32.totalorder %s11879_s18, %s11613_s29  ;;  %p11622_p2 = scmp.lt.s32.totalorder %s11613_s29, %s11613_s29 }
  0x29   : > { %p11616_p10 = pnand %p11614_p9, %p11885_p6  ;;  %p11623_p13 = por %p11622_p2, %p11621_p12 }
  0x2b   : > { %p11617_p11 = pneg %p11616_p10 }
  0x2d   : > { %p11624_p3 = pnand %p11623_p13, %p11617_p11 }
  0x2f   : > { %11627 = shalt.err (!%p11624_p3)
}
  0x30   : > { %10507 = dma.hbm_to_vmem [thread:$0]  (!%p11875_p5), %s15049_s6, 128, %s11879_s18, [#allocation11]  }
  0x31   : > { %s11639_s15 = scalar_lea.vmem %s11881_s21, 2048  ;;  %p11647_p7 = scmp.lt.s32.totalorder %s11881_s21, %s11881_s21 }
  0x32   : > { %p11640_p0 = scmp.ne.s32.totalorder %s11881_s21, %s11639_s15  ;;  %p11648_p8 = scmp.lt.s32.totalorder %s11639_s15, %s11639_s15 }
  0x34   : > { %p11642_p1 = pnand %p11640_p0, %p11885_p6  ;;  %p11649_p9 = por %p11648_p8, %p11647_p7 }
  0x36   : > { %p11643_p4 = pneg %p11642_p1 }
  0x38   : > { %p11650_p10 = pnand %p11649_p9, %p11643_p4 }
  0x3a   : > { %11653 = shalt.err (!%p11650_p10)
}
  0x3b   : > { %s11790_s16 = smov 128   ;;  %s11791_s17 = smov 8  }
  0x3c   : > { %10492 = dma.hbm_to_vmem [thread:$0]  (!%p11875_p5), %s15044_s1, 2048, %s11881_s21, [#allocation3], %s11790_s16, %s11790_s16, %s11791_s17  }
  0x3d   : > { %s11792_s18 = smov [#allocation6]  }
  0x3e   : > { %s285_s24 = sshll.u32 %s11792_s18, 4  ;;  %s286_s24 = int_to_ptr.vmem [resolvable:$true] %s285_s24 }
  0x3f   : > { %s11665_s25 = scalar_lea.vmem %s286_s24, 8192  ;;  %p11673_p13 = scmp.lt.s32.totalorder %s286_s24, %s286_s24 }
  0x40   : > { %p11666_p11 = scmp.ne.s32.totalorder %s286_s24, %s11665_s25  ;;  %p11674_p3 = scmp.lt.s32.totalorder %s11665_s25, %s11665_s25 }
  0x42   : > { %p11668_p12 = pnand %p11666_p11, %p11885_p6  ;;  %p11675_p0 = por %p11674_p3, %p11673_p13 }
  0x44   : > { %p11669_p2 = pneg %p11668_p12 }
  0x46   : > { %p11676_p1 = pnand %p11675_p0, %p11669_p2 }
  0x48   : > { %11679 = shalt.err (!%p11676_p1)
}
  0x49   : > { %s11793_s26 = smov 256   ;;  %s11794_s27 = smov 16  }
  0x4a   : > { %10498 = dma.hbm_to_vmem [thread:$0]  (!%p11875_p5), %s15046_s3, 8192, %s286_s24, [#allocation5], %s11793_s26, %s11793_s26, %s11794_s27  }
  0x4b   : > { %s11795_s29 = smov [#allocation9]  }
  0x4c   : > { %s309_s10 = sshll.u32 %s11795_s29, 4  ;;  %s310_s10 = int_to_ptr.vmem [resolvable:$true] %s309_s10 }
  0x4d   : > { %s11691_s11 = scalar_lea.vmem %s310_s10, 32768  ;;  %p11699_p9 = scmp.lt.s32.totalorder %s310_s10, %s310_s10 }
  0x4e   : > { %p11692_p4 = scmp.ne.s32.totalorder %s310_s10, %s11691_s11  ;;  %p11700_p10 = scmp.lt.s32.totalorder %s11691_s11, %s11691_s11 }
  0x50   : > { %p11694_p7 = pnand %p11692_p4, %p11885_p6  ;;  %p11701_p11 = por %p11700_p10, %p11699_p9 }
  0x52   : > { %p11695_p8 = pneg %p11694_p7 }
  0x54   : > { %p11702_p12 = pnand %p11701_p11, %p11695_p8 }
  0x56   : > { %11705 = shalt.err (!%p11702_p12)
}
  0x57   : > { %s11796_s15 = smov 512   ;;  %s11797_s16 = smov 32  }
  0x58   : > { %10504 = dma.hbm_to_vmem [thread:$0]  (!%p11875_p5), %s15048_s5, 32768, %s310_s10, [#allocation8], %s11796_s15, %s11796_s15, %s11797_s16  }
  0x59   : > { %s11798_s23 = smov [#allocation12]  }
  0x5a   : > { %s333_s18 = sshll.u32 %s11798_s23, 4  ;;  %s334_s18 = int_to_ptr.vmem [resolvable:$true] %s333_s18 }
  0x5b   : > { %s11717_s24 = scalar_lea.vmem %s334_s18, 57344  ;;  %p11725_p0 = scmp.lt.s32.totalorder %s334_s18, %s334_s18 }
  0x5c   : > { %p11718_p2 = scmp.ne.s32.totalorder %s334_s18, %s11717_s24  ;;  %p11726_p1 = scmp.lt.s32.totalorder %s11717_s24, %s11717_s24 }
  0x5e   : > { %p11720_p13 = pnand %p11718_p2, %p11885_p6  ;;  %p11727_p4 = por %p11726_p1, %p11725_p0 }
  0x60   : > { %p11721_p3 = pneg %p11720_p13 }
  0x62   : > { %p11728_p7 = pnand %p11727_p4, %p11721_p3 }
  0x64   : > { %11731 = shalt.err (!%p11728_p7)
}
  0x65   : > { %s11799_s25 = smov 448   ;;  %s11800_s26 = smov 28  }
  0x66   : > { %10510 = dma.hbm_to_vmem [thread:$0]  (!%p11875_p5), %s15050_s7, 57344, %s334_s18, [#allocation11], %s11799_s25, %s11799_s25, %s11800_s26  }
  0x67   : > { %s11801_s21 = smov [#allocation13]  }
  0x68   : > { %s347_s29 = sshll.u32 %s11801_s21, 4  ;;  %s348_s29 = int_to_ptr.vmem [resolvable:$true] %s347_s29 }
  0x69   : > { %s11743_s10 = scalar_lea.vmem %s348_s29, 112  ;;  %s11750_s11 = scalar_lea.vmem %s348_s29, 128 }
  0x6a   : > { %p11744_p8 = scmp.ne.s32.totalorder %s348_s29, %s11743_s10  ;;  %p11751_p11 = scmp.lt.s32.totalorder %s348_s29, %s348_s29 }
  0x6b   : > { %p11752_p12 = scmp.lt.s32.totalorder %s11750_s11, %s11743_s10 }
  0x6c   : > { %p11746_p9 = pnand %p11744_p8, %p11885_p6 }
  0x6d   : > { %p11753_p2 = por %p11752_p12, %p11751_p11 }
  0x6e   : > { %p11747_p10 = pneg %p11746_p9 }
  0x70   : > { %p11754_p13 = pnand %p11753_p2, %p11747_p10 }
  0x72   : > { %11757 = shalt.err (!%p11754_p13)
}
  0x73   : > { %10513 = dma.hbm_to_vmem [thread:$0]  (!%p11875_p5), %s15051_s8, 112, %s348_s29, [#allocation14]  }
  0x74   : > { %p15216_p3 = scmp.ne.s32.totalorder %s15213_s14, 0 }
  0x76   : > { %369 = sbr.rel (%p15216_p3) target bundleno = 1636 (0x664), region = 56 }
  0x7b   : > { %p15217_p0 = scmp.ne.s32.totalorder %s15212_s13, 0 }
  0x7d   : > { %11763 = dma.done.wait (%p15217_p0), [#allocation3], 2048  }
  0x7e   : > { %11765 = vsyncadd (%p15217_p0), [#allocation3], 4294965248 }
  0x7f   : > { %11767 = dma.done.wait (%p15217_p0), [#allocation5], 8224  }
  0x80   : > { %11769 = vsyncadd (%p15217_p0), [#allocation5], 4294959072 }
  0x81   : > { %11771 = dma.done.wait (%p15217_p0), [#allocation8], 32832  }
  0x82   : > { %11773 = vsyncadd (%p15217_p0), [#allocation8], 4294934464 }
  0x83   : > { %11775 = dma.done.wait (%p15217_p0), [#allocation11], 57472  }
  0x84   : > { %11777 = vsyncadd (%p15217_p0), [#allocation11], 4294909824 }
  0x85   : > { %11779 = dma.done.wait (%p15217_p0), [#allocation14], 112  }
  0x86   : > { %11781 = vsyncadd (%p15217_p0), [#allocation14], 4294967184  ;;  %v11802_v0 = vmov 0   ;;  %s9386_s14 = sshll.u32 %s9365_s12, 4  ;;  %v10555_v1 = vld [vmem:[#allocation2 + $0x74] ss:$8 sps:$4 sm:$0xff]  }
  0x87   : > { %652 = vmatprep.mubr.bf16.mxu0 %v11802_v0  ;;  %p435_p5 = scmp.lt.s32.totalorder %s9386_s14, 31  ;;  %v10557_v2 = vld [vmem:[#allocation2 + $0x70] ss:$8 sps:$4 sm:$0xff]   ;;  %620 = vmatprep.subr.bf16.mxu0 %v10555_v1  ;;  %v10558_v3 = vld [vmem:[#allocation2 + $0x64] ss:$8 sps:$4 sm:$0xff]  }
  0x88   : > { %621 = vmatpush1.bf16.msra.mxu0 %v10557_v2  ;;  %v10560_v4 = vld [vmem:[#allocation2 + $0x60] ss:$8 sps:$4 sm:$0xff]   ;;  %v10561_v5 = vld [vmem:[#allocation2 + $0x54] ss:$8 sps:$4 sm:$0xff]   ;;  %v10563_v6 = vld [vmem:[#allocation2 + $0x50] ss:$8 sps:$4 sm:$0xff]  }
  0x89   : > { %s15869_s14 = smov (!%p435_p5, %s9386_s14), 31  ;;  %622 = vmatprep.subr.bf16.mxu0 %v10558_v3  ;;  %v10564_v7 = vld [vmem:[#allocation2 + $0x44] ss:$8 sps:$4 sm:$0xff]   ;;  %v10566_v8 = vld [vmem:[#allocation2 + $0x40] ss:$8 sps:$4 sm:$0xff]  }
  0x8a   : > { %s9387_s13 = sshll.u32 %s15869_s14, 2  ;;  %v10567_v9 = vld [vmem:[#allocation2 + $0x34] ss:$8 sps:$4 sm:$0xff]   ;;  %v10569_v10 = vld [vmem:[#allocation2 + $0x30] ss:$8 sps:$4 sm:$0xff]   ;;  %s10456_s17 = smul.u32 56, %s15869_s14 }
  0x8b   : > { %s11986_s12 = scalar_lea.vmem %s15043_s0, %s9387_s13  ;;  %v10570_v11 = vld [vmem:[#allocation2 + $0x24] ss:$8 sps:$4 sm:$0xff]   ;;  %v10572_v12 = vld [vmem:[#allocation2 + $0x20] ss:$8 sps:$4 sm:$0xff]   ;;  %v10573_v14 = vld [vmem:[#allocation2 + $0x14] ss:$8 sps:$4 sm:$0xff]  }
  0x8c   : > { %623 = vmatpush1.bf16.msra.mxu0 %v10560_v4  ;;  %v10587_v13 = vld [vmem:[#allocation6 + $0xe4] ss:$16 sps:$4 sm:$0xff]   ;;  %v10592_v15 = vld [vmem:[#allocation6 + $0xe0] ss:$16 sps:$4 sm:$0xff]   ;;  %v10591_v23 = vld [vmem:[#allocation6 + $0xec] ss:$16 sps:$4 sm:$0xff]   ;;  %s13866_s18 = scalar_lea.vmem %s15052_s9, %s10456_s17 }
  0x8d   : > { %624 = vmatprep.subr.bf16.mxu0 %v10561_v5  ;;  %1219 = vmatprep.subr.bf16.mxu1 %v10587_v13  ;;  %v10593_v16 = vld [vmem:[#allocation6 + $0xc4] ss:$16 sps:$4 sm:$0xff]   ;;  %v10598_v19 = vld [vmem:[#allocation6 + $0xc0] ss:$16 sps:$4 sm:$0xff]   ;;  %v10589_v26 = vld [vmem:[#allocation6 + $0xe8] ss:$16 sps:$4 sm:$0xff]  }
  0x8e   : > { %v10575_v17 = vld [vmem:[#allocation2 + $0x10] ss:$8 sps:$4 sm:$0xff]   ;;  %v10576_v18 = vld [vmem:[#allocation2 + $0x4] ss:$8 sps:$4 sm:$0xff]   ;;  %1220 = vmatpush1.bf16.msra.mxu1 %v10592_v15  ;;  %v10578_v21 = vld [vmem:[#allocation2] ss:$8 sps:$4 sm:$0xff]  }
  0x8f   : > { %1221 = vmatprep.subr.bf16.mxu1 %v10593_v16  ;;  %v10599_v20 = vld [vmem:[#allocation6 + $0xa4] ss:$16 sps:$4 sm:$0xff]   ;;  %v10604_v22 = vld [vmem:[#allocation6 + $0xa0] ss:$16 sps:$4 sm:$0xff]   ;;  %v10597_v27 = vld [vmem:[#allocation6 + $0xcc] ss:$16 sps:$4 sm:$0xff]  }
  0x90   : > { %625 = vmatpush1.bf16.msra.mxu0 %v10563_v6  ;;  %v10605_v24 = vld [vmem:[#allocation6 + $0x84] ss:$16 sps:$4 sm:$0xff]   ;;  %v10610_v28 = vld [vmem:[#allocation6 + $0x80] ss:$16 sps:$4 sm:$0xff]   ;;  %v10595_v30 = vld [vmem:[#allocation6 + $0xc8] ss:$16 sps:$4 sm:$0xff]  }
  0x91   : > { %626 = vmatprep.subr.bf16.mxu0 %v10564_v7  ;;  %v10579_v25 = vld [vmem:[%s11986_s12] sm:$0xff]   ;;  %v10580_v34 = vld [vmem:[%s11986_s12 + $0x8] sm:$0xff]   ;;  %v10581_v43 = vld [vmem:[%s11986_s12 + $0x10] sm:$0xff]  }
  0x92   : > { %1222 = vmatpush1.bf16.msra.mxu1 %v10598_v19  ;;  %v10611_v29 = vld [vmem:[#allocation6 + $0x64] ss:$16 sps:$4 sm:$0xff]   ;;  %v10603_v31 = vld [vmem:[#allocation6 + $0xac] ss:$16 sps:$4 sm:$0xff]   ;;  %v10616_v32 = vld [vmem:[#allocation6 + $0x60] ss:$16 sps:$4 sm:$0xff]  }
  0x93   : > { %1223 = vmatprep.subr.bf16.mxu1 %v10599_v20  ;;  %v10617_v33 = vld [vmem:[#allocation6 + $0x44] ss:$16 sps:$4 sm:$0xff]   ;;  %v10601_v35 = vld [vmem:[#allocation6 + $0xa8] ss:$16 sps:$4 sm:$0xff]   ;;  %v10609_v36 = vld [vmem:[#allocation6 + $0x8c] ss:$16 sps:$4 sm:$0xff]  }
  0x94   : > { %627 = vmatpush1.bf16.msra.mxu0 %v10566_v8  ;;  %v10622_v37 = vld [vmem:[#allocation6 + $0x40] ss:$16 sps:$4 sm:$0xff]   ;;  %v10623_v38 = vld [vmem:[#allocation6 + $0x24] ss:$16 sps:$4 sm:$0xff]   ;;  %v10607_v39 = vld [vmem:[#allocation6 + $0x88] ss:$16 sps:$4 sm:$0xff]  }
  0x95   : > { %628 = vmatprep.subr.bf16.mxu0 %v10567_v9  ;;  %v10615_v40 = vld [vmem:[#allocation6 + $0x6c] ss:$16 sps:$4 sm:$0xff]   ;;  %v10628_v41 = vld [vmem:[#allocation6 + $0x20] ss:$16 sps:$4 sm:$0xff]   ;;  %v10629_v42 = vld [vmem:[#allocation6 + $0x4] ss:$16 sps:$4 sm:$0xff]  }
  0x96   : > { %1224 = vmatpush1.bf16.msra.mxu1 %v10604_v22  ;;  %v10613_v44 = vld [vmem:[#allocation6 + $0x68] ss:$16 sps:$4 sm:$0xff]   ;;  %v10621_v45 = vld [vmem:[#allocation6 + $0x4c] ss:$16 sps:$4 sm:$0xff]   ;;  %v10634_v46 = vld [vmem:[#allocation6] ss:$16 sps:$4 sm:$0xff]  }
  0x97   : > { %1225 = vmatprep.subr.bf16.mxu1 %v10605_v24  ;;  %v10635_v47 = vld [vmem:[#allocation6 + $0x1e4] ss:$16 sps:$4 sm:$0xff]   ;;  %v10619_v48 = vld [vmem:[#allocation6 + $0x48] ss:$16 sps:$4 sm:$0xff]   ;;  %v10627_v49 = vld [vmem:[#allocation6 + $0x2c] ss:$16 sps:$4 sm:$0xff]  }
  0x98   : > { %629 = vmatpush1.bf16.msra.mxu0 %v10569_v10  ;;  %v10640_v50 = vld [vmem:[#allocation6 + $0x1e0] ss:$16 sps:$4 sm:$0xff]   ;;  %v10641_v51 = vld [vmem:[#allocation6 + $0x1c4] ss:$16 sps:$4 sm:$0xff]   ;;  %v10625_v53 = vld [vmem:[#allocation6 + $0x28] ss:$16 sps:$4 sm:$0xff]  }
  0x99   : > { %630 = vmatprep.subr.bf16.mxu0 %v10570_v11  ;;  %v10582_v52 = vld [vmem:[%s11986_s12 + $0x18] sm:$0xff]   ;;  %v10646_v55 = vld [vmem:[#allocation6 + $0x1c0] ss:$16 sps:$4 sm:$0xff]   ;;  %v10584_v4 = vld [vmem:[%s11986_s12 + $0x28] sm:$0xff]  }
  0x9a   : > { %1226 = vmatpush1.bf16.msra.mxu1 %v10610_v28  ;;  %v10633_v54 = vld [vmem:[#allocation6 + $0xc] ss:$16 sps:$4 sm:$0xff]   ;;  %v10647_v56 = vld [vmem:[#allocation6 + $0x1a4] ss:$16 sps:$4 sm:$0xff]   ;;  %v10631_v57 = vld [vmem:[#allocation6 + $0x8] ss:$16 sps:$4 sm:$0xff]  }
  0x9b   : > { %1227 = vmatprep.subr.bf16.mxu1 %v10611_v29  ;;  %v10639_v58 = vld [vmem:[#allocation6 + $0x1ec] ss:$16 sps:$4 sm:$0xff]   ;;  %v10652_v59 = vld [vmem:[#allocation6 + $0x1a0] ss:$16 sps:$4 sm:$0xff]   ;;  %v10653_v60 = vld [vmem:[#allocation6 + $0x184] ss:$16 sps:$4 sm:$0xff]  }
  0x9c   : > { %631 = vmatpush1.bf16.msra.mxu0 %v10572_v12  ;;  %v10583_v61 = vld [vmem:[%s11986_s12 + $0x20] sm:$0xff]   ;;  %v10637_v62 = vld [vmem:[#allocation6 + $0x1e8] ss:$16 sps:$4 sm:$0xff]   ;;  %v10585_v8 = vld [vmem:[%s11986_s12 + $0x30] sm:$0xff]  }
  0x9d   : > { %632 = vmatprep.subr.bf16.mxu0 %v10573_v14  ;;  %v10645_v63 = vld [vmem:[#allocation6 + $0x1cc] ss:$16 sps:$4 sm:$0xff]   ;;  %v10658_v1 = vld [vmem:[#allocation6 + $0x180] ss:$16 sps:$4 sm:$0xff]   ;;  %v10643_v2 = vld [vmem:[#allocation6 + $0x1c8] ss:$16 sps:$4 sm:$0xff]  }
  0x9e   : > { %1228 = vmatpush1.bf16.msra.mxu1 %v10616_v32  ;;  %v10651_v3 = vld [vmem:[#allocation6 + $0x1ac] ss:$16 sps:$4 sm:$0xff]   ;;  %v10649_v5 = vld [vmem:[#allocation6 + $0x1a8] ss:$16 sps:$4 sm:$0xff]   ;;  %v10659_v10 = vld [vmem:[#allocation6 + $0x164] ss:$16 sps:$4 sm:$0xff]  }
  0x9f   : > { %1229 = vmatprep.subr.bf16.mxu1 %v10617_v33  ;;  %v10657_v6 = vld [vmem:[#allocation6 + $0x18c] ss:$16 sps:$4 sm:$0xff]   ;;  %v10655_v7 = vld [vmem:[#allocation6 + $0x188] ss:$16 sps:$4 sm:$0xff]   ;;  %v10664_v13 = vld [vmem:[#allocation6 + $0x160] ss:$16 sps:$4 sm:$0xff]   ;;  %v482_v33 = vlaneseq }
  0xa0   : > { %633 = vmatpush1.bf16.msra.mxu0 %v10575_v17  ;;  %v10586_v9 = vld [vmem:[%s11986_s12 + $0x38] sm:$0xff]   ;;  %v10670_v17 = vld [vmem:[#allocation6 + $0x140] ss:$16 sps:$4 sm:$0xff]  }
  0xa1   : > { %634 = vmatprep.subr.bf16.mxu0 %v10576_v18  ;;  %v10663_v11 = vld [vmem:[#allocation6 + $0x16c] ss:$16 sps:$4 sm:$0xff]   ;;  %v10661_v12 = vld [vmem:[#allocation6 + $0x168] ss:$16 sps:$4 sm:$0xff]   ;;  %v10665_v14 = vld [vmem:[#allocation6 + $0x144] ss:$16 sps:$4 sm:$0xff]  }
  0xa2   : > { %1230 = vmatpush1.bf16.msra.mxu1 %v10622_v37  ;;  %v10669_v15 = vld [vmem:[#allocation6 + $0x14c] ss:$16 sps:$4 sm:$0xff]   ;;  %v10667_v16 = vld [vmem:[#allocation6 + $0x148] ss:$16 sps:$4 sm:$0xff]   ;;  %v10671_v18 = vld [vmem:[#allocation6 + $0x124] ss:$16 sps:$4 sm:$0xff]  }
  0xa3   : > { %1231 = vmatprep.subr.bf16.mxu1 %v10623_v38  ;;  %v10673_v19 = vld [vmem:[#allocation6 + $0x128] ss:$16 sps:$4 sm:$0xff]   ;;  %v10676_v20 = vld [vmem:[#allocation6 + $0x120] ss:$16 sps:$4 sm:$0xff]   ;;  %v10681_v22 = vld [vmem:[#allocation6 + $0x10c] ss:$16 sps:$4 sm:$0xff]  }
  0xa4   : > { %635 = vmatpush1.bf16.msra.mxu0 %v10578_v21  ;;  %v10677_v21 = vld [vmem:[#allocation6 + $0x104] ss:$16 sps:$4 sm:$0xff]   ;;  %v10682_v24 = vld [vmem:[#allocation6 + $0x100] ss:$16 sps:$4 sm:$0xff]   ;;  %v480_v37 = vld [vmem:[#allocation4] sm:$0x3] }
  0xa5   : > { %1332 = vmatprep.subr.bf16.mxu0 %v10591_v23  ;;  %v10679_v23 = vld [vmem:[#allocation6 + $0x108] ss:$16 sps:$4 sm:$0xff]  }
  0xa6   : > { %1232 = vmatpush1.bf16.msra.mxu1 %v10628_v41 }
  0xa7   : > { %653 = vmatmul.mubr.bf16.vlgmr.msra.gmra.mxu0 %v10579_v25  ;;  %1233 = vmatprep.subr.bf16.mxu1 %v10629_v42  ;;  %v12003_v25 = vld [vmem:[#allocation9 + $0x1c0] sm:$0xff] }
  0xa8   : > { %662 = vmatprep.mubr.bf16.mxu0 %v11802_v0  ;;  %1333 = vmatpush1.bf16.msra.mxu0 %v10589_v26  ;;  %v1665_v26 = vld [vmem:[#allocation9 + $0x1e0] sm:$0xff] }
  0xa9   : > { %1334 = vmatprep.subr.bf16.mxu0 %v10597_v27  ;;  %v1789_v27 = vld [vmem:[#allocation9 + $0x5c0] sm:$0xff]  ;;  %v9534_v28 = vcombine.low %v12003_v25, %v1665_v26  ;;  %v9535_v29 = vcombine.high %v12003_v25, %v1665_v26 }
  0xaa   : > { %1234 = vmatpush1.bf16.msra.mxu1 %v10634_v46 }
  0xab   : > { %1235 = vmatprep.subr.bf16.mxu1 %v10635_v47 }
  0xac   : > { %1335 = vmatpush1.bf16.msra.mxu0 %v10595_v30  ;;  %v1793_v30 = vld [vmem:[#allocation9 + $0x5e0] sm:$0xff] }
  0xad   : > { %1336 = vmatprep.subr.bf16.mxu0 %v10603_v31  ;;  %v9662_v31 = vcombine.low %v1789_v27, %v1793_v30  ;;  %v9663_v32 = vcombine.high %v1789_v27, %v1793_v30 }
  0xae   : > { %1236 = vmatpush2.bf16.msra.mxu1 %v10640_v50 }
  0xaf   : > { %663 = vmatmul.mubr.bf16.gmra.mxu0 %v10580_v34  ;;  %1237 = vmatprep.subr.bf16.mxu1 %v10641_v51  ;;  %v12007_v34 = vshrl.u32 %v482_v33, 7 }
  0xb0   : > { %672 = vmatprep.mubr.bf16.mxu0 %v11802_v0  ;;  %1337 = vmatpush1.bf16.msra.mxu0 %v10601_v35 }
  0xb1   : > { %1338 = vmatprep.subr.bf16.mxu0 %v10609_v36  ;;  %15218 = vst [vmem:[#allocation20_spill] sm:$0xff] %v12007_v34  ;;  %v12010_v35 = vsub.s32 0, %v12007_v34  ;;  %v12013_v36 = vsub.s32 1, %v12007_v34 }
  0xb2   : > { %1238 = vmatpush2.bf16.msra.mxu1 %v10646_v55  ;;  %v1657_v55 = vld [vmem:[#allocation9 + $0x1a0] sm:$0xff] }
  0xb3   : > { %1239 = vmatprep.subr.bf16.mxu1 %v10647_v56  ;;  %15219 = vst [vmem:[#allocation21_spill] sm:$0xff] %v12010_v35  ;;  %15220 = vst [vmem:[#allocation22_spill] sm:$0xff] %v12013_v36  ;;  %v12016_v38 = vrot.slane %v480_v37, %v12010_v35  ;;  %v1781_v56 = vld [vmem:[#allocation9 + $0x580] sm:$0xff] }
  0xb4   : > { %1339 = vmatpush1.bf16.msra.mxu0 %v10607_v39  ;;  %v12019_v39 = vrot.slane %v480_v37, %v12013_v36 }
  0xb5   : > { %1340 = vmatprep.subr.bf16.mxu0 %v10615_v40 }
  0xb6   : > { %1240 = vmatpush2.bf16.msra.mxu1 %v10652_v59 }
  0xb7   : > { %673 = vmatmul.mubr.bf16.gmra.mxu0 %v10581_v43  ;;  %1241 = vmatprep.subr.bf16.mxu1 %v10653_v60 }
  0xb8   : > { %682 = vmatprep.mubr.bf16.mxu0 %v11802_v0  ;;  %1341 = vmatpush1.bf16.msra.mxu0 %v10613_v44 }
  0xb9   : > { %1342 = vmatprep.subr.bf16.mxu0 %v10621_v45 }
  0xba   : > { %1242 = vmatpush2.bf16.msra.mxu1 %v10658_v1 }
  0xbb   : > { %1243 = vmatprep.subr.bf16.mxu1 %v10659_v10 }
  0xbc   : > { %1343 = vmatpush1.bf16.msra.mxu0 %v10619_v48 }
  0xbd   : > { %1344 = vmatprep.subr.bf16.mxu0 %v10627_v49 }
  0xbe   : > { %1244 = vmatpush2.bf16.msra.mxu1 %v10664_v13 }
  0xbf   : > { %683 = vmatmul.mubr.bf16.gmra.mxu0 %v10582_v52  ;;  %1245 = vmatprep.subr.bf16.mxu1 %v10665_v14 }
  0xc0   : > { %692 = vmatprep.mubr.bf16.mxu0 %v11802_v0  ;;  %1345 = vmatpush1.bf16.msra.mxu0 %v10625_v53 }
  0xc1   : > { %1346 = vmatprep.subr.bf16.mxu0 %v10633_v54  ;;  %v1653_v54 = vld [vmem:[#allocation9 + $0x180] sm:$0xff] }
  0xc2   : > { %1246 = vmatpush2.bf16.msra.mxu1 %v10670_v17 }
  0xc3   : > { %1247 = vmatprep.subr.bf16.mxu1 %v10671_v18 }
  0xc4   : > { %1347 = vmatpush1.bf16.msra.mxu0 %v10631_v57  ;;  %v1785_v57 = vld [vmem:[#allocation9 + $0x5a0] sm:$0xff] }
  0xc5   : > { %1348 = vmatprep.subr.bf16.mxu0 %v10639_v58  ;;  %v9655_v13 = vcombine.high %v1781_v56, %v1785_v57 }
  0xc6   : > { %1248 = vmatpush2.bf16.msra.mxu1 %v10676_v20  ;;  %v12035_v20 = vld [vmem:[#allocation9 + $0x100] sm:$0xff] }
  0xc7   : > { %693 = vmatmul.mubr.bf16.gmra.mxu0 %v10583_v61  ;;  %1249 = vmatprep.subr.bf16.mxu1 %v10677_v21  ;;  %v12037_v21 = vld [vmem:[#allocation9 + $0x120] sm:$0xff] }
  0xc8   : > { %702 = vmatprep.mubr.bf16.mxu0 %v11802_v0  ;;  %1349 = vmatpush2.bf16.msra.mxu0 %v10637_v62 }
  0xc9   : > { %1350 = vmatprep.subr.bf16.mxu0 %v10645_v63 }
  0xca   : > { %1250 = vmatpush2.bf16.msra.mxu1 %v10682_v24 }
  0xcb   : > { %3183 = vmatprep.subr.bf16.mxu1 %v9535_v29 }
  0xcc   : > { %1351 = vmatpush2.bf16.msra.mxu0 %v10643_v2 }
  0xcd   : > { %1352 = vmatprep.subr.bf16.mxu0 %v10651_v3 }
  0xcf   : > { %703 = vmatmul.mubr.bf16.gmra.mxu0 %v10584_v4 }
  0xd0   : > { %712 = vmatprep.mubr.bf16.mxu0 %v11802_v0  ;;  %1353 = vmatpush2.bf16.msra.mxu0 %v10649_v5 }
  0xd1   : > { %1354 = vmatprep.subr.bf16.mxu0 %v10657_v6  ;;  %v1645_v6 = vld [vmem:[#allocation9 + $0x140] sm:$0xff] }
  0xd4   : > { %1355 = vmatpush2.bf16.msra.mxu0 %v10655_v7  ;;  %v1649_v7 = vld [vmem:[#allocation9 + $0x160] sm:$0xff] }
  0xd5   : > { %1356 = vmatprep.subr.bf16.mxu0 %v10663_v11  ;;  %v9519_v26 = vcombine.high %v1645_v6, %v1649_v7  ;;  %v9518_v37 = vcombine.low %v1645_v6, %v1649_v7 }
  0xd7   : > { %713 = vmatmul.mubr.bf16.gmra.mxu0 %v10585_v8  ;;  %v1773_v8 = vld [vmem:[#allocation9 + $0x540] sm:$0xff] }
  0xd8   : > { %722 = vmatprep.mubr.bf16.mxu0 %v11802_v0  ;;  %1357 = vmatpush2.bf16.msra.mxu0 %v10661_v12  ;;  %v10675_v0 = vld [vmem:[#allocation6 + $0x12c] ss:$16 sps:$4 sm:$0xff]   ;;  %v9527_v12 = vcombine.high %v1653_v54, %v1657_v55 }
  0xd9   : > { %1358 = vmatprep.subr.bf16.mxu0 %v10669_v15 }
  0xdc   : > { %1359 = vmatpush2.bf16.msra.mxu0 %v10667_v16 }
  0xdd   : > { %1360 = vmatprep.subr.bf16.mxu0 %v10675_v0  ;;  %v9526_v0 = vcombine.low %v1653_v54, %v1657_v55 }
  0xdf   : > { %723 = vmatmul.mubr.bf16.gmra.mxu0 %v10586_v9  ;;  %v1777_v9 = vld [vmem:[#allocation9 + $0x560] sm:$0xff] }
  0xe0   : > { %1361 = vmatpush2.bf16.msra.mxu0 %v10673_v19  ;;  %v9654_v19 = vcombine.low %v1781_v56, %v1785_v57  ;;  %v9647_v27 = vcombine.high %v1773_v8, %v1777_v9  ;;  %v9510_v56 = vcombine.low %v12035_v20, %v12037_v21 }
  0xe1   : > { %1362 = vmatprep.subr.bf16.mxu0 %v10681_v22  ;;  %v12039_v22 = vld [vmem:[#allocation9 + $0x500] sm:$0xff] }
  0xe4   : > { %1363 = vmatpush2.bf16.msra.mxu0 %v10679_v23  ;;  %v1769_v23 = vld [vmem:[#allocation9 + $0x520] sm:$0xff] }
  0xe5   : > { %3296 = vmatprep.subr.bf16.mxu0 %v9663_v32  ;;  %v9638_v57 = vcombine.low %v12039_v22, %v1769_v23 }
 0x167   : > { %v654_v40 = vpop.f32.mrf.mxu0 }
 0x168   : > { %v655_v41 = vadd.f32 %v654_v40, %v12016_v38 }
 0x169   : > { %v656_v42 = vpop.f32.mrf.mxu0 }
 0x16a   : > { %v733_v43 = vmul.f32 0.2, %v655_v41  ;;  %v657_v44 = vadd.f32 %v656_v42, %v12019_v39 }
 0x16b   : > { %v658_v45 = vpop.f32.mrf.mxu0 }
 0x16c   : > { %v734_v46 = vmul.f32 0.2, %v657_v44  ;;  %v659_v47 = vadd.f32 %v658_v45, %v12016_v38  ;;  %v765_v1 = vmax.f32 %v655_v41, %v733_v43  ;;  %v9646_v43 = vcombine.low %v1773_v8, %v1777_v9  ;;  %v12047_v45 = vld [vmem:[#allocation9 + $0xe0] sm:$0xff] }
 0x16d   : > { %v660_v48 = vpop.f32.mrf.mxu0 }
 0x16e   : > { %v735_v49 = vmul.f32 0.2, %v659_v47  ;;  %v661_v50 = vadd.f32 %v660_v48, %v12019_v39  ;;  %v766_v60 = vmax.f32 %v657_v44, %v734_v46  ;;  %v12045_v44 = vld [vmem:[#allocation9 + $0xc0] sm:$0xff] }
 0x16f   : > { %v664_v51 = vpop.f32.mrf.mxu0  ;;  %v12049_v46 = vld [vmem:[#allocation9 + $0x4c0] sm:$0xff]  ;;  %v9502_v9 = vcombine.low %v12045_v44, %v12047_v45 }
 0x170   : > { %v736_v52 = vmul.f32 0.2, %v661_v50  ;;  %v12026_v53 = vadd.f32 %v664_v51, %v12016_v38  ;;  %v767_v58 = vmax.f32 %v659_v47, %v735_v49  ;;  %v1761_v47 = vld [vmem:[#allocation9 + $0x4e0] sm:$0xff]  ;;  %v9639_v51 = vcombine.high %v12039_v22, %v1769_v23 }
 0x171   : > { %v666_v59 = vpop.f32.mrf.mxu0  ;;  %v1745_v22 = vld [vmem:[#allocation9 + $0x460] sm:$0xff] }
 0x172   : > { %v737_v61 = vmul.f32 0.2, %v12026_v53  ;;  %v667_v62 = vadd.f32 %v666_v59, %v12019_v39  ;;  %v768_v63 = vmax.f32 %v661_v50, %v736_v52  ;;  %v797_v11 = vpack.c.bf16 %v767_v58, %v765_v1  ;;  %v12058_v58 = vld [vmem:[#allocation9 + $0x80] sm:$0xff] }
 0x173   : > { %v668_v2 = vpop.f32.mrf.mxu0  ;;  %v9511_v50 = vcombine.high %v12035_v20, %v12037_v21  ;;  %v12060_v59 = vld [vmem:[#allocation9 + $0xa0] sm:$0xff] }
 0x174   : > { %v738_v3 = vmul.f32 0.2, %v667_v62  ;;  %v669_v4 = vadd.f32 %v668_v2, %v12016_v38  ;;  %v798_v5 = vpack.c.bf16 %v768_v63, %v766_v60  ;;  %v769_v32 = vmax.f32 %v12026_v53, %v737_v61  ;;  %v1741_v21 = vld [vmem:[#allocation9 + $0x440] sm:$0xff] }
 0x175   : > { %v670_v10 = vpop.f32.mrf.mxu0  ;;  %v9631_v63 = vcombine.high %v12049_v46, %v1761_v47 }
 0x176   : > { %v739_v14 = vmul.f32 0.2, %v669_v4  ;;  %v671_v15 = vadd.f32 %v670_v10, %v12019_v39  ;;  %1251 = vmatprep.mubr.bf16.mxu1 %v798_v5  ;;  %1364 = vmatprep.mubr.bf16.mxu0 %v798_v5  ;;  %v770_v29 = vmax.f32 %v667_v62, %v738_v3  ;;  %v9503_v62 = vcombine.high %v12045_v44, %v12047_v45  ;;  %v1753_v5 = vld [vmem:[#allocation9 + $0x4a0] sm:$0xff] }
 0x177   : > { %v674_v16 = vpop.f32.mrf.mxu0  ;;  %1252 = vmatmul.mubr.bf16.vlgmr.msra.gmra.mxu1 %v797_v11  ;;  %1365 = vmatmul.mubr.bf16.vlgmr.msra.gmra.mxu0 %v797_v11 }
 0x178   : > { %v740_v17 = vmul.f32 0.2, %v671_v15  ;;  %v12033_v18 = vadd.f32 %v674_v16, %v12016_v38  ;;  %3184 = vmatpush1.bf16.msra.mxu1 %v9534_v28  ;;  %3297 = vmatpush1.bf16.msra.mxu0 %v9662_v31  ;;  %v771_v24 = vmax.f32 %v669_v4, %v739_v14  ;;  %v1749_v4 = vld [vmem:[#allocation9 + $0x480] sm:$0xff] }
 0x179   : > { %v676_v25 = vpop.f32.mrf.mxu0  ;;  %3185 = vmatprep.subr.bf16.mxu1 %v9527_v12  ;;  %3298 = vmatprep.subr.bf16.mxu0 %v9655_v13  ;;  %v9630_v12 = vcombine.low %v12049_v46, %v1761_v47  ;;  %v9623_v16 = vcombine.high %v1749_v4, %v1753_v5 }
 0x17a   : > { %v772_v30 = vmax.f32 %v671_v15, %v740_v17  ;;  %v741_v28 = vmul.f32 0.2, %v12033_v18  ;;  %v677_v31 = vadd.f32 %v676_v25, %v12019_v39  ;;  %v799_v49 = vpack.c.bf16 %v771_v24, %v769_v32  ;;  %v1613_v17 = vld [vmem:[#allocation9 + $0x40] sm:$0xff] }
 0x17b   : > { %v678_v33 = vpop.f32.mrf.mxu0  ;;  %v9495_v15 = vcombine.high %v12058_v58, %v12060_v59  ;;  %v1605_v32 = vld [vmem:[#allocation9] sm:$0xff] }
 0x17c   : > { %v742_v40 = vmul.f32 0.2, %v677_v31  ;;  %v679_v41 = vadd.f32 %v678_v33, %v12016_v38  ;;  %v800_v42 = vpack.c.bf16 %v772_v30, %v770_v29  ;;  %3186 = vmatpush1.bf16.msra.mxu1 %v9526_v0  ;;  %3299 = vmatpush1.bf16.msra.mxu0 %v9654_v19  ;;  %v773_v6 = vmax.f32 %v12033_v18, %v741_v28  ;;  %v1617_v18 = vld [vmem:[#allocation9 + $0x60] sm:$0xff] }
 0x17d   : > { %v680_v48 = vpop.f32.mrf.mxu0  ;;  %3187 = vmatprep.subr.bf16.mxu1 %v9519_v26  ;;  %3300 = vmatprep.subr.bf16.mxu0 %v9647_v27  ;;  %v9494_v26 = vcombine.low %v12058_v58, %v12060_v59  ;;  %v9622_v27 = vcombine.low %v1749_v4, %v1753_v5  ;;  %v9487_v28 = vcombine.high %v1613_v17, %v1617_v18 }
 0x17e   : > { %v743_v52 = vmul.f32 0.2, %v679_v41  ;;  %v681_v53 = vadd.f32 %v680_v48, %v12019_v39  ;;  %1261 = vmatprep.mubr.bf16.mxu1 %v800_v42  ;;  %1374 = vmatprep.mubr.bf16.mxu0 %v800_v42  ;;  %v774_v1 = vmax.f32 %v677_v31, %v742_v40  ;;  %v9615_v31 = vcombine.high %v1741_v21, %v1745_v22  ;;  %v1733_v42 = vld [vmem:[#allocation9 + $0x400] sm:$0xff] }
 0x17f   : > { %v684_v54 = vpop.f32.mrf.mxu0  ;;  %1262 = vmatmul.mubr.bf16.gmra.mxu1 %v799_v49  ;;  %1375 = vmatmul.mubr.bf16.gmra.mxu0 %v799_v49  ;;  %v9486_v47 = vcombine.low %v1613_v17, %v1617_v18 }
 0x180   : > { %v744_v55 = vmul.f32 0.2, %v681_v53  ;;  %3188 = vmatpush1.bf16.msra.mxu1 %v9518_v37  ;;  %3301 = vmatpush1.bf16.msra.mxu0 %v9646_v43  ;;  %v775_v60 = vmax.f32 %v679_v41, %v743_v52  ;;  %v685_v7 = vadd.f32 %v684_v54, %v12016_v38  ;;  %v1609_v41 = vld [vmem:[#allocation9 + $0x20] sm:$0xff] }
 0x181   : > { %v686_v61 = vpop.f32.mrf.mxu0  ;;  %3189 = vmatprep.subr.bf16.mxu1 %v9511_v50  ;;  %3302 = vmatprep.subr.bf16.mxu0 %v9639_v51  ;;  %v1737_v43 = vld [vmem:[#allocation9 + $0x420] sm:$0xff]  ;;  %v9614_v50 = vcombine.low %v1741_v21, %v1745_v22 }
 0x182   : > { %v776_v2 = vmax.f32 %v681_v53, %v744_v55  ;;  %v687_v3 = vadd.f32 %v686_v61, %v12019_v39  ;;  %v801_v14 = vpack.c.bf16 %v775_v60, %v773_v6  ;;  %v745_v23 = vmul.f32 0.2, %v685_v7  ;;  %v1725_v55 = vld [vmem:[#allocation9 + $0x3c0] sm:$0xff] }
 0x183   : > { %v688_v8 = vpop.f32.mrf.mxu0  ;;  %v9479_v53 = vcombine.high %v1605_v32, %v1609_v41  ;;  %v9607_v54 = vcombine.high %v1733_v42, %v1737_v43  ;;  %v1853_v60 = vld [vmem:[#allocation9 + $0x7c0] sm:$0xff] }
 0x184   : > { %v689_v10 = vadd.f32 %v688_v8, %v12016_v38  ;;  %v802_v11 = vpack.c.bf16 %v776_v2, %v774_v1  ;;  %3190 = vmatpush1.bf16.msra.mxu1 %v9510_v56  ;;  %3303 = vmatpush1.bf16.msra.mxu0 %v9638_v57  ;;  %v746_v0 = vmul.f32 0.2, %v687_v3  ;;  %v777_v44 = vmax.f32 %v685_v7, %v745_v23  ;;  %v1729_v56 = vld [vmem:[#allocation9 + $0x3e0] sm:$0xff] }
 0x185   : > { %v690_v13 = vpop.f32.mrf.mxu0  ;;  %3191 = vmatprep.subr.bf16.mxu1 %v9503_v62  ;;  %3304 = vmatprep.subr.bf16.mxu0 %v9631_v63  ;;  %v1857_v61 = vld [vmem:[#allocation9 + $0x7e0] sm:$0xff]  ;;  %v9478_v2 = vcombine.low %v1605_v32, %v1609_v41  ;;  %v9599_v6 = vcombine.high %v1725_v55, %v1729_v56  ;;  %v9598_v18 = vcombine.low %v1725_v55, %v1729_v56 }
 0x186   : > { %v747_v19 = vmul.f32 0.2, %v689_v10  ;;  %v691_v20 = vadd.f32 %v690_v13, %v12019_v39  ;;  %1271 = vmatprep.mubr.bf16.mxu1 %v802_v11  ;;  %1384 = vmatprep.mubr.bf16.mxu0 %v802_v11  ;;  %v778_v33 = vmax.f32 %v687_v3, %v746_v0  ;;  %v9606_v3 = vcombine.low %v1733_v42, %v1737_v43  ;;  %v1717_v8 = vld [vmem:[#allocation9 + $0x380] sm:$0xff] }
 0x187   : > { %v694_v24 = vpop.f32.mrf.mxu0  ;;  %1272 = vmatmul.mubr.bf16.gmra.mxu1 %v801_v14  ;;  %1385 = vmatmul.mubr.bf16.gmra.mxu0 %v801_v14  ;;  %v9727_v7 = vcombine.high %v1853_v60, %v1857_v61  ;;  %v1845_v13 = vld [vmem:[#allocation9 + $0x780] sm:$0xff] }
 0x188   : > { %v748_v25 = vmul.f32 0.2, %v691_v20  ;;  %3192 = vmatpush1.bf16.msra.mxu1 %v9502_v9  ;;  %3305 = vmatpush1.bf16.msra.mxu0 %v9630_v12  ;;  %v779_v29 = vmax.f32 %v689_v10, %v747_v19  ;;  %v695_v45 = vadd.f32 %v694_v24, %v12016_v38  ;;  %v1721_v12 = vld [vmem:[#allocation9 + $0x3a0] sm:$0xff] }
 0x189   : > { %v696_v30 = vpop.f32.mrf.mxu0  ;;  %3193 = vmatprep.subr.bf16.mxu1 %v9495_v15  ;;  %3306 = vmatprep.subr.bf16.mxu0 %v9623_v16  ;;  %v1849_v14 = vld [vmem:[#allocation9 + $0x7a0] sm:$0xff]  ;;  %v9591_v23 = vcombine.high %v1717_v8, %v1721_v12 }
 0x18a   : > { %v780_v37 = vmax.f32 %v691_v20, %v748_v25  ;;  %v697_v40 = vadd.f32 %v696_v30, %v12019_v39  ;;  %v803_v52 = vpack.c.bf16 %v779_v29, %v777_v44  ;;  %v749_v62 = vmul.f32 0.2, %v695_v45  ;;  %v1709_v25 = vld [vmem:[#allocation9 + $0x340] sm:$0xff] }
 0x18b   : > { %v698_v46 = vpop.f32.mrf.mxu0  ;;  %v9726_v20 = vcombine.low %v1853_v60, %v1857_v61  ;;  %v9719_v24 = vcombine.high %v1845_v13, %v1849_v14  ;;  %v9718_v41 = vcombine.low %v1845_v13, %v1849_v14 }
 0x18c   : > { %v699_v48 = vadd.f32 %v698_v46, %v12016_v38  ;;  %v804_v49 = vpack.c.bf16 %v780_v37, %v778_v33  ;;  %3194 = vmatpush1.bf16.msra.mxu1 %v9494_v26  ;;  %3307 = vmatpush1.bf16.msra.mxu0 %v9622_v27  ;;  %v750_v57 = vmul.f32 0.2, %v697_v40  ;;  %v781_v15 = vmax.f32 %v695_v45, %v749_v62  ;;  %v1713_v26 = vld [vmem:[#allocation9 + $0x360] sm:$0xff] }
 0x18d   : > { %v700_v51 = vpop.f32.mrf.mxu0  ;;  %3195 = vmatprep.subr.bf16.mxu1 %v9487_v28  ;;  %3308 = vmatprep.subr.bf16.mxu0 %v9615_v31  ;;  %v1837_v28 = vld [vmem:[#allocation9 + $0x740] sm:$0xff]  ;;  %v9583_v44 = vcombine.high %v1709_v25, %v1713_v26  ;;  %v9582_v56 = vcombine.low %v1709_v25, %v1713_v26 }
 0x18e   : > { %v751_v58 = vmul.f32 0.2, %v699_v48  ;;  %v701_v59 = vadd.f32 %v700_v51, %v12019_v39  ;;  %1281 = vmatprep.mubr.bf16.mxu1 %v804_v49  ;;  %1394 = vmatprep.mubr.bf16.mxu0 %v804_v49  ;;  %v782_v9 = vmax.f32 %v697_v40, %v750_v57  ;;  %v1841_v31 = vld [vmem:[#allocation9 + $0x760] sm:$0xff]  ;;  %v9590_v40 = vcombine.low %v1717_v8, %v1721_v12 }
 0x18f   : > { %v704_v63 = vpop.f32.mrf.mxu0  ;;  %1282 = vmatmul.mubr.bf16.gmra.mxu1 %v803_v52  ;;  %1395 = vmatmul.mubr.bf16.gmra.mxu0 %v803_v52  ;;  %v9711_v45 = vcombine.high %v1837_v28, %v1841_v31  ;;  %v1701_v46 = vld [vmem:[#allocation9 + $0x300] sm:$0xff] }
 0x190   : > { %v752_v1 = vmul.f32 0.2, %v701_v59  ;;  %3196 = vmatpush1.bf16.msra.mxu1 %v9486_v47  ;;  %3309 = vmatpush1.bf16.msra.mxu0 %v9614_v50  ;;  %v783_v4 = vmax.f32 %v699_v48, %v751_v58  ;;  %v705_v16 = vadd.f32 %v704_v63, %v12016_v38  ;;  %v1705_v50 = vld [vmem:[#allocation9 + $0x320] sm:$0xff] }
 0x191   : > { %v706_v5 = vpop.f32.mrf.mxu0  ;;  %3197 = vmatprep.subr.bf16.mxu1 %v9479_v53  ;;  %3310 = vmatprep.subr.bf16.mxu0 %v9607_v54  ;;  %v1829_v51 = vld [vmem:[#allocation9 + $0x700] sm:$0xff]  ;;  %v9575_v62 = vcombine.high %v1701_v46, %v1705_v50 }
 0x192   : > { %v784_v10 = vmax.f32 %v701_v59, %v752_v1  ;;  %v707_v11 = vadd.f32 %v706_v5, %v12019_v39  ;;  %v805_v22 = vpack.c.bf16 %v783_v4, %v781_v15  ;;  %v753_v32 = vmul.f32 0.2, %v705_v16  ;;  %v1833_v52 = vld [vmem:[#allocation9 + $0x720] sm:$0xff] }
 0x193   : > { %v708_v17 = vpop.f32.mrf.mxu0  ;;  %v9710_v59 = vcombine.low %v1837_v28, %v1841_v31  ;;  %v9703_v63 = vcombine.high %v1829_v51, %v1833_v52  ;;  %v1693_v4 = vld [vmem:[#allocation9 + $0x2c0] sm:$0xff] }
 0x194   : > { %v709_v0 = vadd.f32 %v708_v17, %v12016_v38  ;;  %v806_v19 = vpack.c.bf16 %v784_v10, %v782_v9  ;;  %3198 = vmatpush1.bf16.msra.mxu1 %v9478_v2  ;;  %3311 = vmatpush1.bf16.msra.mxu0 %v9606_v3  ;;  %v754_v27 = vmul.f32 0.2, %v707_v11  ;;  %v785_v53 = vmax.f32 %v705_v16, %v753_v32  ;;  %v1697_v5 = vld [vmem:[#allocation9 + $0x2e0] sm:$0xff] }
 0x195   : > { %v710_v21 = vpop.f32.mrf.mxu0  ;;  %3199 = vmatprep.subr.bf16.mxu1 %v9599_v6  ;;  %3312 = vmatprep.subr.bf16.mxu0 %v9727_v7  ;;  %v9574_v9 = vcombine.low %v1701_v46, %v1705_v50  ;;  %v9702_v10 = vcombine.low %v1829_v51, %v1833_v52  ;;  %v9567_v13 = vcombine.high %v1693_v4, %v1697_v5  ;;  %v1817_v46 = vld [vmem:[#allocation9 + $0x6a0] sm:$0xff] }
 0x196   : > { %v755_v29 = vmul.f32 0.2, %v709_v0  ;;  %v711_v30 = vadd.f32 %v710_v21, %v12019_v39  ;;  %1291 = vmatprep.mubr.bf16.mxu1 %v806_v19  ;;  %1404 = vmatprep.mubr.bf16.mxu0 %v806_v19  ;;  %v786_v47 = vmax.f32 %v707_v11, %v754_v27  ;;  %v9566_v21 = vcombine.low %v1693_v4, %v1697_v5  ;;  %v1677_v50 = vld [vmem:[#allocation9 + $0x240] sm:$0xff]  ;;  %v12095_v4 = vld [vmem:[#allocation9 + $0x1e8] sm:$0xff] }
 0x197   : > { %v714_v33 = vpop.f32.mrf.mxu0  ;;  %1292 = vmatmul.mubr.bf16.gmra.mxu1 %v805_v22  ;;  %1405 = vmatmul.mubr.bf16.gmra.mxu0 %v805_v22  ;;  %v1681_v51 = vld [vmem:[#allocation9 + $0x260] sm:$0xff]  ;;  %v12097_v5 = vld [vmem:[#allocation9 + $0x5c8] sm:$0xff] }
 0x198   : > { %v756_v37 = vmul.f32 0.2, %v711_v30  ;;  %3200 = vmatpush2.bf16.msra.mxu1 %v9598_v18  ;;  %3313 = vmatpush2.bf16.msra.mxu0 %v9726_v20  ;;  %v787_v42 = vmax.f32 %v709_v0, %v755_v29  ;;  %v715_v54 = vadd.f32 %v714_v33, %v12016_v38  ;;  %v1805_v52 = vld [vmem:[#allocation9 + $0x640] sm:$0xff] }
 0x199   : > { %v716_v43 = vpop.f32.mrf.mxu0  ;;  %3201 = vmatprep.subr.bf16.mxu1 %v9591_v23  ;;  %3314 = vmatprep.subr.bf16.mxu0 %v9719_v24 }
 0x19a   : > { %v788_v48 = vmax.f32 %v711_v30, %v756_v37  ;;  %v717_v49 = vadd.f32 %v716_v43, %v12019_v39  ;;  %v807_v61 = vpack.c.bf16 %v787_v42, %v785_v53  ;;  %v757_v6 = vmul.f32 0.2, %v715_v54  ;;  %v1821_v37 = vld [vmem:[#allocation9 + $0x6c0] sm:$0xff] }
 0x19b   : > { %v718_v55 = vpop.f32.mrf.mxu0  ;;  %v1685_v42 = vld [vmem:[#allocation9 + $0x280] sm:$0xff]  ;;  %v9551_v53 = vcombine.high %v1677_v50, %v1681_v51 }
 0x19c   : > { %v719_v57 = vadd.f32 %v718_v55, %v12016_v38  ;;  %v808_v58 = vpack.c.bf16 %v788_v48, %v786_v47  ;;  %3202 = vmatpush2.bf16.msra.mxu1 %v9590_v40  ;;  %3315 = vmatpush2.bf16.msra.mxu0 %v9718_v41  ;;  %v758_v1 = vmul.f32 0.2, %v717_v49  ;;  %v789_v17 = vmax.f32 %v715_v54, %v757_v6  ;;  %v1825_v40 = vld [vmem:[#allocation9 + $0x6e0] sm:$0xff] }
 0x19d   : > { %v720_v60 = vpop.f32.mrf.mxu0  ;;  %3203 = vmatprep.subr.bf16.mxu1 %v9583_v44  ;;  %3316 = vmatprep.subr.bf16.mxu0 %v9711_v45  ;;  %v9694_v41 = vcombine.low %v1821_v37, %v1825_v40  ;;  %v1689_v43 = vld [vmem:[#allocation9 + $0x2a0] sm:$0xff]  ;;  %v9550_v55 = vcombine.low %v1677_v50, %v1681_v51  ;;  %v12187_v50 = vld [vmem:[#allocation9 + $0x48] sm:$0xff] }
 0x19e   : > { %v759_v2 = vmul.f32 0.2, %v719_v57  ;;  %v721_v3 = vadd.f32 %v720_v60, %v12019_v39  ;;  %1301 = vmatprep.mubr.bf16.mxu1 %v808_v58  ;;  %1414 = vmatprep.mubr.bf16.mxu0 %v808_v58  ;;  %v790_v14 = vmax.f32 %v717_v49, %v758_v1  ;;  %v9559_v44 = vcombine.high %v1685_v42, %v1689_v43  ;;  %v1813_v45 = vld [vmem:[#allocation9 + $0x680] sm:$0xff]  ;;  %v12189_v51 = vld [vmem:[#allocation9 + $0x68] sm:$0xff] }
 0x19f   : > { %v724_v7 = vpop.f32.mrf.mxu0  ;;  %1302 = vmatmul.mubr.bf16.gmra.mxu1 %v807_v61  ;;  %1415 = vmatmul.mubr.bf16.gmra.mxu0 %v807_v61  ;;  %v9558_v47 = vcombine.low %v1685_v42, %v1689_v43  ;;  %v9687_v48 = vcombine.high %v1813_v45, %v1817_v46  ;;  %v9686_v49 = vcombine.low %v1813_v45, %v1817_v46  ;;  %v1809_v54 = vld [vmem:[#allocation9 + $0x660] sm:$0xff]  ;;  %v12171_v42 = vld [vmem:[#allocation9 + $0x88] sm:$0xff] }
 0x1a0   : > { %v760_v8 = vmul.f32 0.2, %v721_v3  ;;  %3204 = vmatpush2.bf16.msra.mxu1 %v9582_v56  ;;  %3317 = vmatpush2.bf16.msra.mxu0 %v9710_v59  ;;  %v791_v11 = vmax.f32 %v719_v57, %v759_v2  ;;  %v725_v18 = vadd.f32 %v724_v7, %v12016_v38  ;;  %v9678_v56 = vcombine.low %v1805_v52, %v1809_v54  ;;  %v1669_v58 = vld [vmem:[#allocation9 + $0x200] sm:$0xff]  ;;  %v12101_v7 = vld [vmem:[#allocation9 + $0x5e8] sm:$0xff] }
 0x1a1   : > { %v726_v12 = vpop.f32.mrf.mxu0  ;;  %3205 = vmatprep.subr.bf16.mxu1 %v9575_v62  ;;  %3318 = vmatprep.subr.bf16.mxu0 %v9703_v63  ;;  %v9679_v57 = vcombine.high %v1805_v52, %v1809_v54  ;;  %v1673_v59 = vld [vmem:[#allocation9 + $0x220] sm:$0xff]  ;;  %v12173_v43 = vld [vmem:[#allocation9 + $0xa8] sm:$0xff] }
 0x1a2   : > { %v792_v15 = vmax.f32 %v721_v3, %v760_v8  ;;  %v727_v16 = vadd.f32 %v726_v12, %v12019_v39  ;;  %v809_v23 = vpack.c.bf16 %v791_v11, %v789_v17  ;;  %v761_v27 = vmul.f32 0.2, %v725_v18  ;;  %v1797_v60 = vld [vmem:[#allocation9 + $0x600] sm:$0xff]  ;;  %v12093_v3 = vld [vmem:[#allocation9 + $0x1c8] sm:$0xff]  ;;  %v877_v11 = vld [vmem:[#allocation7] sm:$0xf] }
 0x1a3   : > { %v728_v0 = vpop.f32.mrf.mxu0  ;;  %v9543_v61 = vcombine.high %v1669_v58, %v1673_v59  ;;  %v1801_v62 = vld [vmem:[#allocation9 + $0x620] sm:$0xff]  ;;  %v9542_v63 = vcombine.low %v1669_v58, %v1673_v59  ;;  %v9537_v6 = vcombine.high %v12093_v3, %v12095_v4  ;;  %v12110_v12 = vsub.s32 2, %v12007_v34  ;;  %v12121_v17 = vld [vmem:[#allocation9 + $0x5a8] sm:$0xff] }
 0x1a4   : > { %v729_v19 = vadd.f32 %v728_v0, %v12016_v38  ;;  %v810_v20 = vpack.c.bf16 %v792_v15, %v790_v14  ;;  %3206 = vmatpush2.bf16.msra.mxu1 %v9574_v9  ;;  %3319 = vmatpush2.bf16.msra.mxu0 %v9702_v10  ;;  %v762_v24 = vmul.f32 0.2, %v727_v16  ;;  %v793_v31 = vmax.f32 %v725_v18, %v761_v27  ;;  %v12117_v15 = vld [vmem:[#allocation9 + $0x1a8] sm:$0xff] }
 0x1a5   : > { %v730_v22 = vpop.f32.mrf.mxu0  ;;  %3207 = vmatprep.subr.bf16.mxu1 %v9567_v13  ;;  %v9670_v1 = vcombine.low %v1797_v60, %v1801_v62  ;;  %v9671_v2 = vcombine.high %v1797_v60, %v1801_v62  ;;  %v9665_v10 = vcombine.high %v12097_v5, %v12101_v7  ;;  %15221 = vst [vmem:[#allocation23_spill] sm:$0xff] %v12110_v12  ;;  %v12112_v13 = vld [vmem:[#allocation9 + $0x188] sm:$0xff]  ;;  %v12115_v14 = vsub.s32 3, %v12007_v34 }
 0x1a6   : > { %v763_v25 = vmul.f32 0.2, %v729_v19  ;;  %v731_v26 = vadd.f32 %v730_v22, %v12019_v39  ;;  %1311 = vmatprep.mubr.bf16.mxu1 %v810_v20  ;;  %1424 = vmatprep.mubr.bf16.mxu0 %v810_v20  ;;  %v794_v38 = vmax.f32 %v727_v16, %v762_v24  ;;  %v9695_v39 = vcombine.high %v1821_v37, %v1825_v40  ;;  %v12119_v16 = vld [vmem:[#allocation9 + $0x588] sm:$0xff] }
 0x1a7   : > { %1312 = vmatmul.mubr.bf16.gmra.mxu1 %v809_v23  ;;  %1425 = vmatmul.mubr.bf16.gmra.mxu0 %v809_v23  ;;  %15222 = vst [vmem:[#allocation24_spill] sm:$0xff] %v12115_v14  ;;  %v12123_v18 = vld [vmem:[#allocation9 + $0x148] sm:$0xff]  ;;  %v12136_v23 = vrot.slane %v877_v11, %v12010_v35  ;;  %v12139_v24 = vrot.slane %v877_v11, %v12110_v12 }
 0x1a8   : > { %v764_v29 = vmul.f32 0.2, %v731_v26  ;;  %3208 = vmatpush2.bf16.msra.mxu1 %v9566_v21  ;;  %v795_v30 = vmax.f32 %v729_v19, %v763_v25  ;;  %3320 = vmatprep.subr.bf16.mxu0 %v9695_v39  ;;  %v12125_v0 = vld [vmem:[#allocation9 + $0x168] sm:$0xff] }
 0x1a9   : > { %3321 = vmatpush2.bf16.msra.mxu0 %v9694_v41  ;;  %3209 = vmatprep.subr.bf16.mxu1 %v9559_v44  ;;  %v12127_v19 = vld [vmem:[#allocation9 + $0x548] sm:$0xff] }
 0x1aa   : > { %v796_v28 = vmax.f32 %v731_v26, %v764_v29  ;;  %v811_v33 = vpack.c.bf16 %v795_v30, %v793_v31  ;;  %3322 = vmatprep.subr.bf16.mxu0 %v9687_v48  ;;  %v12129_v20 = vld [vmem:[#allocation9 + $0x568] sm:$0xff]  ;;  %v12148_v29 = vrot.slane %v877_v11, %v12013_v36  ;;  %v12151_v30 = vrot.slane %v877_v11, %v12115_v14 }
 0x1ab   : > { %v12131_v21 = vld [vmem:[#allocation9 + $0x108] sm:$0xff] }
 0x1ac   : > { %v812_v32 = vpack.c.bf16 %v796_v28, %v794_v38  ;;  %3210 = vmatpush2.bf16.msra.mxu1 %v9558_v47  ;;  %v12133_v22 = vld [vmem:[#allocation9 + $0x128] sm:$0xff] }
 0x1ad   : > { %3323 = vmatpush2.bf16.msra.mxu0 %v9686_v49  ;;  %3211 = vmatprep.subr.bf16.mxu1 %v9551_v53  ;;  %v12141_v25 = vld [vmem:[#allocation9 + $0x508] sm:$0xff] }
 0x1ae   : > { %1321 = vmatprep.mubr.bf16.mxu1 %v812_v32  ;;  %1434 = vmatprep.mubr.bf16.mxu0 %v812_v32  ;;  %v12143_v26 = vld [vmem:[#allocation9 + $0x528] sm:$0xff] }
 0x1af   : > { %1322 = vmatmul.mubr.bf16.gmra.mxu1 %v811_v33  ;;  %1435 = vmatmul.mubr.bf16.gmra.mxu0 %v811_v33  ;;  %v12145_v27 = vld [vmem:[#allocation9 + $0xc8] sm:$0xff] }
 0x1b0   : > { %3212 = vmatpush2.bf16.msra.mxu1 %v9550_v55  ;;  %3324 = vmatprep.subr.bf16.mxu0 %v9679_v57  ;;  %v12157_v31 = vld [vmem:[#allocation9 + $0xe8] sm:$0xff] }
 0x1b1   : > { %3325 = vmatpush2.bf16.msra.mxu0 %v9678_v56  ;;  %3213 = vmatprep.subr.bf16.mxu1 %v9543_v61  ;;  %v12159_v32 = vld [vmem:[#allocation9 + $0x4c8] sm:$0xff] }
 0x1b2   : > { %3326 = vmatprep.subr.bf16.mxu0 %v9671_v2  ;;  %v12161_v33 = vld [vmem:[#allocation9 + $0x4e8] sm:$0xff] }
 0x1b3   : > { %v12175_v44 = vld [vmem:[#allocation9 + $0x488] sm:$0xff] }
 0x1b4   : > { %3214 = vmatpush2.bf16.msra.mxu1 %v9542_v63  ;;  %v12185_v49 = vld [vmem:[#allocation9 + $0x4a8] sm:$0xff] }
 0x1b5   : > { %3327 = vmatpush2.bf16.msra.mxu0 %v9670_v1  ;;  %3409 = vmatprep.subr.bf16.mxu1 %v9537_v6  ;;  %v12199_v58 = vld [vmem:[#allocation9 + $0x448] sm:$0xff] }
 0x1b6   : > { %3522 = vmatprep.subr.bf16.mxu0 %v9665_v10  ;;  %15223 = vst [vmem:[#allocation25_spill] sm:$0xff] %v12199_v58  ;;  %v12201_v59 = vld [vmem:[#allocation9 + $0x468] sm:$0xff] }
 0x1b7   : > { %15224 = vst [vmem:[#allocation26_spill] sm:$0xff] %v12201_v59  ;;  %v12211_v1 = vld [vmem:[#allocation9 + $0x8] sm:$0xff] }
 0x1b8   : > { %15225 = vst [vmem:[#allocation27_spill] sm:$0xff] %v12211_v1  ;;  %v12213_v2 = vld [vmem:[#allocation9 + $0x28] sm:$0xff] }
 0x1b9   : > { %15226 = vst [vmem:[#allocation28_spill] sm:$0xff] %v12213_v2  ;;  %v12215_v6 = vld [vmem:[#allocation9 + $0x408] sm:$0xff] }
 0x1ba   : > { %15227 = vst [vmem:[#allocation29_spill] sm:$0xff] %v12215_v6  ;;  %v12226_v56 = vld [vmem:[#allocation9 + $0x428] sm:$0xff] }
 0x1bb   : > { %15228 = vst [vmem:[#allocation30_spill] sm:$0xff] %v12226_v56  ;;  %v12228_v57 = vld [vmem:[#allocation9 + $0x3c8] sm:$0xff] }
 0x1bc   : > { %15229 = vst [vmem:[#allocation31_spill] sm:$0xff] %v12228_v57  ;;  %v12230_v54 = vld [vmem:[#allocation9 + $0x3e8] sm:$0xff] }
 0x1bd   : > { %15230 = vst [vmem:[#allocation32_spill] sm:$0xff] %v12230_v54  ;;  %v12238_v62 = vld [vmem:[#allocation9 + $0x7c8] sm:$0xff] }
 0x1be   : > { %15231 = vst [vmem:[#allocation33_spill] sm:$0xff] %v12238_v62  ;;  %v12240_v48 = vld [vmem:[#allocation9 + $0x7e8] sm:$0xff] }
 0x1bf   : > { %15232 = vst [vmem:[#allocation34_spill] sm:$0xff] %v12240_v48  ;;  %v12262_v40 = vld [vmem:[#allocation9 + $0x388] sm:$0xff] }
 0x1c0   : > { %v12264_v55 = vld [vmem:[#allocation9 + $0x3a8] sm:$0xff] }
 0x1c1   : > { %v12278_v1 = vld [vmem:[#allocation9 + $0x788] sm:$0xff] }
 0x1c2   : > { %v12280_v12 = vld [vmem:[#allocation9 + $0x7a8] sm:$0xff] }
 0x237   : > { %v1253_v52 = vpop.f32.mrf.mxu1  ;;  %v1366_v53 = vpop.f32.mrf.mxu0 }
 0x238   : > { %v12218_v10 = vadd.f32 %v1253_v52, %v12136_v23  ;;  %v1367_v63 = vadd.f32 %v1366_v53, %v12139_v24 }
 0x239   : > { %v1255_v11 = vpop.f32.mrf.mxu1  ;;  %v1368_v60 = vpop.f32.mrf.mxu0 }
 0x23a   : > { %v1256_v52 = vadd.f32 %v1255_v11, %v12148_v29  ;;  %v1369_v47 = vadd.f32 %v1368_v60, %v12151_v30  ;;  %v1445_v39 = vmul.f32 0.2, %v12218_v10  ;;  %v1447_v8 = vmul.f32 0.2, %v1367_v63 }
 0x23b   : > { %v1257_v45 = vpop.f32.mrf.mxu1  ;;  %v1370_v46 = vpop.f32.mrf.mxu0 }
 0x23c   : > { %v1258_v37 = vadd.f32 %v1257_v45, %v12136_v23  ;;  %v1371_v60 = vadd.f32 %v1370_v46, %v12139_v24  ;;  %v1446_v28 = vmul.f32 0.2, %v1256_v52  ;;  %v1448_v53 = vmul.f32 0.2, %v1369_v47 }
 0x23d   : > { %v1259_v38 = vpop.f32.mrf.mxu1  ;;  %v1372_v11 = vpop.f32.mrf.mxu0  ;;  %v1511_v58 = vmax.f32 %v1367_v63, %v1447_v8 }
 0x23e   : > { %v1260_v9 = vadd.f32 %v1259_v38, %v12148_v29  ;;  %v1373_v41 = vadd.f32 %v1372_v11, %v12151_v30  ;;  %v1449_v34 = vmul.f32 0.2, %v1258_v37  ;;  %v1451_v45 = vmul.f32 0.2, %v1371_v60 }
 0x23f   : > { %v1263_v14 = vpop.f32.mrf.mxu1  ;;  %v1376_v46 = vpop.f32.mrf.mxu0  ;;  %v1509_v38 = vmax.f32 %v12218_v10, %v1445_v39  ;;  %v1510_v48 = vmax.f32 %v1256_v52, %v1446_v28  ;;  %v1512_v62 = vmax.f32 %v1369_v47, %v1448_v53 }
 0x240   : > { %v1450_v35 = vmul.f32 0.2, %v1260_v9  ;;  %v1452_v61 = vmul.f32 0.2, %v1373_v41  ;;  %v12271_v36 = vadd.f32 %v1263_v14, %v12136_v23  ;;  %v1513_v57 = vmax.f32 %v1258_v37, %v1449_v34 }
 0x241   : > { %v1515_v11 = vmax.f32 %v1371_v60, %v1451_v45  ;;  %v1265_v56 = vpop.f32.mrf.mxu1  ;;  %v1378_v6 = vpop.f32.mrf.mxu0  ;;  %v1377_v54 = vadd.f32 %v1376_v46, %v12139_v24 }
 0x242   : > { %v1514_v14 = vmax.f32 %v1260_v9, %v1450_v35  ;;  %v1516_v59 = vmax.f32 %v1373_v41, %v1452_v61  ;;  %v1266_v39 = vadd.f32 %v1265_v56, %v12148_v29  ;;  %v1379_v34 = vadd.f32 %v1378_v6, %v12151_v30  ;;  %v12298_v61 = vld [vmem:[#allocation9 + $0x348] sm:$0xff] }
 0x243   : > { %v1267_v37 = vpop.f32.mrf.mxu1  ;;  %v1380_v10 = vpop.f32.mrf.mxu0  ;;  %v1453_v2 = vmul.f32 0.2, %v12271_v36  ;;  %v12292_v35 = vpack.c.bf16 %v1513_v57, %v1509_v38  ;;  %v12294_v8 = vpack.c.bf16 %v1515_v11, %v1511_v58  ;;  %v1455_v57 = vmul.f32 0.2, %v1377_v54 }
 0x244   : > { %v12285_v60 = vpack.c.bf16 %v1514_v14, %v1510_v48  ;;  %v12287_v45 = vpack.c.bf16 %v1516_v59, %v1512_v62  ;;  %v1268_v9 = vadd.f32 %v1267_v37, %v12136_v23  ;;  %v1381_v41 = vadd.f32 %v1380_v10, %v12139_v24  ;;  %v12300_v48 = vld [vmem:[#allocation9 + $0x368] sm:$0xff] }
 0x245   : > { %15234 = vst [vmem:[#allocation36_spill] sm:$0xff] %v12292_v35  ;;  %15235 = vst [vmem:[#allocation37_spill] sm:$0xff] %v12294_v8  ;;  %v1269_v47 = vpop.f32.mrf.mxu1  ;;  %v1382_v56 = vpop.f32.mrf.mxu0  ;;  %v1454_v59 = vmul.f32 0.2, %v1266_v39  ;;  %v1456_v62 = vmul.f32 0.2, %v1379_v34  ;;  %v15236_v10 = vcombine.low %v12093_v3, %v12095_v4  ;;  %v1517_v28 = vmax.f32 %v12271_v36, %v1453_v2 }
 0x246   : > { %15233 = vst [vmem:[#allocation35_spill] sm:$0xff] %v12287_v45  ;;  %v1270_v63 = vadd.f32 %v1269_v47, %v12148_v29  ;;  %v1383_v6 = vadd.f32 %v1382_v56, %v12151_v30  ;;  %3215 = vmatprep.mubr.bf16.mxu1 %v12285_v60  ;;  %3328 = vmatprep.mubr.bf16.mxu0 %v12287_v45  ;;  %v1457_v58 = vmul.f32 0.2, %v1268_v9  ;;  %v1459_v52 = vmul.f32 0.2, %v1381_v41 }
 0x247   : > { %v1273_v53 = vpop.f32.mrf.mxu1  ;;  %v1386_v46 = vpop.f32.mrf.mxu0  ;;  %3216 = vmatmul.mubr.bf16.vlgmr.msra.gmra.mxu1 %v12292_v35  ;;  %3329 = vmatmul.mubr.bf16.vlgmr.msra.gmra.mxu0 %v12294_v8  ;;  %v15237_v47 = vcombine.low %v12097_v5, %v12101_v7  ;;  %v15239_v3 = vcombine.high %v12119_v16, %v12121_v17  ;;  %v1518_v4 = vmax.f32 %v1266_v39, %v1454_v59 }
 0x248   : > { %v1458_v11 = vmul.f32 0.2, %v1270_v63  ;;  %v1460_v14 = vmul.f32 0.2, %v1383_v6  ;;  %v12311_v37 = vadd.f32 %v1273_v53, %v12136_v23  ;;  %3410 = vmatpush1.bf16.msra.mxu1 %v15236_v10  ;;  %v1521_v8 = vmax.f32 %v1268_v9, %v1457_v58 }
 0x249   : > { %3523 = vmatpush1.bf16.msra.mxu0 %v15237_v47  ;;  %v1523_v38 = vmax.f32 %v1381_v41, %v1459_v52  ;;  %v1275_v35 = vpop.f32.mrf.mxu1  ;;  %v1388_v45 = vpop.f32.mrf.mxu0  ;;  %v15238_v53 = vcombine.high %v12112_v13, %v12117_v15  ;;  %v1520_v5 = vmax.f32 %v1379_v34, %v1456_v62  ;;  %v1519_v47 = vmax.f32 %v1377_v54, %v1455_v57 }
 0x24a   : > { %3524 = vmatprep.subr.bf16.mxu0 %v15239_v3  ;;  %v1522_v7 = vmax.f32 %v1270_v63, %v1458_v11  ;;  %v1524_v10 = vmax.f32 %v1383_v6, %v1460_v14  ;;  %v12329_v56 = vadd.f32 %v1386_v46, %v12139_v24  ;;  %v1276_v36 = vadd.f32 %v1275_v35, %v12148_v29  ;;  %v12353_v63 = vld [vmem:[#allocation9 + $0x748] sm:$0xff] }
 0x24b   : > { %3411 = vmatprep.subr.bf16.mxu1 %v15238_v53  ;;  %v1389_v2 = vadd.f32 %v1388_v45, %v12151_v30  ;;  %v1277_v9 = vpop.f32.mrf.mxu1  ;;  %v1390_v41 = vpop.f32.mrf.mxu0  ;;  %v12333_v58 = vpack.c.bf16 %v1521_v8, %v1517_v28  ;;  %v1461_v39 = vmul.f32 0.2, %v12311_v37  ;;  %v15240_v54 = vcombine.low %v12112_v13, %v12117_v15  ;;  %v12355_v13 = vld [vmem:[#allocation9 + $0x768] sm:$0xff] }
 0x24c   : > { %v12335_v52 = vpack.c.bf16 %v1522_v7, %v1518_v4  ;;  %v12337_v53 = vpack.c.bf16 %v1524_v10, %v1520_v5  ;;  %v12343_v34 = vpack.c.bf16 %v1523_v38, %v1519_v47  ;;  %v1278_v35 = vadd.f32 %v1277_v9, %v12136_v23 }
 0x24d   : > { %3412 = vmatpush1.bf16.msra.mxu1 %v15240_v54  ;;  %v1391_v45 = vadd.f32 %v1390_v41, %v12139_v24  ;;  %v15241_v28 = vcombine.low %v12119_v16, %v12121_v17  ;;  %v1279_v8 = vpop.f32.mrf.mxu1  ;;  %v1392_v59 = vpop.f32.mrf.mxu0  ;;  %v15242_v62 = vcombine.high %v12123_v18, %v12125_v0  ;;  %v1462_v15 = vmul.f32 0.2, %v1276_v36 }
 0x24e   : > { %v1464_v6 = vmul.f32 0.2, %v1389_v2  ;;  %v1280_v57 = vadd.f32 %v1279_v8, %v12148_v29  ;;  %v1393_v46 = vadd.f32 %v1392_v59, %v12151_v30  ;;  %3225 = vmatprep.mubr.bf16.mxu1 %v12335_v52  ;;  %3338 = vmatprep.mubr.bf16.mxu0 %v12337_v53  ;;  %v1463_v16 = vmul.f32 0.2, %v12329_v56 }
 0x24f   : > { %3525 = vmatpush1.bf16.msra.mxu0 %v15241_v28  ;;  %3413 = vmatprep.subr.bf16.mxu1 %v15242_v62  ;;  %v1465_v17 = vmul.f32 0.2, %v1278_v35  ;;  %v1467_v38 = vmul.f32 0.2, %v1391_v45  ;;  %v1283_v11 = vpop.f32.mrf.mxu1  ;;  %v1396_v14 = vpop.f32.mrf.mxu0  ;;  %v1525_v4 = vmax.f32 %v12311_v37, %v1461_v39  ;;  %v15243_v10 = vcombine.low %v12123_v18, %v12125_v0 }
 0x250   : > { %3226 = vmatmul.mubr.bf16.gmra.mxu1 %v12333_v58  ;;  %3339 = vmatmul.mubr.bf16.gmra.mxu0 %v12343_v34  ;;  %v1466_v5 = vmul.f32 0.2, %v1280_v57  ;;  %v1468_v7 = vmul.f32 0.2, %v1393_v46  ;;  %v15244_v47 = vcombine.high %v12127_v19, %v12129_v20  ;;  %v12376_v28 = vadd.f32 %v1283_v11, %v12136_v23 }
 0x251   : > { %3414 = vmatpush1.bf16.msra.mxu1 %v15243_v10  ;;  %v1529_v41 = vmax.f32 %v1278_v35, %v1465_v17  ;;  %v1531_v54 = vmax.f32 %v1391_v45, %v1467_v38  ;;  %v15245_v37 = vcombine.low %v12127_v19, %v12129_v20  ;;  %v1285_v39 = vpop.f32.mrf.mxu1  ;;  %v1398_v8 = vpop.f32.mrf.mxu0  ;;  %v15246_v18 = vcombine.high %v12131_v21, %v12133_v22 }
 0x252   : > { %3526 = vmatprep.subr.bf16.mxu0 %v15244_v47  ;;  %v1526_v0 = vmax.f32 %v1276_v36, %v1462_v15  ;;  %v1528_v59 = vmax.f32 %v1389_v2, %v1464_v6  ;;  %v1530_v62 = vmax.f32 %v1280_v57, %v1466_v5  ;;  %v1532_v10 = vmax.f32 %v1393_v46, %v1468_v7  ;;  %v12404_v6 = vld [vmem:[#allocation9 + $0x308] sm:$0xff] }
 0x253   : > { %3527 = vmatpush1.bf16.msra.mxu0 %v15245_v37  ;;  %3415 = vmatprep.subr.bf16.mxu1 %v15246_v18  ;;  %v15247_v35 = vcombine.high %v12141_v25, %v12143_v26  ;;  %v1527_v45 = vmax.f32 %v12329_v56, %v1463_v16  ;;  %v12389_v17 = vadd.f32 %v1396_v14, %v12139_v24  ;;  %v1287_v38 = vpop.f32.mrf.mxu1  ;;  %v1400_v11 = vpop.f32.mrf.mxu0  ;;  %v12406_v57 = vld [vmem:[#allocation9 + $0x328] sm:$0xff]  ;;  %v1469_v16 = vmul.f32 0.2, %v12376_v28 }
 0x254   : > { %v1286_v19 = vadd.f32 %v1285_v39, %v12148_v29  ;;  %v1399_v20 = vadd.f32 %v1398_v8, %v12151_v30  ;;  %v12393_v47 = vpack.c.bf16 %v1529_v41, %v1525_v4  ;;  %v12395_v36 = vpack.c.bf16 %v1530_v62, %v1526_v0 }
 0x255   : > { %3528 = vmatprep.subr.bf16.mxu0 %v15247_v35  ;;  %v12397_v2 = vpack.c.bf16 %v1532_v10, %v1528_v59  ;;  %v15248_v15 = vcombine.low %v12131_v21, %v12133_v22  ;;  %v12408_v46 = vpack.c.bf16 %v1531_v54, %v1527_v45  ;;  %v1288_v14 = vadd.f32 %v1287_v38, %v12136_v23  ;;  %v1289_v21 = vpop.f32.mrf.mxu1  ;;  %v1402_v22 = vpop.f32.mrf.mxu0 }
 0x256   : > { %v1401_v4 = vadd.f32 %v1400_v11, %v12139_v24  ;;  %v15249_v5 = vcombine.low %v12141_v25, %v12143_v26  ;;  %v15250_v7 = vcombine.high %v12145_v27, %v12157_v31  ;;  %v1470_v41 = vmul.f32 0.2, %v1286_v19  ;;  %3235 = vmatprep.mubr.bf16.mxu1 %v12395_v36 }
 0x257   : > { %3416 = vmatpush1.bf16.msra.mxu1 %v15248_v15  ;;  %v1472_v37 = vmul.f32 0.2, %v1399_v20  ;;  %v1290_v54 = vadd.f32 %v1289_v21, %v12148_v29  ;;  %v1403_v39 = vadd.f32 %v1402_v22, %v12151_v30  ;;  %3348 = vmatprep.mubr.bf16.mxu0 %v12397_v2  ;;  %v1471_v8 = vmul.f32 0.2, %v12389_v17  ;;  %v1293_v18 = vpop.f32.mrf.mxu1  ;;  %v1406_v0 = vpop.f32.mrf.mxu0 }
 0x258   : > { %3529 = vmatpush1.bf16.msra.mxu0 %v15249_v5  ;;  %3417 = vmatprep.subr.bf16.mxu1 %v15250_v7  ;;  %v1473_v25 = vmul.f32 0.2, %v1288_v14  ;;  %v1475_v26 = vmul.f32 0.2, %v1401_v4  ;;  %v12429_v35 = vadd.f32 %v1293_v18, %v12136_v23  ;;  %v15251_v45 = vcombine.low %v12145_v27, %v12157_v31 }
 0x259   : > { %3236 = vmatmul.mubr.bf16.gmra.mxu1 %v12393_v47  ;;  %3349 = vmatmul.mubr.bf16.gmra.mxu0 %v12408_v46  ;;  %v1474_v62 = vmul.f32 0.2, %v1290_v54  ;;  %v1476_v10 = vmul.f32 0.2, %v1403_v39  ;;  %v15252_v38 = vcombine.high %v12159_v32, %v12161_v33  ;;  %v1533_v15 = vmax.f32 %v12376_v28, %v1469_v16  ;;  %v1295_v7 = vpop.f32.mrf.mxu1  ;;  %v1408_v18 = vpop.f32.mrf.mxu0 }
 0x25a   : > { %v1537_v5 = vmax.f32 %v1288_v14, %v1473_v25  ;;  %v1539_v21 = vmax.f32 %v1401_v4, %v1475_v26  ;;  %v15253_v22 = vcombine.low %v12159_v32, %v12161_v33  ;;  %v15254_v27 = vcombine.high %v12171_v42, %v12173_v43 }
 0x25b   : > { %3418 = vmatpush1.bf16.msra.mxu1 %v15251_v45  ;;  %3530 = vmatprep.subr.bf16.mxu0 %v15252_v38  ;;  %v1534_v31 = vmax.f32 %v1286_v19, %v1470_v41  ;;  %v1536_v45 = vmax.f32 %v1399_v20, %v1472_v37  ;;  %v1538_v38 = vmax.f32 %v1290_v54, %v1474_v62  ;;  %v1297_v14 = vpop.f32.mrf.mxu1  ;;  %v1410_v4 = vpop.f32.mrf.mxu0  ;;  %v1477_v41 = vmul.f32 0.2, %v12429_v35  ;;  %v12465_v37 = vld [vmem:[#allocation9 + $0x708] sm:$0xff] }
 0x25c   : > { %3531 = vmatpush1.bf16.msra.mxu0 %v15253_v22  ;;  %3419 = vmatprep.subr.bf16.mxu1 %v15254_v27  ;;  %v1540_v59 = vmax.f32 %v1403_v39, %v1476_v10  ;;  %v15255_v11 = vcombine.high %v12175_v44, %v12185_v49  ;;  %v1535_v28 = vmax.f32 %v12389_v17, %v1471_v8  ;;  %v12467_v54 = vld [vmem:[#allocation9 + $0x728] sm:$0xff] }
 0x25d   : > { %v12451_v16 = vadd.f32 %v1406_v0, %v12139_v24  ;;  %v1296_v32 = vadd.f32 %v1295_v7, %v12148_v29  ;;  %v1409_v33 = vadd.f32 %v1408_v18, %v12151_v30  ;;  %v12455_v25 = vpack.c.bf16 %v1537_v5, %v1533_v15  ;;  %v1412_v62 = vpop.f32.mrf.mxu0 }
 0x25e   : > { %3532 = vmatprep.subr.bf16.mxu0 %v15255_v11  ;;  %v12457_v19 = vpack.c.bf16 %v1538_v38, %v1534_v31  ;;  %v12459_v20 = vpack.c.bf16 %v1540_v59, %v1536_v45  ;;  %v15256_v17 = vcombine.low %v12171_v42, %v12173_v43  ;;  %v12469_v39 = vpack.c.bf16 %v1539_v21, %v1535_v28  ;;  %v1299_v59 = vpop.f32.mrf.mxu1  ;;  %v15261_v38 = vld [vmem:[#allocation25_spill] sm:$0xff]  ;;  %v15262_v28 = vld [vmem:[#allocation26_spill] sm:$0xff] }
 0x25f   : > { %v1298_v8 = vadd.f32 %v1297_v14, %v12136_v23  ;;  %v1411_v26 = vadd.f32 %v1410_v4, %v12139_v24  ;;  %v15258_v0 = vcombine.low %v12175_v44, %v12185_v49  ;;  %v15259_v42 = vcombine.high %v12187_v50, %v12189_v51  ;;  %v1416_v22 = vpop.f32.mrf.mxu0 }
 0x260   : > { %3420 = vmatpush1.bf16.msra.mxu1 %v15256_v17  ;;  %15257 = vst [vmem:[#allocation38_spill] sm:$0xff] %v12469_v39  ;;  %v1478_v43 = vmul.f32 0.2, %v1296_v32  ;;  %v1480_v10 = vmul.f32 0.2, %v1409_v33  ;;  %v1300_v11 = vadd.f32 %v1299_v59, %v12148_v29  ;;  %v1413_v15 = vadd.f32 %v1412_v62, %v12151_v30  ;;  %3245 = vmatprep.mubr.bf16.mxu1 %v12457_v19  ;;  %v1303_v21 = vpop.f32.mrf.mxu1 }
 0x261   : > { %3533 = vmatpush1.bf16.msra.mxu0 %v15258_v0  ;;  %3421 = vmatprep.subr.bf16.mxu1 %v15259_v42  ;;  %v1479_v5 = vmul.f32 0.2, %v12451_v16  ;;  %v1481_v44 = vmul.f32 0.2, %v1298_v8  ;;  %v1483_v49 = vmul.f32 0.2, %v1411_v26  ;;  %v1541_v18 = vmax.f32 %v12429_v35, %v1477_v41  ;;  %v1418_v62 = vpop.f32.mrf.mxu0 }
 0x262   : > { %3358 = vmatprep.mubr.bf16.mxu0 %v12459_v20  ;;  %3246 = vmatmul.mubr.bf16.gmra.mxu1 %v12455_v25  ;;  %v1482_v27 = vmul.f32 0.2, %v1300_v11  ;;  %v1484_v31 = vmul.f32 0.2, %v1413_v15  ;;  %v15260_v45 = vcombine.low %v12187_v50, %v12189_v51  ;;  %v15263_v14 = vcombine.high %v15261_v38, %v15262_v28  ;;  %v1305_v41 = vpop.f32.mrf.mxu1  ;;  %v15265_v50 = vld [vmem:[#allocation27_spill] sm:$0xff]  ;;  %v15266_v51 = vld [vmem:[#allocation28_spill] sm:$0xff] }
 0x263   : > { %3359 = vmatmul.mubr.bf16.gmra.mxu0 %v12469_v39  ;;  %v1545_v17 = vmax.f32 %v1298_v8, %v1481_v44  ;;  %v1547_v0 = vmax.f32 %v1411_v26, %v1483_v49  ;;  %v12498_v59 = vadd.f32 %v1303_v21, %v12136_v23  ;;  %v15264_v35 = vcombine.low %v15261_v38, %v15262_v28  ;;  %v15268_v49 = vld [vmem:[#allocation29_spill] sm:$0xff]  ;;  %v15269_v21 = vld [vmem:[#allocation30_spill] sm:$0xff]  ;;  %v1420_v56 = vpop.f32.mrf.mxu0 }
 0x264   : > { %3422 = vmatpush1.bf16.msra.mxu1 %v15260_v45  ;;  %3534 = vmatprep.subr.bf16.mxu0 %v15263_v14  ;;  %v15267_v42 = vcombine.high %v15265_v50, %v15266_v51  ;;  %v12506_v45 = vld [vmem:[#allocation9 + $0x2c8] sm:$0xff]  ;;  %v1542_v7 = vmax.f32 %v1296_v32, %v1478_v43  ;;  %v1544_v8 = vmax.f32 %v1409_v33, %v1480_v10  ;;  %v1307_v9 = vpop.f32.mrf.mxu1 }
 0x265   : > { %3535 = vmatpush1.bf16.msra.mxu0 %v15264_v35  ;;  %v12508_v14 = vld [vmem:[#allocation9 + $0x2e8] sm:$0xff]  ;;  %v1546_v26 = vmax.f32 %v1300_v11, %v1482_v27  ;;  %v1548_v44 = vmax.f32 %v1413_v15, %v1484_v31  ;;  %v15270_v4 = vcombine.high %v15268_v49, %v15269_v21  ;;  %v1543_v38 = vmax.f32 %v12451_v16, %v1479_v5  ;;  %v15278_v31 = vld [vmem:[#allocation32_spill] sm:$0xff] }
 0x266   : > { %3423 = vmatprep.subr.bf16.mxu1 %v15267_v42  ;;  %v12515_v28 = vadd.f32 %v1416_v22, %v12139_v24  ;;  %v1306_v35 = vadd.f32 %v1305_v41, %v12148_v29  ;;  %v1419_v42 = vadd.f32 %v1418_v62, %v12151_v30  ;;  %v12519_v3 = vpack.c.bf16 %v1545_v17, %v1541_v18  ;;  %v1422_v18 = vpop.f32.mrf.mxu0  ;;  %v15277_v27 = vld [vmem:[#allocation31_spill] sm:$0xff] }
 0x267   : > { %3536 = vmatprep.subr.bf16.mxu0 %v15270_v4  ;;  %v12521_v32 = vpack.c.bf16 %v1546_v26, %v1542_v7  ;;  %v12523_v33 = vpack.c.bf16 %v1548_v44, %v1544_v8  ;;  %v15274_v43 = vcombine.low %v15265_v50, %v15266_v51  ;;  %v12530_v10 = vpack.c.bf16 %v1547_v0, %v1543_v38  ;;  %v1309_v7 = vpop.f32.mrf.mxu1  ;;  %v12541_v17 = vld [vmem:[#allocation9 + $0x6c8] sm:$0xff] }
 0x268   : > { %15271 = vst [vmem:[#allocation25_spill] sm:$0xff] %v12519_v3  ;;  %v1485_v11 = vmul.f32 0.2, %v12498_v59  ;;  %v1308_v15 = vadd.f32 %v1307_v9, %v12136_v23  ;;  %v1421_v5 = vadd.f32 %v1420_v56, %v12139_v24  ;;  %v15276_v22 = vcombine.low %v15268_v49, %v15269_v21  ;;  %v12543_v0 = vld [vmem:[#allocation9 + $0x6e8] sm:$0xff]  ;;  %v1426_v44 = vpop.f32.mrf.mxu0 }
 0x269   : > { %15272 = vst [vmem:[#allocation26_spill] sm:$0xff] %v12521_v32  ;;  %15273 = vst [vmem:[#allocation27_spill] sm:$0xff] %v12523_v33  ;;  %3424 = vmatpush1.bf16.msra.mxu1 %v15274_v43  ;;  %v15279_v4 = vcombine.high %v15277_v27, %v15278_v31  ;;  %v1486_v41 = vmul.f32 0.2, %v1306_v35  ;;  %v1488_v62 = vmul.f32 0.2, %v1419_v42  ;;  %v1310_v9 = vadd.f32 %v1309_v7, %v12148_v29  ;;  %v1313_v26 = vpop.f32.mrf.mxu1 }
 0x26a   : > { %15275 = vst [vmem:[#allocation28_spill] sm:$0xff] %v12530_v10  ;;  %3537 = vmatpush1.bf16.msra.mxu0 %v15276_v22  ;;  %v1423_v56 = vadd.f32 %v1422_v18, %v12151_v30  ;;  %3255 = vmatprep.mubr.bf16.mxu1 %v12521_v32  ;;  %v1487_v50 = vmul.f32 0.2, %v12515_v28  ;;  %v1489_v51 = vmul.f32 0.2, %v1308_v15  ;;  %v12555_v43 = vadd.f32 %v1313_v26, %v12136_v23  ;;  %v15281_v7 = vld [vmem:[#allocation33_spill] sm:$0xff]  ;;  %v1428_v32 = vpop.f32.mrf.mxu0 }
 0x26b   : > { %3425 = vmatprep.subr.bf16.mxu1 %v15279_v4  ;;  %3368 = vmatprep.mubr.bf16.mxu0 %v12523_v33  ;;  %v1491_v8 = vmul.f32 0.2, %v1421_v5  ;;  %v1490_v21 = vmul.f32 0.2, %v1310_v9  ;;  %v15280_v22 = vcombine.low %v15277_v27, %v15278_v31  ;;  %v15282_v18 = vld [vmem:[#allocation34_spill] sm:$0xff]  ;;  %v1315_v26 = vpop.f32.mrf.mxu1  ;;  %v15285_v27 = vcombine.high %v12262_v40, %v12264_v55 }
 0x26c   : > { %3256 = vmatmul.mubr.bf16.gmra.mxu1 %v12519_v3  ;;  %3369 = vmatmul.mubr.bf16.gmra.mxu0 %v12530_v10  ;;  %v1492_v38 = vmul.f32 0.2, %v1423_v56  ;;  %v15283_v4 = vcombine.high %v15281_v7, %v15282_v18  ;;  %v1549_v10 = vmax.f32 %v12498_v59, %v1485_v11  ;;  %v1553_v3 = vmax.f32 %v1308_v15, %v1489_v51  ;;  %v1430_v51 = vpop.f32.mrf.mxu0 }
 0x26d   : > { %3426 = vmatpush2.bf16.msra.mxu1 %v15280_v22  ;;  %v1555_v49 = vmax.f32 %v1421_v5, %v1491_v8  ;;  %v15284_v33 = vcombine.low %v15281_v7, %v15282_v18  ;;  %v1550_v31 = vmax.f32 %v1306_v35, %v1486_v41  ;;  %v1552_v22 = vmax.f32 %v1419_v42, %v1488_v62  ;;  %v1317_v5 = vpop.f32.mrf.mxu1 }
 0x26e   : > { %3538 = vmatprep.subr.bf16.mxu0 %v15283_v4  ;;  %3427 = vmatprep.subr.bf16.mxu1 %v15285_v27  ;;  %v1554_v4 = vmax.f32 %v1310_v9, %v1490_v21  ;;  %v1556_v39 = vmax.f32 %v1423_v56, %v1492_v38  ;;  %v15286_v16 = vcombine.high %v12278_v1, %v12280_v12  ;;  %v1493_v41 = vmul.f32 0.2, %v12555_v43  ;;  %v1432_v9 = vpop.f32.mrf.mxu0  ;;  %v12601_v56 = vld [vmem:[#allocation9 + $0x288] sm:$0xff] }
 0x26f   : > { %3539 = vmatpush2.bf16.msra.mxu0 %v15284_v33  ;;  %v1551_v59 = vmax.f32 %v12515_v28, %v1487_v50  ;;  %v12577_v11 = vadd.f32 %v1426_v44, %v12139_v24  ;;  %v1316_v33 = vadd.f32 %v1315_v26, %v12148_v29  ;;  %v1429_v15 = vadd.f32 %v1428_v32, %v12151_v30 }
 0x270   : > { %3540 = vmatprep.subr.bf16.mxu0 %v15286_v16  ;;  %v12581_v8 = vpack.c.bf16 %v1553_v3, %v1549_v10  ;;  %v12583_v35 = vpack.c.bf16 %v1554_v4, %v1550_v31  ;;  %v12585_v42 = vpack.c.bf16 %v1556_v39, %v1552_v22  ;;  %v15287_v28 = vcombine.low %v12262_v40, %v12264_v55  ;;  %v1319_v10 = vpop.f32.mrf.mxu1  ;;  %v12603_v40 = vld [vmem:[#allocation9 + $0x2a8] sm:$0xff]  ;;  %v1436_v7 = vpop.f32.mrf.mxu0 }
 0x271   : > { %v12591_v16 = vpack.c.bf16 %v1555_v49, %v1551_v59  ;;  %v1318_v62 = vadd.f32 %v1317_v5, %v12136_v23  ;;  %v1431_v32 = vadd.f32 %v1430_v51, %v12139_v24  ;;  %v15288_v3 = vcombine.low %v12278_v1, %v12280_v12 }
 0x272   : > { %3428 = vmatpush2.bf16.msra.mxu1 %v15287_v28  ;;  %v15289_v39 = vcombine.high %v12298_v61, %v12300_v48  ;;  %v1494_v55 = vmul.f32 0.2, %v1316_v33  ;;  %v1496_v50 = vmul.f32 0.2, %v1429_v15  ;;  %v1320_v44 = vadd.f32 %v1319_v10, %v12148_v29  ;;  %3265 = vmatprep.mubr.bf16.mxu1 %v12583_v35  ;;  %v1323_v38 = vpop.f32.mrf.mxu1  ;;  %v12634_v10 = vld [vmem:[#allocation9 + $0x6a8] sm:$0xff] }
 0x273   : > { %3541 = vmatpush2.bf16.msra.mxu0 %v15288_v3  ;;  %v1433_v49 = vadd.f32 %v1432_v9, %v12151_v30  ;;  %3378 = vmatprep.mubr.bf16.mxu0 %v12585_v42  ;;  %v1495_v12 = vmul.f32 0.2, %v12577_v11  ;;  %v1497_v1 = vmul.f32 0.2, %v1318_v62  ;;  %v1499_v21 = vmul.f32 0.2, %v1431_v32  ;;  %v1438_v3 = vpop.f32.mrf.mxu0 }
 0x274   : > { %3429 = vmatprep.subr.bf16.mxu1 %v15289_v39  ;;  %3266 = vmatmul.mubr.bf16.gmra.mxu1 %v12581_v8  ;;  %v9697_v18 = vcombine.high %v12541_v17, %v12543_v0  ;;  %v1557_v26 = vmax.f32 %v12555_v43, %v1493_v41  ;;  %v1498_v27 = vmul.f32 0.2, %v1320_v44  ;;  %v15290_v22 = vcombine.low %v12298_v61, %v12300_v48  ;;  %v1325_v41 = vpop.f32.mrf.mxu1  ;;  %v12632_v48 = vld [vmem:[#allocation9 + $0x688] sm:$0xff] }
 0x275   : > { %3379 = vmatmul.mubr.bf16.gmra.mxu0 %v12591_v16  ;;  %v1500_v31 = vmul.f32 0.2, %v1433_v49  ;;  %v15291_v4 = vcombine.high %v12353_v63, %v12355_v13  ;;  %v9561_v59 = vcombine.high %v12601_v56, %v12603_v40  ;;  %v1561_v5 = vmax.f32 %v1318_v62, %v1497_v1 }
 0x276   : > { %3430 = vmatpush2.bf16.msra.mxu1 %v15290_v22  ;;  %v1563_v51 = vmax.f32 %v1431_v32, %v1499_v21  ;;  %v12624_v28 = vadd.f32 %v1323_v38, %v12136_v23  ;;  %v15292_v43 = vcombine.low %v12353_v63, %v12355_v13  ;;  %v15293_v61 = vcombine.high %v12404_v6, %v12406_v57  ;;  %v1327_v22 = vpop.f32.mrf.mxu1 }
 0x277   : > { %3542 = vmatprep.subr.bf16.mxu0 %v15291_v4  ;;  %v1558_v9 = vmax.f32 %v1316_v33, %v1494_v55  ;;  %v1560_v62 = vmax.f32 %v1429_v15, %v1496_v50  ;;  %v1562_v32 = vmax.f32 %v1320_v44, %v1498_v27  ;;  %v1564_v39 = vmax.f32 %v1433_v49, %v1500_v31  ;;  %v1440_v4 = vpop.f32.mrf.mxu0 }
 0x278   : > { %3543 = vmatpush2.bf16.msra.mxu0 %v15292_v43  ;;  %3431 = vmatprep.subr.bf16.mxu1 %v15293_v61  ;;  %v15294_v1 = vcombine.high %v12465_v37, %v12467_v54  ;;  %v1559_v63 = vmax.f32 %v12577_v11, %v1495_v12  ;;  %v1437_v13 = vadd.f32 %v1436_v7, %v12139_v24  ;;  %v1501_v44 = vmul.f32 0.2, %v12624_v28 }
 0x279   : > { %v1326_v21 = vadd.f32 %v1325_v41, %v12148_v29  ;;  %v1439_v38 = vadd.f32 %v1438_v3, %v12151_v30  ;;  %v12643_v43 = vpack.c.bf16 %v1561_v5, %v1557_v26  ;;  %v12645_v33 = vpack.c.bf16 %v1562_v32, %v1558_v9  ;;  %v1329_v26 = vpop.f32.mrf.mxu1  ;;  %v1442_v27 = vpop.f32.mrf.mxu0 }
 0x27a   : > { %3544 = vmatprep.subr.bf16.mxu0 %v15294_v1  ;;  %v12647_v15 = vpack.c.bf16 %v1564_v39, %v1560_v62  ;;  %v15295_v55 = vcombine.low %v12404_v6, %v12406_v57  ;;  %v9689_v11 = vcombine.high %v12632_v48, %v12634_v10  ;;  %v12654_v50 = vpack.c.bf16 %v1563_v51, %v1559_v63  ;;  %v1806_v63 = vld [vmem:[#allocation9 + $0x648] sm:$0xff] }
 0x27b   : > { %v1328_v49 = vadd.f32 %v1327_v22, %v12136_v23  ;;  %v1441_v12 = vadd.f32 %v1440_v4, %v12139_v24  ;;  %v15296_v7 = vcombine.low %v12465_v37, %v12467_v54  ;;  %v15297_v6 = vcombine.high %v12506_v45, %v12508_v14  ;;  %3275 = vmatprep.mubr.bf16.mxu1 %v12645_v33  ;;  %v1678_v23 = vld [vmem:[#allocation9 + $0x248] sm:$0xff] }
 0x27c   : > { %3432 = vmatpush2.bf16.msra.mxu1 %v15295_v55  ;;  %v1502_v57 = vmul.f32 0.2, %v1326_v21  ;;  %v1504_v31 = vmul.f32 0.2, %v1439_v38  ;;  %v1330_v5 = vadd.f32 %v1329_v26, %v12148_v29  ;;  %v1443_v51 = vadd.f32 %v1442_v27, %v12151_v30  ;;  %3388 = vmatprep.mubr.bf16.mxu0 %v12647_v15  ;;  %v1682_v24 = vld [vmem:[#allocation9 + $0x268] sm:$0xff]  ;;  %v1791_v26 = vld [vmem:[#allocation9 + $0x5d0] sm:$0xff] }
 0x27d   : > { %3545 = vmatpush2.bf16.msra.mxu0 %v15296_v7  ;;  %3433 = vmatprep.subr.bf16.mxu1 %v15297_v6  ;;  %v1503_v37 = vmul.f32 0.2, %v1437_v13  ;;  %v1505_v54 = vmul.f32 0.2, %v1328_v49  ;;  %v1507_v41 = vmul.f32 0.2, %v1441_v12  ;;  %v15298_v29 = vcombine.low %v12506_v45, %v12508_v14 }
 0x27e   : > { %3276 = vmatmul.mubr.bf16.gmra.mxu1 %v12643_v43  ;;  %3389 = vmatmul.mubr.bf16.gmra.mxu0 %v12654_v50  ;;  %v1506_v3 = vmul.f32 0.2, %v1330_v5  ;;  %v1508_v61 = vmul.f32 0.2, %v1443_v51  ;;  %v9560_v30 = vcombine.low %v12601_v56, %v12603_v40  ;;  %v9688_v9 = vcombine.low %v12632_v48, %v12634_v10  ;;  %v1810_v22 = vld [vmem:[#allocation9 + $0x668] sm:$0xff]  ;;  %v1795_v27 = vld [vmem:[#allocation9 + $0x5f0] sm:$0xff] }
 0x27f   : > { %3546 = vmatprep.subr.bf16.mxu0 %v9697_v18  ;;  %v1569_v62 = vmax.f32 %v1328_v49, %v1505_v54  ;;  %v1571_v32 = vmax.f32 %v1441_v12, %v1507_v41  ;;  %v15299_v39 = vcombine.low %v12541_v17, %v12543_v0  ;;  %v9553_v1 = vcombine.high %v1678_v23, %v1682_v24  ;;  %v1670_v55 = vld [vmem:[#allocation9 + $0x208] sm:$0xff]  ;;  %v1783_v54 = vld [vmem:[#allocation9 + $0x590] sm:$0xff] }
 0x280   : > { %3434 = vmatpush2.bf16.msra.mxu1 %v15298_v29  ;;  %v1566_v4 = vmax.f32 %v1326_v21, %v1502_v57  ;;  %v1568_v45 = vmax.f32 %v1439_v38, %v1504_v31  ;;  %v1570_v14 = vmax.f32 %v1330_v5, %v1506_v3  ;;  %v1572_v18 = vmax.f32 %v1443_v51, %v1508_v61  ;;  %v1674_v48 = vld [vmem:[#allocation9 + $0x228] sm:$0xff]  ;;  %v1787_v41 = vld [vmem:[#allocation9 + $0x5b0] sm:$0xff] }
 0x281   : > { %3547 = vmatpush2.bf16.msra.mxu0 %v15299_v39  ;;  %3435 = vmatprep.subr.bf16.mxu1 %v9561_v59  ;;  %v1565_v56 = vmax.f32 %v12624_v28, %v1501_v44  ;;  %v1567_v40 = vmax.f32 %v1437_v13, %v1503_v37  ;;  %v9552_v17 = vcombine.low %v1678_v23, %v1682_v24  ;;  %v1798_v59 = vld [vmem:[#allocation9 + $0x608] sm:$0xff]  ;;  %v1663_v13 = vld [vmem:[#allocation9 + $0x1d0] sm:$0xff] }
 0x282   : > { %3548 = vmatprep.subr.bf16.mxu0 %v9689_v11  ;;  %v12682_v10 = vpack.c.bf16 %v1570_v14, %v1566_v4  ;;  %v12684_v49 = vpack.c.bf16 %v1572_v18, %v1568_v45  ;;  %v9681_v0 = vcombine.high %v1806_v63, %v1810_v22  ;;  %v1802_v12 = vld [vmem:[#allocation9 + $0x628] sm:$0xff]  ;;  %v9680_v38 = vcombine.low %v1806_v63, %v1810_v22  ;;  %v1667_v11 = vld [vmem:[#allocation9 + $0x1f0] sm:$0xff] }
 0x283   : > { %v12686_v7 = vpack.c.bf16 %v1569_v62, %v1565_v56  ;;  %v12688_v21 = vpack.c.bf16 %v1571_v32, %v1567_v40  ;;  %v9545_v28 = vcombine.high %v1670_v55, %v1674_v48  ;;  %v9673_v44 = vcombine.high %v1798_v59, %v1802_v12  ;;  %v15300_v5 = vld [vmem:[#allocation35_spill] sm:$0xff]  ;;  %v1655_v23 = vld [vmem:[#allocation9 + $0x190] sm:$0xff]  ;;  %v15302_v32 = vld [vmem:[#allocation37_spill] sm:$0xff] }
 0x284   : > { %3436 = vmatpush2.bf16.msra.mxu1 %v9560_v30  ;;  %3285 = vmatprep.mubr.bf16.mxu1 %v12682_v10  ;;  %v9544_v6 = vcombine.low %v1670_v55, %v1674_v48  ;;  %v9672_v57 = vcombine.low %v1798_v59, %v1802_v12  ;;  %v9539_v31 = vcombine.high %v1663_v13, %v1667_v11  ;;  %v1659_v24 = vld [vmem:[#allocation9 + $0x1b0] sm:$0xff] }
 0x285   : > { %3549 = vmatpush2.bf16.msra.mxu0 %v9688_v9  ;;  %3437 = vmatprep.subr.bf16.mxu1 %v9553_v1  ;;  %v9667_v51 = vcombine.high %v1791_v26, %v1795_v27  ;;  %v9538_v37 = vcombine.low %v1663_v13, %v1667_v11  ;;  %v9666_v3 = vcombine.low %v1791_v26, %v1795_v27  ;;  %v1647_v29 = vld [vmem:[#allocation9 + $0x150] sm:$0xff] }
 0x286   : > { %3398 = vmatprep.mubr.bf16.mxu0 %v12684_v49  ;;  %3286 = vmatmul.mubr.bf16.gmra.mxu1 %v12686_v7  ;;  %v9531_v61 = vcombine.high %v1655_v23, %v1659_v24  ;;  %v1651_v30 = vld [vmem:[#allocation9 + $0x170] sm:$0xff]  ;;  %v9659_v62 = vcombine.high %v1783_v54, %v1787_v41  ;;  %v9530_v39 = vcombine.low %v1655_v23, %v1659_v24 }
 0x287   : > { %3399 = vmatmul.mubr.bf16.gmra.mxu0 %v12688_v21  ;;  %3550 = vmatprep.subr.bf16.mxu0 %v9681_v0  ;;  %v15301_v9 = vld [vmem:[#allocation36_spill] sm:$0xff]  ;;  %v9523_v22 = vcombine.high %v1647_v29, %v1651_v30  ;;  %v9658_v4 = vcombine.low %v1783_v54, %v1787_v41  ;;  %v9522_v56 = vcombine.low %v1647_v29, %v1651_v30 }
 0x288   : > { %3438 = vmatpush2.bf16.msra.mxu1 %v9552_v17  ;;  %3441 = vmatprep.mubr.bf16.mxu1 %v12285_v60  ;;  %v1775_v1 = vld [vmem:[#allocation9 + $0x550] sm:$0xff] }
 0x289   : > { %3551 = vmatpush2.bf16.msra.mxu0 %v9680_v38  ;;  %3554 = vmatprep.mubr.bf16.mxu0 %v15300_v5  ;;  %v1779_v63 = vld [vmem:[#allocation9 + $0x570] sm:$0xff] }
 0x28a   : > { %3439 = vmatprep.subr.bf16.mxu1 %v9545_v28  ;;  %3552 = vmatprep.subr.bf16.mxu0 %v9673_v44  ;;  %v9651_v45 = vcombine.high %v1775_v1, %v1779_v63  ;;  %v1639_v14 = vld [vmem:[#allocation9 + $0x110] sm:$0xff]  ;;  %v9650_v48 = vcombine.low %v1775_v1, %v1779_v63 }
 0x28b   : > { %v1643_v18 = vld [vmem:[#allocation9 + $0x130] sm:$0xff] }
 0x28c   : > { %3440 = vmatpush2.bf16.msra.mxu1 %v9544_v6  ;;  %v1767_v40 = vld [vmem:[#allocation9 + $0x510] sm:$0xff]  ;;  %v9515_v17 = vcombine.high %v1639_v14, %v1643_v18  ;;  %v9514_v38 = vcombine.low %v1639_v14, %v1643_v18 }
 0x28d   : > { %3553 = vmatpush2.bf16.msra.mxu0 %v9672_v57  ;;  %3635 = vmatprep.subr.bf16.mxu1 %v9539_v31  ;;  %v1771_v55 = vld [vmem:[#allocation9 + $0x530] sm:$0xff] }
 0x28e   : > { %3748 = vmatprep.subr.bf16.mxu0 %v9667_v51  ;;  %v1631_v0 = vld [vmem:[#allocation9 + $0xd0] sm:$0xff]  ;;  %v9643_v12 = vcombine.high %v1767_v40, %v1771_v55  ;;  %v9642_v44 = vcombine.low %v1767_v40, %v1771_v55 }
 0x28f   : > { %3442 = vmatmul.mubr.bf16.vlgmr.msra.gmra.mxu1 %v15301_v9  ;;  %v1635_v59 = vld [vmem:[#allocation9 + $0xf0] sm:$0xff] }
 0x290   : > { %3555 = vmatmul.mubr.bf16.vlgmr.msra.gmra.mxu0 %v15302_v32  ;;  %3636 = vmatpush1.bf16.msra.mxu1 %v9538_v37  ;;  %v1759_v28 = vld [vmem:[#allocation9 + $0x4d0] sm:$0xff]  ;;  %v9507_v11 = vcombine.high %v1631_v0, %v1635_v59  ;;  %v9506_v57 = vcombine.low %v1631_v0, %v1635_v59 }
 0x291   : > { %3451 = vmatprep.mubr.bf16.mxu1 %v12335_v52  ;;  %3564 = vmatprep.mubr.bf16.mxu0 %v12337_v53  ;;  %v1763_v13 = vld [vmem:[#allocation9 + $0x4f0] sm:$0xff] }
 0x292   : > { %3749 = vmatpush1.bf16.msra.mxu0 %v9666_v3  ;;  %3637 = vmatprep.subr.bf16.mxu1 %v9531_v61  ;;  %v9635_v26 = vcombine.high %v1759_v28, %v1763_v13  ;;  %v1623_v27 = vld [vmem:[#allocation9 + $0x90] sm:$0xff]  ;;  %v9634_v23 = vcombine.low %v1759_v28, %v1763_v13 }
 0x293   : > { %3750 = vmatprep.subr.bf16.mxu0 %v9659_v62  ;;  %v1627_v6 = vld [vmem:[#allocation9 + $0xb0] sm:$0xff] }
 0x294   : > { %3638 = vmatpush1.bf16.msra.mxu1 %v9530_v39  ;;  %v1751_v31 = vld [vmem:[#allocation9 + $0x490] sm:$0xff]  ;;  %v9499_v24 = vcombine.high %v1623_v27, %v1627_v6  ;;  %v9498_v3 = vcombine.low %v1623_v27, %v1627_v6 }
 0x295   : > { %3639 = vmatprep.subr.bf16.mxu1 %v9523_v22  ;;  %v1755_v51 = vld [vmem:[#allocation9 + $0x4b0] sm:$0xff] }
 0x296   : > { %3751 = vmatpush1.bf16.msra.mxu0 %v9658_v4  ;;  %v1615_v37 = vld [vmem:[#allocation9 + $0x50] sm:$0xff]  ;;  %v9627_v41 = vcombine.high %v1751_v31, %v1755_v51  ;;  %v9626_v62 = vcombine.low %v1751_v31, %v1755_v51 }
 0x297   : > { %3452 = vmatmul.mubr.bf16.gmra.mxu1 %v12333_v58  ;;  %3752 = vmatprep.subr.bf16.mxu0 %v9651_v45  ;;  %v1619_v54 = vld [vmem:[#allocation9 + $0x70] sm:$0xff] }
 0x298   : > { %3565 = vmatmul.mubr.bf16.gmra.mxu0 %v12343_v34  ;;  %3640 = vmatpush1.bf16.msra.mxu1 %v9522_v56  ;;  %v1743_v61 = vld [vmem:[#allocation9 + $0x450] sm:$0xff]  ;;  %v9491_v30 = vcombine.high %v1615_v37, %v1619_v54  ;;  %v9490_v22 = vcombine.low %v1615_v37, %v1619_v54  ;;  %v15306_v37 = vld [vmem:[#allocation25_spill] sm:$0xff] }
 0x299   : > { %3461 = vmatprep.mubr.bf16.mxu1 %v12395_v36  ;;  %3574 = vmatprep.mubr.bf16.mxu0 %v12397_v2  ;;  %v1747_v29 = vld [vmem:[#allocation9 + $0x470] sm:$0xff] }
 0x29a   : > { %3753 = vmatpush1.bf16.msra.mxu0 %v9650_v48  ;;  %3641 = vmatprep.subr.bf16.mxu1 %v9515_v17  ;;  %v9619_v39 = vcombine.high %v1743_v61, %v1747_v29  ;;  %v1607_v1 = vld [vmem:[#allocation9 + $0x10] sm:$0xff]  ;;  %v9618_v14 = vcombine.low %v1743_v61, %v1747_v29  ;;  %v15303_v48 = vld [vmem:[#allocation38_spill] sm:$0xff] }
 0x29b   : > { %3754 = vmatprep.subr.bf16.mxu0 %v9643_v12  ;;  %v1611_v63 = vld [vmem:[#allocation9 + $0x30] sm:$0xff]  ;;  %v15304_v12 = vld [vmem:[#allocation26_spill] sm:$0xff] }
 0x29c   : > { %3642 = vmatpush1.bf16.msra.mxu1 %v9514_v38  ;;  %v1735_v4 = vld [vmem:[#allocation9 + $0x410] sm:$0xff]  ;;  %v9483_v18 = vcombine.high %v1607_v1, %v1611_v63  ;;  %v9482_v17 = vcombine.low %v1607_v1, %v1611_v63  ;;  %v15305_v38 = vld [vmem:[#allocation27_spill] sm:$0xff] }
 0x29d   : > { %3643 = vmatprep.subr.bf16.mxu1 %v9507_v11  ;;  %v1739_v45 = vld [vmem:[#allocation9 + $0x430] sm:$0xff] }
 0x29e   : > { %3755 = vmatpush1.bf16.msra.mxu0 %v9642_v44  ;;  %v1727_v56 = vld [vmem:[#allocation9 + $0x3d0] sm:$0xff]  ;;  %v9611_v55 = vcombine.high %v1735_v4, %v1739_v45  ;;  %v9610_v13 = vcombine.low %v1735_v4, %v1739_v45 }
 0x29f   : > { %3462 = vmatmul.mubr.bf16.gmra.mxu1 %v12393_v47  ;;  %3756 = vmatprep.subr.bf16.mxu0 %v9635_v26  ;;  %v1731_v40 = vld [vmem:[#allocation9 + $0x3f0] sm:$0xff] }
 0x2a0   : > { %3575 = vmatmul.mubr.bf16.gmra.mxu0 %v12408_v46  ;;  %3644 = vmatpush1.bf16.msra.mxu1 %v9506_v57  ;;  %v1855_v0 = vld [vmem:[#allocation9 + $0x7d0] sm:$0xff]  ;;  %v9603_v28 = vcombine.high %v1727_v56, %v1731_v40  ;;  %v9602_v27 = vcombine.low %v1727_v56, %v1731_v40 }
 0x2a1   : > { %3471 = vmatprep.mubr.bf16.mxu1 %v12457_v19  ;;  %3584 = vmatprep.mubr.bf16.mxu0 %v12459_v20  ;;  %v1859_v59 = vld [vmem:[#allocation9 + $0x7f0] sm:$0xff] }
 0x2a2   : > { %3757 = vmatpush1.bf16.msra.mxu0 %v9634_v23  ;;  %3645 = vmatprep.subr.bf16.mxu1 %v9499_v24  ;;  %v9731_v11 = vcombine.high %v1855_v0, %v1859_v59  ;;  %v1719_v44 = vld [vmem:[#allocation9 + $0x390] sm:$0xff]  ;;  %v9730_v31 = vcombine.low %v1855_v0, %v1859_v59 }
 0x2a3   : > { %3758 = vmatprep.subr.bf16.mxu0 %v9627_v41  ;;  %v1723_v26 = vld [vmem:[#allocation9 + $0x3b0] sm:$0xff] }
 0x2a4   : > { %3646 = vmatpush1.bf16.msra.mxu1 %v9498_v3  ;;  %v1847_v6 = vld [vmem:[#allocation9 + $0x790] sm:$0xff]  ;;  %v9595_v51 = vcombine.high %v1719_v44, %v1723_v26  ;;  %v9594_v3 = vcombine.low %v1719_v44, %v1723_v26 }
 0x2a5   : > { %3647 = vmatprep.subr.bf16.mxu1 %v9491_v30  ;;  %v1851_v57 = vld [vmem:[#allocation9 + $0x7b0] sm:$0xff] }
 0x2a6   : > { %3759 = vmatpush1.bf16.msra.mxu0 %v9626_v62  ;;  %v1711_v23 = vld [vmem:[#allocation9 + $0x350] sm:$0xff]  ;;  %v9723_v54 = vcombine.high %v1847_v6, %v1851_v57  ;;  %v9722_v62 = vcombine.low %v1847_v6, %v1851_v57 }
 0x2a7   : > { %3472 = vmatmul.mubr.bf16.gmra.mxu1 %v12455_v25  ;;  %3760 = vmatprep.subr.bf16.mxu0 %v9619_v39  ;;  %v1715_v24 = vld [vmem:[#allocation9 + $0x370] sm:$0xff] }
 0x2a8   : > { %3585 = vmatmul.mubr.bf16.gmra.mxu0 %v15303_v48  ;;  %3648 = vmatpush1.bf16.msra.mxu1 %v9490_v22  ;;  %v15307_v41 = vld [vmem:[#allocation28_spill] sm:$0xff]  ;;  %v9587_v30 = vcombine.high %v1711_v23, %v1715_v24  ;;  %v9586_v22 = vcombine.low %v1711_v23, %v1715_v24 }
 0x2a9   : > { %3481 = vmatprep.mubr.bf16.mxu1 %v15304_v12  ;;  %3594 = vmatprep.mubr.bf16.mxu0 %v15305_v38  ;;  %v1839_v61 = vld [vmem:[#allocation9 + $0x750] sm:$0xff] }
 0x2aa   : > { %3761 = vmatpush1.bf16.msra.mxu0 %v9618_v14  ;;  %3649 = vmatprep.subr.bf16.mxu1 %v9483_v18  ;;  %v1843_v29 = vld [vmem:[#allocation9 + $0x770] sm:$0xff] }
 0x2ab   : > { %3762 = vmatprep.subr.bf16.mxu0 %v9611_v55  ;;  %v9715_v39 = vcombine.high %v1839_v61, %v1843_v29  ;;  %v1703_v1 = vld [vmem:[#allocation9 + $0x310] sm:$0xff]  ;;  %v9714_v14 = vcombine.low %v1839_v61, %v1843_v29 }
 0x2ac   : > { %3650 = vmatpush1.bf16.msra.mxu1 %v9482_v17  ;;  %v1707_v63 = vld [vmem:[#allocation9 + $0x330] sm:$0xff] }
 0x2ad   : > { %3651 = vmatprep.subr.bf16.mxu1 %v9603_v28  ;;  %v1831_v4 = vld [vmem:[#allocation9 + $0x710] sm:$0xff]  ;;  %v9579_v18 = vcombine.high %v1703_v1, %v1707_v63  ;;  %v9578_v17 = vcombine.low %v1703_v1, %v1707_v63 }
 0x2ae   : > { %3763 = vmatpush1.bf16.msra.mxu0 %v9610_v13  ;;  %v1835_v45 = vld [vmem:[#allocation9 + $0x730] sm:$0xff] }
 0x2af   : > { %3482 = vmatmul.mubr.bf16.gmra.mxu1 %v15306_v37  ;;  %3764 = vmatprep.subr.bf16.mxu0 %v9731_v11  ;;  %v1695_v56 = vld [vmem:[#allocation9 + $0x2d0] sm:$0xff]  ;;  %v9707_v55 = vcombine.high %v1831_v4, %v1835_v45  ;;  %v9706_v13 = vcombine.low %v1831_v4, %v1835_v45 }
 0x2b0   : > { %3595 = vmatmul.mubr.bf16.gmra.mxu0 %v15307_v41  ;;  %3652 = vmatpush2.bf16.msra.mxu1 %v9602_v27  ;;  %v1699_v40 = vld [vmem:[#allocation9 + $0x2f0] sm:$0xff] }
 0x2b1   : > { %3491 = vmatprep.mubr.bf16.mxu1 %v12583_v35  ;;  %3604 = vmatprep.mubr.bf16.mxu0 %v12585_v42  ;;  %v1823_v0 = vld [vmem:[#allocation9 + $0x6d0] sm:$0xff]  ;;  %v9571_v28 = vcombine.high %v1695_v56, %v1699_v40  ;;  %v9570_v27 = vcombine.low %v1695_v56, %v1699_v40  ;;  %v1664_v56 = vld [vmem:[#allocation9 + $0x1d8] sm:$0xff] }
 0x2b2   : > { %3765 = vmatpush2.bf16.msra.mxu0 %v9730_v31  ;;  %3653 = vmatprep.subr.bf16.mxu1 %v9595_v51  ;;  %v1827_v59 = vld [vmem:[#allocation9 + $0x6f0] sm:$0xff]  ;;  %v1668_v40 = vld [vmem:[#allocation9 + $0x1f8] sm:$0xff] }
 0x2b3   : > { %3766 = vmatprep.subr.bf16.mxu0 %v9723_v54  ;;  %v9699_v11 = vcombine.high %v1823_v0, %v1827_v59  ;;  %v1687_v44 = vld [vmem:[#allocation9 + $0x290] sm:$0xff]  ;;  %v9698_v31 = vcombine.low %v1823_v0, %v1827_v59  ;;  %v1792_v0 = vld [vmem:[#allocation9 + $0x5d8] sm:$0xff] }
 0x2b4   : > { %3654 = vmatpush2.bf16.msra.mxu1 %v9594_v3  ;;  %v1691_v26 = vld [vmem:[#allocation9 + $0x2b0] sm:$0xff]  ;;  %v1796_v59 = vld [vmem:[#allocation9 + $0x5f8] sm:$0xff] }
 0x2b5   : > { %3655 = vmatprep.subr.bf16.mxu1 %v9587_v30  ;;  %v1815_v6 = vld [vmem:[#allocation9 + $0x690] sm:$0xff]  ;;  %v9563_v51 = vcombine.high %v1687_v44, %v1691_v26  ;;  %v9562_v3 = vcombine.low %v1687_v44, %v1691_v26  ;;  %v1660_v44 = vld [vmem:[#allocation9 + $0x1b8] sm:$0xff]  ;;  %v9669_v26 = vcombine.high %v1792_v0, %v1796_v59 }
 0x2b6   : > { %3767 = vmatpush2.bf16.msra.mxu0 %v9722_v62  ;;  %v1819_v57 = vld [vmem:[#allocation9 + $0x6b0] sm:$0xff] }
 0x2b7   : > { %3492 = vmatmul.mubr.bf16.gmra.mxu1 %v12581_v8  ;;  %3768 = vmatprep.subr.bf16.mxu0 %v9715_v39  ;;  %v1679_v23 = vld [vmem:[#allocation9 + $0x250] sm:$0xff]  ;;  %v9691_v54 = vcombine.high %v1815_v6, %v1819_v57  ;;  %v9690_v62 = vcombine.low %v1815_v6, %v1819_v57  ;;  %v1784_v6 = vld [vmem:[#allocation9 + $0x598] sm:$0xff] }
 0x2b8   : > { %3605 = vmatmul.mubr.bf16.gmra.mxu0 %v12591_v16  ;;  %3656 = vmatpush2.bf16.msra.mxu1 %v9586_v22  ;;  %v1683_v24 = vld [vmem:[#allocation9 + $0x270] sm:$0xff]  ;;  %v1788_v57 = vld [vmem:[#allocation9 + $0x5b8] sm:$0xff] }
 0x2b9   : > { %3501 = vmatprep.mubr.bf16.mxu1 %v12645_v33  ;;  %3614 = vmatprep.mubr.bf16.mxu0 %v12647_v15  ;;  %v1807_v61 = vld [vmem:[#allocation9 + $0x650] sm:$0xff]  ;;  %v9555_v30 = vcombine.high %v1679_v23, %v1683_v24  ;;  %v9554_v22 = vcombine.low %v1679_v23, %v1683_v24  ;;  %v1648_v23 = vld [vmem:[#allocation9 + $0x158] sm:$0xff] }
 0x2ba   : > { %3769 = vmatpush2.bf16.msra.mxu0 %v9714_v14  ;;  %3657 = vmatprep.subr.bf16.mxu1 %v9579_v18  ;;  %v1811_v29 = vld [vmem:[#allocation9 + $0x670] sm:$0xff]  ;;  %v1652_v24 = vld [vmem:[#allocation9 + $0x178] sm:$0xff] }
 0x2bb   : > { %3770 = vmatprep.subr.bf16.mxu0 %v9707_v55  ;;  %v9683_v39 = vcombine.high %v1807_v61, %v1811_v29  ;;  %v1671_v1 = vld [vmem:[#allocation9 + $0x210] sm:$0xff]  ;;  %v9682_v14 = vcombine.low %v1807_v61, %v1811_v29  ;;  %v1776_v61 = vld [vmem:[#allocation9 + $0x558] sm:$0xff] }
 0x2bc   : > { %3658 = vmatpush2.bf16.msra.mxu1 %v9578_v17  ;;  %v1675_v63 = vld [vmem:[#allocation9 + $0x230] sm:$0xff]  ;;  %v1780_v29 = vld [vmem:[#allocation9 + $0x578] sm:$0xff] }
 0x2bd   : > { %3659 = vmatprep.subr.bf16.mxu1 %v9571_v28  ;;  %v1799_v4 = vld [vmem:[#allocation9 + $0x610] sm:$0xff]  ;;  %v9547_v18 = vcombine.high %v1671_v1, %v1675_v63  ;;  %v9546_v17 = vcombine.low %v1671_v1, %v1675_v63  ;;  %v9541_v28 = vcombine.high %v1664_v56, %v1668_v40  ;;  %v1644_v1 = vld [vmem:[#allocation9 + $0x138] sm:$0xff]  ;;  %v9653_v63 = vcombine.high %v1776_v61, %v1780_v29 }
 0x2be   : > { %3771 = vmatpush2.bf16.msra.mxu0 %v9706_v13  ;;  %v1803_v45 = vld [vmem:[#allocation9 + $0x630] sm:$0xff] }
 0x2bf   : > { %3502 = vmatmul.mubr.bf16.gmra.mxu1 %v12643_v43  ;;  %3772 = vmatprep.subr.bf16.mxu0 %v9699_v11  ;;  %v9675_v55 = vcombine.high %v1799_v4, %v1803_v45  ;;  %v9674_v13 = vcombine.low %v1799_v4, %v1803_v45  ;;  %v1656_v11 = vld [vmem:[#allocation9 + $0x198] sm:$0xff] }
 0x2c0   : > { %3615 = vmatmul.mubr.bf16.gmra.mxu0 %v12654_v50  ;;  %3660 = vmatpush2.bf16.msra.mxu1 %v9570_v27  ;;  %v9540_v27 = vcombine.low %v1664_v56, %v1668_v40  ;;  %v1768_v4 = vld [vmem:[#allocation9 + $0x518] sm:$0xff] }
 0x2c1   : > { %3511 = vmatprep.mubr.bf16.mxu1 %v12682_v10  ;;  %3624 = vmatprep.mubr.bf16.mxu0 %v12684_v49  ;;  %v1772_v45 = vld [vmem:[#allocation9 + $0x538] sm:$0xff] }
 0x2c2   : > { %3773 = vmatpush2.bf16.msra.mxu0 %v9698_v31  ;;  %3661 = vmatprep.subr.bf16.mxu1 %v9563_v51  ;;  %v9533_v31 = vcombine.high %v1656_v11, %v1660_v44  ;;  %v9668_v51 = vcombine.low %v1792_v0, %v1796_v59  ;;  %v1632_v56 = vld [vmem:[#allocation9 + $0xd8] sm:$0xff] }
 0x2c3   : > { %3774 = vmatprep.subr.bf16.mxu0 %v9691_v54  ;;  %v9661_v54 = vcombine.high %v1784_v6, %v1788_v57  ;;  %v1636_v40 = vld [vmem:[#allocation9 + $0xf8] sm:$0xff] }
 0x2c4   : > { %3662 = vmatpush2.bf16.msra.mxu1 %v9562_v3  ;;  %v9532_v3 = vcombine.low %v1656_v11, %v1660_v44  ;;  %v1760_v0 = vld [vmem:[#allocation9 + $0x4d8] sm:$0xff] }
 0x2c5   : > { %3663 = vmatprep.subr.bf16.mxu1 %v9555_v30  ;;  %v9525_v30 = vcombine.high %v1648_v23, %v1652_v24  ;;  %v1764_v59 = vld [vmem:[#allocation9 + $0x4f8] sm:$0xff] }
 0x2c6   : > { %3775 = vmatpush2.bf16.msra.mxu0 %v9690_v62  ;;  %v9660_v62 = vcombine.low %v1784_v6, %v1788_v57  ;;  %v1624_v11 = vld [vmem:[#allocation9 + $0x98] sm:$0xff] }
 0x2c7   : > { %3512 = vmatmul.mubr.bf16.gmra.mxu1 %v12686_v7  ;;  %3776 = vmatprep.subr.bf16.mxu0 %v9683_v39  ;;  %v1640_v39 = vld [vmem:[#allocation9 + $0x118] sm:$0xff] }
 0x2c8   : > { %3625 = vmatmul.mubr.bf16.gmra.mxu0 %v12688_v21  ;;  %3664 = vmatpush2.bf16.msra.mxu1 %v9554_v22  ;;  %v9524_v22 = vcombine.low %v1648_v23, %v1652_v24  ;;  %v1628_v44 = vld [vmem:[#allocation9 + $0xb8] sm:$0xff] }
 0x2c9   : > { %3667 = vmatprep.mubr.bf16.mxu1 %v12285_v60  ;;  %3780 = vmatprep.mubr.bf16.mxu0 %v15300_v5  ;;  %v1752_v6 = vld [vmem:[#allocation9 + $0x498] sm:$0xff] }
 0x2ca   : > { %3777 = vmatpush2.bf16.msra.mxu0 %v9682_v14  ;;  %3665 = vmatprep.subr.bf16.mxu1 %v9547_v18  ;;  %v9517_v14 = vcombine.high %v1640_v39, %v1644_v1  ;;  %v9652_v18 = vcombine.low %v1776_v61, %v1780_v29  ;;  %v1756_v57 = vld [vmem:[#allocation9 + $0x4b8] sm:$0xff] }
 0x2cb   : > { %3778 = vmatprep.subr.bf16.mxu0 %v9675_v55  ;;  %v9645_v55 = vcombine.high %v1768_v4, %v1772_v45  ;;  %v1616_v23 = vld [vmem:[#allocation9 + $0x58] sm:$0xff] }
 0x2cc   : > { %3666 = vmatpush2.bf16.msra.mxu1 %v9546_v17  ;;  %v9516_v17 = vcombine.low %v1640_v39, %v1644_v1  ;;  %v1620_v24 = vld [vmem:[#allocation9 + $0x78] sm:$0xff] }
 0x2cd   : > { %3861 = vmatprep.subr.bf16.mxu1 %v9541_v28  ;;  %v9509_v28 = vcombine.high %v1632_v56, %v1636_v40  ;;  %v1744_v61 = vld [vmem:[#allocation9 + $0x458] sm:$0xff] }
 0x2ce   : > { %3779 = vmatpush2.bf16.msra.mxu0 %v9674_v13  ;;  %v9644_v13 = vcombine.low %v1768_v4, %v1772_v45  ;;  %v1748_v29 = vld [vmem:[#allocation9 + $0x478] sm:$0xff] }
 0x2cf   : > { %3668 = vmatmul.mubr.bf16.vlgmr.msra.gmra.mxu1 %v15301_v9  ;;  %3974 = vmatprep.subr.bf16.mxu0 %v9669_v26  ;;  %v9637_v26 = vcombine.high %v1760_v0, %v1764_v59  ;;  %v1608_v39 = vld [vmem:[#allocation9 + $0x18] sm:$0xff] }
 0x2d0   : > { %3862 = vmatpush1.bf16.msra.mxu1 %v9540_v27  ;;  %3677 = vmatprep.mubr.bf16.mxu1 %v12335_v52  ;;  %v9508_v27 = vcombine.low %v1632_v56, %v1636_v40  ;;  %v1612_v1 = vld [vmem:[#allocation9 + $0x38] sm:$0xff] }
 0x2d1   : > { %3781 = vmatmul.mubr.bf16.vlgmr.msra.gmra.mxu0 %v15302_v32  ;;  %3863 = vmatprep.subr.bf16.mxu1 %v9533_v31  ;;  %v9501_v31 = vcombine.high %v1624_v11, %v1628_v44  ;;  %v1736_v4 = vld [vmem:[#allocation9 + $0x418] sm:$0xff] }
 0x2d2   : > { %3790 = vmatprep.mubr.bf16.mxu0 %v12337_v53  ;;  %3975 = vmatpush1.bf16.msra.mxu0 %v9668_v51  ;;  %v9636_v51 = vcombine.low %v1760_v0, %v1764_v59  ;;  %v1740_v45 = vld [vmem:[#allocation9 + $0x438] sm:$0xff] }
 0x2d3   : > { %3976 = vmatprep.subr.bf16.mxu0 %v9661_v54  ;;  %v9629_v54 = vcombine.high %v1752_v6, %v1756_v57  ;;  %v1728_v56 = vld [vmem:[#allocation9 + $0x3d8] sm:$0xff] }
 0x2d4   : > { %3864 = vmatpush1.bf16.msra.mxu1 %v9532_v3  ;;  %v9500_v3 = vcombine.low %v1624_v11, %v1628_v44  ;;  %v1732_v40 = vld [vmem:[#allocation9 + $0x3f8] sm:$0xff] }
 0x2d5   : > { %3865 = vmatprep.subr.bf16.mxu1 %v9525_v30  ;;  %v9493_v30 = vcombine.high %v1616_v23, %v1620_v24  ;;  %v1856_v0 = vld [vmem:[#allocation9 + $0x7d8] sm:$0xff] }
 0x2d6   : > { %3977 = vmatpush1.bf16.msra.mxu0 %v9660_v62  ;;  %v9628_v62 = vcombine.low %v1752_v6, %v1756_v57  ;;  %v1860_v59 = vld [vmem:[#allocation9 + $0x7f8] sm:$0xff] }
 0x2d7   : > { %3678 = vmatmul.mubr.bf16.gmra.mxu1 %v12333_v58  ;;  %3978 = vmatprep.subr.bf16.mxu0 %v9653_v63  ;;  %v9621_v63 = vcombine.high %v1744_v61, %v1748_v29  ;;  %v1720_v11 = vld [vmem:[#allocation9 + $0x398] sm:$0xff] }
 0x2d8   : > { %3866 = vmatpush1.bf16.msra.mxu1 %v9524_v22  ;;  %3687 = vmatprep.mubr.bf16.mxu1 %v12395_v36  ;;  %v9492_v22 = vcombine.low %v1616_v23, %v1620_v24  ;;  %v1724_v44 = vld [vmem:[#allocation9 + $0x3b8] sm:$0xff] }
 0x2d9   : > { %3791 = vmatmul.mubr.bf16.gmra.mxu0 %v12343_v34  ;;  %3867 = vmatprep.subr.bf16.mxu1 %v9517_v14  ;;  %v9485_v14 = vcombine.high %v1608_v39, %v1612_v1  ;;  %v1848_v6 = vld [vmem:[#allocation9 + $0x798] sm:$0xff] }
 0x2da   : > { %3800 = vmatprep.mubr.bf16.mxu0 %v12397_v2  ;;  %3979 = vmatpush1.bf16.msra.mxu0 %v9652_v18  ;;  %v9620_v18 = vcombine.low %v1744_v61, %v1748_v29  ;;  %v1852_v57 = vld [vmem:[#allocation9 + $0x7b8] sm:$0xff] }
 0x2db   : > { %3980 = vmatprep.subr.bf16.mxu0 %v9645_v55  ;;  %v9613_v55 = vcombine.high %v1736_v4, %v1740_v45  ;;  %v1712_v23 = vld [vmem:[#allocation9 + $0x358] sm:$0xff] }
 0x2dc   : > { %3868 = vmatpush1.bf16.msra.mxu1 %v9516_v17  ;;  %v9484_v17 = vcombine.low %v1608_v39, %v1612_v1  ;;  %v1716_v24 = vld [vmem:[#allocation9 + $0x378] sm:$0xff] }
 0x2dd   : > { %3869 = vmatprep.subr.bf16.mxu1 %v9509_v28  ;;  %v9605_v28 = vcombine.high %v1728_v56, %v1732_v40  ;;  %v1840_v61 = vld [vmem:[#allocation9 + $0x758] sm:$0xff] }
 0x2de   : > { %3981 = vmatpush1.bf16.msra.mxu0 %v9644_v13  ;;  %v9612_v13 = vcombine.low %v1736_v4, %v1740_v45  ;;  %v1844_v29 = vld [vmem:[#allocation9 + $0x778] sm:$0xff] }
 0x2df   : > { %3688 = vmatmul.mubr.bf16.gmra.mxu1 %v12393_v47  ;;  %3982 = vmatprep.subr.bf16.mxu0 %v9637_v26  ;;  %v9733_v26 = vcombine.high %v1856_v0, %v1860_v59  ;;  %v1704_v39 = vld [vmem:[#allocation9 + $0x318] sm:$0xff] }
 0x2e0   : > { %3870 = vmatpush1.bf16.msra.mxu1 %v9508_v27  ;;  %3697 = vmatprep.mubr.bf16.mxu1 %v12457_v19  ;;  %v9604_v27 = vcombine.low %v1728_v56, %v1732_v40  ;;  %v1708_v1 = vld [vmem:[#allocation9 + $0x338] sm:$0xff] }
 0x2e1   : > { %3801 = vmatmul.mubr.bf16.gmra.mxu0 %v12408_v46  ;;  %3871 = vmatprep.subr.bf16.mxu1 %v9501_v31  ;;  %v9597_v31 = vcombine.high %v1720_v11, %v1724_v44  ;;  %v1832_v4 = vld [vmem:[#allocation9 + $0x718] sm:$0xff] }
 0x2e2   : > { %3810 = vmatprep.mubr.bf16.mxu0 %v12459_v20  ;;  %3983 = vmatpush1.bf16.msra.mxu0 %v9636_v51  ;;  %v9732_v51 = vcombine.low %v1856_v0, %v1860_v59  ;;  %v1836_v45 = vld [vmem:[#allocation9 + $0x738] sm:$0xff] }
 0x2e3   : > { %3984 = vmatprep.subr.bf16.mxu0 %v9629_v54  ;;  %v9725_v54 = vcombine.high %v1848_v6, %v1852_v57  ;;  %v1696_v56 = vld [vmem:[#allocation9 + $0x2d8] sm:$0xff] }
 0x2e4   : > { %3872 = vmatpush1.bf16.msra.mxu1 %v9500_v3  ;;  %v9596_v3 = vcombine.low %v1720_v11, %v1724_v44  ;;  %v1700_v40 = vld [vmem:[#allocation9 + $0x2f8] sm:$0xff] }
 0x2e5   : > { %3873 = vmatprep.subr.bf16.mxu1 %v9493_v30  ;;  %v9589_v30 = vcombine.high %v1712_v23, %v1716_v24  ;;  %v1824_v0 = vld [vmem:[#allocation9 + $0x6d8] sm:$0xff] }
 0x2e6   : > { %3985 = vmatpush1.bf16.msra.mxu0 %v9628_v62  ;;  %v9724_v62 = vcombine.low %v1848_v6, %v1852_v57  ;;  %v1828_v59 = vld [vmem:[#allocation9 + $0x6f8] sm:$0xff] }
 0x2e7   : > { %3698 = vmatmul.mubr.bf16.gmra.mxu1 %v12455_v25  ;;  %3986 = vmatprep.subr.bf16.mxu0 %v9621_v63  ;;  %v9717_v63 = vcombine.high %v1840_v61, %v1844_v29  ;;  %v1688_v11 = vld [vmem:[#allocation9 + $0x298] sm:$0xff] }
 0x2e8   : > { %3874 = vmatpush1.bf16.msra.mxu1 %v9492_v22  ;;  %3707 = vmatprep.mubr.bf16.mxu1 %v15304_v12  ;;  %v9588_v22 = vcombine.low %v1712_v23, %v1716_v24  ;;  %v1692_v44 = vld [vmem:[#allocation9 + $0x2b8] sm:$0xff] }
 0x2e9   : > { %3811 = vmatmul.mubr.bf16.gmra.mxu0 %v15303_v48  ;;  %3875 = vmatprep.subr.bf16.mxu1 %v9485_v14  ;;  %v9581_v14 = vcombine.high %v1704_v39, %v1708_v1  ;;  %v1816_v6 = vld [vmem:[#allocation9 + $0x698] sm:$0xff] }
 0x2ea   : > { %3820 = vmatprep.mubr.bf16.mxu0 %v15305_v38  ;;  %3987 = vmatpush1.bf16.msra.mxu0 %v9620_v18  ;;  %v9716_v18 = vcombine.low %v1840_v61, %v1844_v29  ;;  %v1820_v57 = vld [vmem:[#allocation9 + $0x6b8] sm:$0xff] }
 0x2eb   : > { %3988 = vmatprep.subr.bf16.mxu0 %v9613_v55  ;;  %v9709_v55 = vcombine.high %v1832_v4, %v1836_v45  ;;  %v1680_v23 = vld [vmem:[#allocation9 + $0x258] sm:$0xff] }
 0x2ec   : > { %3876 = vmatpush1.bf16.msra.mxu1 %v9484_v17  ;;  %v9580_v17 = vcombine.low %v1704_v39, %v1708_v1  ;;  %v1684_v24 = vld [vmem:[#allocation9 + $0x278] sm:$0xff] }
 0x2ed   : > { %3877 = vmatprep.subr.bf16.mxu1 %v9605_v28  ;;  %v9573_v28 = vcombine.high %v1696_v56, %v1700_v40  ;;  %v1808_v61 = vld [vmem:[#allocation9 + $0x658] sm:$0xff] }
 0x2ee   : > { %3989 = vmatpush1.bf16.msra.mxu0 %v9612_v13  ;;  %v9708_v13 = vcombine.low %v1832_v4, %v1836_v45  ;;  %v1812_v29 = vld [vmem:[#allocation9 + $0x678] sm:$0xff] }
 0x2ef   : > { %3708 = vmatmul.mubr.bf16.gmra.mxu1 %v15306_v37  ;;  %3990 = vmatprep.subr.bf16.mxu0 %v9733_v26  ;;  %v9701_v26 = vcombine.high %v1824_v0, %v1828_v59  ;;  %v1672_v39 = vld [vmem:[#allocation9 + $0x218] sm:$0xff] }
 0x2f0   : > { %3878 = vmatpush2.bf16.msra.mxu1 %v9604_v27  ;;  %3717 = vmatprep.mubr.bf16.mxu1 %v12583_v35  ;;  %v9572_v27 = vcombine.low %v1696_v56, %v1700_v40  ;;  %v1676_v1 = vld [vmem:[#allocation9 + $0x238] sm:$0xff] }
 0x2f1   : > { %3821 = vmatmul.mubr.bf16.gmra.mxu0 %v15307_v41  ;;  %3879 = vmatprep.subr.bf16.mxu1 %v9597_v31  ;;  %v9565_v31 = vcombine.high %v1688_v11, %v1692_v44  ;;  %v1800_v4 = vld [vmem:[#allocation9 + $0x618] sm:$0xff]  ;;  %v9548_v40 = vcombine.low %v1672_v39, %v1676_v1 }
 0x2f2   : > { %3830 = vmatprep.mubr.bf16.mxu0 %v12585_v42  ;;  %3991 = vmatpush2.bf16.msra.mxu0 %v9732_v51  ;;  %v9700_v51 = vcombine.low %v1824_v0, %v1828_v59  ;;  %v1804_v45 = vld [vmem:[#allocation9 + $0x638] sm:$0xff]  ;;  %v10700_v0 = vld [vmem:[#allocation12 + $0x50c] ss:$28 sps:$4 sm:$0xff]  }
 0x2f3   : > { %3992 = vmatprep.subr.bf16.mxu0 %v9725_v54  ;;  %v9693_v54 = vcombine.high %v1816_v6, %v1820_v57  ;;  %v9677_v56 = vcombine.high %v1800_v4, %v1804_v45  ;;  %v10683_v59 = vld [vmem:[#allocation12 + $0x188] ss:$28 sps:$4 sm:$0xff]  }
 0x2f4   : > { %3880 = vmatpush2.bf16.msra.mxu1 %v9596_v3  ;;  %v9564_v3 = vcombine.low %v1688_v11, %v1692_v44  ;;  %v10706_v44 = vld [vmem:[#allocation12 + $0x4d4] ss:$28 sps:$4 sm:$0xff]  }
 0x2f5   : > { %3881 = vmatprep.subr.bf16.mxu1 %v9589_v30  ;;  %v9557_v30 = vcombine.high %v1680_v23, %v1684_v24 }
 0x2f6   : > { %3993 = vmatpush2.bf16.msra.mxu0 %v9724_v62  ;;  %v9692_v62 = vcombine.low %v1816_v6, %v1820_v57  ;;  %v10691_v6 = vld [vmem:[#allocation12 + $0x11c] ss:$28 sps:$4 sm:$0xff]   ;;  %v10704_v57 = vld [vmem:[#allocation12 + $0x4d0] ss:$28 sps:$4 sm:$0xff]  }
 0x2f7   : > { %3718 = vmatmul.mubr.bf16.gmra.mxu1 %v12581_v8  ;;  %3994 = vmatprep.subr.bf16.mxu0 %v9717_v63  ;;  %v9685_v63 = vcombine.high %v1808_v61, %v1812_v29 }
 0x2f8   : > { %3882 = vmatpush2.bf16.msra.mxu1 %v9588_v22  ;;  %3727 = vmatprep.mubr.bf16.mxu1 %v12645_v33  ;;  %v9556_v22 = vcombine.low %v1680_v23, %v1684_v24  ;;  %v10694_v24 = vld [vmem:[#allocation12 + $0xe4] ss:$28 sps:$4 sm:$0xff]  }
 0x2f9   : > { %3831 = vmatmul.mubr.bf16.gmra.mxu0 %v12591_v16  ;;  %3883 = vmatprep.subr.bf16.mxu1 %v9581_v14  ;;  %v9549_v14 = vcombine.high %v1672_v39, %v1676_v1  ;;  %v10697_v39 = vld [vmem:[#allocation12 + $0xac] ss:$28 sps:$4 sm:$0xff]   ;;  %v10716_v1 = vld [vmem:[#allocation12 + $0x460] ss:$28 sps:$4 sm:$0xff]  }
 0x2fa   : > { %3840 = vmatprep.mubr.bf16.mxu0 %v12647_v15  ;;  %3995 = vmatpush2.bf16.msra.mxu0 %v9716_v18  ;;  %v9684_v18 = vcombine.low %v1808_v61, %v1812_v29  ;;  %v10718_v61 = vld [vmem:[#allocation12 + $0x464] ss:$28 sps:$4 sm:$0xff]  }
 0x2fb   : > { %3996 = vmatprep.subr.bf16.mxu0 %v9709_v55  ;;  %v10685_v55 = vld [vmem:[#allocation12 + $0x18c] ss:$28 sps:$4 sm:$0xff]   ;;  %v10692_v29 = vld [vmem:[#allocation12 + $0xe0] ss:$28 sps:$4 sm:$0xff]  }
 0x2fc   : > { %3884 = vmatpush2.bf16.msra.mxu1 %v9580_v17  ;;  %v9676_v17 = vcombine.low %v1800_v4, %v1804_v45  ;;  %v10703_v45 = vld [vmem:[#allocation12 + $0x74] ss:$28 sps:$4 sm:$0xff]  }
 0x2fd   : > { %3885 = vmatprep.subr.bf16.mxu1 %v9573_v28  ;;  %v10688_v28 = vld [vmem:[#allocation12 + $0x154] ss:$28 sps:$4 sm:$0xff]  }
 0x2fe   : > { %3997 = vmatpush2.bf16.msra.mxu0 %v9708_v13  ;;  %v10698_v13 = vld [vmem:[#allocation12 + $0x508] ss:$28 sps:$4 sm:$0xff]  }
 0x2ff   : > { %3728 = vmatmul.mubr.bf16.gmra.mxu1 %v12643_v43  ;;  %3998 = vmatprep.subr.bf16.mxu0 %v9701_v26 }
 0x300   : > { %3886 = vmatpush2.bf16.msra.mxu1 %v9572_v27  ;;  %3737 = vmatprep.mubr.bf16.mxu1 %v12682_v10 }
 0x301   : > { %3841 = vmatmul.mubr.bf16.gmra.mxu0 %v12654_v50  ;;  %3887 = vmatprep.subr.bf16.mxu1 %v9565_v31 }
 0x302   : > { %3850 = vmatprep.mubr.bf16.mxu0 %v12684_v49  ;;  %3999 = vmatpush2.bf16.msra.mxu0 %v9700_v51  ;;  %v10689_v51 = vld [vmem:[#allocation12 + $0x118] ss:$28 sps:$4 sm:$0xff]  }
 0x303   : > { %4000 = vmatprep.subr.bf16.mxu0 %v9693_v54  ;;  %v10710_v54 = vld [vmem:[#allocation12 + $0x498] ss:$28 sps:$4 sm:$0xff]  }
 0x304   : > { %3888 = vmatpush2.bf16.msra.mxu1 %v9564_v3 }
 0x305   : > { %3889 = vmatprep.subr.bf16.mxu1 %v9557_v30 }
 0x306   : > { %4001 = vmatpush2.bf16.msra.mxu0 %v9692_v62 }
 0x307   : > { %3738 = vmatmul.mubr.bf16.gmra.mxu1 %v12686_v7  ;;  %4002 = vmatprep.subr.bf16.mxu0 %v9685_v63  ;;  %v12760_v11 = vpop.f32.mrf.mxu1 }
 0x308   : > { %3890 = vmatpush2.bf16.msra.mxu1 %v9556_v22  ;;  %3893 = vmatprep.mubr.bf16.mxu1 %v12285_v60  ;;  %v12762_v60 = vpop.f32.mrf.mxu0  ;;  %v10695_v22 = vld [vmem:[#allocation12 + $0xa8] ss:$28 sps:$4 sm:$0xff]  }
 0x309   : > { %3851 = vmatmul.mubr.bf16.gmra.mxu0 %v12688_v21  ;;  %3891 = vmatprep.subr.bf16.mxu1 %v9549_v14  ;;  %v12767_v26 = vpop.f32.mrf.mxu1  ;;  %v10722_v14 = vld [vmem:[#allocation12 + $0x428] ss:$28 sps:$4 sm:$0xff]  }
 0x30a   : > { %4003 = vmatpush2.bf16.msra.mxu0 %v9684_v18  ;;  %4006 = vmatprep.mubr.bf16.mxu0 %v15300_v5  ;;  %v10686_v5 = vld [vmem:[#allocation12 + $0x150] ss:$28 sps:$4 sm:$0xff]   ;;  %v12769_v27 = vpop.f32.mrf.mxu0 }
 0x30b   : > { %4004 = vmatprep.subr.bf16.mxu0 %v9677_v56  ;;  %v12772_v31 = vpop.f32.mrf.mxu1  ;;  %v10730_v56 = vld [vmem:[#allocation12 + $0x3f4] ss:$28 sps:$4 sm:$0xff]  }
 0x30c   : > { %3892 = vmatpush2.bf16.msra.mxu1 %v9548_v40  ;;  %v10701_v40 = vld [vmem:[#allocation12 + $0x70] ss:$28 sps:$4 sm:$0xff]  }
 0x30d   : > { %7260 = vmatprep.subr.bf16.mxu1 %v10685_v55  ;;  %v12776_v23 = vpop.f32.mrf.mxu1 }
 0x30e   : > { %4005 = vmatpush2.bf16.msra.mxu0 %v9676_v17 }
 0x30f   : > { %3894 = vmatmul.mubr.bf16.vlgmr.msra.gmra.mxu1 %v15301_v9  ;;  %7373 = vmatprep.subr.bf16.mxu0 %v10700_v0  ;;  %v12774_v9 = vpop.f32.mrf.mxu0  ;;  %v10709_v0 = vld [vmem:[#allocation12 + $0x3c] ss:$28 sps:$4 sm:$0xff]  }
 0x310   : > { %3903 = vmatprep.mubr.bf16.mxu1 %v12335_v52  ;;  %7261 = vmatpush1.bf16.msra.mxu1 %v10683_v59  ;;  %v10712_v52 = vld [vmem:[#allocation12 + $0x49c] ss:$28 sps:$4 sm:$0xff]   ;;  %v12780_v3 = vpop.f32.mrf.mxu1  ;;  %v10728_v59 = vld [vmem:[#allocation12 + $0x3f0] ss:$28 sps:$4 sm:$0xff]  }
 0x311   : > { %4007 = vmatmul.mubr.bf16.vlgmr.msra.gmra.mxu0 %v15302_v32  ;;  %7262 = vmatprep.subr.bf16.mxu1 %v10688_v28  ;;  %v12778_v32 = vpop.f32.mrf.mxu0 }
 0x312   : > { %4016 = vmatprep.mubr.bf16.mxu0 %v12337_v53  ;;  %7374 = vmatpush1.bf16.msra.mxu0 %v10698_v13  ;;  %v12787_v30 = vpop.f32.mrf.mxu1  ;;  %v10707_v13 = vld [vmem:[#allocation12 + $0x38] ss:$28 sps:$4 sm:$0xff]  }
 0x313   : > { %7375 = vmatprep.subr.bf16.mxu0 %v10706_v44  ;;  %v12782_v53 = vpop.f32.mrf.mxu0 }
 0x314   : > { %7263 = vmatpush1.bf16.msra.mxu1 %v10686_v5  ;;  %v12792_v63 = vpop.f32.mrf.mxu1  ;;  %v10715_v5 = vld [vmem:[#allocation12 + $0x4] ss:$28 sps:$4 sm:$0xff]  }
 0x315   : > { %7264 = vmatprep.subr.bf16.mxu1 %v10691_v6  ;;  %v12789_v62 = vpop.f32.mrf.mxu0  ;;  %v10734_v6 = vld [vmem:[#allocation12 + $0x3b8] ss:$28 sps:$4 sm:$0xff]  }
 0x316   : > { %7376 = vmatpush1.bf16.msra.mxu0 %v10704_v57  ;;  %v12796_v4 = vpop.f32.mrf.mxu1 }
 0x317   : > { %3904 = vmatmul.mubr.bf16.gmra.mxu1 %v12333_v58  ;;  %7377 = vmatprep.subr.bf16.mxu0 %v10712_v52  ;;  %v12794_v58 = vpop.f32.mrf.mxu0  ;;  %v10742_v52 = vld [vmem:[#allocation12 + $0x384] ss:$28 sps:$4 sm:$0xff]  }
 0x318   : > { %3913 = vmatprep.mubr.bf16.mxu1 %v12395_v36  ;;  %7265 = vmatpush1.bf16.msra.mxu1 %v10689_v51  ;;  %v10724_v36 = vld [vmem:[#allocation12 + $0x42c] ss:$28 sps:$4 sm:$0xff]   ;;  %v10713_v51 = vld [vmem:[#allocation12] ss:$28 sps:$4 sm:$0xff]  }
 0x319   : > { %4017 = vmatmul.mubr.bf16.gmra.mxu0 %v12343_v34  ;;  %7266 = vmatprep.subr.bf16.mxu1 %v10694_v24  ;;  %v12798_v34 = vpop.f32.mrf.mxu0  ;;  %v12800_v18 = vpop.f32.mrf.mxu1 }
 0x31a   : > { %4026 = vmatprep.mubr.bf16.mxu0 %v12397_v2  ;;  %7378 = vmatpush1.bf16.msra.mxu0 %v10710_v54 }
 0x31b   : > { %7379 = vmatprep.subr.bf16.mxu0 %v10718_v61  ;;  %v12802_v2 = vpop.f32.mrf.mxu0  ;;  %v12807_v55 = vpop.f32.mrf.mxu1  ;;  %v10721_v61 = vld [vmem:[#allocation12 + $0x34c] ss:$28 sps:$4 sm:$0xff]  }
 0x31c   : > { %7267 = vmatpush1.bf16.msra.mxu1 %v10692_v29  ;;  %v10740_v29 = vld [vmem:[#allocation12 + $0x380] ss:$28 sps:$4 sm:$0xff]  }
 0x31d   : > { %7268 = vmatprep.subr.bf16.mxu1 %v10697_v39  ;;  %v12809_v17 = vpop.f32.mrf.mxu0  ;;  %v12812_v28 = vpop.f32.mrf.mxu1 }
 0x31e   : > { %7380 = vmatpush1.bf16.msra.mxu0 %v10716_v1  ;;  %v10719_v1 = vld [vmem:[#allocation12 + $0x348] ss:$28 sps:$4 sm:$0xff]  }
 0x31f   : > { %3914 = vmatmul.mubr.bf16.gmra.mxu1 %v12393_v47  ;;  %7381 = vmatprep.subr.bf16.mxu0 %v10724_v36  ;;  %v12814_v47 = vpop.f32.mrf.mxu0  ;;  %v12816_v44 = vpop.f32.mrf.mxu1 }
 0x320   : > { %3923 = vmatprep.mubr.bf16.mxu1 %v12457_v19  ;;  %7269 = vmatpush1.bf16.msra.mxu1 %v10695_v22  ;;  %v10736_v19 = vld [vmem:[#allocation12 + $0x3bc] ss:$28 sps:$4 sm:$0xff]   ;;  %v10727_v22 = vld [vmem:[#allocation12 + $0x314] ss:$28 sps:$4 sm:$0xff]  }
 0x321   : > { %4027 = vmatmul.mubr.bf16.gmra.mxu0 %v12408_v46  ;;  %7270 = vmatprep.subr.bf16.mxu1 %v10703_v45  ;;  %v12818_v46 = vpop.f32.mrf.mxu0  ;;  %v10746_v45 = vld [vmem:[#allocation12 + $0x6c8] ss:$28 sps:$4 sm:$0xff]  }
 0x322   : > { %4036 = vmatprep.mubr.bf16.mxu0 %v12459_v20  ;;  %7382 = vmatpush1.bf16.msra.mxu0 %v10722_v14  ;;  %v12820_v57 = vpop.f32.mrf.mxu1 }
 0x323   : > { %7383 = vmatprep.subr.bf16.mxu0 %v10730_v56  ;;  %v12822_v20 = vpop.f32.mrf.mxu0  ;;  %v10754_v56 = vld [vmem:[#allocation12 + $0x694] ss:$28 sps:$4 sm:$0xff]  }
 0x324   : > { %7271 = vmatpush1.bf16.msra.mxu1 %v10701_v40  ;;  %v12827_v24 = vpop.f32.mrf.mxu1  ;;  %v10725_v40 = vld [vmem:[#allocation12 + $0x310] ss:$28 sps:$4 sm:$0xff]  }
 0x325   : > { %7272 = vmatprep.subr.bf16.mxu1 %v10709_v0  ;;  %v12829_v54 = vpop.f32.mrf.mxu0 }
 0x326   : > { %7384 = vmatpush1.bf16.msra.mxu0 %v10728_v59  ;;  %v12832_v39 = vpop.f32.mrf.mxu1 }
 0x327   : > { %3924 = vmatmul.mubr.bf16.gmra.mxu1 %v12455_v25  ;;  %7385 = vmatprep.subr.bf16.mxu0 %v10736_v19  ;;  %v12834_v25 = vpop.f32.mrf.mxu0  ;;  %v10733_v19 = vld [vmem:[#allocation12 + $0x2dc] ss:$28 sps:$4 sm:$0xff]  }
 0x328   : > { %3933 = vmatprep.mubr.bf16.mxu1 %v15304_v12  ;;  %7273 = vmatpush1.bf16.msra.mxu1 %v10707_v13  ;;  %v10748_v12 = vld [vmem:[#allocation12 + $0x6cc] ss:$28 sps:$4 sm:$0xff]   ;;  %v12836_v36 = vpop.f32.mrf.mxu1 }
 0x329   : > { %4037 = vmatmul.mubr.bf16.gmra.mxu0 %v15303_v48  ;;  %7274 = vmatprep.subr.bf16.mxu1 %v10715_v5  ;;  %v12838_v48 = vpop.f32.mrf.mxu0  ;;  %v10752_v13 = vld [vmem:[#allocation12 + $0x690] ss:$28 sps:$4 sm:$0xff]   ;;  %v12852_v5 = vld [vmem:[#allocation10] sm:$0xff] }
 0x32a   : > { %4046 = vmatprep.mubr.bf16.mxu0 %v15305_v38  ;;  %7386 = vmatpush1.bf16.msra.mxu0 %v10734_v6 }
 0x32b   : > { %7387 = vmatprep.subr.bf16.mxu0 %v10742_v52  ;;  %v15308_v52 = vld [vmem:[#allocation22_spill] sm:$0xff] }
 0x32c   : > { %7275 = vmatpush1.bf16.msra.mxu1 %v10713_v51  ;;  %v12840_v14 = vpop.f32.mrf.mxu1  ;;  %v12842_v38 = vpop.f32.mrf.mxu0  ;;  %v10731_v51 = vld [vmem:[#allocation12 + $0x2d8] ss:$28 sps:$4 sm:$0xff]  }
 0x32d   : > { %7276 = vmatprep.subr.bf16.mxu1 %v10721_v61 }
 0x32e   : > { %7388 = vmatpush1.bf16.msra.mxu0 %v10740_v29  ;;  %v12847_v0 = vpop.f32.mrf.mxu1  ;;  %v12849_v59 = vpop.f32.mrf.mxu0 }
 0x32f   : > { %3934 = vmatmul.mubr.bf16.gmra.mxu1 %v15306_v37  ;;  %7389 = vmatprep.subr.bf16.mxu0 %v10748_v12 }
 0x330   : > { %3943 = vmatprep.mubr.bf16.mxu1 %v12583_v35  ;;  %7277 = vmatpush2.bf16.msra.mxu1 %v10719_v1  ;;  %v12854_v37 = vpop.f32.mrf.mxu1  ;;  %v12856_v6 = vpop.f32.mrf.mxu0  ;;  %v10760_v35 = vld [vmem:[#allocation12 + $0x65c] ss:$28 sps:$4 sm:$0xff]  }
 0x331   : > { %4047 = vmatmul.mubr.bf16.gmra.mxu0 %v15307_v41  ;;  %7278 = vmatprep.subr.bf16.mxu1 %v10727_v22  ;;  %v12860_v41 = vrot.slane %v12852_v5, %v15308_v52  ;;  %v10758_v1 = vld [vmem:[#allocation12 + $0x658] ss:$28 sps:$4 sm:$0xff]   ;;  %v10745_v52 = vld [vmem:[#allocation12 + $0x26c] ss:$28 sps:$4 sm:$0xff]  }
 0x332   : > { %4056 = vmatprep.mubr.bf16.mxu0 %v12585_v42  ;;  %7390 = vmatpush2.bf16.msra.mxu0 %v10746_v45  ;;  %v12862_v61 = vpop.f32.mrf.mxu1  ;;  %v12864_v29 = vpop.f32.mrf.mxu0  ;;  %v10739_v42 = vld [vmem:[#allocation12 + $0x2a4] ss:$28 sps:$4 sm:$0xff]  }
 0x333   : > { %7391 = vmatprep.subr.bf16.mxu0 %v10754_v56  ;;  %v3224_v12 = vadd.f32 %v12776_v23, %v12860_v41  ;;  %v10766_v56 = vld [vmem:[#allocation12 + $0x624] ss:$28 sps:$4 sm:$0xff]  }
 0x334   : > { %7279 = vmatpush2.bf16.msra.mxu1 %v10725_v40  ;;  %v12868_v22 = vpop.f32.mrf.mxu1  ;;  %v3220_v40 = vadd.f32 %v12767_v26, %v12860_v41 }
 0x335   : > { %7280 = vmatprep.subr.bf16.mxu1 %v10733_v19  ;;  %v12870_v45 = vpop.f32.mrf.mxu0  ;;  %v10737_v19 = vld [vmem:[#allocation12 + $0x2a0] ss:$28 sps:$4 sm:$0xff]  }
 0x336   : > { %7392 = vmatpush2.bf16.msra.mxu0 %v10752_v13  ;;  %15309 = vst [vmem:[#allocation29_spill] sm:$0xff] %v12870_v45  ;;  %v12877_v23 = vpop.f32.mrf.mxu1  ;;  %v15312_v45 = vld [vmem:[#allocation21_spill] sm:$0xff] }
 0x337   : > { %3944 = vmatmul.mubr.bf16.gmra.mxu1 %v12581_v8  ;;  %7393 = vmatprep.subr.bf16.mxu0 %v10760_v35  ;;  %15310 = vst [vmem:[#allocation30_spill] sm:$0xff] %v12877_v23  ;;  %v12879_v13 = vpop.f32.mrf.mxu0  ;;  %v12883_v8 = vrot.slane %v12852_v5, %v15312_v45  ;;  %v3337_v35 = vadd.f32 %v12778_v32, %v3224_v12  ;;  %v10743_v45 = vld [vmem:[#allocation12 + $0x268] ss:$28 sps:$4 sm:$0xff]  }
 0x338   : > { %3953 = vmatprep.mubr.bf16.mxu1 %v12645_v33  ;;  %7281 = vmatpush2.bf16.msra.mxu1 %v10731_v51  ;;  %15311 = vst [vmem:[#allocation31_spill] sm:$0xff] %v12879_v13  ;;  %v10764_v33 = vld [vmem:[#allocation12 + $0x620] ss:$28 sps:$4 sm:$0xff]   ;;  %v12887_v26 = vpop.f32.mrf.mxu1  ;;  %v3333_v13 = vadd.f32 %v12769_v27, %v3220_v40  ;;  %v10767_v27 = vld [vmem:[#allocation12 + $0x5e8] ss:$28 sps:$4 sm:$0xff]  }
 0x339   : > { %4057 = vmatmul.mubr.bf16.gmra.mxu0 %v12591_v16  ;;  %7282 = vmatprep.subr.bf16.mxu1 %v10739_v42  ;;  %v12889_v51 = vpop.f32.mrf.mxu0  ;;  %v10769_v16 = vld [vmem:[#allocation12 + $0x5ec] ss:$28 sps:$4 sm:$0xff]   ;;  %v3222_v42 = vadd.f32 %v12772_v31, %v12883_v8  ;;  %v3218_v12 = vadd.f32 %v12760_v11, %v12883_v8  ;;  %v3230_v11 = vadd.f32 %v12787_v30, %v12860_v41 }
 0x33a   : > { %4066 = vmatprep.mubr.bf16.mxu0 %v12647_v15  ;;  %7394 = vmatpush2.bf16.msra.mxu0 %v10758_v1  ;;  %15313 = vst [vmem:[#allocation32_spill] sm:$0xff] %v12889_v51  ;;  %v12894_v23 = vpop.f32.mrf.mxu1  ;;  %v10751_v15 = vld [vmem:[#allocation12 + $0x234] ss:$28 sps:$4 sm:$0xff]   ;;  %v4096_v1 = vmul.f32 0.2, %v3337_v35 }
 0x33b   : > { %7395 = vmatprep.subr.bf16.mxu0 %v10766_v56  ;;  %v12896_v32 = vpop.f32.mrf.mxu0  ;;  %v3234_v56 = vadd.f32 %v12796_v4, %v12860_v41  ;;  %v4088_v51 = vmul.f32 0.2, %v3333_v13  ;;  %v10749_v4 = vld [vmem:[#allocation12 + $0x230] ss:$28 sps:$4 sm:$0xff]  }
 0x33c   : > { %7283 = vmatpush2.bf16.msra.mxu1 %v10737_v19  ;;  %v10772_v19 = vld [vmem:[#allocation12 + $0x5b4] ss:$28 sps:$4 sm:$0xff]  }
 0x33d   : > { %7284 = vmatprep.subr.bf16.mxu1 %v10745_v52  ;;  %v12908_v52 = vadd.f32 %v12774_v9, %v3222_v42  ;;  %v12921_v9 = vadd.f32 %v12762_v60, %v3218_v12  ;;  %v4224_v42 = vmax.f32 %v3337_v35, %v4096_v1  ;;  %v12924_v30 = vadd.f32 %v12798_v34, %v3234_v56  ;;  %v10755_v34 = vld [vmem:[#allocation12 + $0x1f8] ss:$28 sps:$4 sm:$0xff]   ;;  %v10763_v1 = vld [vmem:[#allocation12 + $0x1c4] ss:$28 sps:$4 sm:$0xff]  }
 0x33e   : > { %7396 = vmatpush2.bf16.msra.mxu0 %v10764_v33  ;;  %v12902_v40 = vpop.f32.mrf.mxu1  ;;  %v12904_v31 = vpop.f32.mrf.mxu0  ;;  %v3232_v33 = vadd.f32 %v12792_v63, %v12883_v8  ;;  %v12935_v35 = vadd.f32 %v12789_v62, %v3230_v11  ;;  %v3244_v62 = vadd.f32 %v12816_v44, %v12860_v41 }
 0x33f   : > { %15314 = vst [vmem:[#allocation33_spill] sm:$0xff] %v12904_v31  ;;  %3954 = vmatmul.mubr.bf16.gmra.mxu1 %v12643_v43  ;;  %7397 = vmatprep.subr.bf16.mxu0 %v10769_v16  ;;  %v10757_v16 = vld [vmem:[#allocation12 + $0x1fc] ss:$28 sps:$4 sm:$0xff]   ;;  %v4095_v60 = vmul.f32 0.2, %v12908_v52 }
 0x340   : > { %3963 = vmatprep.mubr.bf16.mxu1 %v12682_v10  ;;  %7285 = vmatpush2.bf16.msra.mxu1 %v10743_v45  ;;  %v12916_v31 = vpop.f32.mrf.mxu1  ;;  %v12918_v43 = vpop.f32.mrf.mxu0  ;;  %v10770_v10 = vld [vmem:[#allocation12 + $0x5b0] ss:$28 sps:$4 sm:$0xff]   ;;  %v4087_v56 = vmul.f32 0.2, %v12921_v9  ;;  %v4104_v44 = vmul.f32 0.2, %v12935_v35 }
 0x341   : > { %4067 = vmatmul.mubr.bf16.gmra.mxu0 %v12654_v50  ;;  %15315 = vst [vmem:[#allocation34_spill] sm:$0xff] %v12918_v43  ;;  %7286 = vmatprep.subr.bf16.mxu1 %v10751_v15  ;;  %v3228_v50 = vadd.f32 %v12780_v3, %v12883_v8  ;;  %v10775_v15 = vld [vmem:[#allocation12 + $0x57c] ss:$28 sps:$4 sm:$0xff]   ;;  %v4216_v43 = vmax.f32 %v3333_v13, %v4088_v51  ;;  %v4112_v13 = vmul.f32 0.2, %v12924_v30 }
 0x342   : > { %4076 = vmatprep.mubr.bf16.mxu0 %v12684_v49  ;;  %7398 = vmatpush2.bf16.msra.mxu0 %v10767_v27  ;;  %v12929_v63 = vpop.f32.mrf.mxu1  ;;  %v12931_v45 = vpop.f32.mrf.mxu0  ;;  %v12938_v49 = vadd.f32 %v12794_v58, %v3232_v33  ;;  %v10773_v51 = vld [vmem:[#allocation12 + $0x578] ss:$28 sps:$4 sm:$0xff]   ;;  %v10778_v33 = vld [vmem:[#allocation12 + $0x544] ss:$28 sps:$4 sm:$0xff]  }
 0x343   : > { %7399 = vmatprep.subr.bf16.mxu0 %v10772_v19  ;;  %v12945_v27 = vpack.c.bf16 %v4224_v42, %v4216_v43  ;;  %v12951_v58 = vadd.f32 %v12782_v53, %v3228_v50  ;;  %v3238_v19 = vadd.f32 %v12800_v18, %v12883_v8  ;;  %v4223_v43 = vmax.f32 %v12908_v52, %v4095_v60  ;;  %v10761_v18 = vld [vmem:[#allocation12 + $0x1c0] ss:$28 sps:$4 sm:$0xff]   ;;  %v10781_v50 = vld [vmem:[#allocation12 + $0x88c] ss:$28 sps:$4 sm:$0xff]  }
 0x344   : > { %7287 = vmatpush2.bf16.msra.mxu1 %v10749_v4  ;;  %v12940_v12 = vpop.f32.mrf.mxu1  ;;  %v12942_v3 = vpop.f32.mrf.mxu0  ;;  %v3242_v53 = vadd.f32 %v12812_v28, %v12883_v8  ;;  %v4111_v42 = vmul.f32 0.2, %v12938_v49  ;;  %v3252_v52 = vadd.f32 %v12832_v39, %v12883_v8  ;;  %v4240_v60 = vmax.f32 %v12924_v30, %v4112_v13  ;;  %v10776_v39 = vld [vmem:[#allocation12 + $0x540] ss:$28 sps:$4 sm:$0xff]  }
 0x345   : > { %7288 = vmatprep.subr.bf16.mxu1 %v10757_v16  ;;  %15316 = vst [vmem:[#allocation35_spill] sm:$0xff] %v12945_v27  ;;  %v3240_v16 = vadd.f32 %v12807_v55, %v12860_v41  ;;  %v4232_v13 = vmax.f32 %v12935_v35, %v4104_v44 }
 0x346   : > { %7400 = vmatpush2.bf16.msra.mxu0 %v10770_v10  ;;  %v12955_v11 = vpop.f32.mrf.mxu1  ;;  %v3254_v10 = vadd.f32 %v12836_v36, %v12860_v41  ;;  %v12986_v36 = vadd.f32 %v12802_v2, %v3238_v19 }
 0x347   : > { %v12957_v4 = vpop.f32.mrf.mxu0  ;;  %3964 = vmatmul.mubr.bf16.gmra.mxu1 %v12686_v7  ;;  %7401 = vmatprep.subr.bf16.mxu0 %v10775_v15  ;;  %v3248_v7 = vadd.f32 %v12820_v57, %v12883_v8  ;;  %v4215_v15 = vmax.f32 %v12921_v9, %v4087_v56  ;;  %v12982_v57 = vadd.f32 %v12818_v46, %v3244_v62  ;;  %v15317_v9 = vld [vmem:[#allocation23_spill] sm:$0xff]  ;;  %v10829_v46 = vld [vmem:[#allocation12 + $0xc0c] ss:$28 sps:$4 sm:$0xff]  }
 0x348   : > { %7289 = vmatpush2.bf16.msra.mxu1 %v10755_v34  ;;  %7292 = vmatprep.mubr.bf16.mxu1 %v12945_v27  ;;  %v12975_v55 = vpop.f32.mrf.mxu1  ;;  %v4103_v34 = vmul.f32 0.2, %v12951_v58  ;;  %v12996_v30 = vrot.slane %v12852_v5, %v15317_v9  ;;  %v3353_v2 = vadd.f32 %v12809_v17, %v3240_v16  ;;  %v13003_v62 = vadd.f32 %v12814_v47, %v3242_v53  ;;  %v10784_v17 = vld [vmem:[#allocation12 + $0x854] ss:$28 sps:$4 sm:$0xff]  }
 0x349   : > { %4077 = vmatmul.mubr.bf16.gmra.mxu0 %v12688_v21  ;;  %v12977_v28 = vpop.f32.mrf.mxu0  ;;  %7290 = vmatprep.subr.bf16.mxu1 %v10763_v1  ;;  %v3250_v21 = vadd.f32 %v12827_v24, %v12860_v41  ;;  %v12998_v56 = vpack.c.bf16 %v4223_v43, %v4215_v15  ;;  %v10779_v24 = vld [vmem:[#allocation12 + $0x888] ss:$28 sps:$4 sm:$0xff]   ;;  %v13007_v19 = vadd.f32 %v12822_v20, %v3248_v7  ;;  %v4128_v44 = vmul.f32 0.2, %v12982_v57 }
 0x34a   : > { %7402 = vmatpush2.bf16.msra.mxu0 %v10773_v51  ;;  %v12990_v27 = vpop.f32.mrf.mxu1  ;;  %v4239_v51 = vmax.f32 %v12938_v49, %v4111_v42  ;;  %v13010_v9 = vadd.f32 %v12834_v25, %v3252_v52  ;;  %v13019_v47 = vpack.c.bf16 %v4240_v60, %v4232_v13  ;;  %v3258_v20 = vadd.f32 %v12840_v14, %v12883_v8  ;;  %v15320_v49 = vld [vmem:[#allocation24_spill] sm:$0xff] }
 0x34b   : > { %v12992_v1 = vpop.f32.mrf.mxu0  ;;  %7403 = vmatprep.subr.bf16.mxu0 %v10778_v33  ;;  %15318 = vst [vmem:[#allocation36_spill] sm:$0xff] %v12998_v56  ;;  %v13013_v33 = vadd.f32 %v12838_v48, %v3254_v10  ;;  %v13026_v25 = vrot.slane %v12852_v5, %v15320_v49  ;;  %v4231_v48 = vmax.f32 %v12951_v58, %v4103_v34  ;;  %v4119_v16 = vmul.f32 0.2, %v12986_v36  ;;  %v10782_v42 = vld [vmem:[#allocation12 + $0x850] ss:$28 sps:$4 sm:$0xff]  }
 0x34c   : > { %7291 = vmatpush2.bf16.msra.mxu1 %v10761_v18  ;;  %v13015_v43 = vpop.f32.mrf.mxu1  ;;  %15319 = vst [vmem:[#allocation37_spill] sm:$0xff] %v13019_v47  ;;  %v3363_v53 = vadd.f32 %v12829_v54, %v3250_v21  ;;  %v4120_v7 = vmul.f32 0.2, %v3353_v2  ;;  %v4127_v52 = vmul.f32 0.2, %v13003_v62  ;;  %v4256_v60 = vmax.f32 %v12982_v57, %v4128_v44 }
 0x34d   : > { %v13017_v35 = vpop.f32.mrf.mxu0  ;;  %7486 = vmatprep.subr.bf16.mxu1 %v10781_v50  ;;  %v10787_v5 = vld [vmem:[#allocation12 + $0x81c] ss:$28 sps:$4 sm:$0xff]   ;;  %v13034_v10 = vpack.c.bf16 %v4239_v51, %v4231_v48  ;;  %v4135_v58 = vmul.f32 0.2, %v13007_v19  ;;  %v4143_v50 = vmul.f32 0.2, %v13010_v9  ;;  %v4247_v13 = vmax.f32 %v12986_v36, %v4119_v16 }
 0x34e   : > { %7404 = vmatpush2.bf16.msra.mxu0 %v10776_v39  ;;  %v4144_v54 = vmul.f32 0.2, %v13013_v33  ;;  %v13041_v39 = vadd.f32 %v12842_v38, %v3258_v20  ;;  %v3260_v51 = vadd.f32 %v12847_v0, %v12860_v41  ;;  %v3264_v48 = vadd.f32 %v12862_v61, %v12860_v41 }
 0x34f   : > { %v3443_v18 = vpop.f32.mrf.mxu1  ;;  %7293 = vmatmul.mubr.bf16.vlgmr.msra.gmra.mxu1 %v12998_v56  ;;  %7599 = vmatprep.subr.bf16.mxu0 %v10829_v46  ;;  %15321 = vst [vmem:[#allocation38_spill] sm:$0xff] %v13034_v10  ;;  %v4248_v49 = vmax.f32 %v3353_v2, %v4120_v7  ;;  %v4255_v57 = vmax.f32 %v13003_v62, %v4127_v52  ;;  %v10790_v2 = vld [vmem:[#allocation12 + $0x7e4] ss:$28 sps:$4 sm:$0xff]  }
 0x350   : > { %v3556_v14 = vpop.f32.mrf.mxu0  ;;  %7302 = vmatprep.mubr.bf16.mxu1 %v13019_v47  ;;  %7487 = vmatpush1.bf16.msra.mxu1 %v10779_v24  ;;  %v3444_v34 = vadd.f32 %v3443_v18, %v12996_v30  ;;  %v4136_v24 = vmul.f32 0.2, %v3363_v53  ;;  %v3262_v38 = vadd.f32 %v12854_v37, %v12883_v8  ;;  %v10785_v18 = vld [vmem:[#allocation12 + $0x818] ss:$28 sps:$4 sm:$0xff]   ;;  %v4263_v36 = vmax.f32 %v13007_v19, %v4135_v58 }
 0x351   : > { %v3445_v15 = vpop.f32.mrf.mxu1  ;;  %7488 = vmatprep.subr.bf16.mxu1 %v10784_v17  ;;  %v4271_v16 = vmax.f32 %v13010_v9, %v4143_v50  ;;  %v4272_v0 = vmax.f32 %v13013_v33, %v4144_v54  ;;  %v13057_v7 = vpack.c.bf16 %v4256_v60, %v4248_v49  ;;  %v13060_v62 = vmul.f32 0.2, %v13041_v39 }
 0x352   : > { %v3446_v21 = vadd.f32 %v3445_v15, %v13026_v25  ;;  %v3558_v46 = vpop.f32.mrf.mxu0  ;;  %v3557_v37 = vadd.f32 %v3556_v14, %v3444_v34  ;;  %v13063_v47 = vadd.f32 %v12849_v59, %v3260_v51  ;;  %v13066_v9 = vadd.f32 %v12864_v29, %v3264_v48  ;;  %v10788_v59 = vld [vmem:[#allocation12 + $0x7e0] ss:$28 sps:$4 sm:$0xff]   ;;  %v10793_v34 = vld [vmem:[#allocation12 + $0x7ac] ss:$28 sps:$4 sm:$0xff]  }
 0x353   : > { %v3447_v17 = vpop.f32.mrf.mxu1  ;;  %15322 = vst [vmem:[#allocation26_spill] sm:$0xff] %v13057_v7  ;;  %v13070_v49 = vpack.c.bf16 %v4255_v57, %v4247_v13  ;;  %v3268_v57 = vadd.f32 %v12868_v22, %v12883_v8 }
 0x354   : > { %v3448_v44 = vadd.f32 %v3447_v17, %v12996_v30  ;;  %v3560_v20 = vpop.f32.mrf.mxu0  ;;  %7489 = vmatpush1.bf16.msra.mxu1 %v10782_v42  ;;  %v3559_v15 = vadd.f32 %v3558_v46, %v3446_v21  ;;  %v4264_v42 = vmax.f32 %v3363_v53, %v4136_v24  ;;  %v13076_v53 = vpack.c.bf16 %v4271_v16, %v4263_v36 }
 0x355   : > { %v3449_v61 = vpop.f32.mrf.mxu1  ;;  %7490 = vmatprep.subr.bf16.mxu1 %v10787_v5  ;;  %15323 = vst [vmem:[#allocation27_spill] sm:$0xff] %v13070_v49  ;;  %v13073_v5 = vadd.f32 %v12856_v6, %v3262_v38  ;;  %v4089_v6 = vmul.f32 0.2, %v3557_v37  ;;  %v4152_v51 = vmul.f32 0.2, %v13063_v47 }
 0x356   : > { %v3561_v52 = vadd.f32 %v3560_v20, %v3448_v44  ;;  %v3562_v17 = vpop.f32.mrf.mxu0  ;;  %v3450_v19 = vadd.f32 %v3449_v61, %v13026_v25  ;;  %15324 = vst [vmem:[#allocation25_spill] sm:$0xff] %v13076_v53  ;;  %v13078_v29 = vpack.c.bf16 %v4272_v0, %v4264_v42  ;;  %v4090_v50 = vmul.f32 0.2, %v3559_v15  ;;  %v10791_v61 = vld [vmem:[#allocation12 + $0x7a8] ss:$28 sps:$4 sm:$0xff]  }
 0x357   : > { %v3453_v33 = vpop.f32.mrf.mxu1  ;;  %7303 = vmatmul.mubr.bf16.gmra.mxu1 %v13034_v10  ;;  %v4160_v48 = vmul.f32 0.2, %v13066_v9  ;;  %v13089_v20 = vmul.f32 0.2, %v13073_v5  ;;  %v3274_v42 = vadd.f32 %v12894_v23, %v12860_v41  ;;  %v4217_v21 = vmax.f32 %v3557_v37, %v4089_v6  ;;  %v10827_v37 = vld [vmem:[#allocation12 + $0xc08] ss:$28 sps:$4 sm:$0xff]  }
 0x358   : > { %v4097_v14 = vmul.f32 0.2, %v3561_v52  ;;  %v3566_v58 = vpop.f32.mrf.mxu0  ;;  %7312 = vmatprep.mubr.bf16.mxu1 %v13057_v7  ;;  %7491 = vmatpush1.bf16.msra.mxu1 %v10785_v18  ;;  %15325 = vst [vmem:[#allocation28_spill] sm:$0xff] %v13078_v29  ;;  %v3563_v54 = vadd.f32 %v3562_v17, %v3450_v19  ;;  %v3454_v46 = vadd.f32 %v3453_v33, %v12996_v30 }
 0x359   : > { %v3455_v60 = vpop.f32.mrf.mxu1  ;;  %7492 = vmatprep.subr.bf16.mxu1 %v10790_v2  ;;  %v15326_v2 = vld [vmem:[#allocation30_spill] sm:$0xff]  ;;  %v4218_v22 = vmax.f32 %v3559_v15, %v4090_v50 }
 0x35a   : > { %v3456_v13 = vadd.f32 %v3455_v60, %v13026_v25  ;;  %v3568_v24 = vpop.f32.mrf.mxu0  ;;  %v4098_v38 = vmul.f32 0.2, %v3563_v54  ;;  %v4225_v18 = vmax.f32 %v3561_v52, %v4097_v14  ;;  %v3270_v17 = vadd.f32 %v15326_v2, %v12860_v41  ;;  %v10796_v60 = vld [vmem:[#allocation12 + $0x774] ss:$28 sps:$4 sm:$0xff]  }
 0x35b   : > { %v3457_v44 = vpop.f32.mrf.mxu1  ;;  %v13098_v52 = vadd.f32 %v3566_v58, %v3454_v46  ;;  %v4280_v58 = vmax.f32 %v13063_v47, %v4152_v51  ;;  %v15328_v46 = vld [vmem:[#allocation29_spill] sm:$0xff] }
 0x35c   : > { %v13091_v36 = vadd.f32 %v3568_v24, %v3456_v13  ;;  %v3458_v16 = vadd.f32 %v3457_v44, %v12996_v30  ;;  %v3570_v0 = vpop.f32.mrf.mxu0  ;;  %7493 = vmatpush1.bf16.msra.mxu1 %v10788_v59  ;;  %v4226_v19 = vmax.f32 %v3563_v54, %v4098_v38  ;;  %v4288_v24 = vmax.f32 %v13066_v9, %v4160_v48  ;;  %v10835_v9 = vld [vmem:[#allocation12 + $0xbd4] ss:$28 sps:$4 sm:$0xff]   ;;  %v15329_v38 = vld [vmem:[#allocation31_spill] sm:$0xff] }
 0x35d   : > { %v3459_v33 = vpop.f32.mrf.mxu1  ;;  %7494 = vmatprep.subr.bf16.mxu1 %v10793_v34  ;;  %v3272_v44 = vadd.f32 %v12887_v26, %v12883_v8  ;;  %v13111_v50 = vpack.c.bf16 %v4225_v18, %v4217_v21  ;;  %v10794_v26 = vld [vmem:[#allocation12 + $0x770] ss:$28 sps:$4 sm:$0xff]   ;;  %v13116_v48 = vadd.f32 %v15328_v46, %v3268_v57  ;;  %v10799_v21 = vld [vmem:[#allocation12 + $0x73c] ss:$28 sps:$4 sm:$0xff]   ;;  %v4105_v51 = vmul.f32 0.2, %v13098_v52 }
 0x35e   : > { %v13100_v14 = vadd.f32 %v3570_v0, %v3458_v16  ;;  %v3460_v13 = vadd.f32 %v3459_v33, %v13026_v25  ;;  %v3572_v59 = vpop.f32.mrf.mxu0  ;;  %v13106_v2 = vpack.c.bf16 %v4226_v19, %v4218_v22  ;;  %v4106_v23 = vmul.f32 0.2, %v13091_v36 }
 0x35f   : > { %v3463_v15 = vpop.f32.mrf.mxu1  ;;  %7313 = vmatmul.mubr.bf16.gmra.mxu1 %v13070_v49  ;;  %v13119_v16 = vadd.f32 %v15329_v38, %v3270_v17  ;;  %v13122_v0 = vadd.f32 %v12896_v32, %v3274_v42  ;;  %v4287_v17 = vmax.f32 %v13073_v5, %v13089_v20  ;;  %v13131_v32 = vpack.c.bf16 %v4288_v24, %v4280_v58  ;;  %v15331_v42 = vld [vmem:[#allocation32_spill] sm:$0xff] }
 0x360   : > { %15327 = vst [vmem:[#allocation30_spill] sm:$0xff] %v13106_v2  ;;  %v4113_v54 = vmul.f32 0.2, %v13100_v14  ;;  %v3573_v34 = vadd.f32 %v3572_v59, %v3460_v13  ;;  %v3576_v6 = vpop.f32.mrf.mxu0  ;;  %7322 = vmatprep.mubr.bf16.mxu1 %v13078_v29  ;;  %7495 = vmatpush1.bf16.msra.mxu1 %v10791_v61  ;;  %v3464_v61 = vadd.f32 %v3463_v15, %v12996_v30  ;;  %v10833_v13 = vld [vmem:[#allocation12 + $0xbd0] ss:$28 sps:$4 sm:$0xff]  }
 0x361   : > { %7405 = vmatprep.mubr.bf16.mxu0 %v13106_v2  ;;  %v3465_v47 = vpop.f32.mrf.mxu1  ;;  %7496 = vmatprep.subr.bf16.mxu1 %v10796_v60  ;;  %15330 = vst [vmem:[#allocation29_spill] sm:$0xff] %v13131_v32  ;;  %v13134_v19 = vadd.f32 %v15331_v42, %v3272_v44  ;;  %v4234_v33 = vmax.f32 %v13091_v36, %v4106_v23  ;;  %v4168_v5 = vmul.f32 0.2, %v13119_v16  ;;  %v4176_v20 = vmul.f32 0.2, %v13122_v0 }
 0x362   : > { %v4114_v18 = vmul.f32 0.2, %v3573_v34  ;;  %v3466_v22 = vadd.f32 %v3465_v47, %v13026_v25  ;;  %v3578_v57 = vpop.f32.mrf.mxu0  ;;  %7406 = vmatmul.mubr.bf16.vlgmr.msra.gmra.mxu0 %v13111_v50  ;;  %v4241_v59 = vmax.f32 %v13100_v14, %v4113_v54  ;;  %v10797_v47 = vld [vmem:[#allocation12 + $0x738] ss:$28 sps:$4 sm:$0xff]   ;;  %v3284_v24 = vadd.f32 %v12940_v12, %v12860_v41 }
 0x363   : > { %v3467_v60 = vpop.f32.mrf.mxu1  ;;  %7600 = vmatpush1.bf16.msra.mxu0 %v10827_v37  ;;  %v10841_v23 = vld [vmem:[#allocation12 + $0xb9c] ss:$28 sps:$4 sm:$0xff]   ;;  %v4233_v14 = vmax.f32 %v13098_v52, %v4105_v51  ;;  %v13148_v58 = vadd.f32 %v3576_v6, %v3464_v61  ;;  %v13155_v12 = vmul.f32 0.2, %v13134_v19  ;;  %v15332_v51 = vmax.f32 %v13041_v39, %v13060_v62 }
 0x364   : > { %v4242_v15 = vmax.f32 %v3573_v34, %v4114_v18  ;;  %v13138_v46 = vadd.f32 %v3578_v57, %v3466_v22  ;;  %v3580_v38 = vpop.f32.mrf.mxu0  ;;  %7497 = vmatpush1.bf16.msra.mxu1 %v10794_v26  ;;  %7601 = vmatprep.subr.bf16.mxu0 %v10835_v9  ;;  %v3468_v36 = vadd.f32 %v3467_v60, %v12996_v30  ;;  %v10802_v26 = vld [vmem:[#allocation12 + $0x704] ss:$28 sps:$4 sm:$0xff]   ;;  %v13152_v9 = vmul.f32 0.2, %v13116_v48  ;;  %v10839_v6 = vld [vmem:[#allocation12 + $0xb98] ss:$28 sps:$4 sm:$0xff]  }
 0x365   : > { %v3469_v44 = vpop.f32.mrf.mxu1  ;;  %7498 = vmatprep.subr.bf16.mxu1 %v10799_v21  ;;  %v3280_v21 = vadd.f32 %v12916_v31, %v12860_v41  ;;  %v13165_v61 = vpack.c.bf16 %v4287_v17, %v15332_v51  ;;  %v13167_v22 = vpack.c.bf16 %v4241_v59, %v4233_v14  ;;  %v10847_v31 = vld [vmem:[#allocation12 + $0xb64] ss:$28 sps:$4 sm:$0xff]   ;;  %v4296_v60 = vmax.f32 %v13119_v16, %v4168_v5  ;;  %v10805_v16 = vld [vmem:[#allocation12 + $0xa4c] ss:$28 sps:$4 sm:$0xff]  }
 0x366   : > { %v13146_v37 = vpack.c.bf16 %v4242_v15, %v4234_v33  ;;  %v3470_v54 = vadd.f32 %v3469_v44, %v13026_v25  ;;  %v3582_v34 = vpop.f32.mrf.mxu0  ;;  %v13159_v18 = vadd.f32 %v3580_v38, %v3468_v36  ;;  %v4122_v57 = vmul.f32 0.2, %v13138_v46  ;;  %v10800_v17 = vld [vmem:[#allocation12 + $0x700] ss:$28 sps:$4 sm:$0xff]   ;;  %v10803_v51 = vld [vmem:[#allocation12 + $0xa48] ss:$28 sps:$4 sm:$0xff]  }
 0x367   : > { %v3473_v52 = vpop.f32.mrf.mxu1  ;;  %7323 = vmatmul.mubr.bf16.gmra.mxu1 %v13076_v53  ;;  %7602 = vmatpush1.bf16.msra.mxu0 %v10833_v13  ;;  %15333 = vst [vmem:[#allocation31_spill] sm:$0xff] %v13165_v61  ;;  %v4304_v13 = vmax.f32 %v13122_v0, %v4176_v20  ;;  %v13175_v15 = vadd.f32 %v12942_v3, %v3284_v24  ;;  %v4121_v59 = vmul.f32 0.2, %v13148_v58 }
 0x368   : > { %v3583_v42 = vadd.f32 %v3582_v34, %v3470_v54  ;;  %v3586_v33 = vpop.f32.mrf.mxu0  ;;  %7332 = vmatprep.mubr.bf16.mxu1 %v13131_v32  ;;  %7415 = vmatprep.mubr.bf16.mxu0 %v13146_v37  ;;  %v4129_v39 = vmul.f32 0.2, %v13159_v18  ;;  %v3474_v36 = vadd.f32 %v3473_v52, %v12996_v30  ;;  %v4303_v3 = vmax.f32 %v13134_v19, %v13155_v12 }
 0x369   : > { %v3475_v62 = vpop.f32.mrf.mxu1  ;;  %7499 = vmatpush1.bf16.msra.mxu1 %v10797_v47  ;;  %7603 = vmatprep.subr.bf16.mxu0 %v10841_v23  ;;  %v3278_v0 = vadd.f32 %v12902_v40, %v12883_v8  ;;  %v15334_v47 = vld [vmem:[#allocation34_spill] sm:$0xff]  ;;  %v3282_v20 = vadd.f32 %v12929_v63, %v12883_v8  ;;  %v4250_v54 = vmax.f32 %v13138_v46, %v4122_v57  ;;  %v4192_v40 = vmul.f32 0.2, %v13175_v15  ;;  %v10853_v46 = vld [vmem:[#allocation12 + $0xb2c] ss:$28 sps:$4 sm:$0xff]  }
 0x36a   : > { %v4130_v38 = vmul.f32 0.2, %v3583_v42  ;;  %v3476_v44 = vadd.f32 %v3475_v62, %v13026_v25  ;;  %v3588_v14 = vpop.f32.mrf.mxu0  ;;  %7416 = vmatmul.mubr.bf16.gmra.mxu0 %v13167_v22  ;;  %7500 = vmatprep.subr.bf16.mxu1 %v10802_v26  ;;  %v13187_v5 = vadd.f32 %v15334_v47, %v3280_v21  ;;  %v10845_v23 = vld [vmem:[#allocation12 + $0xb60] ss:$28 sps:$4 sm:$0xff]   ;;  %v4257_v34 = vmax.f32 %v13159_v18, %v4129_v39  ;;  %v10806_v47 = vld [vmem:[#allocation12 + $0xa10] ss:$28 sps:$4 sm:$0xff]  }
 0x36b   : > { %v3477_v24 = vpop.f32.mrf.mxu1  ;;  %7604 = vmatpush1.bf16.msra.mxu0 %v10839_v6  ;;  %v13194_v12 = vpack.c.bf16 %v4304_v13, %v4296_v60  ;;  %v3294_v21 = vadd.f32 %v13015_v43, %v12860_v41  ;;  %v4249_v18 = vmax.f32 %v13148_v58, %v4121_v59  ;;  %v10808_v13 = vld [vmem:[#allocation12 + $0xa14] ss:$28 sps:$4 sm:$0xff]   ;;  %v13210_v43 = vadd.f32 %v12931_v45, %v3282_v20 }
 0x36c   : > { %v4258_v26 = vmax.f32 %v3583_v42, %v4130_v38  ;;  %v3478_v52 = vadd.f32 %v3477_v24, %v12996_v30  ;;  %v3590_v19 = vpop.f32.mrf.mxu0  ;;  %7605 = vmatprep.subr.bf16.mxu0 %v10847_v31  ;;  %v13199_v63 = vadd.f32 %v3588_v14, %v3476_v44  ;;  %v13204_v42 = vadd.f32 %v3586_v33, %v3474_v36  ;;  %v10851_v33 = vld [vmem:[#allocation12 + $0xb28] ss:$28 sps:$4 sm:$0xff]   ;;  %v15336_v38 = vld [vmem:[#allocation33_spill] sm:$0xff] }
 0x36d   : > { %15335 = vst [vmem:[#allocation32_spill] sm:$0xff] %v13194_v12  ;;  %v3479_v6 = vpop.f32.mrf.mxu1  ;;  %7501 = vmatpush1.bf16.msra.mxu1 %v10800_v17  ;;  %v4184_v39 = vmul.f32 0.2, %v13187_v5  ;;  %v3290_v62 = vadd.f32 %v12975_v55, %v12860_v41  ;;  %v4295_v59 = vmax.f32 %v13116_v48, %v13152_v9  ;;  %v13219_v36 = vadd.f32 %v15336_v38, %v3278_v0  ;;  %v10859_v41 = vld [vmem:[#allocation12 + $0xaf4] ss:$28 sps:$4 sm:$0xff]  }
 0x36e   : > { %v13202_v57 = vpack.c.bf16 %v4258_v26, %v4250_v54  ;;  %v13206_v31 = vadd.f32 %v3590_v19, %v3478_v52  ;;  %v3592_v60 = vpop.f32.mrf.mxu0  ;;  %7502 = vmatprep.subr.bf16.mxu1 %v10805_v16  ;;  %v3480_v17 = vadd.f32 %v3479_v6, %v13026_v25  ;;  %v13221_v44 = vpack.c.bf16 %v4257_v34, %v4249_v18  ;;  %v10865_v18 = vld [vmem:[#allocation12 + $0xabc] ss:$28 sps:$4 sm:$0xff]   ;;  %v10814_v38 = vld [vmem:[#allocation12 + $0x9a4] ss:$28 sps:$4 sm:$0xff]  }
 0x36f   : > { %v3483_v58 = vpop.f32.mrf.mxu1  ;;  %7333 = vmatmul.mubr.bf16.gmra.mxu1 %v13165_v61  ;;  %7606 = vmatpush1.bf16.msra.mxu0 %v10845_v23  ;;  %v4320_v55 = vmax.f32 %v13175_v15, %v4192_v40  ;;  %v13228_v16 = vadd.f32 %v13017_v35, %v3294_v21  ;;  %v4138_v48 = vmul.f32 0.2, %v13199_v63  ;;  %v13231_v20 = vpack.c.bf16 %v4303_v3, %v4295_v59  ;;  %v10811_v35 = vld [vmem:[#allocation12 + $0x9dc] ss:$28 sps:$4 sm:$0xff]   ;;  %v10857_v40 = vld [vmem:[#allocation12 + $0xaf0] ss:$28 sps:$4 sm:$0xff]  }
 0x370   : > { %15337 = vst [vmem:[#allocation34_spill] sm:$0xff] %v13221_v44  ;;  %v4145_v45 = vmul.f32 0.2, %v13206_v31  ;;  %v3596_v14 = vpop.f32.mrf.mxu0  ;;  %7342 = vmatprep.mubr.bf16.mxu1 %v13194_v12  ;;  %7425 = vmatprep.mubr.bf16.mxu0 %v13202_v57  ;;  %v3593_v9 = vadd.f32 %v3592_v60, %v3480_v17  ;;  %v4137_v24 = vmul.f32 0.2, %v13204_v42  ;;  %v3484_v23 = vadd.f32 %v3483_v58, %v12996_v30 }
 0x371   : > { %v3485_v0 = vpop.f32.mrf.mxu1  ;;  %7503 = vmatpush2.bf16.msra.mxu1 %v10803_v51  ;;  %7607 = vmatprep.subr.bf16.mxu0 %v10853_v46  ;;  %15338 = vst [vmem:[#allocation33_spill] sm:$0xff] %v13231_v20  ;;  %v4312_v15 = vmax.f32 %v13187_v5, %v4184_v39  ;;  %v13239_v26 = vmul.f32 0.2, %v13210_v43  ;;  %v13242_v52 = vadd.f32 %v12977_v28, %v3290_v62  ;;  %v4208_v28 = vmul.f32 0.2, %v13228_v16 }
 0x372   : > { %v3486_v54 = vadd.f32 %v3485_v0, %v13026_v25  ;;  %v3598_v34 = vpop.f32.mrf.mxu0  ;;  %7426 = vmatmul.mubr.bf16.gmra.mxu0 %v13221_v44  ;;  %7504 = vmatprep.subr.bf16.mxu1 %v10808_v13  ;;  %v4146_v3 = vmul.f32 0.2, %v3593_v9  ;;  %v3292_v21 = vadd.f32 %v12990_v27, %v12883_v8  ;;  %v4273_v6 = vmax.f32 %v13206_v31, %v4145_v45  ;;  %v10809_v17 = vld [vmem:[#allocation12 + $0x9d8] ss:$28 sps:$4 sm:$0xff]  }
 0x373   : > { %v3487_v19 = vpop.f32.mrf.mxu1  ;;  %7608 = vmatpush1.bf16.msra.mxu0 %v10851_v33  ;;  %v13250_v60 = vpack.c.bf16 %v4320_v55, %v4312_v15  ;;  %v4266_v13 = vmax.f32 %v13199_v63, %v4138_v48  ;;  %v4265_v27 = vmax.f32 %v13204_v42, %v4137_v24  ;;  %v13255_v31 = vadd.f32 %v3596_v14, %v3484_v23  ;;  %v10863_v42 = vld [vmem:[#allocation12 + $0xab8] ss:$28 sps:$4 sm:$0xff]  }
 0x374   : > { %v13247_v51 = vadd.f32 %v3598_v34, %v3486_v54  ;;  %v3488_v46 = vadd.f32 %v3487_v19, %v12996_v30  ;;  %v3600_v5 = vpop.f32.mrf.mxu0  ;;  %7609 = vmatprep.subr.bf16.mxu0 %v10859_v41  ;;  %v4274_v39 = vmax.f32 %v3593_v9, %v4146_v3  ;;  %v4183_v45 = vmul.f32 0.2, %v13219_v36 }
 0x375   : > { %15339 = vst [vmem:[#allocation39_spill] sm:$0xff] %v13250_v60  ;;  %v3489_v62 = vpop.f32.mrf.mxu1  ;;  %7505 = vmatpush2.bf16.msra.mxu1 %v10806_v47  ;;  %v3288_v63 = vadd.f32 %v12955_v11, %v12883_v8  ;;  %v4200_v41 = vmul.f32 0.2, %v13242_v52  ;;  %v13267_v14 = vpack.c.bf16 %v4273_v6, %v4265_v27  ;;  %v10871_v8 = vld [vmem:[#allocation12 + $0xa84] ss:$28 sps:$4 sm:$0xff]   ;;  %v4319_v11 = vmax.f32 %v13210_v43, %v13239_v26 }
 0x376   : > { %v13257_v58 = vadd.f32 %v3600_v5, %v3488_v46  ;;  %v3490_v33 = vadd.f32 %v3489_v62, %v13026_v25  ;;  %v3602_v59 = vpop.f32.mrf.mxu0  ;;  %7506 = vmatprep.subr.bf16.mxu1 %v10811_v35  ;;  %v13264_v55 = vpack.c.bf16 %v4274_v39, %v4266_v13  ;;  %v4154_v9 = vmul.f32 0.2, %v13247_v51  ;;  %v10812_v35 = vld [vmem:[#allocation12 + $0x9a0] ss:$28 sps:$4 sm:$0xff]   ;;  %v10815_v27 = vld [vmem:[#allocation12 + $0x968] ss:$28 sps:$4 sm:$0xff]  }
 0x377   : > { %v3493_v48 = vpop.f32.mrf.mxu1  ;;  %7343 = vmatmul.mubr.bf16.gmra.mxu1 %v13231_v20  ;;  %7610 = vmatpush1.bf16.msra.mxu0 %v10857_v40  ;;  %15341 = vst [vmem:[#allocation41_spill] sm:$0xff] %v13267_v14  ;;  %v13275_v23 = vadd.f32 %v12992_v1, %v3292_v21  ;;  %v4336_v54 = vmax.f32 %v13228_v16, %v4208_v28  ;;  %v4153_v15 = vmul.f32 0.2, %v13255_v31  ;;  %v10817_v1 = vld [vmem:[#allocation12 + $0x96c] ss:$28 sps:$4 sm:$0xff]  }
 0x378   : > { %15340 = vst [vmem:[#allocation40_spill] sm:$0xff] %v13264_v55  ;;  %v4161_v0 = vmul.f32 0.2, %v13257_v58  ;;  %v3603_v47 = vadd.f32 %v3602_v59, %v3490_v33  ;;  %v3606_v24 = vpop.f32.mrf.mxu0  ;;  %7352 = vmatprep.mubr.bf16.mxu1 %v13250_v60  ;;  %7611 = vmatprep.subr.bf16.mxu0 %v10865_v18  ;;  %v3494_v19 = vadd.f32 %v3493_v48, %v12996_v30  ;;  %v10869_v46 = vld [vmem:[#allocation12 + $0xa80] ss:$28 sps:$4 sm:$0xff]  }
 0x379   : > { %7435 = vmatprep.mubr.bf16.mxu0 %v13264_v55  ;;  %v3495_v34 = vpop.f32.mrf.mxu1  ;;  %7507 = vmatpush2.bf16.msra.mxu1 %v10809_v17  ;;  %v4311_v43 = vmax.f32 %v13219_v36, %v4183_v45  ;;  %v13285_v16 = vadd.f32 %v12957_v4, %v3288_v63  ;;  %v4328_v26 = vmax.f32 %v13242_v52, %v4200_v41  ;;  %v4207_v36 = vmul.f32 0.2, %v13275_v23  ;;  %v10877_v33 = vld [vmem:[#allocation12 + $0xdcc] ss:$28 sps:$4 sm:$0xff]   ;;  %v10820_v63 = vld [vmem:[#allocation12 + $0x934] ss:$28 sps:$4 sm:$0xff]  }
 0x37a   : > { %v4162_v3 = vmul.f32 0.2, %v3603_v47  ;;  %v3496_v40 = vadd.f32 %v3495_v34, %v13026_v25  ;;  %v3608_v6 = vpop.f32.mrf.mxu0  ;;  %7436 = vmatmul.mubr.bf16.gmra.mxu0 %v13267_v14  ;;  %7508 = vmatprep.subr.bf16.mxu1 %v10814_v38  ;;  %v4282_v5 = vmax.f32 %v13247_v51, %v4154_v9  ;;  %v4289_v18 = vmax.f32 %v13257_v58, %v4161_v0  ;;  %v10875_v9 = vld [vmem:[#allocation12 + $0xdc8] ss:$28 sps:$4 sm:$0xff]  }
 0x37b   : > { %v3497_v21 = vpop.f32.mrf.mxu1  ;;  %7612 = vmatpush1.bf16.msra.mxu0 %v10863_v42  ;;  %v13292_v62 = vpack.c.bf16 %v4319_v11, %v4311_v43  ;;  %v13295_v4 = vpack.c.bf16 %v4336_v54, %v4328_v26  ;;  %v4281_v51 = vmax.f32 %v13255_v31, %v4153_v15  ;;  %v3607_v59 = vadd.f32 %v3606_v24, %v3494_v19  ;;  %v10883_v24 = vld [vmem:[#allocation12 + $0xd94] ss:$28 sps:$4 sm:$0xff]  }
 0x37c   : > { %v4290_v28 = vmax.f32 %v3603_v47, %v4162_v3  ;;  %v13290_v13 = vadd.f32 %v3608_v6, %v3496_v40  ;;  %v3610_v39 = vpop.f32.mrf.mxu0  ;;  %7613 = vmatprep.subr.bf16.mxu0 %v10871_v8  ;;  %v3498_v52 = vadd.f32 %v3497_v21, %v12996_v30  ;;  %v4199_v41 = vmul.f32 0.2, %v13285_v16 }
 0x37d   : > { %15342 = vst [vmem:[#allocation42_spill] sm:$0xff] %v13292_v62  ;;  %15343 = vst [vmem:[#allocation43_spill] sm:$0xff] %v13295_v4  ;;  %v3499_v17 = vpop.f32.mrf.mxu1  ;;  %7509 = vmatpush2.bf16.msra.mxu1 %v10812_v35  ;;  %v13304_v0 = vpack.c.bf16 %v4289_v18, %v4281_v51  ;;  %v4335_v11 = vmax.f32 %v13275_v23, %v4207_v36  ;;  %v10818_v35 = vld [vmem:[#allocation12 + $0x930] ss:$28 sps:$4 sm:$0xff]   ;;  %v4169_v15 = vmul.f32 0.2, %v3607_v59 }
 0x37e   : > { %v13299_v58 = vpack.c.bf16 %v4290_v28, %v4282_v5  ;;  %v3500_v38 = vadd.f32 %v3499_v17, %v13026_v25  ;;  %v3612_v45 = vpop.f32.mrf.mxu0  ;;  %7510 = vmatprep.subr.bf16.mxu1 %v10817_v1  ;;  %v3611_v48 = vadd.f32 %v3610_v39, %v3498_v52  ;;  %v4170_v31 = vmul.f32 0.2, %v13290_v13  ;;  %v10823_v1 = vld [vmem:[#allocation12 + $0x8fc] ss:$28 sps:$4 sm:$0xff]   ;;  %v10881_v23 = vld [vmem:[#allocation12 + $0xd90] ss:$28 sps:$4 sm:$0xff]  }
 0x37f   : > { %v3503_v42 = vpop.f32.mrf.mxu1  ;;  %7353 = vmatmul.mubr.bf16.gmra.mxu1 %v13292_v62  ;;  %7614 = vmatpush1.bf16.msra.mxu0 %v10869_v46  ;;  %15345 = vst [vmem:[#allocation45_spill] sm:$0xff] %v13304_v0  ;;  %v4327_v43 = vmax.f32 %v13285_v16, %v4199_v41  ;;  %v10889_v39 = vld [vmem:[#allocation12 + $0xd5c] ss:$28 sps:$4 sm:$0xff]  }
 0x380   : > { %15344 = vst [vmem:[#allocation44_spill] sm:$0xff] %v13299_v58  ;;  %v3613_v47 = vadd.f32 %v3612_v45, %v3500_v38  ;;  %v3616_v8 = vpop.f32.mrf.mxu0  ;;  %7362 = vmatprep.mubr.bf16.mxu1 %v13295_v4  ;;  %7445 = vmatprep.mubr.bf16.mxu0 %v13299_v58  ;;  %v4177_v54 = vmul.f32 0.2, %v3611_v48  ;;  %v3504_v19 = vadd.f32 %v3503_v42, %v12996_v30 }
 0x381   : > { %v3505_v34 = vpop.f32.mrf.mxu1  ;;  %7511 = vmatpush2.bf16.msra.mxu1 %v10815_v27  ;;  %7615 = vmatprep.subr.bf16.mxu0 %v10877_v33  ;;  %v4298_v21 = vmax.f32 %v13290_v13, %v4170_v31  ;;  %v13316_v36 = vpack.c.bf16 %v4335_v11, %v4327_v43  ;;  %v10821_v27 = vld [vmem:[#allocation12 + $0x8f8] ss:$28 sps:$4 sm:$0xff]   ;;  %v4297_v33 = vmax.f32 %v3607_v59, %v4169_v15  ;;  %v10826_v13 = vld [vmem:[#allocation12 + $0x8c4] ss:$28 sps:$4 sm:$0xff]   ;;  %v15349_v11 = vld [vmem:[#allocation20_spill] sm:$0xff] }
 0x382   : > { %v4178_v3 = vmul.f32 0.2, %v3613_v47  ;;  %v3506_v40 = vadd.f32 %v3505_v34, %v13026_v25  ;;  %v3618_v6 = vpop.f32.mrf.mxu0  ;;  %7446 = vmatmul.mubr.bf16.gmra.mxu0 %v13304_v0  ;;  %7512 = vmatprep.subr.bf16.mxu1 %v10820_v63  ;;  %v4305_v46 = vmax.f32 %v3611_v48, %v4177_v54  ;;  %v3617_v51 = vadd.f32 %v3616_v8, %v3504_v19  ;;  %v10887_v48 = vld [vmem:[#allocation12 + $0xd58] ss:$28 sps:$4 sm:$0xff]   ;;  %v10895_v59 = vld [vmem:[#allocation12 + $0xd24] ss:$28 sps:$4 sm:$0xff]  }
 0x383   : > { %v3507_v26 = vpop.f32.mrf.mxu1  ;;  %7616 = vmatpush2.bf16.msra.mxu0 %v10875_v9  ;;  %15346 = vst [vmem:[#allocation46_spill] sm:$0xff] %v13316_v36  ;;  %v15107_v54 = vsub.s32 4, %v15349_v11  ;;  %v15106_v34 = vsub.s32 5, %v15349_v11 }
 0x384   : > { %v4306_v5 = vmax.f32 %v3613_v47, %v4178_v3  ;;  %v3508_v18 = vadd.f32 %v3507_v26, %v12996_v30  ;;  %v3620_v28 = vpop.f32.mrf.mxu0  ;;  %7617 = vmatprep.subr.bf16.mxu0 %v10883_v24  ;;  %v3619_v52 = vadd.f32 %v3618_v6, %v3506_v40  ;;  %v13322_v42 = vpack.c.bf16 %v4305_v46, %v4297_v33  ;;  %v10832_v6 = vld [vmem:[#allocation12 + $0x194] ss:$28 sps:$4 sm:$0xff]   ;;  %v10893_v26 = vld [vmem:[#allocation12 + $0xd20] ss:$28 sps:$4 sm:$0xff]  }
 0x385   : > { %v3509_v17 = vpop.f32.mrf.mxu1  ;;  %7513 = vmatpush2.bf16.msra.mxu1 %v10818_v35  ;;  %v10824_v35 = vld [vmem:[#allocation12 + $0x8c0] ss:$28 sps:$4 sm:$0xff]   ;;  %v4185_v15 = vmul.f32 0.2, %v3617_v51 }
 0x386   : > { %v13318_v16 = vpack.c.bf16 %v4306_v5, %v4298_v21  ;;  %v3621_v38 = vadd.f32 %v3620_v28, %v3508_v18  ;;  %v3622_v45 = vpop.f32.mrf.mxu0  ;;  %7514 = vmatprep.subr.bf16.mxu1 %v10823_v1  ;;  %v3510_v63 = vadd.f32 %v3509_v17, %v13026_v25  ;;  %15348 = vst [vmem:[#allocation48_spill] sm:$0xff] %v13322_v42  ;;  %v4186_v47 = vmul.f32 0.2, %v3619_v52  ;;  %v10901_v18 = vld [vmem:[#allocation12 + $0xcec] ss:$28 sps:$4 sm:$0xff]  }
 0x387   : > { %v3513_v41 = vpop.f32.mrf.mxu1  ;;  %7363 = vmatmul.mubr.bf16.gmra.mxu1 %v13316_v36  ;;  %7618 = vmatpush2.bf16.msra.mxu0 %v10881_v23 }
 0x388   : > { %15347 = vst [vmem:[#allocation47_spill] sm:$0xff] %v13318_v16  ;;  %v4193_v9 = vmul.f32 0.2, %v3621_v38  ;;  %v3626_v31 = vpop.f32.mrf.mxu0  ;;  %7455 = vmatprep.mubr.bf16.mxu0 %v13318_v16  ;;  %7619 = vmatprep.subr.bf16.mxu0 %v10889_v39  ;;  %v3623_v8 = vadd.f32 %v3622_v45, %v3510_v63  ;;  %v3514_v3 = vadd.f32 %v3513_v41, %v12996_v30 }
 0x389   : > { %v3515_v24 = vpop.f32.mrf.mxu1  ;;  %7515 = vmatpush2.bf16.msra.mxu1 %v10821_v27  ;;  %v4314_v28 = vmax.f32 %v3619_v52, %v4186_v47  ;;  %v13331_v27 = vld [vmem:[#allocation10] sm:$0xff] }
 0x38a   : > { %v3516_v19 = vadd.f32 %v3515_v24, %v13026_v25  ;;  %v3628_v40 = vpop.f32.mrf.mxu0  ;;  %7456 = vmatmul.mubr.bf16.gmra.mxu0 %v13322_v42  ;;  %7516 = vmatprep.subr.bf16.mxu1 %v10826_v13  ;;  %v4194_v1 = vmul.f32 0.2, %v3623_v8  ;;  %v4321_v23 = vmax.f32 %v3621_v38, %v4193_v9  ;;  %v13336_v33 = vrot.slane %v13331_v27, %v15107_v54  ;;  %v10899_v9 = vld [vmem:[#allocation12 + $0xce8] ss:$28 sps:$4 sm:$0xff]  }
 0x38b   : > { %v3517_v43 = vpop.f32.mrf.mxu1  ;;  %7620 = vmatpush2.bf16.msra.mxu0 %v10887_v48  ;;  %v13341_v38 = vrot.slane %v13331_v27, %v15106_v34  ;;  %v3627_v45 = vadd.f32 %v3626_v31, %v3514_v3  ;;  %v10830_v34 = vld [vmem:[#allocation12 + $0x190] ss:$28 sps:$4 sm:$0xff]  }
 0x38c   : > { %v3629_v21 = vadd.f32 %v3628_v40, %v3516_v19  ;;  %v3518_v46 = vadd.f32 %v3517_v43, %v12996_v30  ;;  %v3630_v5 = vpop.f32.mrf.mxu0  ;;  %7621 = vmatprep.subr.bf16.mxu0 %v10895_v59  ;;  %v4322_v39 = vmax.f32 %v3623_v8, %v4194_v1  ;;  %v4313_v30 = vmax.f32 %v3617_v51, %v4185_v15  ;;  %v10907_v19 = vld [vmem:[#allocation12 + $0xcb4] ss:$28 sps:$4 sm:$0xff]  }
 0x38d   : > { %v3519_v17 = vpop.f32.mrf.mxu1  ;;  %7517 = vmatpush2.bf16.msra.mxu1 %v10824_v35  ;;  %v4201_v35 = vmul.f32 0.2, %v3627_v45  ;;  %v10905_v1 = vld [vmem:[#allocation12 + $0xcb0] ss:$28 sps:$4 sm:$0xff]  }
 0x38e   : > { %v3631_v13 = vadd.f32 %v3630_v5, %v3518_v46  ;;  %v3520_v52 = vadd.f32 %v3519_v17, %v13026_v25  ;;  %v3632_v63 = vpop.f32.mrf.mxu0  ;;  %7712 = vmatprep.subr.bf16.mxu1 %v10832_v6  ;;  %v13344_v41 = vpack.c.bf16 %v4322_v39, %v4314_v28  ;;  %v13346_v59 = vpack.c.bf16 %v4321_v23, %v4313_v30  ;;  %v10913_v5 = vld [vmem:[#allocation12 + $0xc7c] ss:$28 sps:$4 sm:$0xff]  }
 0x38f   : > { %v3669_v48 = vpop.f32.mrf.mxu1  ;;  %7622 = vmatpush2.bf16.msra.mxu0 %v10893_v26  ;;  %v4202_v47 = vmul.f32 0.2, %v3629_v21  ;;  %v4329_v30 = vmax.f32 %v3627_v45, %v4201_v35 }
 0x390   : > { %15350 = vst [vmem:[#allocation49_spill] sm:$0xff] %v13344_v41  ;;  %15351 = vst [vmem:[#allocation50_spill] sm:$0xff] %v13346_v59  ;;  %v4209_v8 = vmul.f32 0.2, %v3631_v13  ;;  %v3633_v24 = vadd.f32 %v3632_v63, %v3520_v52  ;;  %7623 = vmatprep.subr.bf16.mxu0 %v10901_v18  ;;  %v3670_v51 = vadd.f32 %v3669_v48, %v13336_v33  ;;  %7465 = vmatprep.mubr.bf16.mxu0 %v13344_v41 }
 0x391   : > { %v3782_v31 = vpop.f32.mrf.mxu0  ;;  %v3671_v25 = vpop.f32.mrf.mxu1  ;;  %v4330_v43 = vmax.f32 %v3629_v21, %v4202_v47  ;;  %v10911_v21 = vld [vmem:[#allocation12 + $0xc78] ss:$28 sps:$4 sm:$0xff]  }
 0x392   : > { %v4210_v15 = vmul.f32 0.2, %v3633_v24  ;;  %v3672_v3 = vadd.f32 %v3671_v25, %v13341_v38  ;;  %7466 = vmatmul.mubr.bf16.gmra.mxu0 %v13346_v59  ;;  %v4337_v26 = vmax.f32 %v3631_v13, %v4209_v8  ;;  %v3783_v18 = vadd.f32 %v3782_v31, %v3670_v51 }
 0x393   : > { %v3784_v40 = vpop.f32.mrf.mxu0  ;;  %v3673_v6 = vpop.f32.mrf.mxu1  ;;  %7624 = vmatpush2.bf16.msra.mxu0 %v10899_v9 }
 0x394   : > { %v4338_v23 = vmax.f32 %v3633_v24, %v4210_v15  ;;  %v3785_v46 = vadd.f32 %v3784_v40, %v3672_v3  ;;  %7625 = vmatprep.subr.bf16.mxu0 %v10907_v19  ;;  %v3674_v28 = vadd.f32 %v3673_v6, %v13336_v33  ;;  %v13356_v13 = vpack.c.bf16 %v4337_v26, %v4329_v30  ;;  %v10919_v24 = vld [vmem:[#allocation12 + $0xc44] ss:$28 sps:$4 sm:$0xff]  }
 0x395   : > { %v3786_v39 = vpop.f32.mrf.mxu0  ;;  %v3675_v17 = vpop.f32.mrf.mxu1  ;;  %v4091_v19 = vmul.f32 0.2, %v3783_v18 }
 0x396   : > { %v13353_v52 = vpack.c.bf16 %v4338_v23, %v4330_v43  ;;  %v3676_v63 = vadd.f32 %v3675_v17, %v13341_v38  ;;  %v3787_v48 = vadd.f32 %v3786_v39, %v3674_v28  ;;  %15353 = vst [vmem:[#allocation52_spill] sm:$0xff] %v13356_v13  ;;  %v4092_v47 = vmul.f32 0.2, %v3785_v46  ;;  %v10917_v43 = vld [vmem:[#allocation12 + $0xc40] ss:$28 sps:$4 sm:$0xff]  }
 0x397   : > { %v3788_v25 = vpop.f32.mrf.mxu0  ;;  %v3679_v9 = vpop.f32.mrf.mxu1  ;;  %7626 = vmatpush2.bf16.msra.mxu0 %v10905_v1  ;;  %v10925_v28 = vld [vmem:[#allocation12 + $0x514] ss:$28 sps:$4 sm:$0xff]   ;;  %v4219_v39 = vmax.f32 %v3783_v18, %v4091_v19 }
 0x398   : > { %15352 = vst [vmem:[#allocation51_spill] sm:$0xff] %v13353_v52  ;;  %v3789_v8 = vadd.f32 %v3788_v25, %v3676_v63  ;;  %7475 = vmatprep.mubr.bf16.mxu0 %v13353_v52  ;;  %7627 = vmatprep.subr.bf16.mxu0 %v10913_v5  ;;  %v4099_v51 = vmul.f32 0.2, %v3787_v48  ;;  %v3680_v15 = vadd.f32 %v3679_v9, %v13336_v33 }
 0x399   : > { %v3792_v45 = vpop.f32.mrf.mxu0  ;;  %v3681_v31 = vpop.f32.mrf.mxu1  ;;  %v4220_v26 = vmax.f32 %v3785_v46, %v4092_v47  ;;  %v10838_v47 = vld [vmem:[#allocation12 + $0x15c] ss:$28 sps:$4 sm:$0xff]  }
 0x39a   : > { %v4100_v35 = vmul.f32 0.2, %v3789_v8  ;;  %v3682_v3 = vadd.f32 %v3681_v31, %v13341_v38  ;;  %7476 = vmatmul.mubr.bf16.gmra.mxu0 %v13356_v13  ;;  %v4227_v40 = vmax.f32 %v3787_v48, %v4099_v51  ;;  %v3793_v9 = vadd.f32 %v3792_v45, %v3680_v15 }
 0x39b   : > { %v3794_v6 = vpop.f32.mrf.mxu0  ;;  %v3683_v1 = vpop.f32.mrf.mxu1  ;;  %7628 = vmatpush2.bf16.msra.mxu0 %v10911_v21 }
 0x39c   : > { %v4228_v23 = vmax.f32 %v3789_v8, %v4100_v35  ;;  %v3684_v5 = vadd.f32 %v3683_v1, %v13336_v33  ;;  %7629 = vmatprep.subr.bf16.mxu0 %v10919_v24  ;;  %v3795_v17 = vadd.f32 %v3794_v6, %v3682_v3  ;;  %v13365_v48 = vpack.c.bf16 %v4227_v40, %v4219_v39  ;;  %v10836_v40 = vld [vmem:[#allocation12 + $0x158] ss:$28 sps:$4 sm:$0xff]  }
 0x39d   : > { %v3796_v30 = vpop.f32.mrf.mxu0  ;;  %v3685_v63 = vpop.f32.mrf.mxu1  ;;  %v4107_v45 = vmul.f32 0.2, %v3793_v9 }
 0x39e   : > { %v13363_v25 = vpack.c.bf16 %v4228_v23, %v4220_v26  ;;  %v3797_v31 = vadd.f32 %v3796_v30, %v3684_v5  ;;  %v3686_v21 = vadd.f32 %v3685_v63, %v13341_v38  ;;  %v4108_v18 = vmul.f32 0.2, %v3795_v17  ;;  %v10844_v26 = vld [vmem:[#allocation12 + $0x124] ss:$28 sps:$4 sm:$0xff]  }
 0x39f   : > { %v3798_v51 = vpop.f32.mrf.mxu0  ;;  %v3689_v46 = vpop.f32.mrf.mxu1  ;;  %7630 = vmatpush2.bf16.msra.mxu0 %v10917_v43 }
 0x3a0   : > { %15354 = vst [vmem:[#allocation53_spill] sm:$0xff] %v13363_v25  ;;  %v4115_v8 = vmul.f32 0.2, %v3797_v31  ;;  %7518 = vmatprep.mubr.bf16.mxu1 %v13363_v25  ;;  %7825 = vmatprep.subr.bf16.mxu0 %v10925_v28  ;;  %v3799_v24 = vadd.f32 %v3798_v51, %v3686_v21  ;;  %v3690_v15 = vadd.f32 %v3689_v46, %v13336_v33 }
 0x3a1   : > { %v3802_v19 = vpop.f32.mrf.mxu0  ;;  %v3691_v35 = vpop.f32.mrf.mxu1  ;;  %7519 = vmatmul.mubr.bf16.vlgmr.msra.gmra.mxu1 %v13365_v48  ;;  %v4236_v39 = vmax.f32 %v3795_v17, %v4108_v18  ;;  %v4235_v51 = vmax.f32 %v3793_v9, %v4107_v45  ;;  %v10850_v18 = vld [vmem:[#allocation12 + $0xec] ss:$28 sps:$4 sm:$0xff]  }
 0x3a2   : > { %v3692_v3 = vadd.f32 %v3691_v35, %v13341_v38  ;;  %7713 = vmatpush1.bf16.msra.mxu1 %v10830_v34  ;;  %v4116_v6 = vmul.f32 0.2, %v3799_v24  ;;  %v4243_v23 = vmax.f32 %v3797_v31, %v4115_v8  ;;  %v3803_v54 = vadd.f32 %v3802_v19, %v3690_v15 }
 0x3a3   : > { %v3804_v1 = vpop.f32.mrf.mxu0  ;;  %v3693_v43 = vpop.f32.mrf.mxu1  ;;  %7714 = vmatprep.subr.bf16.mxu1 %v10838_v47  ;;  %v10842_v47 = vld [vmem:[#allocation12 + $0x120] ss:$28 sps:$4 sm:$0xff]  }
 0x3a4   : > { %v3805_v5 = vadd.f32 %v3804_v1, %v3692_v3  ;;  %v3694_v28 = vadd.f32 %v3693_v43, %v13336_v33  ;;  %v4244_v30 = vmax.f32 %v3799_v24, %v4116_v6  ;;  %v13376_v31 = vpack.c.bf16 %v4243_v23, %v4235_v51  ;;  %v10848_v43 = vld [vmem:[#allocation12 + $0xe8] ss:$28 sps:$4 sm:$0xff]  }
 0x3a5   : > { %v3806_v63 = vpop.f32.mrf.mxu0  ;;  %v3695_v21 = vpop.f32.mrf.mxu1  ;;  %v4123_v19 = vmul.f32 0.2, %v3803_v54 }
 0x3a6   : > { %v3807_v46 = vadd.f32 %v3806_v63, %v3694_v28  ;;  %v3696_v35 = vadd.f32 %v3695_v21, %v13341_v38  ;;  %7715 = vmatpush1.bf16.msra.mxu1 %v10836_v40  ;;  %v13374_v34 = vpack.c.bf16 %v4244_v30, %v4236_v39  ;;  %v4124_v8 = vmul.f32 0.2, %v3805_v5  ;;  %v10856_v39 = vld [vmem:[#allocation12 + $0xb4] ss:$28 sps:$4 sm:$0xff]  }
 0x3a7   : > { %v3808_v13 = vpop.f32.mrf.mxu0  ;;  %v3699_v52 = vpop.f32.mrf.mxu1  ;;  %7716 = vmatprep.subr.bf16.mxu1 %v10844_v26  ;;  %v4251_v51 = vmax.f32 %v3803_v54, %v4123_v19 }
 0x3a8   : > { %v4131_v3 = vmul.f32 0.2, %v3807_v46  ;;  %v3809_v17 = vadd.f32 %v3808_v13, %v3696_v35  ;;  %7528 = vmatprep.mubr.bf16.mxu1 %v13374_v34  ;;  %v3700_v15 = vadd.f32 %v3699_v52, %v13336_v33  ;;  %v4252_v26 = vmax.f32 %v3805_v5, %v4124_v8  ;;  %v10854_v5 = vld [vmem:[#allocation12 + $0xb0] ss:$28 sps:$4 sm:$0xff]  }
 0x3a9   : > { %v3812_v24 = vpop.f32.mrf.mxu0  ;;  %v3701_v9 = vpop.f32.mrf.mxu1  ;;  %7529 = vmatmul.mubr.bf16.gmra.mxu1 %v13376_v31 }
 0x3aa   : > { %v4132_v45 = vmul.f32 0.2, %v3809_v17  ;;  %v3702_v40 = vadd.f32 %v3701_v9, %v13341_v38  ;;  %7717 = vmatpush1.bf16.msra.mxu1 %v10842_v47  ;;  %v4259_v23 = vmax.f32 %v3807_v46, %v4131_v3  ;;  %v3813_v35 = vadd.f32 %v3812_v24, %v3700_v15 }
 0x3ab   : > { %v3814_v6 = vpop.f32.mrf.mxu0  ;;  %v3703_v1 = vpop.f32.mrf.mxu1  ;;  %7718 = vmatprep.subr.bf16.mxu1 %v10850_v18 }
 0x3ac   : > { %v4260_v13 = vmax.f32 %v3809_v17, %v4132_v45  ;;  %v3815_v28 = vadd.f32 %v3814_v6, %v3702_v40  ;;  %v3704_v30 = vadd.f32 %v3703_v1, %v13336_v33  ;;  %v13386_v46 = vpack.c.bf16 %v4259_v23, %v4251_v51  ;;  %v10862_v17 = vld [vmem:[#allocation12 + $0x7c] ss:$28 sps:$4 sm:$0xff]  }
 0x3ad   : > { %v3816_v63 = vpop.f32.mrf.mxu0  ;;  %v3705_v21 = vpop.f32.mrf.mxu1  ;;  %v4139_v45 = vmul.f32 0.2, %v3813_v35 }
 0x3ae   : > { %v13383_v52 = vpack.c.bf16 %v4260_v13, %v4252_v26  ;;  %v3706_v9 = vadd.f32 %v3705_v21, %v13341_v38  ;;  %v3817_v59 = vadd.f32 %v3816_v63, %v3704_v30  ;;  %7719 = vmatpush1.bf16.msra.mxu1 %v10848_v43  ;;  %15355 = vst [vmem:[#allocation54_spill] sm:$0xff] %v13386_v46  ;;  %v4140_v8 = vmul.f32 0.2, %v3815_v28  ;;  %v10860_v43 = vld [vmem:[#allocation12 + $0x78] ss:$28 sps:$4 sm:$0xff]  }
 0x3af   : > { %v3818_v47 = vpop.f32.mrf.mxu0  ;;  %v3709_v41 = vpop.f32.mrf.mxu1  ;;  %7720 = vmatprep.subr.bf16.mxu1 %v10856_v39  ;;  %v10868_v30 = vld [vmem:[#allocation12 + $0x44] ss:$28 sps:$4 sm:$0xff]  }
 0x3b0   : > { %v3819_v3 = vadd.f32 %v3818_v47, %v3706_v9  ;;  %7538 = vmatprep.mubr.bf16.mxu1 %v13383_v52  ;;  %v4147_v18 = vmul.f32 0.2, %v3817_v59  ;;  %v3710_v15 = vadd.f32 %v3709_v41, %v13336_v33  ;;  %v4268_v26 = vmax.f32 %v3815_v28, %v4140_v8  ;;  %v10866_v28 = vld [vmem:[#allocation12 + $0x40] ss:$28 sps:$4 sm:$0xff]  }
 0x3b1   : > { %v3822_v54 = vpop.f32.mrf.mxu0  ;;  %v3711_v19 = vpop.f32.mrf.mxu1  ;;  %7539 = vmatmul.mubr.bf16.gmra.mxu1 %v13386_v46  ;;  %v4267_v9 = vmax.f32 %v3813_v35, %v4139_v45 }
 0x3b2   : > { %v4148_v24 = vmul.f32 0.2, %v3819_v3  ;;  %v3712_v40 = vadd.f32 %v3711_v19, %v13341_v38  ;;  %7721 = vmatpush1.bf16.msra.mxu1 %v10854_v5  ;;  %v4275_v23 = vmax.f32 %v3817_v59, %v4147_v18  ;;  %v3823_v47 = vadd.f32 %v3822_v54, %v3710_v15 }
 0x3b3   : > { %v3824_v6 = vpop.f32.mrf.mxu0  ;;  %v3713_v1 = vpop.f32.mrf.mxu1  ;;  %7722 = vmatprep.subr.bf16.mxu1 %v10862_v17 }
 0x3b4   : > { %v4276_v13 = vmax.f32 %v3819_v3, %v4148_v24  ;;  %v3714_v39 = vadd.f32 %v3713_v1, %v13336_v33  ;;  %v3825_v63 = vadd.f32 %v3824_v6, %v3712_v40  ;;  %v13396_v59 = vpack.c.bf16 %v4275_v23, %v4267_v9  ;;  %v10874_v3 = vld [vmem:[#allocation12 + $0xc] ss:$28 sps:$4 sm:$0xff]  }
 0x3b5   : > { %v3826_v21 = vpop.f32.mrf.mxu0  ;;  %v3715_v51 = vpop.f32.mrf.mxu1  ;;  %v4155_v24 = vmul.f32 0.2, %v3823_v47 }
 0x3b6   : > { %v13393_v41 = vpack.c.bf16 %v4276_v13, %v4268_v26  ;;  %v3827_v19 = vadd.f32 %v3826_v21, %v3714_v39  ;;  %v3716_v42 = vadd.f32 %v3715_v51, %v13341_v38  ;;  %7723 = vmatpush1.bf16.msra.mxu1 %v10860_v43  ;;  %15357 = vst [vmem:[#allocation56_spill] sm:$0xff] %v13396_v59  ;;  %v4156_v17 = vmul.f32 0.2, %v3825_v63  ;;  %v10872_v43 = vld [vmem:[#allocation12 + $0x8] ss:$28 sps:$4 sm:$0xff]  }
 0x3b7   : > { %v3828_v5 = vpop.f32.mrf.mxu0  ;;  %v3719_v16 = vpop.f32.mrf.mxu1  ;;  %7724 = vmatprep.subr.bf16.mxu1 %v10868_v30 }
 0x3b8   : > { %15356 = vst [vmem:[#allocation55_spill] sm:$0xff] %v13393_v41  ;;  %v4163_v8 = vmul.f32 0.2, %v3827_v19  ;;  %7548 = vmatprep.mubr.bf16.mxu1 %v13393_v41  ;;  %v3829_v18 = vadd.f32 %v3828_v5, %v3716_v42  ;;  %v3720_v54 = vadd.f32 %v3719_v16, %v13336_v33  ;;  %v10880_v42 = vld [vmem:[#allocation12 + $0x354] ss:$28 sps:$4 sm:$0xff]   ;;  %v4284_v39 = vmax.f32 %v3825_v63, %v4156_v17 }
 0x3b9   : > { %v3832_v35 = vpop.f32.mrf.mxu0  ;;  %v3721_v45 = vpop.f32.mrf.mxu1  ;;  %7549 = vmatmul.mubr.bf16.gmra.mxu1 %v13396_v59  ;;  %v4283_v16 = vmax.f32 %v3823_v47, %v4155_v24  ;;  %v10886_v63 = vld [vmem:[#allocation12 + $0x31c] ss:$28 sps:$4 sm:$0xff]  }
 0x3ba   : > { %v3722_v15 = vadd.f32 %v3721_v45, %v13341_v38  ;;  %v4164_v40 = vmul.f32 0.2, %v3829_v18  ;;  %7725 = vmatpush1.bf16.msra.mxu1 %v10866_v28  ;;  %v4291_v26 = vmax.f32 %v3827_v19, %v4163_v8  ;;  %v3833_v9 = vadd.f32 %v3832_v35, %v3720_v54  ;;  %v10878_v19 = vld [vmem:[#allocation12 + $0x350] ss:$28 sps:$4 sm:$0xff]  }
 0x3bb   : > { %v3834_v6 = vpop.f32.mrf.mxu0  ;;  %v3723_v1 = vpop.f32.mrf.mxu1  ;;  %7726 = vmatprep.subr.bf16.mxu1 %v10874_v3 }
 0x3bc   : > { %v3835_v23 = vadd.f32 %v3834_v6, %v3722_v15  ;;  %v3724_v13 = vadd.f32 %v3723_v1, %v13336_v33  ;;  %v4292_v30 = vmax.f32 %v3829_v18, %v4164_v40  ;;  %v13406_v8 = vpack.c.bf16 %v4291_v26, %v4283_v16 }
 0x3bd   : > { %v3836_v21 = vpop.f32.mrf.mxu0  ;;  %v3725_v51 = vpop.f32.mrf.mxu1  ;;  %v4171_v18 = vmul.f32 0.2, %v3833_v9 }
 0x3be   : > { %v3837_v5 = vadd.f32 %v3836_v21, %v3724_v13  ;;  %v3726_v45 = vadd.f32 %v3725_v51, %v13341_v38  ;;  %v13404_v0 = vpack.c.bf16 %v4292_v30, %v4284_v39  ;;  %7727 = vmatpush1.bf16.msra.mxu1 %v10872_v43  ;;  %15359 = vst [vmem:[#allocation58_spill] sm:$0xff] %v13406_v8  ;;  %v4172_v15 = vmul.f32 0.2, %v3835_v23  ;;  %v10884_v43 = vld [vmem:[#allocation12 + $0x318] ss:$28 sps:$4 sm:$0xff]  }
 0x3bf   : > { %v3838_v28 = vpop.f32.mrf.mxu0  ;;  %v3729_v58 = vpop.f32.mrf.mxu1  ;;  %7728 = vmatprep.subr.bf16.mxu1 %v10880_v42  ;;  %v10892_v30 = vld [vmem:[#allocation12 + $0x2e4] ss:$28 sps:$4 sm:$0xff]  }
 0x3c0   : > { %15358 = vst [vmem:[#allocation57_spill] sm:$0xff] %v13404_v0  ;;  %v4179_v3 = vmul.f32 0.2, %v3837_v5  ;;  %v3839_v6 = vadd.f32 %v3838_v28, %v3726_v45  ;;  %7558 = vmatprep.mubr.bf16.mxu1 %v13404_v0  ;;  %v3730_v24 = vadd.f32 %v3729_v58, %v13336_v33  ;;  %v4300_v26 = vmax.f32 %v3835_v23, %v4172_v15  ;;  %v10890_v23 = vld [vmem:[#allocation12 + $0x2e0] ss:$28 sps:$4 sm:$0xff]  }
 0x3c1   : > { %v3842_v17 = vpop.f32.mrf.mxu0  ;;  %v3731_v47 = vpop.f32.mrf.mxu1  ;;  %7559 = vmatmul.mubr.bf16.gmra.mxu1 %v13406_v8  ;;  %v4299_v45 = vmax.f32 %v3833_v9, %v4171_v18 }
 0x3c2   : > { %v4180_v35 = vmul.f32 0.2, %v3839_v6  ;;  %v3732_v54 = vadd.f32 %v3731_v47, %v13341_v38  ;;  %7729 = vmatpush2.bf16.msra.mxu1 %v10878_v19  ;;  %v4307_v13 = vmax.f32 %v3837_v5, %v4179_v3  ;;  %v3843_v28 = vadd.f32 %v3842_v17, %v3730_v24 }
 0x3c3   : > { %v3844_v40 = vpop.f32.mrf.mxu0  ;;  %v3733_v1 = vpop.f32.mrf.mxu1  ;;  %7730 = vmatprep.subr.bf16.mxu1 %v10886_v63  ;;  %v15130_v17 = vsub.s32 6, %v15349_v11 }
 0x3c4   : > { %v4308_v42 = vmax.f32 %v3839_v6, %v4180_v35  ;;  %v3845_v39 = vadd.f32 %v3844_v40, %v3732_v54  ;;  %v3734_v21 = vadd.f32 %v3733_v1, %v13336_v33  ;;  %v13416_v5 = vpack.c.bf16 %v4307_v13, %v4299_v45  ;;  %v10898_v6 = vld [vmem:[#allocation12 + $0x2ac] ss:$28 sps:$4 sm:$0xff]  }
 0x3c5   : > { %v3846_v51 = vpop.f32.mrf.mxu0  ;;  %v3735_v16 = vpop.f32.mrf.mxu1  ;;  %v1893_v35 = vsub.s32 7, %v15349_v11  ;;  %v4187_v24 = vmul.f32 0.2, %v3843_v28  ;;  %v10896_v13 = vld [vmem:[#allocation12 + $0x2a8] ss:$28 sps:$4 sm:$0xff]  }
 0x3c6   : > { %v13413_v58 = vpack.c.bf16 %v4308_v42, %v4300_v26  ;;  %v3736_v47 = vadd.f32 %v3735_v16, %v13341_v38  ;;  %v3847_v8 = vadd.f32 %v3846_v51, %v3734_v21  ;;  %7731 = vmatpush2.bf16.msra.mxu1 %v10884_v43  ;;  %15361 = vst [vmem:[#allocation60_spill] sm:$0xff] %v13416_v5  ;;  %v4188_v15 = vmul.f32 0.2, %v3845_v39  ;;  %v10904_v16 = vld [vmem:[#allocation12 + $0x274] ss:$28 sps:$4 sm:$0xff]  }
 0x3c7   : > { %v3848_v19 = vpop.f32.mrf.mxu0  ;;  %v3739_v0 = vpop.f32.mrf.mxu1  ;;  %7732 = vmatprep.subr.bf16.mxu1 %v10892_v30 }
 0x3c8   : > { %15360 = vst [vmem:[#allocation59_spill] sm:$0xff] %v13413_v58  ;;  %v3849_v3 = vadd.f32 %v3848_v19, %v3736_v47  ;;  %7568 = vmatprep.mubr.bf16.mxu1 %v13413_v58  ;;  %v4195_v63 = vmul.f32 0.2, %v3847_v8  ;;  %v3740_v40 = vadd.f32 %v3739_v0, %v13336_v33  ;;  %v4316_v42 = vmax.f32 %v3845_v39, %v4188_v15 }
 0x3c9   : > { %v3852_v9 = vpop.f32.mrf.mxu0  ;;  %v3741_v18 = vpop.f32.mrf.mxu1  ;;  %7569 = vmatmul.mubr.bf16.gmra.mxu1 %v13416_v5  ;;  %v13428_v0 = vrot.slane %v13331_v27, %v15130_v17 }
 0x3ca   : > { %v4196_v54 = vmul.f32 0.2, %v3849_v3  ;;  %v3742_v1 = vadd.f32 %v3741_v18, %v13341_v38  ;;  %7733 = vmatpush2.bf16.msra.mxu1 %v10890_v23  ;;  %v4323_v30 = vmax.f32 %v3847_v8, %v4195_v63  ;;  %v13431_v18 = vrot.slane %v13331_v27, %v1893_v35 }
 0x3cb   : > { %v3854_v43 = vpop.f32.mrf.mxu0  ;;  %v3743_v26 = vpop.f32.mrf.mxu1  ;;  %7734 = vmatprep.subr.bf16.mxu1 %v10898_v6  ;;  %v4315_v23 = vmax.f32 %v3843_v28, %v4187_v24  ;;  %v3853_v8 = vadd.f32 %v3852_v9, %v3740_v40  ;;  %v10902_v6 = vld [vmem:[#allocation12 + $0x270] ss:$28 sps:$4 sm:$0xff]  }
 0x3cc   : > { %v4324_v21 = vmax.f32 %v3849_v3, %v4196_v54  ;;  %v3744_v51 = vadd.f32 %v3743_v26, %v13336_v33  ;;  %v3855_v45 = vadd.f32 %v3854_v43, %v3742_v1  ;;  %v10910_v1 = vld [vmem:[#allocation12 + $0x23c] ss:$28 sps:$4 sm:$0xff]  }
 0x3cd   : > { %v3856_v47 = vpop.f32.mrf.mxu0  ;;  %v3745_v19 = vpop.f32.mrf.mxu1  ;;  %v13436_v63 = vpack.c.bf16 %v4323_v30, %v4315_v23  ;;  %v4203_v40 = vmul.f32 0.2, %v3853_v8 }
 0x3ce   : > { %v13433_v5 = vpack.c.bf16 %v4324_v21, %v4316_v42  ;;  %v3857_v39 = vadd.f32 %v3856_v47, %v3744_v51  ;;  %v3746_v33 = vadd.f32 %v3745_v19, %v13341_v38  ;;  %7735 = vmatpush2.bf16.msra.mxu1 %v10896_v13  ;;  %v4204_v27 = vmul.f32 0.2, %v3855_v45  ;;  %v10908_v42 = vld [vmem:[#allocation12 + $0x238] ss:$28 sps:$4 sm:$0xff]  }
 0x3cf   : > { %v3858_v15 = vpop.f32.mrf.mxu0  ;;  %v3895_v3 = vpop.f32.mrf.mxu1  ;;  %15363 = vst [vmem:[#allocation62_spill] sm:$0xff] %v13436_v63  ;;  %7736 = vmatprep.subr.bf16.mxu1 %v10904_v16  ;;  %v10916_v16 = vld [vmem:[#allocation12 + $0x204] ss:$28 sps:$4 sm:$0xff]  }
 0x3d0   : > { %15362 = vst [vmem:[#allocation61_spill] sm:$0xff] %v13433_v5  ;;  %v4211_v54 = vmul.f32 0.2, %v3857_v39  ;;  %7578 = vmatprep.mubr.bf16.mxu1 %v13433_v5  ;;  %v3859_v35 = vadd.f32 %v3858_v15, %v3746_v33  ;;  %v3896_v28 = vadd.f32 %v3895_v3, %v13428_v0  ;;  %v4332_v47 = vmax.f32 %v3855_v45, %v4204_v27  ;;  %v10922_v45 = vld [vmem:[#allocation12 + $0x1cc] ss:$28 sps:$4 sm:$0xff]  }
 0x3d1   : > { %v4008_v24 = vpop.f32.mrf.mxu0  ;;  %v3897_v9 = vpop.f32.mrf.mxu1  ;;  %7579 = vmatmul.mubr.bf16.gmra.mxu1 %v13436_v63  ;;  %v4331_v3 = vmax.f32 %v3853_v8, %v4203_v40 }
 0x3d2   : > { %v3898_v38 = vadd.f32 %v3897_v9, %v13431_v18  ;;  %v4212_v43 = vmul.f32 0.2, %v3859_v35  ;;  %7737 = vmatpush2.bf16.msra.mxu1 %v10902_v6  ;;  %v4339_v30 = vmax.f32 %v3857_v39, %v4211_v54  ;;  %v4009_v23 = vadd.f32 %v4008_v24, %v3896_v28  ;;  %v10914_v39 = vld [vmem:[#allocation12 + $0x200] ss:$28 sps:$4 sm:$0xff]  }
 0x3d3   : > { %v4010_v26 = vpop.f32.mrf.mxu0  ;;  %v3899_v13 = vpop.f32.mrf.mxu1  ;;  %7738 = vmatprep.subr.bf16.mxu1 %v10910_v1 }
 0x3d4   : > { %v4011_v21 = vadd.f32 %v4010_v26, %v3898_v38  ;;  %v3900_v51 = vadd.f32 %v3899_v13, %v13428_v0  ;;  %v4340_v19 = vmax.f32 %v3859_v35, %v4212_v43  ;;  %v13446_v54 = vpack.c.bf16 %v4339_v30, %v4331_v3  ;;  %v10920_v30 = vld [vmem:[#allocation12 + $0x1c8] ss:$28 sps:$4 sm:$0xff]  }
 0x3d5   : > { %v4012_v33 = vpop.f32.mrf.mxu0  ;;  %v3901_v15 = vpop.f32.mrf.mxu1  ;;  %v4093_v27 = vmul.f32 0.2, %v4009_v23 }
 0x3d6   : > { %v4013_v9 = vadd.f32 %v4012_v33, %v3900_v51  ;;  %v3902_v17 = vadd.f32 %v3901_v15, %v13431_v18  ;;  %v13444_v11 = vpack.c.bf16 %v4340_v19, %v4332_v47  ;;  %7739 = vmatpush2.bf16.msra.mxu1 %v10908_v42  ;;  %15365 = vst [vmem:[#allocation64_spill] sm:$0xff] %v13446_v54  ;;  %v4094_v38 = vmul.f32 0.2, %v4011_v21  ;;  %v15366_v42 = vld [vmem:[#allocation35_spill] sm:$0xff] }
 0x3d7   : > { %v4014_v6 = vpop.f32.mrf.mxu0  ;;  %v3905_v63 = vpop.f32.mrf.mxu1  ;;  %7740 = vmatprep.subr.bf16.mxu1 %v10916_v16  ;;  %v4221_v19 = vmax.f32 %v4009_v23, %v4093_v27  ;;  %v10931_v23 = vld [vmem:[#allocation12 + $0x4dc] ss:$28 sps:$4 sm:$0xff]  }
 0x3d8   : > { %15364 = vst [vmem:[#allocation63_spill] sm:$0xff] %v13444_v11  ;;  %v4101_v1 = vmul.f32 0.2, %v4013_v9  ;;  %v4015_v26 = vadd.f32 %v4014_v6, %v3902_v17  ;;  %v3906_v35 = vadd.f32 %v3905_v63, %v13428_v0  ;;  %7588 = vmatprep.mubr.bf16.mxu1 %v13444_v11  ;;  %v4222_v51 = vmax.f32 %v4011_v21, %v4094_v38  ;;  %v10928_v63 = vld [vmem:[#allocation12 + $0x894] ss:$28 sps:$4 sm:$0xff]  }
 0x3d9   : > { %v4018_v8 = vpop.f32.mrf.mxu0  ;;  %v3907_v28 = vpop.f32.mrf.mxu1  ;;  %7589 = vmatmul.mubr.bf16.gmra.mxu1 %v13446_v54  ;;  %v10926_v38 = vld [vmem:[#allocation12 + $0x890] ss:$28 sps:$4 sm:$0xff]   ;;  %v10934_v27 = vld [vmem:[#allocation12 + $0x85c] ss:$28 sps:$4 sm:$0xff]  }
 0x3da   : > { %v4102_v24 = vmul.f32 0.2, %v4015_v26  ;;  %v3908_v40 = vadd.f32 %v3907_v28, %v13431_v18  ;;  %v4229_v43 = vmax.f32 %v4013_v9, %v4101_v1  ;;  %7741 = vmatpush2.bf16.msra.mxu1 %v10914_v39  ;;  %7744 = vmatprep.mubr.bf16.mxu1 %v15366_v42  ;;  %v4019_v33 = vadd.f32 %v4018_v8, %v3906_v35  ;;  %v10923_v39 = vld [vmem:[#allocation12 + $0x510] ss:$28 sps:$4 sm:$0xff]  }
 0x3db   : > { %v4020_v13 = vpop.f32.mrf.mxu0  ;;  %v3909_v17 = vpop.f32.mrf.mxu1  ;;  %7742 = vmatprep.subr.bf16.mxu1 %v10922_v45 }
 0x3dc   : > { %v4230_v16 = vmax.f32 %v4015_v26, %v4102_v24  ;;  %v4021_v47 = vadd.f32 %v4020_v13, %v3908_v40  ;;  %v3910_v15 = vadd.f32 %v3909_v17, %v13428_v0  ;;  %v13457_v1 = vpack.c.bf16 %v4229_v43, %v4221_v19  ;;  %v10932_v19 = vld [vmem:[#allocation12 + $0x858] ss:$28 sps:$4 sm:$0xff]  }
 0x3dd   : > { %v4022_v3 = vpop.f32.mrf.mxu0  ;;  %v3911_v6 = vpop.f32.mrf.mxu1  ;;  %v4109_v35 = vmul.f32 0.2, %v4019_v33 }
 0x3de   : > { %v13454_v28 = vpack.c.bf16 %v4230_v16, %v4222_v51  ;;  %v3912_v9 = vadd.f32 %v3911_v6, %v13431_v18  ;;  %15368 = vst [vmem:[#allocation66_spill] sm:$0xff] %v13457_v1  ;;  %v4023_v42 = vadd.f32 %v4022_v3, %v3910_v15  ;;  %7743 = vmatpush2.bf16.msra.mxu1 %v10920_v30  ;;  %v4110_v26 = vmul.f32 0.2, %v4021_v47  ;;  %v15369_v16 = vld [vmem:[#allocation37_spill] sm:$0xff]  ;;  %v10937_v15 = vld [vmem:[#allocation12 + $0x4a4] ss:$28 sps:$4 sm:$0xff]  }
 0x3df   : > { %v4024_v54 = vpop.f32.mrf.mxu0  ;;  %v3915_v21 = vpop.f32.mrf.mxu1  ;;  %7938 = vmatprep.subr.bf16.mxu1 %v10928_v63 }
 0x3e0   : > { %15367 = vst [vmem:[#allocation65_spill] sm:$0xff] %v13454_v28  ;;  %v4025_v45 = vadd.f32 %v4024_v54, %v3912_v9  ;;  %7631 = vmatprep.mubr.bf16.mxu0 %v13454_v28  ;;  %v4117_v8 = vmul.f32 0.2, %v4023_v42  ;;  %v3916_v13 = vadd.f32 %v3915_v21, %v13428_v0  ;;  %v10929_v54 = vld [vmem:[#allocation12 + $0x4d8] ss:$28 sps:$4 sm:$0xff]   ;;  %v4238_v3 = vmax.f32 %v4021_v47, %v4110_v26 }
 0x3e1   : > { %v4028_v24 = vpop.f32.mrf.mxu0  ;;  %v3917_v40 = vpop.f32.mrf.mxu1  ;;  %7632 = vmatmul.mubr.bf16.vlgmr.msra.gmra.mxu0 %v13457_v1  ;;  %7745 = vmatmul.mubr.bf16.vlgmr.msra.gmra.mxu1 %v12998_v56  ;;  %v10940_v21 = vld [vmem:[#allocation12 + $0x824] ss:$28 sps:$4 sm:$0xff]  }
 0x3e2   : > { %v4118_v43 = vmul.f32 0.2, %v4025_v45  ;;  %v3918_v17 = vadd.f32 %v3917_v40, %v13431_v18  ;;  %7826 = vmatpush1.bf16.msra.mxu0 %v10923_v39  ;;  %v4245_v30 = vmax.f32 %v4023_v42, %v4117_v8  ;;  %7754 = vmatprep.mubr.bf16.mxu1 %v15369_v16  ;;  %v4237_v40 = vmax.f32 %v4019_v33, %v4109_v35  ;;  %v10943_v33 = vld [vmem:[#allocation12 + $0x46c] ss:$28 sps:$4 sm:$0xff]  }
 0x3e3   : > { %v4030_v51 = vpop.f32.mrf.mxu0  ;;  %7939 = vmatpush1.bf16.msra.mxu1 %v10926_v38  ;;  %v3919_v63 = vpop.f32.mrf.mxu1  ;;  %7827 = vmatprep.subr.bf16.mxu0 %v10931_v23  ;;  %v4029_v42 = vadd.f32 %v4028_v24, %v3916_v13  ;;  %v10935_v38 = vld [vmem:[#allocation12 + $0x4a0] ss:$28 sps:$4 sm:$0xff]   ;;  %v10946_v35 = vld [vmem:[#allocation12 + $0x7ec] ss:$28 sps:$4 sm:$0xff]  }
 0x3e4   : > { %v4246_v6 = vmax.f32 %v4025_v45, %v4118_v43  ;;  %v3920_v9 = vadd.f32 %v3919_v63, %v13428_v0  ;;  %7940 = vmatprep.subr.bf16.mxu1 %v10934_v27  ;;  %v4031_v1 = vadd.f32 %v4030_v51, %v3918_v17  ;;  %v13468_v16 = vpack.c.bf16 %v4245_v30, %v4237_v40  ;;  %v10938_v23 = vld [vmem:[#allocation12 + $0x820] ss:$28 sps:$4 sm:$0xff]   ;;  %v10941_v51 = vld [vmem:[#allocation12 + $0x468] ss:$28 sps:$4 sm:$0xff]  }
 0x3e5   : > { %v4032_v56 = vpop.f32.mrf.mxu0  ;;  %v3921_v39 = vpop.f32.mrf.mxu1  ;;  %v4125_v17 = vmul.f32 0.2, %v4029_v42 }
 0x3e6   : > { %v13466_v28 = vpack.c.bf16 %v4246_v6, %v4238_v3  ;;  %v4033_v8 = vadd.f32 %v4032_v56, %v3920_v9  ;;  %7828 = vmatpush1.bf16.msra.mxu0 %v10929_v54  ;;  %15371 = vst [vmem:[#allocation68_spill] sm:$0xff] %v13468_v16  ;;  %v3922_v47 = vadd.f32 %v3921_v39, %v13431_v18  ;;  %v4126_v43 = vmul.f32 0.2, %v4031_v1  ;;  %v10944_v3 = vld [vmem:[#allocation12 + $0x7e8] ss:$28 sps:$4 sm:$0xff]  }
 0x3e7   : > { %v4034_v26 = vpop.f32.mrf.mxu0  ;;  %7941 = vmatpush1.bf16.msra.mxu1 %v10932_v19  ;;  %v3925_v45 = vpop.f32.mrf.mxu1  ;;  %7829 = vmatprep.subr.bf16.mxu0 %v10937_v15  ;;  %v10949_v6 = vld [vmem:[#allocation12 + $0x434] ss:$28 sps:$4 sm:$0xff]  }
 0x3e8   : > { %15370 = vst [vmem:[#allocation67_spill] sm:$0xff] %v13466_v28  ;;  %v4133_v27 = vmul.f32 0.2, %v4033_v8  ;;  %7641 = vmatprep.mubr.bf16.mxu0 %v13466_v28  ;;  %7942 = vmatprep.subr.bf16.mxu1 %v10940_v21  ;;  %v4035_v24 = vadd.f32 %v4034_v26, %v3922_v47  ;;  %v3926_v54 = vadd.f32 %v3925_v45, %v13428_v0  ;;  %v10952_v39 = vld [vmem:[#allocation12 + $0x7b4] ss:$28 sps:$4 sm:$0xff]  }
 0x3e9   : > { %v4038_v56 = vpop.f32.mrf.mxu0  ;;  %v3927_v13 = vpop.f32.mrf.mxu1  ;;  %7642 = vmatmul.mubr.bf16.gmra.mxu0 %v13468_v16  ;;  %7755 = vmatmul.mubr.bf16.gmra.mxu1 %v13034_v10  ;;  %v4254_v47 = vmax.f32 %v4031_v1, %v4126_v43  ;;  %v10950_v43 = vld [vmem:[#allocation12 + $0x7b0] ss:$28 sps:$4 sm:$0xff]  }
 0x3ea   : > { %v3928_v30 = vadd.f32 %v3927_v13, %v13431_v18  ;;  %7830 = vmatpush1.bf16.msra.mxu0 %v10935_v38  ;;  %v4134_v63 = vmul.f32 0.2, %v4035_v24  ;;  %7764 = vmatprep.mubr.bf16.mxu1 %v13057_v7  ;;  %v4261_v9 = vmax.f32 %v4033_v8, %v4133_v27  ;;  %v4253_v13 = vmax.f32 %v4029_v42, %v4125_v17  ;;  %v10955_v42 = vld [vmem:[#allocation12 + $0x3fc] ss:$28 sps:$4 sm:$0xff]  }
 0x3eb   : > { %v4040_v19 = vpop.f32.mrf.mxu0  ;;  %7943 = vmatpush1.bf16.msra.mxu1 %v10938_v23  ;;  %v3929_v15 = vpop.f32.mrf.mxu1  ;;  %7831 = vmatprep.subr.bf16.mxu0 %v10943_v33  ;;  %v4039_v10 = vadd.f32 %v4038_v56, %v3926_v54  ;;  %v10958_v17 = vld [vmem:[#allocation12 + $0x77c] ss:$28 sps:$4 sm:$0xff]  }
 0x3ec   : > { %v4041_v21 = vadd.f32 %v4040_v19, %v3928_v30  ;;  %v3930_v40 = vadd.f32 %v3929_v15, %v13428_v0  ;;  %7944 = vmatprep.subr.bf16.mxu1 %v10946_v35  ;;  %v4262_v26 = vmax.f32 %v4035_v24, %v4134_v63  ;;  %v10947_v30 = vld [vmem:[#allocation12 + $0x430] ss:$28 sps:$4 sm:$0xff]   ;;  %v13481_v33 = vpack.c.bf16 %v4261_v9, %v4253_v13  ;;  %v10961_v13 = vld [vmem:[#allocation12 + $0x3c4] ss:$28 sps:$4 sm:$0xff]  }
 0x3ed   : > { %v4042_v45 = vpop.f32.mrf.mxu0  ;;  %v3931_v38 = vpop.f32.mrf.mxu1  ;;  %v4141_v54 = vmul.f32 0.2, %v4039_v10 }
 0x3ee   : > { %v4043_v16 = vadd.f32 %v4042_v45, %v3930_v40  ;;  %v3932_v7 = vadd.f32 %v3931_v38, %v13431_v18  ;;  %7832 = vmatpush1.bf16.msra.mxu0 %v10941_v51  ;;  %v13479_v23 = vpack.c.bf16 %v4262_v26, %v4254_v47  ;;  %v4142_v28 = vmul.f32 0.2, %v4041_v21  ;;  %15373 = vst [vmem:[#allocation70_spill] sm:$0xff] %v13481_v33  ;;  %v10956_v47 = vld [vmem:[#allocation12 + $0x778] ss:$28 sps:$4 sm:$0xff]  }
 0x3ef   : > { %v4044_v8 = vpop.f32.mrf.mxu0  ;;  %7945 = vmatpush1.bf16.msra.mxu1 %v10944_v3  ;;  %v3935_v27 = vpop.f32.mrf.mxu1  ;;  %7833 = vmatprep.subr.bf16.mxu0 %v10949_v6  ;;  %v10953_v6 = vld [vmem:[#allocation12 + $0x3f8] ss:$28 sps:$4 sm:$0xff]  }
 0x3f0   : > { %15372 = vst [vmem:[#allocation69_spill] sm:$0xff] %v13479_v23  ;;  %v4149_v1 = vmul.f32 0.2, %v4043_v16  ;;  %v4045_v35 = vadd.f32 %v4044_v8, %v3932_v7  ;;  %7946 = vmatprep.subr.bf16.mxu1 %v10952_v39  ;;  %7651 = vmatprep.mubr.bf16.mxu0 %v13479_v23  ;;  %v3936_v63 = vadd.f32 %v3935_v27, %v13428_v0  ;;  %v10964_v8 = vld [vmem:[#allocation12 + $0x744] ss:$28 sps:$4 sm:$0xff]  }
 0x3f1   : > { %v4048_v24 = vpop.f32.mrf.mxu0  ;;  %v3937_v56 = vpop.f32.mrf.mxu1  ;;  %7652 = vmatmul.mubr.bf16.gmra.mxu0 %v13481_v33  ;;  %7765 = vmatmul.mubr.bf16.gmra.mxu1 %v13070_v49  ;;  %v4270_v15 = vmax.f32 %v4041_v21, %v4142_v28  ;;  %v4269_v28 = vmax.f32 %v4039_v10, %v4141_v54 }
 0x3f2   : > { %v4150_v51 = vmul.f32 0.2, %v4045_v35  ;;  %v3938_v19 = vadd.f32 %v3937_v56, %v13431_v18  ;;  %7834 = vmatpush1.bf16.msra.mxu0 %v10947_v30  ;;  %7774 = vmatprep.mubr.bf16.mxu1 %v13078_v29  ;;  %v4277_v9 = vmax.f32 %v4043_v16, %v4149_v1  ;;  %v4049_v27 = vadd.f32 %v4048_v24, %v3936_v63  ;;  %v10970_v63 = vld [vmem:[#allocation12 + $0x70c] ss:$28 sps:$4 sm:$0xff]  }
 0x3f3   : > { %v4050_v7 = vpop.f32.mrf.mxu0  ;;  %v3939_v3 = vpop.f32.mrf.mxu1  ;;  %7947 = vmatpush1.bf16.msra.mxu1 %v10950_v43  ;;  %7835 = vmatprep.subr.bf16.mxu0 %v10955_v42  ;;  %v10959_v43 = vld [vmem:[#allocation12 + $0x3c0] ss:$28 sps:$4 sm:$0xff]  }
 0x3f4   : > { %v4278_v40 = vmax.f32 %v4045_v35, %v4150_v51  ;;  %v4051_v39 = vadd.f32 %v4050_v7, %v3938_v19  ;;  %v3940_v26 = vadd.f32 %v3939_v3, %v13428_v0  ;;  %7948 = vmatprep.subr.bf16.mxu1 %v10958_v17  ;;  %v13493_v42 = vpack.c.bf16 %v4277_v9, %v4269_v28  ;;  %v10962_v17 = vld [vmem:[#allocation12 + $0x740] ss:$28 sps:$4 sm:$0xff]   ;;  %v10967_v19 = vld [vmem:[#allocation12 + $0x38c] ss:$28 sps:$4 sm:$0xff]  }
 0x3f5   : > { %v4052_v45 = vpop.f32.mrf.mxu0  ;;  %v3941_v38 = vpop.f32.mrf.mxu1 }
 0x3f6   : > { %v13490_v21 = vpack.c.bf16 %v4278_v40, %v4270_v15  ;;  %v3942_v30 = vadd.f32 %v3941_v38, %v13431_v18  ;;  %v4158_v56 = vmul.f32 0.2, %v4051_v39  ;;  %v4053_v16 = vadd.f32 %v4052_v45, %v3940_v26  ;;  %7836 = vmatpush1.bf16.msra.mxu0 %v10953_v6  ;;  %15375 = vst [vmem:[#allocation72_spill] sm:$0xff] %v13493_v42  ;;  %v10965_v26 = vld [vmem:[#allocation12 + $0x388] ss:$28 sps:$4 sm:$0xff]  }
 0x3f7   : > { %v4054_v1 = vpop.f32.mrf.mxu0  ;;  %v3945_v35 = vpop.f32.mrf.mxu1  ;;  %7949 = vmatpush1.bf16.msra.mxu1 %v10956_v47  ;;  %7837 = vmatprep.subr.bf16.mxu0 %v10961_v13  ;;  %v4157_v15 = vmul.f32 0.2, %v4049_v27 }
 0x3f8   : > { %15374 = vst [vmem:[#allocation71_spill] sm:$0xff] %v13490_v21  ;;  %v4055_v51 = vadd.f32 %v4054_v1, %v3942_v30  ;;  %7661 = vmatprep.mubr.bf16.mxu0 %v13490_v21  ;;  %v4165_v10 = vmul.f32 0.2, %v4053_v16  ;;  %7950 = vmatprep.subr.bf16.mxu1 %v10964_v8  ;;  %v3946_v3 = vadd.f32 %v3945_v35, %v13428_v0  ;;  %v10968_v8 = vld [vmem:[#allocation12 + $0x708] ss:$28 sps:$4 sm:$0xff]  }
 0x3f9   : > { %v4058_v54 = vpop.f32.mrf.mxu0  ;;  %v3947_v24 = vpop.f32.mrf.mxu1  ;;  %7662 = vmatmul.mubr.bf16.gmra.mxu0 %v13493_v42  ;;  %7775 = vmatmul.mubr.bf16.gmra.mxu1 %v13076_v53  ;;  %v4286_v9 = vmax.f32 %v4051_v39, %v4158_v56  ;;  %v10973_v35 = vld [vmem:[#allocation12 + $0x6d4] ss:$28 sps:$4 sm:$0xff]   ;;  %v4285_v39 = vmax.f32 %v4049_v27, %v4157_v15 }
 0x3fa   : > { %v4166_v7 = vmul.f32 0.2, %v4055_v51  ;;  %v3948_v6 = vadd.f32 %v3947_v24, %v13431_v18  ;;  %7838 = vmatpush1.bf16.msra.mxu0 %v10959_v43  ;;  %7784 = vmatprep.mubr.bf16.mxu1 %v13131_v32  ;;  %v4293_v45 = vmax.f32 %v4053_v16, %v4165_v10  ;;  %v10976_v24 = vld [vmem:[#allocation12 + $0xa54] ss:$28 sps:$4 sm:$0xff]   ;;  %v4059_v43 = vadd.f32 %v4058_v54, %v3946_v3  ;;  %v10982_v3 = vld [vmem:[#allocation12 + $0xa1c] ss:$28 sps:$4 sm:$0xff]  }
 0x3fb   : > { %v4060_v40 = vpop.f32.mrf.mxu0  ;;  %v3949_v47 = vpop.f32.mrf.mxu1  ;;  %7951 = vmatpush1.bf16.msra.mxu1 %v10962_v17  ;;  %7839 = vmatprep.subr.bf16.mxu0 %v10967_v19  ;;  %v10971_v17 = vld [vmem:[#allocation12 + $0x6d0] ss:$28 sps:$4 sm:$0xff]  }
 0x3fc   : > { %v4294_v38 = vmax.f32 %v4055_v51, %v4166_v7  ;;  %v3950_v13 = vadd.f32 %v3949_v47, %v13428_v0  ;;  %v4061_v28 = vadd.f32 %v4060_v40, %v3948_v6  ;;  %7952 = vmatprep.subr.bf16.mxu1 %v10970_v63  ;;  %v13505_v10 = vpack.c.bf16 %v4293_v45, %v4285_v39  ;;  %v10974_v63 = vld [vmem:[#allocation12 + $0xa50] ss:$28 sps:$4 sm:$0xff]   ;;  %v10979_v7 = vld [vmem:[#allocation12 + $0x69c] ss:$28 sps:$4 sm:$0xff]  }
 0x3fd   : > { %v4062_v30 = vpop.f32.mrf.mxu0  ;;  %v3951_v1 = vpop.f32.mrf.mxu1 }
 0x3fe   : > { %v13502_v56 = vpack.c.bf16 %v4294_v38, %v4286_v9  ;;  %v4063_v32 = vadd.f32 %v4062_v30, %v3950_v13  ;;  %v3952_v53 = vadd.f32 %v3951_v1, %v13431_v18  ;;  %7840 = vmatpush1.bf16.msra.mxu0 %v10965_v26  ;;  %15377 = vst [vmem:[#allocation74_spill] sm:$0xff] %v13505_v10  ;;  %v4174_v6 = vmul.f32 0.2, %v4061_v28  ;;  %v10977_v38 = vld [vmem:[#allocation12 + $0x698] ss:$28 sps:$4 sm:$0xff]  }
 0x3ff   : > { %v4064_v16 = vpop.f32.mrf.mxu0  ;;  %v3955_v51 = vpop.f32.mrf.mxu1  ;;  %7953 = vmatpush1.bf16.msra.mxu1 %v10968_v8  ;;  %7841 = vmatprep.subr.bf16.mxu0 %v10973_v35  ;;  %v4173_v9 = vmul.f32 0.2, %v4059_v43  ;;  %v10980_v1 = vld [vmem:[#allocation12 + $0xa18] ss:$28 sps:$4 sm:$0xff]   ;;  %v10985_v35 = vld [vmem:[#allocation12 + $0x664] ss:$28 sps:$4 sm:$0xff]  }
 0x400   : > { %15376 = vst [vmem:[#allocation73_spill] sm:$0xff] %v13502_v56  ;;  %v4181_v19 = vmul.f32 0.2, %v4063_v32  ;;  %7671 = vmatprep.mubr.bf16.mxu0 %v13502_v56  ;;  %v4065_v27 = vadd.f32 %v4064_v16, %v3952_v53  ;;  %7954 = vmatprep.subr.bf16.mxu1 %v10976_v24  ;;  %v3956_v40 = vadd.f32 %v3955_v51, %v13428_v0 }
 0x401   : > { %v4068_v15 = vpop.f32.mrf.mxu0  ;;  %v3957_v54 = vpop.f32.mrf.mxu1  ;;  %7672 = vmatmul.mubr.bf16.gmra.mxu0 %v13505_v10  ;;  %7785 = vmatmul.mubr.bf16.gmra.mxu1 %v13165_v61  ;;  %v4302_v24 = vmax.f32 %v4061_v28, %v4174_v6  ;;  %v4301_v61 = vmax.f32 %v4059_v43, %v4173_v9  ;;  %v10994_v9 = vld [vmem:[#allocation12 + $0x9ac] ss:$28 sps:$4 sm:$0xff]  }
 0x402   : > { %v3958_v47 = vadd.f32 %v3957_v54, %v13431_v18  ;;  %v4182_v26 = vmul.f32 0.2, %v4065_v27  ;;  %7842 = vmatpush2.bf16.msra.mxu0 %v10971_v17  ;;  %7794 = vmatprep.mubr.bf16.mxu1 %v13194_v12  ;;  %v4309_v13 = vmax.f32 %v4063_v32, %v4181_v19  ;;  %v10988_v54 = vld [vmem:[#allocation12 + $0x9e4] ss:$28 sps:$4 sm:$0xff]   ;;  %v4069_v17 = vadd.f32 %v4068_v15, %v3956_v40 }
 0x403   : > { %v4070_v45 = vpop.f32.mrf.mxu0  ;;  %v3959_v53 = vpop.f32.mrf.mxu1  ;;  %7955 = vmatpush2.bf16.msra.mxu1 %v10974_v63  ;;  %7843 = vmatprep.subr.bf16.mxu0 %v10979_v7  ;;  %v10983_v7 = vld [vmem:[#allocation12 + $0x660] ss:$28 sps:$4 sm:$0xff]  }
 0x404   : > { %v4071_v8 = vadd.f32 %v4070_v45, %v3958_v47  ;;  %v3960_v30 = vadd.f32 %v3959_v53, %v13428_v0  ;;  %v4310_v39 = vmax.f32 %v4065_v27, %v4182_v26  ;;  %7956 = vmatprep.subr.bf16.mxu1 %v10982_v3  ;;  %v13517_v47 = vpack.c.bf16 %v4309_v13, %v4301_v61  ;;  %v10986_v27 = vld [vmem:[#allocation12 + $0x9e0] ss:$28 sps:$4 sm:$0xff]   ;;  %v10991_v3 = vld [vmem:[#allocation12 + $0x62c] ss:$28 sps:$4 sm:$0xff]  }
 0x405   : > { %v4072_v16 = vpop.f32.mrf.mxu0  ;;  %v3961_v51 = vpop.f32.mrf.mxu1  ;;  %v4189_v40 = vmul.f32 0.2, %v4069_v17  ;;  %v10989_v13 = vld [vmem:[#allocation12 + $0x628] ss:$28 sps:$4 sm:$0xff]  }
 0x406   : > { %v4073_v10 = vadd.f32 %v4072_v16, %v3960_v30  ;;  %v3962_v12 = vadd.f32 %v3961_v51, %v13431_v18  ;;  %v13515_v56 = vpack.c.bf16 %v4310_v39, %v4302_v24  ;;  %v4190_v32 = vmul.f32 0.2, %v4071_v8  ;;  %7844 = vmatpush2.bf16.msra.mxu0 %v10977_v38  ;;  %15379 = vst [vmem:[#allocation76_spill] sm:$0xff] %v13517_v47  ;;  %v10992_v24 = vld [vmem:[#allocation12 + $0x9a8] ss:$28 sps:$4 sm:$0xff]  }
 0x407   : > { %v4074_v19 = vpop.f32.mrf.mxu0  ;;  %v3965_v63 = vpop.f32.mrf.mxu1  ;;  %7957 = vmatpush2.bf16.msra.mxu1 %v10980_v1  ;;  %7845 = vmatprep.subr.bf16.mxu0 %v10985_v35 }
 0x408   : > { %15378 = vst [vmem:[#allocation75_spill] sm:$0xff] %v13515_v56  ;;  %v4197_v28 = vmul.f32 0.2, %v4073_v10  ;;  %v4075_v6 = vadd.f32 %v4074_v19, %v3962_v12  ;;  %7681 = vmatprep.mubr.bf16.mxu0 %v13515_v56  ;;  %7958 = vmatprep.subr.bf16.mxu1 %v10988_v54  ;;  %v3966_v45 = vadd.f32 %v3965_v63, %v13428_v0  ;;  %v10997_v54 = vld [vmem:[#allocation12 + $0x5f4] ss:$28 sps:$4 sm:$0xff]  }
 0x409   : > { %v4078_v43 = vpop.f32.mrf.mxu0  ;;  %v3967_v15 = vpop.f32.mrf.mxu1  ;;  %7682 = vmatmul.mubr.bf16.gmra.mxu0 %v13517_v47  ;;  %7795 = vmatmul.mubr.bf16.gmra.mxu1 %v13231_v20  ;;  %v4318_v61 = vmax.f32 %v4071_v8, %v4190_v32  ;;  %v11000_v19 = vld [vmem:[#allocation12 + $0x974] ss:$28 sps:$4 sm:$0xff]   ;;  %v4317_v8 = vmax.f32 %v4069_v17, %v4189_v40  ;;  %v11003_v17 = vld [vmem:[#allocation12 + $0x5bc] ss:$28 sps:$4 sm:$0xff]  }
 0x40a   : > { %v4198_v26 = vmul.f32 0.2, %v4075_v6  ;;  %v3968_v53 = vadd.f32 %v3967_v15, %v13431_v18  ;;  %7846 = vmatpush2.bf16.msra.mxu0 %v10983_v7  ;;  %7804 = vmatprep.mubr.bf16.mxu1 %v13250_v60  ;;  %v4325_v30 = vmax.f32 %v4073_v10, %v4197_v28  ;;  %v4079_v63 = vadd.f32 %v4078_v43, %v3966_v45 }
 0x40b   : > { %v4080_v12 = vpop.f32.mrf.mxu0  ;;  %v3969_v38 = vpop.f32.mrf.mxu1  ;;  %7959 = vmatpush2.bf16.msra.mxu1 %v10986_v27  ;;  %7847 = vmatprep.subr.bf16.mxu0 %v10991_v3 }
 0x40c   : > { %v4326_v1 = vmax.f32 %v4075_v6, %v4198_v26  ;;  %v4081_v35 = vadd.f32 %v4080_v12, %v3968_v53  ;;  %v3970_v39 = vadd.f32 %v3969_v38, %v13428_v0  ;;  %7960 = vmatprep.subr.bf16.mxu1 %v10994_v9  ;;  %v10995_v6 = vld [vmem:[#allocation12 + $0x5f0] ss:$28 sps:$4 sm:$0xff]   ;;  %v13531_v27 = vpack.c.bf16 %v4325_v30, %v4317_v8  ;;  %v11004_v30 = vld [vmem:[#allocation12 + $0x938] ss:$28 sps:$4 sm:$0xff]  }
 0x40d   : > { %v4082_v16 = vpop.f32.mrf.mxu0  ;;  %v3971_v51 = vpop.f32.mrf.mxu1  ;;  %v10998_v9 = vld [vmem:[#allocation12 + $0x970] ss:$28 sps:$4 sm:$0xff]   ;;  %v4205_v26 = vmul.f32 0.2, %v4079_v63 }
 0x40e   : > { %v13526_v32 = vpack.c.bf16 %v4326_v1, %v4318_v61  ;;  %v3972_v7 = vadd.f32 %v3971_v51, %v13431_v18  ;;  %v4083_v15 = vadd.f32 %v4082_v16, %v3970_v39  ;;  %7848 = vmatpush2.bf16.msra.mxu0 %v10989_v13  ;;  %15381 = vst [vmem:[#allocation78_spill] sm:$0xff] %v13531_v27  ;;  %v4206_v0 = vmul.f32 0.2, %v4081_v35  ;;  %v11006_v18 = vld [vmem:[#allocation12 + $0x93c] ss:$28 sps:$4 sm:$0xff]  }
 0x40f   : > { %v4084_v10 = vpop.f32.mrf.mxu0  ;;  %v13529_v28 = vpop.f32.mrf.mxu1  ;;  %7961 = vmatpush2.bf16.msra.mxu1 %v10992_v24  ;;  %7849 = vmatprep.subr.bf16.mxu0 %v10997_v54  ;;  %v11001_v61 = vld [vmem:[#allocation12 + $0x5b8] ss:$28 sps:$4 sm:$0xff]   ;;  %v11009_v24 = vld [vmem:[#allocation12 + $0x584] ss:$28 sps:$4 sm:$0xff]   ;;  %v4333_v16 = vmax.f32 %v4079_v63, %v4205_v26 }
 0x410   : > { %15380 = vst [vmem:[#allocation77_spill] sm:$0xff] %v13526_v32  ;;  %v4085_v3 = vadd.f32 %v4084_v10, %v3972_v7  ;;  %7691 = vmatprep.mubr.bf16.mxu0 %v13526_v32  ;;  %v4213_v40 = vmul.f32 0.2, %v4083_v15  ;;  %7962 = vmatprep.subr.bf16.mxu1 %v11000_v19  ;;  %v4334_v12 = vmax.f32 %v4081_v35, %v4206_v0  ;;  %v11012_v39 = vld [vmem:[#allocation12 + $0x904] ss:$28 sps:$4 sm:$0xff]  }
 0x411   : > { %v13534_v43 = vpop.f32.mrf.mxu1  ;;  %7692 = vmatmul.mubr.bf16.gmra.mxu0 %v13531_v27  ;;  %7805 = vmatmul.mubr.bf16.gmra.mxu1 %v13292_v62  ;;  %v11007_v19 = vld [vmem:[#allocation12 + $0x580] ss:$28 sps:$4 sm:$0xff]   ;;  %v11018_v10 = vld [vmem:[#allocation12 + $0x8cc] ss:$28 sps:$4 sm:$0xff]  }
 0x412   : > { %v4214_v45 = vmul.f32 0.2, %v4085_v3  ;;  %7850 = vmatpush2.bf16.msra.mxu0 %v10995_v6  ;;  %7814 = vmatprep.mubr.bf16.mxu1 %v13295_v4  ;;  %v4341_v38 = vmax.f32 %v4083_v15, %v4213_v40  ;;  %v11010_v35 = vld [vmem:[#allocation12 + $0x900] ss:$28 sps:$4 sm:$0xff]   ;;  %v11015_v15 = vld [vmem:[#allocation12 + $0x54c] ss:$28 sps:$4 sm:$0xff]  }
 0x413   : > { %v13539_v53 = vpop.f32.mrf.mxu1  ;;  %7963 = vmatpush2.bf16.msra.mxu1 %v10998_v9  ;;  %7851 = vmatprep.subr.bf16.mxu0 %v11003_v17  ;;  %v11013_v6 = vld [vmem:[#allocation12 + $0x548] ss:$28 sps:$4 sm:$0xff]   ;;  %v11024_v17 = vld [vmem:[#allocation12 + $0x19c] ss:$28 sps:$4 sm:$0xff]  }
 0x414   : > { %v4342_v13 = vmax.f32 %v4085_v3, %v4214_v45  ;;  %7964 = vmatprep.subr.bf16.mxu1 %v11006_v18  ;;  %v13547_v8 = vpack.c.bf16 %v4341_v38, %v4333_v16  ;;  %v11016_v0 = vld [vmem:[#allocation12 + $0x8c8] ss:$28 sps:$4 sm:$0xff]   ;;  %v11021_v3 = vld [vmem:[#allocation12 + $0xc14] ss:$28 sps:$4 sm:$0xff]   ;;  %v11028_v16 = vld [vmem:[#allocation12 + $0x160] ss:$28 sps:$4 sm:$0xff]  }
 0x415   : > { %v13541_v1 = vpop.f32.mrf.mxu1  ;;  %v11019_v18 = vld [vmem:[#allocation12 + $0xc10] ss:$28 sps:$4 sm:$0xff]   ;;  %v11022_v45 = vld [vmem:[#allocation12 + $0x198] ss:$28 sps:$4 sm:$0xff]  }
 0x416   : > { %v13543_v51 = vpack.c.bf16 %v4342_v13, %v4334_v12  ;;  %7852 = vmatpush2.bf16.msra.mxu0 %v11001_v61  ;;  %15383 = vst [vmem:[#allocation80_spill] sm:$0xff] %v13547_v8  ;;  %v11027_v61 = vld [vmem:[#allocation12 + $0xbdc] ss:$28 sps:$4 sm:$0xff]   ;;  %v11030_v12 = vld [vmem:[#allocation12 + $0x164] ss:$28 sps:$4 sm:$0xff]  }
 0x417   : > { %v13545_v54 = vpop.f32.mrf.mxu1  ;;  %7965 = vmatpush2.bf16.msra.mxu1 %v11004_v30  ;;  %7853 = vmatprep.subr.bf16.mxu0 %v11009_v24  ;;  %v11025_v30 = vld [vmem:[#allocation12 + $0xbd8] ss:$28 sps:$4 sm:$0xff]   ;;  %v11033_v24 = vld [vmem:[#allocation12 + $0xba4] ss:$28 sps:$4 sm:$0xff]  }
 0x418   : > { %15382 = vst [vmem:[#allocation79_spill] sm:$0xff] %v13543_v51  ;;  %7701 = vmatprep.mubr.bf16.mxu0 %v13543_v51  ;;  %7966 = vmatprep.subr.bf16.mxu1 %v11012_v39 }
 0x419   : > { %v13550_v7 = vpop.f32.mrf.mxu1  ;;  %7702 = vmatmul.mubr.bf16.gmra.mxu0 %v13547_v8  ;;  %7815 = vmatmul.mubr.bf16.gmra.mxu1 %v13316_v36 }
 0x41a   : > { %7854 = vmatpush2.bf16.msra.mxu0 %v11007_v19  ;;  %7857 = vmatprep.mubr.bf16.mxu0 %v13106_v2  ;;  %v11036_v19 = vld [vmem:[#allocation12 + $0x12c] ss:$28 sps:$4 sm:$0xff]  }
 0x41b   : > { %v13555_v63 = vpop.f32.mrf.mxu1  ;;  %7967 = vmatpush2.bf16.msra.mxu1 %v11010_v35  ;;  %7970 = vmatprep.mubr.bf16.mxu1 %v13363_v25 }
 0x41c   : > { %7855 = vmatprep.subr.bf16.mxu0 %v11015_v15  ;;  %7968 = vmatprep.subr.bf16.mxu1 %v11018_v10  ;;  %v11031_v10 = vld [vmem:[#allocation12 + $0xba0] ss:$28 sps:$4 sm:$0xff]  }
 0x41d   : > { %v13558_v9 = vpop.f32.mrf.mxu1 }
 0x41e   : > { %7856 = vmatpush2.bf16.msra.mxu0 %v11013_v6 }
 0x41f   : > { %v13560_v40 = vpop.f32.mrf.mxu1  ;;  %7969 = vmatpush2.bf16.msra.mxu1 %v11016_v0  ;;  %8051 = vmatprep.subr.bf16.mxu0 %v11021_v3  ;;  %v11034_v0 = vld [vmem:[#allocation12 + $0x128] ss:$28 sps:$4 sm:$0xff]  }
 0x420   : > { %8164 = vmatprep.subr.bf16.mxu1 %v11024_v17  ;;  %v11039_v3 = vld [vmem:[#allocation12 + $0xb6c] ss:$28 sps:$4 sm:$0xff]   ;;  %v11042_v17 = vld [vmem:[#allocation12 + $0xf4] ss:$28 sps:$4 sm:$0xff]  }
 0x421   : > { %v13562_v26 = vpop.f32.mrf.mxu1  ;;  %7858 = vmatmul.mubr.bf16.vlgmr.msra.gmra.mxu0 %v13111_v50 }
 0x422   : > { %v13565_v38 = vpop.f32.mrf.mxu0  ;;  %7971 = vmatmul.mubr.bf16.vlgmr.msra.gmra.mxu1 %v13365_v48  ;;  %8052 = vmatpush1.bf16.msra.mxu0 %v11019_v18 }
 0x423   : > { %v13568_v13 = vpop.f32.mrf.mxu1  ;;  %7867 = vmatprep.mubr.bf16.mxu0 %v13146_v37  ;;  %7980 = vmatprep.mubr.bf16.mxu1 %v13374_v34 }
 0x424   : > { %15384 = vst [vmem:[#allocation81_spill] sm:$0xff] %v13568_v13  ;;  %8165 = vmatpush1.bf16.msra.mxu1 %v11022_v45  ;;  %8053 = vmatprep.subr.bf16.mxu0 %v11027_v61  ;;  %v13574_v35 = vpop.f32.mrf.mxu0  ;;  %v11037_v61 = vld [vmem:[#allocation12 + $0xb68] ss:$28 sps:$4 sm:$0xff]   ;;  %v11136_v13 = vld [vmem:[#allocation12 + $0x7f0] ss:$28 sps:$4 sm:$0xff]  }
 0x425   : > { %v13572_v39 = vpop.f32.mrf.mxu1  ;;  %8166 = vmatprep.subr.bf16.mxu1 %v11030_v12  ;;  %v11045_v12 = vld [vmem:[#allocation12 + $0xb34] ss:$28 sps:$4 sm:$0xff]  }
 0x426   : > { %15385 = vst [vmem:[#allocation82_spill] sm:$0xff] %v13572_v39  ;;  %8054 = vmatpush1.bf16.msra.mxu0 %v11025_v30  ;;  %v13581_v18 = vpop.f32.mrf.mxu0  ;;  %v11051_v39 = vld [vmem:[#allocation12 + $0xafc] ss:$28 sps:$4 sm:$0xff]  }
 0x427   : > { %v13576_v15 = vpop.f32.mrf.mxu1  ;;  %8055 = vmatprep.subr.bf16.mxu0 %v11033_v24  ;;  %v11040_v24 = vld [vmem:[#allocation12 + $0xf0] ss:$28 sps:$4 sm:$0xff]  }
 0x428   : > { %15386 = vst [vmem:[#allocation83_spill] sm:$0xff] %v13576_v15  ;;  %8167 = vmatpush1.bf16.msra.mxu1 %v11028_v16  ;;  %v11048_v16 = vld [vmem:[#allocation12 + $0xbc] ss:$28 sps:$4 sm:$0xff]  }
 0x429   : > { %v13578_v6 = vpop.f32.mrf.mxu1  ;;  %7868 = vmatmul.mubr.bf16.gmra.mxu0 %v13167_v22  ;;  %8168 = vmatprep.subr.bf16.mxu1 %v11036_v19  ;;  %v13590_v19 = vpop.f32.mrf.mxu0  ;;  %v11046_v15 = vld [vmem:[#allocation12 + $0xb8] ss:$28 sps:$4 sm:$0xff]  }
 0x42a   : > { %15387 = vst [vmem:[#allocation84_spill] sm:$0xff] %v13578_v6  ;;  %7981 = vmatmul.mubr.bf16.gmra.mxu1 %v13376_v31  ;;  %8056 = vmatpush1.bf16.msra.mxu0 %v11031_v10  ;;  %v11043_v10 = vld [vmem:[#allocation12 + $0xb30] ss:$28 sps:$4 sm:$0xff]  }
 0x42b   : > { %v13584_v45 = vpop.f32.mrf.mxu1  ;;  %7877 = vmatprep.mubr.bf16.mxu0 %v13202_v57  ;;  %7990 = vmatprep.mubr.bf16.mxu1 %v13383_v52 }
 0x42c   : > { %15388 = vst [vmem:[#allocation85_spill] sm:$0xff] %v13584_v45  ;;  %8169 = vmatpush1.bf16.msra.mxu1 %v11034_v0  ;;  %8057 = vmatprep.subr.bf16.mxu0 %v11039_v3  ;;  %v11054_v0 = vld [vmem:[#allocation12 + $0x84] ss:$28 sps:$4 sm:$0xff]   ;;  %v13597_v3 = vpop.f32.mrf.mxu0 }
 0x42d   : > { %v13588_v30 = vpop.f32.mrf.mxu1  ;;  %8170 = vmatprep.subr.bf16.mxu1 %v11042_v17 }
 0x42e   : > { %15389 = vst [vmem:[#allocation86_spill] sm:$0xff] %v13588_v30  ;;  %8058 = vmatpush1.bf16.msra.mxu0 %v11037_v61  ;;  %v11049_v61 = vld [vmem:[#allocation12 + $0xaf8] ss:$28 sps:$4 sm:$0xff]  }
 0x42f   : > { %v13592_v6 = vpop.f32.mrf.mxu1  ;;  %8059 = vmatprep.subr.bf16.mxu0 %v11045_v12  ;;  %v11057_v12 = vld [vmem:[#allocation12 + $0xac4] ss:$28 sps:$4 sm:$0xff]  }
 0x430   : > { %15390 = vst [vmem:[#allocation87_spill] sm:$0xff] %v13592_v6  ;;  %8171 = vmatpush1.bf16.msra.mxu1 %v11040_v24  ;;  %v13606_v6 = vpop.f32.mrf.mxu0 }
 0x431   : > { %v13594_v45 = vpop.f32.mrf.mxu1  ;;  %7878 = vmatmul.mubr.bf16.gmra.mxu0 %v13221_v44  ;;  %8172 = vmatprep.subr.bf16.mxu1 %v11048_v16  ;;  %v11060_v16 = vld [vmem:[#allocation12 + $0x4c] ss:$28 sps:$4 sm:$0xff]   ;;  %v15404_v44 = vld [vmem:[#allocation47_spill] sm:$0xff] }
 0x432   : > { %15391 = vst [vmem:[#allocation88_spill] sm:$0xff] %v13594_v45  ;;  %7991 = vmatmul.mubr.bf16.gmra.mxu1 %v13386_v46  ;;  %8060 = vmatpush1.bf16.msra.mxu0 %v11043_v10  ;;  %v11052_v45 = vld [vmem:[#allocation12 + $0x80] ss:$28 sps:$4 sm:$0xff]   ;;  %v11058_v46 = vld [vmem:[#allocation12 + $0x48] ss:$28 sps:$4 sm:$0xff]  }
 0x433   : > { %v13600_v17 = vpop.f32.mrf.mxu1  ;;  %7887 = vmatprep.mubr.bf16.mxu0 %v13264_v55  ;;  %8000 = vmatprep.mubr.bf16.mxu1 %v13393_v41  ;;  %v11055_v10 = vld [vmem:[#allocation12 + $0xac0] ss:$28 sps:$4 sm:$0xff]   ;;  %v11063_v41 = vld [vmem:[#allocation12 + $0xa8c] ss:$28 sps:$4 sm:$0xff]   ;;  %v15400_v55 = vld [vmem:[#allocation45_spill] sm:$0xff] }
 0x434   : > { %15392 = vst [vmem:[#allocation89_spill] sm:$0xff] %v13600_v17  ;;  %8173 = vmatpush1.bf16.msra.mxu1 %v11046_v15  ;;  %8061 = vmatprep.subr.bf16.mxu0 %v11051_v39  ;;  %v11066_v39 = vld [vmem:[#allocation12 + $0x14] ss:$28 sps:$4 sm:$0xff]   ;;  %v13613_v15 = vpop.f32.mrf.mxu0 }
 0x435   : > { %v13604_v24 = vpop.f32.mrf.mxu1  ;;  %8174 = vmatprep.subr.bf16.mxu1 %v11054_v0 }
 0x436   : > { %15393 = vst [vmem:[#allocation90_spill] sm:$0xff] %v13604_v24  ;;  %8062 = vmatpush1.bf16.msra.mxu0 %v11049_v61  ;;  %v11061_v61 = vld [vmem:[#allocation12 + $0xa88] ss:$28 sps:$4 sm:$0xff]   ;;  %v11072_v24 = vld [vmem:[#allocation12 + $0x35c] ss:$28 sps:$4 sm:$0xff]  }
 0x437   : > { %v13608_v30 = vpop.f32.mrf.mxu1  ;;  %8063 = vmatprep.subr.bf16.mxu0 %v11057_v12  ;;  %v15398_v12 = vld [vmem:[#allocation57_spill] sm:$0xff] }
 0x438   : > { %15394 = vst [vmem:[#allocation91_spill] sm:$0xff] %v13608_v30  ;;  %8175 = vmatpush1.bf16.msra.mxu1 %v11052_v45  ;;  %v15397_v30 = vld [vmem:[#allocation44_spill] sm:$0xff]  ;;  %v11069_v45 = vld [vmem:[#allocation12 + $0xdd4] ss:$28 sps:$4 sm:$0xff]  }
 0x439   : > { %v13610_v17 = vpop.f32.mrf.mxu1  ;;  %7888 = vmatmul.mubr.bf16.gmra.mxu0 %v13267_v14  ;;  %8176 = vmatprep.subr.bf16.mxu1 %v11060_v16  ;;  %v13620_v16 = vpop.f32.mrf.mxu0 }
 0x43a   : > { %15395 = vst [vmem:[#allocation92_spill] sm:$0xff] %v13610_v17  ;;  %8001 = vmatmul.mubr.bf16.gmra.mxu1 %v13396_v59  ;;  %8064 = vmatpush1.bf16.msra.mxu0 %v11055_v10  ;;  %v11064_v17 = vld [vmem:[#allocation12 + $0x10] ss:$28 sps:$4 sm:$0xff]   ;;  %v11070_v10 = vld [vmem:[#allocation12 + $0x358] ss:$28 sps:$4 sm:$0xff]  }
 0x43b   : > { %v13616_v0 = vpop.f32.mrf.mxu1  ;;  %7897 = vmatprep.mubr.bf16.mxu0 %v15397_v30  ;;  %8010 = vmatprep.mubr.bf16.mxu1 %v15398_v12  ;;  %v11067_v59 = vld [vmem:[#allocation12 + $0xdd0] ss:$28 sps:$4 sm:$0xff]   ;;  %v11078_v12 = vld [vmem:[#allocation12 + $0x324] ss:$28 sps:$4 sm:$0xff]   ;;  %v13625_v30 = vpop.f32.mrf.mxu0 }
 0x43c   : > { %15396 = vst [vmem:[#allocation93_spill] sm:$0xff] %v13616_v0  ;;  %8177 = vmatpush1.bf16.msra.mxu1 %v11058_v46  ;;  %8065 = vmatprep.subr.bf16.mxu0 %v11063_v41  ;;  %v11075_v0 = vld [vmem:[#allocation12 + $0xd9c] ss:$28 sps:$4 sm:$0xff]   ;;  %15401 = vst [vmem:[#allocation95_spill] sm:$0xff] %v13625_v30 }
 0x43d   : > { %8178 = vmatprep.subr.bf16.mxu1 %v11066_v39  ;;  %v13622_v14 = vpop.f32.mrf.mxu1  ;;  %v15403_v41 = vld [vmem:[#allocation58_spill] sm:$0xff] }
 0x43e   : > { %15399 = vst [vmem:[#allocation94_spill] sm:$0xff] %v13622_v14  ;;  %8066 = vmatpush1.bf16.msra.mxu0 %v11061_v61  ;;  %v11073_v39 = vld [vmem:[#allocation12 + $0xd98] ss:$28 sps:$4 sm:$0xff]   ;;  %v11081_v61 = vld [vmem:[#allocation12 + $0xd64] ss:$28 sps:$4 sm:$0xff]  }
 0x43f   : > { %8067 = vmatprep.subr.bf16.mxu0 %v11069_v45  ;;  %v13627_v46 = vpop.f32.mrf.mxu1  ;;  %v11084_v45 = vld [vmem:[#allocation12 + $0x2ec] ss:$28 sps:$4 sm:$0xff]  }
 0x440   : > { %8179 = vmatpush1.bf16.msra.mxu1 %v11064_v17  ;;  %15402 = vst [vmem:[#allocation96_spill] sm:$0xff] %v13627_v46  ;;  %v11076_v17 = vld [vmem:[#allocation12 + $0x320] ss:$28 sps:$4 sm:$0xff]  }
 0x441   : > { %7898 = vmatmul.mubr.bf16.gmra.mxu0 %v15400_v55  ;;  %8180 = vmatprep.subr.bf16.mxu1 %v11072_v24  ;;  %v13632_v24 = vpop.f32.mrf.mxu0  ;;  %v13634_v14 = vpop.f32.mrf.mxu1  ;;  %v11079_v46 = vld [vmem:[#allocation12 + $0xd60] ss:$28 sps:$4 sm:$0xff]   ;;  %v15407_v55 = vld [vmem:[#allocation48_spill] sm:$0xff] }
 0x442   : > { %8011 = vmatmul.mubr.bf16.gmra.mxu1 %v15403_v41  ;;  %8068 = vmatpush2.bf16.msra.mxu0 %v11067_v59  ;;  %15405 = vst [vmem:[#allocation97_spill] sm:$0xff] %v13632_v24  ;;  %15406 = vst [vmem:[#allocation98_spill] sm:$0xff] %v13634_v14  ;;  %v11082_v59 = vld [vmem:[#allocation12 + $0x2e8] ss:$28 sps:$4 sm:$0xff]   ;;  %v15411_v24 = vld [vmem:[#allocation49_spill] sm:$0xff] }
 0x443   : > { %7907 = vmatprep.mubr.bf16.mxu0 %v15404_v44  ;;  %8020 = vmatprep.mubr.bf16.mxu1 %v13413_v58  ;;  %v11087_v41 = vld [vmem:[#allocation12 + $0xd2c] ss:$28 sps:$4 sm:$0xff]   ;;  %v11090_v58 = vld [vmem:[#allocation12 + $0x2b4] ss:$28 sps:$4 sm:$0xff]   ;;  %v13637_v44 = vpop.f32.mrf.mxu0 }
 0x444   : > { %8181 = vmatpush2.bf16.msra.mxu1 %v11070_v10  ;;  %8069 = vmatprep.subr.bf16.mxu0 %v11075_v0  ;;  %15408 = vst [vmem:[#allocation99_spill] sm:$0xff] %v13637_v44  ;;  %v13639_v0 = vpop.f32.mrf.mxu1  ;;  %v11085_v10 = vld [vmem:[#allocation12 + $0xd28] ss:$28 sps:$4 sm:$0xff]  }
 0x445   : > { %8182 = vmatprep.subr.bf16.mxu1 %v11078_v12  ;;  %15409 = vst [vmem:[#allocation100_spill] sm:$0xff] %v13639_v0  ;;  %v15410_v12 = vld [vmem:[#allocation60_spill] sm:$0xff] }
 0x446   : > { %8070 = vmatpush2.bf16.msra.mxu0 %v11073_v39  ;;  %v11093_v39 = vld [vmem:[#allocation12 + $0xcf4] ss:$28 sps:$4 sm:$0xff]   ;;  %v13646_v14 = vpop.f32.mrf.mxu1  ;;  %v15435_v44 = vld [vmem:[#allocation68_spill] sm:$0xff] }
 0x447   : > { %8071 = vmatprep.subr.bf16.mxu0 %v11081_v61  ;;  %v11088_v61 = vld [vmem:[#allocation12 + $0x2b0] ss:$28 sps:$4 sm:$0xff]   ;;  %15413 = vst [vmem:[#allocation102_spill] sm:$0xff] %v13646_v14 }
 0x448   : > { %8183 = vmatpush2.bf16.msra.mxu1 %v11076_v17  ;;  %v11096_v17 = vld [vmem:[#allocation12 + $0x27c] ss:$28 sps:$4 sm:$0xff]   ;;  %v11091_v0 = vld [vmem:[#allocation12 + $0xcf0] ss:$28 sps:$4 sm:$0xff]  }
 0x449   : > { %7908 = vmatmul.mubr.bf16.gmra.mxu0 %v15407_v55  ;;  %8184 = vmatprep.subr.bf16.mxu1 %v11084_v45  ;;  %v13644_v45 = vpop.f32.mrf.mxu0  ;;  %v15414_v55 = vld [vmem:[#allocation50_spill] sm:$0xff]  ;;  %v15421_v14 = vld [vmem:[#allocation52_spill] sm:$0xff] }
 0x44a   : > { %8021 = vmatmul.mubr.bf16.gmra.mxu1 %v15410_v12  ;;  %8072 = vmatpush2.bf16.msra.mxu0 %v11079_v46  ;;  %15412 = vst [vmem:[#allocation101_spill] sm:$0xff] %v13644_v45  ;;  %v11094_v46 = vld [vmem:[#allocation12 + $0x278] ss:$28 sps:$4 sm:$0xff]   ;;  %v15418_v45 = vld [vmem:[#allocation51_spill] sm:$0xff] }
 0x44b   : > { %7917 = vmatprep.mubr.bf16.mxu0 %v15411_v24  ;;  %8030 = vmatprep.mubr.bf16.mxu1 %v13433_v5  ;;  %v11099_v12 = vld [vmem:[#allocation12 + $0xcbc] ss:$28 sps:$4 sm:$0xff]   ;;  %v11102_v5 = vld [vmem:[#allocation12 + $0x244] ss:$28 sps:$4 sm:$0xff]   ;;  %v13649_v24 = vpop.f32.mrf.mxu0 }
 0x44c   : > { %8185 = vmatpush2.bf16.msra.mxu1 %v11082_v59  ;;  %8073 = vmatprep.subr.bf16.mxu0 %v11087_v41  ;;  %15415 = vst [vmem:[#allocation103_spill] sm:$0xff] %v13649_v24  ;;  %v13651_v41 = vpop.f32.mrf.mxu1  ;;  %v11097_v59 = vld [vmem:[#allocation12 + $0xcb8] ss:$28 sps:$4 sm:$0xff]  }
 0x44d   : > { %8186 = vmatprep.subr.bf16.mxu1 %v11090_v58  ;;  %15416 = vst [vmem:[#allocation104_spill] sm:$0xff] %v13651_v41  ;;  %v15417_v58 = vld [vmem:[#allocation62_spill] sm:$0xff] }
 0x44e   : > { %8074 = vmatpush2.bf16.msra.mxu0 %v11085_v10  ;;  %v11105_v10 = vld [vmem:[#allocation12 + $0xc84] ss:$28 sps:$4 sm:$0xff]  }
 0x44f   : > { %8075 = vmatprep.subr.bf16.mxu0 %v11093_v39  ;;  %v11100_v39 = vld [vmem:[#allocation12 + $0x240] ss:$28 sps:$4 sm:$0xff]  }
 0x450   : > { %8187 = vmatpush2.bf16.msra.mxu1 %v11088_v61  ;;  %v11108_v61 = vld [vmem:[#allocation12 + $0x20c] ss:$28 sps:$4 sm:$0xff]   ;;  %v11103_v41 = vld [vmem:[#allocation12 + $0xc80] ss:$28 sps:$4 sm:$0xff]  }
 0x451   : > { %7918 = vmatmul.mubr.bf16.gmra.mxu0 %v15414_v55  ;;  %8188 = vmatprep.subr.bf16.mxu1 %v11096_v17  ;;  %v13656_v17 = vpop.f32.mrf.mxu0  ;;  %v13658_v55 = vpop.f32.mrf.mxu1 }
 0x452   : > { %8031 = vmatmul.mubr.bf16.gmra.mxu1 %v15417_v58  ;;  %8076 = vmatpush2.bf16.msra.mxu0 %v11091_v0  ;;  %15419 = vst [vmem:[#allocation105_spill] sm:$0xff] %v13656_v17  ;;  %15420 = vst [vmem:[#allocation106_spill] sm:$0xff] %v13658_v55  ;;  %v11106_v0 = vld [vmem:[#allocation12 + $0x208] ss:$28 sps:$4 sm:$0xff]   ;;  %v15425_v17 = vld [vmem:[#allocation65_spill] sm:$0xff] }
 0x453   : > { %7927 = vmatprep.mubr.bf16.mxu0 %v15418_v45  ;;  %8040 = vmatprep.mubr.bf16.mxu1 %v13444_v11  ;;  %v11111_v58 = vld [vmem:[#allocation12 + $0xc4c] ss:$28 sps:$4 sm:$0xff]   ;;  %v11114_v11 = vld [vmem:[#allocation12 + $0x1d4] ss:$28 sps:$4 sm:$0xff]   ;;  %v13661_v45 = vpop.f32.mrf.mxu0 }
 0x454   : > { %8189 = vmatpush2.bf16.msra.mxu1 %v11094_v46  ;;  %8077 = vmatprep.subr.bf16.mxu0 %v11099_v12  ;;  %15422 = vst [vmem:[#allocation107_spill] sm:$0xff] %v13661_v45  ;;  %v13663_v12 = vpop.f32.mrf.mxu1  ;;  %v11109_v46 = vld [vmem:[#allocation12 + $0xc48] ss:$28 sps:$4 sm:$0xff]   ;;  %v15429_v45 = vld [vmem:[#allocation66_spill] sm:$0xff] }
 0x455   : > { %8190 = vmatprep.subr.bf16.mxu1 %v11102_v5  ;;  %15423 = vst [vmem:[#allocation108_spill] sm:$0xff] %v13663_v12  ;;  %v15424_v5 = vld [vmem:[#allocation64_spill] sm:$0xff]  ;;  %v11115_v12 = vld [vmem:[#allocation12 + $0x518] ss:$28 sps:$4 sm:$0xff]  }
 0x456   : > { %8078 = vmatpush2.bf16.msra.mxu0 %v11097_v59  ;;  %v15426_v59 = vld [vmem:[#allocation35_spill] sm:$0xff]  ;;  %v13670_v55 = vpop.f32.mrf.mxu1 }
 0x457   : > { %8079 = vmatprep.subr.bf16.mxu0 %v11105_v10  ;;  %v11117_v10 = vld [vmem:[#allocation12 + $0x51c] ss:$28 sps:$4 sm:$0xff]   ;;  %15428 = vst [vmem:[#allocation110_spill] sm:$0xff] %v13670_v55 }
 0x458   : > { %8191 = vmatpush2.bf16.msra.mxu1 %v11100_v39  ;;  %v11112_v39 = vld [vmem:[#allocation12 + $0x1d0] ss:$28 sps:$4 sm:$0xff]   ;;  %v11121_v55 = vld [vmem:[#allocation12 + $0x4e0] ss:$28 sps:$4 sm:$0xff]  }
 0x459   : > { %7928 = vmatmul.mubr.bf16.gmra.mxu0 %v15421_v14  ;;  %8192 = vmatprep.subr.bf16.mxu1 %v11108_v61  ;;  %v11120_v14 = vld [vmem:[#allocation12 + $0x89c] ss:$28 sps:$4 sm:$0xff]   ;;  %v13668_v61 = vpop.f32.mrf.mxu0 }
 0x45a   : > { %8041 = vmatmul.mubr.bf16.gmra.mxu1 %v15424_v5  ;;  %8080 = vmatpush2.bf16.msra.mxu0 %v11103_v41  ;;  %15427 = vst [vmem:[#allocation109_spill] sm:$0xff] %v13668_v61  ;;  %v11123_v5 = vld [vmem:[#allocation12 + $0x4e4] ss:$28 sps:$4 sm:$0xff]  }
 0x45b   : > { %8083 = vmatprep.mubr.bf16.mxu0 %v15425_v17  ;;  %8196 = vmatprep.mubr.bf16.mxu1 %v15426_v59  ;;  %v11118_v17 = vld [vmem:[#allocation12 + $0x898] ss:$28 sps:$4 sm:$0xff]  }
 0x45c   : > { %8193 = vmatpush2.bf16.msra.mxu1 %v11106_v0  ;;  %8081 = vmatprep.subr.bf16.mxu0 %v11111_v58  ;;  %v11126_v0 = vld [vmem:[#allocation12 + $0x864] ss:$28 sps:$4 sm:$0xff]   ;;  %v13675_v58 = vpop.f32.mrf.mxu0 }
 0x45d   : > { %8194 = vmatprep.subr.bf16.mxu1 %v11114_v11  ;;  %15430 = vst [vmem:[#allocation111_spill] sm:$0xff] %v13675_v58  ;;  %v15431_v11 = vld [vmem:[#allocation67_spill] sm:$0xff]  ;;  %v11135_v58 = vld [vmem:[#allocation12 + $0x474] ss:$28 sps:$4 sm:$0xff]  }
 0x45e   : > { %8082 = vmatpush2.bf16.msra.mxu0 %v11109_v46  ;;  %v15432_v46 = vld [vmem:[#allocation36_spill] sm:$0xff]  ;;  %v13684_v24 = vpop.f32.mrf.mxu0 }
 0x45f   : > { %8277 = vmatprep.subr.bf16.mxu0 %v11117_v10  ;;  %v11129_v10 = vld [vmem:[#allocation12 + $0x4ac] ss:$28 sps:$4 sm:$0xff]   ;;  %15434 = vst [vmem:[#allocation112_spill] sm:$0xff] %v13684_v24 }
 0x460   : > { %8195 = vmatpush2.bf16.msra.mxu1 %v11112_v39  ;;  %v15433_v39 = vld [vmem:[#allocation37_spill] sm:$0xff] }
 0x461   : > { %v13672_v41 = vpop.f32.mrf.mxu1  ;;  %8084 = vmatmul.mubr.bf16.vlgmr.msra.gmra.mxu0 %v15429_v45  ;;  %8390 = vmatprep.subr.bf16.mxu1 %v11120_v14  ;;  %v11124_v45 = vld [vmem:[#allocation12 + $0x860] ss:$28 sps:$4 sm:$0xff]   ;;  %v11132_v14 = vld [vmem:[#allocation12 + $0x82c] ss:$28 sps:$4 sm:$0xff]  }
 0x462   : > { %8278 = vmatpush1.bf16.msra.mxu0 %v11115_v12  ;;  %8093 = vmatprep.mubr.bf16.mxu0 %v15431_v11  ;;  %v11127_v11 = vld [vmem:[#allocation12 + $0x4a8] ss:$28 sps:$4 sm:$0xff]  }
 0x463   : > { %v13678_v59 = vpop.f32.mrf.mxu1  ;;  %8197 = vmatmul.mubr.bf16.vlgmr.msra.gmra.mxu1 %v15432_v46  ;;  %8279 = vmatprep.subr.bf16.mxu0 %v11123_v5  ;;  %v11130_v46 = vld [vmem:[#allocation12 + $0x828] ss:$28 sps:$4 sm:$0xff]  }
 0x464   : > { %8206 = vmatprep.mubr.bf16.mxu1 %v15433_v39  ;;  %8391 = vmatpush1.bf16.msra.mxu1 %v11118_v17  ;;  %v11138_v17 = vld [vmem:[#allocation12 + $0x7f4] ss:$28 sps:$4 sm:$0xff]   ;;  %v13691_v39 = vpop.f32.mrf.mxu0 }
 0x465   : > { %v13682_v61 = vpop.f32.mrf.mxu1  ;;  %8392 = vmatprep.subr.bf16.mxu1 %v11126_v0  ;;  %15436 = vst [vmem:[#allocation113_spill] sm:$0xff] %v13691_v39  ;;  %v11133_v0 = vld [vmem:[#allocation12 + $0x470] ss:$28 sps:$4 sm:$0xff]   ;;  %v11142_v39 = vld [vmem:[#allocation12 + $0x7b8] ss:$28 sps:$4 sm:$0xff]  }
 0x466   : > { %8280 = vmatpush1.bf16.msra.mxu0 %v11121_v55  ;;  %v15437_v55 = vld [vmem:[#allocation38_spill] sm:$0xff] }
 0x467   : > { %v13686_v12 = vpop.f32.mrf.mxu1  ;;  %8281 = vmatprep.subr.bf16.mxu0 %v11129_v10  ;;  %v11141_v10 = vld [vmem:[#allocation12 + $0x43c] ss:$28 sps:$4 sm:$0xff]  }
 0x468   : > { %8393 = vmatpush1.bf16.msra.mxu1 %v11124_v45  ;;  %v15438_v45 = vld [vmem:[#allocation26_spill] sm:$0xff] }
 0x469   : > { %v13688_v5 = vpop.f32.mrf.mxu1  ;;  %8094 = vmatmul.mubr.bf16.gmra.mxu0 %v15435_v44  ;;  %8394 = vmatprep.subr.bf16.mxu1 %v11132_v14  ;;  %v11144_v14 = vld [vmem:[#allocation12 + $0x7bc] ss:$28 sps:$4 sm:$0xff]   ;;  %v13700_v44 = vpop.f32.mrf.mxu0 }
 0x46a   : > { %8282 = vmatpush1.bf16.msra.mxu0 %v11127_v11  ;;  %8103 = vmatprep.mubr.bf16.mxu0 %v13479_v23  ;;  %15439 = vst [vmem:[#allocation114_spill] sm:$0xff] %v13700_v44  ;;  %v11139_v11 = vld [vmem:[#allocation12 + $0x438] ss:$28 sps:$4 sm:$0xff]  }
 0x46b   : > { %8207 = vmatmul.mubr.bf16.gmra.mxu1 %v15437_v55  ;;  %v13695_v24 = vpop.f32.mrf.mxu1  ;;  %8283 = vmatprep.subr.bf16.mxu0 %v11135_v58  ;;  %v11147_v55 = vld [vmem:[#allocation12 + $0x404] ss:$28 sps:$4 sm:$0xff]  }
 0x46c   : > { %8216 = vmatprep.mubr.bf16.mxu1 %v15438_v45  ;;  %8395 = vmatpush1.bf16.msra.mxu1 %v11130_v46  ;;  %v11150_v46 = vld [vmem:[#allocation12 + $0x784] ss:$28 sps:$4 sm:$0xff]   ;;  %v13707_v45 = vpop.f32.mrf.mxu0 }
 0x46d   : > { %v13698_v30 = vpop.f32.mrf.mxu1  ;;  %8396 = vmatprep.subr.bf16.mxu1 %v11138_v17  ;;  %15440 = vst [vmem:[#allocation115_spill] sm:$0xff] %v13707_v45  ;;  %v11145_v17 = vld [vmem:[#allocation12 + $0x400] ss:$28 sps:$4 sm:$0xff]   ;;  %v11154_v45 = vld [vmem:[#allocation12 + $0x748] ss:$28 sps:$4 sm:$0xff]  }
 0x46e   : > { %8284 = vmatpush1.bf16.msra.mxu0 %v11133_v0 }
 0x46f   : > { %v13702_v23 = vpop.f32.mrf.mxu1  ;;  %8285 = vmatprep.subr.bf16.mxu0 %v11141_v10  ;;  %v11153_v10 = vld [vmem:[#allocation12 + $0x3cc] ss:$28 sps:$4 sm:$0xff]  }
 0x470   : > { %8397 = vmatpush1.bf16.msra.mxu1 %v11136_v13  ;;  %v11148_v13 = vld [vmem:[#allocation12 + $0x780] ss:$28 sps:$4 sm:$0xff]  }
 0x471   : > { %v13704_v58 = vpop.f32.mrf.mxu1  ;;  %8104 = vmatmul.mubr.bf16.gmra.mxu0 %v13481_v33  ;;  %8398 = vmatprep.subr.bf16.mxu1 %v11144_v14  ;;  %v11156_v14 = vld [vmem:[#allocation12 + $0x74c] ss:$28 sps:$4 sm:$0xff]   ;;  %v13716_v33 = vpop.f32.mrf.mxu0 }
 0x472   : > { %8286 = vmatpush1.bf16.msra.mxu0 %v11139_v11  ;;  %8113 = vmatprep.mubr.bf16.mxu0 %v13490_v21  ;;  %15442 = vst [vmem:[#allocation117_spill] sm:$0xff] %v13716_v33  ;;  %v11151_v11 = vld [vmem:[#allocation12 + $0x3c8] ss:$28 sps:$4 sm:$0xff]   ;;  %v11157_v33 = vld [vmem:[#allocation12 + $0x390] ss:$28 sps:$4 sm:$0xff]  }
 0x473   : > { %8217 = vmatmul.mubr.bf16.gmra.mxu1 %v13070_v49  ;;  %v13711_v0 = vpop.f32.mrf.mxu1  ;;  %8287 = vmatprep.subr.bf16.mxu0 %v11147_v55  ;;  %v11159_v49 = vld [vmem:[#allocation12 + $0x394] ss:$28 sps:$4 sm:$0xff]  }
 0x474   : > { %8226 = vmatprep.mubr.bf16.mxu1 %v13078_v29  ;;  %8399 = vmatpush1.bf16.msra.mxu1 %v11142_v39  ;;  %v11162_v39 = vld [vmem:[#allocation12 + $0x714] ss:$28 sps:$4 sm:$0xff]   ;;  %v13723_v29 = vpop.f32.mrf.mxu0 }
 0x475   : > { %v13714_v44 = vpop.f32.mrf.mxu1  ;;  %8400 = vmatprep.subr.bf16.mxu1 %v11150_v46  ;;  %15445 = vst [vmem:[#allocation120_spill] sm:$0xff] %v13723_v29  ;;  %v15446_v46 = vld [vmem:[#allocation73_spill] sm:$0xff] }
 0x476   : > { %15441 = vst [vmem:[#allocation116_spill] sm:$0xff] %v13714_v44  ;;  %8288 = vmatpush1.bf16.msra.mxu0 %v11145_v17  ;;  %v15447_v17 = vld [vmem:[#allocation25_spill] sm:$0xff] }
 0x477   : > { %v13718_v21 = vpop.f32.mrf.mxu1  ;;  %8289 = vmatprep.subr.bf16.mxu0 %v11153_v10  ;;  %v11165_v10 = vld [vmem:[#allocation12 + $0x6dc] ss:$28 sps:$4 sm:$0xff]  }
 0x478   : > { %15443 = vst [vmem:[#allocation118_spill] sm:$0xff] %v13718_v21  ;;  %8401 = vmatpush1.bf16.msra.mxu1 %v11148_v13  ;;  %v15449_v13 = vld [vmem:[#allocation29_spill] sm:$0xff] }
 0x479   : > { %v13720_v55 = vpop.f32.mrf.mxu1  ;;  %8114 = vmatmul.mubr.bf16.gmra.mxu0 %v13493_v42  ;;  %8402 = vmatprep.subr.bf16.mxu1 %v11156_v14  ;;  %v11168_v14 = vld [vmem:[#allocation12 + $0xa5c] ss:$28 sps:$4 sm:$0xff]   ;;  %v13732_v42 = vpop.f32.mrf.mxu0 }
 0x47a   : > { %15444 = vst [vmem:[#allocation119_spill] sm:$0xff] %v13720_v55  ;;  %8290 = vmatpush1.bf16.msra.mxu0 %v11151_v11  ;;  %8123 = vmatprep.mubr.bf16.mxu0 %v15446_v46  ;;  %v11160_v55 = vld [vmem:[#allocation12 + $0x710] ss:$28 sps:$4 sm:$0xff]   ;;  %15450 = vst [vmem:[#allocation122_spill] sm:$0xff] %v13732_v42  ;;  %v11163_v11 = vld [vmem:[#allocation12 + $0x6d8] ss:$28 sps:$4 sm:$0xff]  }
 0x47b   : > { %8227 = vmatmul.mubr.bf16.gmra.mxu1 %v15447_v17  ;;  %v13727_v44 = vpop.f32.mrf.mxu1  ;;  %8291 = vmatprep.subr.bf16.mxu0 %v11159_v49  ;;  %v11171_v17 = vld [vmem:[#allocation12 + $0x6a4] ss:$28 sps:$4 sm:$0xff]   ;;  %v11166_v29 = vld [vmem:[#allocation12 + $0xa58] ss:$28 sps:$4 sm:$0xff]  }
 0x47c   : > { %15448 = vst [vmem:[#allocation121_spill] sm:$0xff] %v13727_v44  ;;  %8236 = vmatprep.mubr.bf16.mxu1 %v15449_v13  ;;  %8403 = vmatpush1.bf16.msra.mxu1 %v11154_v45  ;;  %v15453_v44 = vld [vmem:[#allocation74_spill] sm:$0xff]  ;;  %v11174_v45 = vld [vmem:[#allocation12 + $0xa24] ss:$28 sps:$4 sm:$0xff]   ;;  %v13739_v13 = vpop.f32.mrf.mxu0 }
 0x47d   : > { %v13730_v21 = vpop.f32.mrf.mxu1  ;;  %8404 = vmatprep.subr.bf16.mxu1 %v11162_v39  ;;  %15454 = vst [vmem:[#allocation125_spill] sm:$0xff] %v13739_v13  ;;  %v11169_v39 = vld [vmem:[#allocation12 + $0x6a0] ss:$28 sps:$4 sm:$0xff]   ;;  %v11178_v13 = vld [vmem:[#allocation12 + $0x9e8] ss:$28 sps:$4 sm:$0xff]  }
 0x47e   : > { %8292 = vmatpush1.bf16.msra.mxu0 %v11157_v33  ;;  %v15455_v33 = vld [vmem:[#allocation31_spill] sm:$0xff] }
 0x47f   : > { %v13734_v46 = vpop.f32.mrf.mxu1  ;;  %8293 = vmatprep.subr.bf16.mxu0 %v11165_v10  ;;  %v11177_v10 = vld [vmem:[#allocation12 + $0x66c] ss:$28 sps:$4 sm:$0xff]  }
 0x480   : > { %15451 = vst [vmem:[#allocation123_spill] sm:$0xff] %v13734_v46  ;;  %8405 = vmatpush1.bf16.msra.mxu1 %v11160_v55  ;;  %v15456_v55 = vld [vmem:[#allocation32_spill] sm:$0xff] }
 0x481   : > { %v13736_v49 = vpop.f32.mrf.mxu1  ;;  %8124 = vmatmul.mubr.bf16.gmra.mxu0 %v15453_v44  ;;  %8406 = vmatprep.subr.bf16.mxu1 %v11168_v14  ;;  %v11180_v14 = vld [vmem:[#allocation12 + $0x9ec] ss:$28 sps:$4 sm:$0xff]   ;;  %v13748_v44 = vpop.f32.mrf.mxu0 }
 0x482   : > { %15452 = vst [vmem:[#allocation124_spill] sm:$0xff] %v13736_v49  ;;  %8294 = vmatpush2.bf16.msra.mxu0 %v11163_v11  ;;  %8133 = vmatprep.mubr.bf16.mxu0 %v13515_v56  ;;  %v11172_v49 = vld [vmem:[#allocation12 + $0xa20] ss:$28 sps:$4 sm:$0xff]   ;;  %15457 = vst [vmem:[#allocation126_spill] sm:$0xff] %v13748_v44  ;;  %v11175_v11 = vld [vmem:[#allocation12 + $0x668] ss:$28 sps:$4 sm:$0xff]  }
 0x483   : > { %8237 = vmatmul.mubr.bf16.gmra.mxu1 %v15455_v33  ;;  %v13743_v42 = vpop.f32.mrf.mxu1  ;;  %8295 = vmatprep.subr.bf16.mxu0 %v11171_v17  ;;  %v11183_v33 = vld [vmem:[#allocation12 + $0x634] ss:$28 sps:$4 sm:$0xff]  }
 0x484   : > { %8246 = vmatprep.mubr.bf16.mxu1 %v15456_v55  ;;  %8407 = vmatpush2.bf16.msra.mxu1 %v11166_v29  ;;  %v11186_v29 = vld [vmem:[#allocation12 + $0x9b4] ss:$28 sps:$4 sm:$0xff]   ;;  %v13755_v55 = vpop.f32.mrf.mxu0 }
 0x485   : > { %v13746_v46 = vpop.f32.mrf.mxu1  ;;  %8408 = vmatprep.subr.bf16.mxu1 %v11174_v45  ;;  %15458 = vst [vmem:[#allocation127_spill] sm:$0xff] %v13755_v55  ;;  %v11181_v45 = vld [vmem:[#allocation12 + $0x630] ss:$28 sps:$4 sm:$0xff]   ;;  %v11190_v55 = vld [vmem:[#allocation12 + $0x978] ss:$28 sps:$4 sm:$0xff]  }
 0x486   : > { %8296 = vmatpush2.bf16.msra.mxu0 %v11169_v39 }
 0x487   : > { %v13750_v56 = vpop.f32.mrf.mxu1  ;;  %8297 = vmatprep.subr.bf16.mxu0 %v11177_v10  ;;  %v11189_v10 = vld [vmem:[#allocation12 + $0x5fc] ss:$28 sps:$4 sm:$0xff]  }
 0x488   : > { %8409 = vmatpush2.bf16.msra.mxu1 %v11172_v49  ;;  %v11184_v49 = vld [vmem:[#allocation12 + $0x9b0] ss:$28 sps:$4 sm:$0xff]  }
 0x489   : > { %v13752_v17 = vpop.f32.mrf.mxu1  ;;  %8134 = vmatmul.mubr.bf16.gmra.mxu0 %v13517_v47  ;;  %8410 = vmatprep.subr.bf16.mxu1 %v11180_v14  ;;  %v11192_v14 = vld [vmem:[#allocation12 + $0x97c] ss:$28 sps:$4 sm:$0xff]   ;;  %v13764_v47 = vpop.f32.mrf.mxu0 }
 0x48a   : > { %8298 = vmatpush2.bf16.msra.mxu0 %v11175_v11  ;;  %8143 = vmatprep.mubr.bf16.mxu0 %v13526_v32  ;;  %15459 = vst [vmem:[#allocation128_spill] sm:$0xff] %v13764_v47  ;;  %v11187_v11 = vld [vmem:[#allocation12 + $0x5f8] ss:$28 sps:$4 sm:$0xff]   ;;  %v11196_v47 = vld [vmem:[#allocation12 + $0x940] ss:$28 sps:$4 sm:$0xff]  }
 0x48b   : > { %8247 = vmatmul.mubr.bf16.gmra.mxu1 %v13231_v20  ;;  %v13759_v39 = vpop.f32.mrf.mxu1  ;;  %8299 = vmatprep.subr.bf16.mxu0 %v11183_v33  ;;  %v11195_v20 = vld [vmem:[#allocation12 + $0x5c4] ss:$28 sps:$4 sm:$0xff]  }
 0x48c   : > { %8256 = vmatprep.mubr.bf16.mxu1 %v13250_v60  ;;  %8411 = vmatpush2.bf16.msra.mxu1 %v11178_v13  ;;  %v11198_v13 = vld [vmem:[#allocation12 + $0x944] ss:$28 sps:$4 sm:$0xff]   ;;  %v13771_v60 = vpop.f32.mrf.mxu0 }
 0x48d   : > { %v13762_v44 = vpop.f32.mrf.mxu1  ;;  %8412 = vmatprep.subr.bf16.mxu1 %v11186_v29  ;;  %15462 = vst [vmem:[#allocation131_spill] sm:$0xff] %v13771_v60  ;;  %v11193_v29 = vld [vmem:[#allocation12 + $0x5c0] ss:$28 sps:$4 sm:$0xff]  }
 0x48e   : > { %8300 = vmatpush2.bf16.msra.mxu0 %v11181_v45  ;;  %v13780_v60 = vpop.f32.mrf.mxu0 }
 0x48f   : > { %v13766_v32 = vpop.f32.mrf.mxu1  ;;  %8301 = vmatprep.subr.bf16.mxu0 %v11189_v10  ;;  %v11201_v10 = vld [vmem:[#allocation12 + $0x58c] ss:$28 sps:$4 sm:$0xff]  }
 0x490   : > { %15460 = vst [vmem:[#allocation129_spill] sm:$0xff] %v13766_v32  ;;  %8413 = vmatpush2.bf16.msra.mxu1 %v11184_v49  ;;  %v4919_v49 = vld [vmem:[#allocation13] sm:$0xff] }
 0x491   : > { %v13768_v33 = vpop.f32.mrf.mxu1  ;;  %8144 = vmatmul.mubr.bf16.gmra.mxu0 %v13531_v27  ;;  %8414 = vmatprep.subr.bf16.mxu1 %v11192_v14  ;;  %v11204_v14 = vld [vmem:[#allocation12 + $0x90c] ss:$28 sps:$4 sm:$0xff]  }
 0x492   : > { %15461 = vst [vmem:[#allocation130_spill] sm:$0xff] %v13768_v33  ;;  %8302 = vmatpush2.bf16.msra.mxu0 %v11187_v11  ;;  %8153 = vmatprep.mubr.bf16.mxu0 %v13543_v51  ;;  %v11199_v11 = vld [vmem:[#allocation12 + $0x588] ss:$28 sps:$4 sm:$0xff]   ;;  %v15464_v51 = vld [vmem:[#allocation21_spill] sm:$0xff] }
 0x493   : > { %8257 = vmatmul.mubr.bf16.gmra.mxu1 %v13292_v62  ;;  %v13775_v45 = vpop.f32.mrf.mxu1  ;;  %8303 = vmatprep.subr.bf16.mxu0 %v11195_v20  ;;  %v13783_v33 = vrot.slane %v4919_v49, %v15464_v51  ;;  %v11207_v20 = vld [vmem:[#allocation12 + $0x554] ss:$28 sps:$4 sm:$0xff]  }
 0x494   : > { %15463 = vst [vmem:[#allocation132_spill] sm:$0xff] %v13775_v45  ;;  %8266 = vmatprep.mubr.bf16.mxu1 %v13295_v4  ;;  %8415 = vmatpush2.bf16.msra.mxu1 %v11190_v55  ;;  %v11202_v45 = vld [vmem:[#allocation12 + $0x908] ss:$28 sps:$4 sm:$0xff]   ;;  %v15465_v4 = vld [vmem:[#allocation22_spill] sm:$0xff]  ;;  %v11205_v51 = vld [vmem:[#allocation12 + $0x550] ss:$28 sps:$4 sm:$0xff]  }
 0x495   : > { %v13778_v27 = vpop.f32.mrf.mxu1  ;;  %8416 = vmatprep.subr.bf16.mxu1 %v11198_v13  ;;  %v13788_v55 = vrot.slane %v4919_v49, %v15465_v4  ;;  %v11210_v13 = vld [vmem:[#allocation12 + $0x8d4] ss:$28 sps:$4 sm:$0xff]   ;;  %v11213_v4 = vld [vmem:[#allocation12 + $0xc1c] ss:$28 sps:$4 sm:$0xff]  }
 0x496   : > { %8304 = vmatpush2.bf16.msra.mxu0 %v11193_v29  ;;  %v13793_v29 = vpop.f32.mrf.mxu0  ;;  %v11208_v49 = vld [vmem:[#allocation12 + $0x8d0] ss:$28 sps:$4 sm:$0xff]  }
 0x497   : > { %v13785_v62 = vpop.f32.mrf.mxu1  ;;  %8305 = vmatprep.subr.bf16.mxu0 %v11201_v10  ;;  %v7295_v10 = vadd.f32 %v13529_v28, %v13783_v33 }
 0x498   : > { %8417 = vmatpush2.bf16.msra.mxu1 %v11196_v47  ;;  %v13807_v28 = vpop.f32.mrf.mxu0 }
 0x499   : > { %v13790_v32 = vpop.f32.mrf.mxu1  ;;  %8154 = vmatmul.mubr.bf16.gmra.mxu0 %v13547_v8  ;;  %8418 = vmatprep.subr.bf16.mxu1 %v11204_v14  ;;  %v7297_v14 = vadd.f32 %v13534_v43, %v13788_v55  ;;  %v11238_v8 = vld [vmem:[#allocation12 + $0x360] ss:$28 sps:$4 sm:$0xff]   ;;  %15468 = vst [vmem:[#allocation133_spill] sm:$0xff] %v13807_v28 }
 0x49a   : > { %8306 = vmatpush2.bf16.msra.mxu0 %v11199_v11  ;;  %8309 = vmatprep.mubr.bf16.mxu0 %v13106_v2  ;;  %v7408_v11 = vadd.f32 %v13565_v38, %v7295_v10  ;;  %v11216_v43 = vld [vmem:[#allocation12 + $0xbe4] ss:$28 sps:$4 sm:$0xff]   ;;  %v7301_v38 = vadd.f32 %v13541_v1, %v13788_v55 }
 0x49b   : > { %8267 = vmatmul.mubr.bf16.gmra.mxu1 %v13316_v36  ;;  %v13799_v47 = vpop.f32.mrf.mxu1  ;;  %8307 = vmatprep.subr.bf16.mxu0 %v11207_v20  ;;  %v11211_v36 = vld [vmem:[#allocation12 + $0xc18] ss:$28 sps:$4 sm:$0xff]   ;;  %v7299_v20 = vadd.f32 %v13539_v53, %v13783_v33  ;;  %v11239_v10 = vld [vmem:[#allocation12 + $0x1a0] ss:$28 sps:$4 sm:$0xff]  }
 0x49c   : > { %15466 = vst [vmem:[#allocation21_spill] sm:$0xff] %v13799_v47  ;;  %8419 = vmatpush2.bf16.msra.mxu1 %v11202_v45  ;;  %8422 = vmatprep.mubr.bf16.mxu1 %v13363_v25  ;;  %v7410_v45 = vadd.f32 %v13574_v35, %v7297_v14  ;;  %v7521_v25 = vadd.f32 %v13672_v41, %v7408_v11  ;;  %v11243_v35 = vld [vmem:[#allocation12 + $0x328] ss:$28 sps:$4 sm:$0xff]  }
 0x49d   : > { %v13805_v2 = vpop.f32.mrf.mxu1  ;;  %8420 = vmatprep.subr.bf16.mxu1 %v11210_v13  ;;  %v7305_v41 = vadd.f32 %v13545_v54, %v13783_v33  ;;  %v7307_v54 = vadd.f32 %v13550_v7, %v13788_v55  ;;  %v11244_v14 = vld [vmem:[#allocation12 + $0x168] ss:$28 sps:$4 sm:$0xff]  }
 0x49e   : > { %15467 = vst [vmem:[#allocation22_spill] sm:$0xff] %v13805_v2  ;;  %8308 = vmatpush2.bf16.msra.mxu0 %v11205_v51  ;;  %v7412_v51 = vadd.f32 %v13581_v18, %v7299_v20  ;;  %v7523_v2 = vadd.f32 %v13678_v59, %v7410_v45  ;;  %v7309_v20 = vadd.f32 %v13555_v63, %v13783_v33  ;;  %v11217_v45 = vld [vmem:[#allocation12 + $0xba8] ss:$28 sps:$4 sm:$0xff]   ;;  %v11249_v63 = vld [vmem:[#allocation12 + $0x130] ss:$28 sps:$4 sm:$0xff]  }
 0x49f   : > { %v13813_v47 = vpop.f32.mrf.mxu1  ;;  %8503 = vmatprep.subr.bf16.mxu0 %v11213_v4  ;;  %v11214_v4 = vld [vmem:[#allocation12 + $0xbe0] ss:$28 sps:$4 sm:$0xff]  }
 0x4a0   : > { %8421 = vmatpush2.bf16.msra.mxu1 %v11208_v49  ;;  %v7414_v49 = vadd.f32 %v13590_v19, %v7301_v38  ;;  %v7525_v18 = vadd.f32 %v13682_v61, %v7412_v51  ;;  %v7418_v19 = vadd.f32 %v13597_v3, %v7305_v41 }
 0x4a1   : > { %v7633_v13 = vpop.f32.mrf.mxu0  ;;  %v13819_v53 = vpop.f32.mrf.mxu1  ;;  %8310 = vmatmul.mubr.bf16.vlgmr.msra.gmra.mxu0 %v13111_v50  ;;  %10184 = vmatprep.subr.bf16.mxu1 %v11238_v8  ;;  %v11219_v8 = vld [vmem:[#allocation12 + $0xbac] ss:$28 sps:$4 sm:$0xff]  }
 0x4a2   : > { %v7634_v28 = vadd.f32 %v7633_v13, %v7521_v25  ;;  %8504 = vmatpush1.bf16.msra.mxu0 %v11211_v36  ;;  %8319 = vmatprep.mubr.bf16.mxu0 %v13146_v37  ;;  %v7527_v61 = vadd.f32 %v13686_v12, %v7414_v49  ;;  %v7531_v38 = vadd.f32 %v13688_v5, %v7418_v19  ;;  %v11222_v13 = vld [vmem:[#allocation12 + $0xb74] ss:$28 sps:$4 sm:$0xff]   ;;  %v11258_v19 = vld [vmem:[#allocation12 + $0x280] ss:$28 sps:$4 sm:$0xff]  }
 0x4a3   : > { %v7635_v1 = vpop.f32.mrf.mxu0  ;;  %8423 = vmatmul.mubr.bf16.vlgmr.msra.gmra.mxu1 %v13365_v48  ;;  %v13828_v59 = vpop.f32.mrf.mxu1  ;;  %8505 = vmatprep.subr.bf16.mxu0 %v11216_v43  ;;  %v7420_v43 = vadd.f32 %v13606_v6, %v7307_v54 }
 0x4a4   : > { %11323 = vtanh.f32 %v7634_v28  ;;  %v7636_v25 = vadd.f32 %v7635_v1, %v7523_v2  ;;  %8432 = vmatprep.mubr.bf16.mxu1 %v13374_v34  ;;  %10185 = vmatpush3.bf16.msra.mxu1 %v11239_v10  ;;  %v11248_v2 = vld [vmem:[#allocation12 + $0x2f0] ss:$28 sps:$4 sm:$0xff]   ;;  %v7311_v10 = vadd.f32 %v13558_v9, %v13788_v55  ;;  %v11253_v1 = vld [vmem:[#allocation12 + $0x2b8] ss:$28 sps:$4 sm:$0xff]  }
 0x4a5   : > { %v7637_v36 = vpop.f32.mrf.mxu0  ;;  %v13835_v28 = vpop.f32.mrf.mxu1  ;;  %10186 = vmatprep.subr.bf16.mxu1 %v11243_v35  ;;  %v7422_v35 = vadd.f32 %v13613_v15, %v7309_v20  ;;  %v7533_v41 = vadd.f32 %v13695_v24, %v7420_v43 }
 0x4a6   : > { %11325 = vtanh.f32 %v7636_v25  ;;  %v7638_v11 = vadd.f32 %v7637_v36, %v7525_v18  ;;  %8506 = vmatpush1.bf16.msra.mxu0 %v11214_v4  ;;  %v11220_v4 = vld [vmem:[#allocation12 + $0xb70] ss:$28 sps:$4 sm:$0xff]   ;;  %v7424_v49 = vadd.f32 %v13620_v16, %v7311_v10  ;;  %v11225_v25 = vld [vmem:[#allocation12 + $0xb3c] ss:$28 sps:$4 sm:$0xff]  }
 0x4a7   : > { %v7639_v7 = vpop.f32.mrf.mxu0  ;;  %v13841_v12 = vpop.f32.mrf.mxu1  ;;  %8507 = vmatprep.subr.bf16.mxu0 %v11219_v8  ;;  %v7535_v15 = vadd.f32 %v13698_v30, %v7422_v35  ;;  %v7315_v8 = vadd.f32 %v13560_v40, %v13783_v33  ;;  %v11254_v36 = vld [vmem:[#allocation12 + $0xf8] ss:$28 sps:$4 sm:$0xff]   ;;  %v7317_v40 = vadd.f32 %v13562_v26, %v13788_v55 }
 0x4a8   : > { %11327 = vtanh.f32 %v7638_v11  ;;  %v7640_v3 = vadd.f32 %v7639_v7, %v7527_v61  ;;  %10187 = vmatpush3.bf16.msra.mxu1 %v11244_v14  ;;  %v7537_v16 = vadd.f32 %v13702_v23, %v7424_v49  ;;  %v15469_v61 = vld [vmem:[#allocation95_spill] sm:$0xff]  ;;  %v11223_v23 = vld [vmem:[#allocation12 + $0xb38] ss:$28 sps:$4 sm:$0xff]  }
 0x4a9   : > { %v7643_v51 = vpop.f32.mrf.mxu0  ;;  %v13847_v5 = vpop.f32.mrf.mxu1  ;;  %8320 = vmatmul.mubr.bf16.gmra.mxu0 %v13167_v22  ;;  %10188 = vmatprep.subr.bf16.mxu1 %v11248_v2  ;;  %v7428_v11 = vadd.f32 %v15469_v61, %v7315_v8  ;;  %v15474_v49 = vld [vmem:[#allocation99_spill] sm:$0xff] }
 0x4aa   : > { %11329 = vtanh.f32 %v7640_v3  ;;  %v7644_v6 = vadd.f32 %v7643_v51, %v7531_v38  ;;  %8508 = vmatpush1.bf16.msra.mxu0 %v11217_v45  ;;  %8329 = vmatprep.mubr.bf16.mxu0 %v13202_v57  ;;  %v11228_v45 = vld [vmem:[#allocation12 + $0xb04] ss:$28 sps:$4 sm:$0xff]   ;;  %v15470_v38 = vld [vmem:[#allocation81_spill] sm:$0xff] }
 0x4ab   : > { %v7645_v9 = vpop.f32.mrf.mxu0  ;;  %8433 = vmatmul.mubr.bf16.gmra.mxu1 %v13376_v31  ;;  %v13855_v18 = vpop.f32.mrf.mxu1  ;;  %8509 = vmatprep.subr.bf16.mxu0 %v11222_v13  ;;  %v7319_v3 = vadd.f32 %v15470_v38, %v13783_v33  ;;  %v15471_v13 = vld [vmem:[#allocation97_spill] sm:$0xff]  ;;  %v7541_v26 = vadd.f32 %v13704_v58, %v7428_v11  ;;  %v11259_v51 = vld [vmem:[#allocation12 + $0xc0] ss:$28 sps:$4 sm:$0xff]   ;;  %v11264_v38 = vld [vmem:[#allocation12 + $0x88] ss:$28 sps:$4 sm:$0xff]  }
 0x4ac   : > { %11331 = vtanh.f32 %v7644_v6  ;;  %v7646_v24 = vadd.f32 %v7645_v9, %v7533_v41  ;;  %8442 = vmatprep.mubr.bf16.mxu1 %v13383_v52  ;;  %10189 = vmatpush3.bf16.msra.mxu1 %v11249_v63  ;;  %v7430_v10 = vadd.f32 %v15471_v13, %v7317_v40  ;;  %v15472_v63 = vld [vmem:[#allocation82_spill] sm:$0xff]  ;;  %v11263_v9 = vld [vmem:[#allocation12 + $0x248] ss:$28 sps:$4 sm:$0xff]   ;;  %v15478_v11 = vld [vmem:[#allocation101_spill] sm:$0xff] }
 0x4ad   : > { %v7647_v54 = vpop.f32.mrf.mxu0  ;;  %v13861_v14 = vpop.f32.mrf.mxu1  ;;  %10190 = vmatprep.subr.bf16.mxu1 %v11253_v1  ;;  %v7321_v35 = vadd.f32 %v15472_v63, %v13788_v55  ;;  %v15473_v1 = vld [vmem:[#allocation34_spill] sm:$0xff]  ;;  %v11231_v40 = vld [vmem:[#allocation12 + $0xacc] ss:$28 sps:$4 sm:$0xff]  }
 0x4ae   : > { %11333 = vtanh.f32 %v7646_v24  ;;  %v7648_v30 = vadd.f32 %v7647_v54, %v7535_v15  ;;  %8510 = vmatpush1.bf16.msra.mxu0 %v11220_v4  ;;  %v7432_v15 = vadd.f32 %v15474_v49, %v7319_v3  ;;  %v7543_v58 = vadd.f32 %v13711_v0, %v7430_v10  ;;  %v11226_v8 = vld [vmem:[#allocation12 + $0xb00] ss:$28 sps:$4 sm:$0xff]   ;;  %v15481_v3 = vld [vmem:[#allocation84_spill] sm:$0xff] }
 0x4af   : > { %v7649_v2 = vpop.f32.mrf.mxu0  ;;  %v13871_v7 = vpop.f32.mrf.mxu1  ;;  %8511 = vmatprep.subr.bf16.mxu0 %v11225_v25  ;;  %v15475_v25 = vld [vmem:[#allocation40_spill] sm:$0xff]  ;;  %v15476_v54 = vld [vmem:[#allocation83_spill] sm:$0xff]  ;;  %v7434_v0 = vadd.f32 %v15478_v11, %v7321_v35  ;;  %v7327_v13 = vadd.f32 %v15481_v3, %v13788_v55  ;;  %v15485_v11 = vld [vmem:[#allocation105_spill] sm:$0xff] }
 0x4b0   : > { %11335 = vtanh.f32 %v7648_v30  ;;  %v7650_v20 = vadd.f32 %v7649_v2, %v7537_v16  ;;  %10191 = vmatpush3.bf16.msra.mxu1 %v11254_v36  ;;  %v7325_v36 = vadd.f32 %v15476_v54, %v13783_v33  ;;  %v15477_v16 = vld [vmem:[#allocation54_spill] sm:$0xff]  ;;  %v15479_v2 = vld [vmem:[#allocation116_spill] sm:$0xff]  ;;  %v15482_v35 = vld [vmem:[#allocation103_spill] sm:$0xff] }
 0x4b1   : > { %v11324_v43 = vpop.eup %11323  ;;  %v7653_v41 = vpop.f32.mrf.mxu0  ;;  %8330 = vmatmul.mubr.bf16.gmra.mxu0 %v15473_v1  ;;  %10192 = vmatprep.subr.bf16.mxu1 %v11258_v19 }
 0x4b2   : > { %9116 = vst [vmem:[%s13866_s18] sm:$0xff] %v11324_v43  ;;  %11337 = vtanh.f32 %v7650_v20  ;;  %v13880_v6 = vpop.f32.mrf.mxu1  ;;  %v7654_v24 = vadd.f32 %v7653_v41, %v7541_v26  ;;  %8512 = vmatpush1.bf16.msra.mxu0 %v11223_v23  ;;  %8339 = vmatprep.mubr.bf16.mxu0 %v15475_v25  ;;  %v7545_v23 = vadd.f32 %v15479_v2, %v7432_v15  ;;  %v15480_v20 = vld [vmem:[#allocation55_spill] sm:$0xff] }
 0x4b3   : > { %v11326_v4 = vpop.eup %11325  ;;  %8443 = vmatmul.mubr.bf16.gmra.mxu1 %v15477_v16  ;;  %v7655_v30 = vpop.f32.mrf.mxu0  ;;  %8513 = vmatprep.subr.bf16.mxu0 %v11228_v45  ;;  %v11268_v45 = vld [vmem:[#allocation12 + $0x210] ss:$28 sps:$4 sm:$0xff]   ;;  %v7438_v41 = vadd.f32 %v15482_v35, %v7325_v36  ;;  %v7440_v2 = vadd.f32 %v15485_v11, %v7327_v13  ;;  %v15486_v36 = vld [vmem:[#allocation119_spill] sm:$0xff] }
 0x4b4   : > { %9117 = vst [vmem:[%s13866_s18 + $0x8] sm:$0xff] %v11326_v4  ;;  %v13890_v19 = vpop.f32.mrf.mxu1  ;;  %11339 = vtanh.f32 %v7654_v24  ;;  %8452 = vmatprep.mubr.bf16.mxu1 %v15480_v20  ;;  %v7656_v43 = vadd.f32 %v7655_v30, %v7543_v58  ;;  %10193 = vmatpush3.bf16.msra.mxu1 %v11259_v51  ;;  %v15483_v4 = vld [vmem:[#allocation118_spill] sm:$0xff]  ;;  %v11229_v51 = vld [vmem:[#allocation12 + $0xac8] ss:$28 sps:$4 sm:$0xff]   ;;  %v15484_v58 = vld [vmem:[#allocation85_spill] sm:$0xff] }
 0x4b5   : > { %v11328_v61 = vpop.eup %11327  ;;  %v7657_v10 = vpop.f32.mrf.mxu0  ;;  %10194 = vmatprep.subr.bf16.mxu1 %v11263_v9  ;;  %v7547_v49 = vadd.f32 %v15483_v4, %v7434_v0  ;;  %v7329_v24 = vadd.f32 %v15484_v58, %v13783_v33  ;;  %v11234_v9 = vld [vmem:[#allocation12 + $0xa94] ss:$28 sps:$4 sm:$0xff]   ;;  %v7551_v3 = vadd.f32 %v15486_v36, %v7438_v41  ;;  %v15489_v13 = vld [vmem:[#allocation107_spill] sm:$0xff]  ;;  %v15493_v36 = vld [vmem:[#allocation56_spill] sm:$0xff] }
 0x4b6   : > { %9123 = vst [vmem:[%s13866_s18 + $0x38] sm:$0xff] %v11328_v61  ;;  %v13898_v26 = vpop.f32.mrf.mxu1  ;;  %11341 = vtanh.f32 %v7656_v43  ;;  %v7658_v15 = vadd.f32 %v7657_v10, %v7545_v23  ;;  %8514 = vmatpush1.bf16.msra.mxu0 %v11226_v8  ;;  %v11269_v8 = vld [vmem:[#allocation12 + $0x50] ss:$28 sps:$4 sm:$0xff]   ;;  %v15487_v23 = vld [vmem:[#allocation86_spill] sm:$0xff] }
 0x4b7   : > { %v11330_v63 = vpop.eup %11329  ;;  %v7659_v54 = vpop.f32.mrf.mxu0  ;;  %8515 = vmatprep.subr.bf16.mxu0 %v11231_v40  ;;  %v7331_v43 = vadd.f32 %v15487_v23, %v13788_v55  ;;  %v15488_v35 = vld [vmem:[#allocation41_spill] sm:$0xff]  ;;  %v7442_v58 = vadd.f32 %v15489_v13, %v7329_v24  ;;  %v11237_v24 = vld [vmem:[#allocation12 + $0xddc] ss:$28 sps:$4 sm:$0xff]   ;;  %v15503_v20 = vld [vmem:[#allocation124_spill] sm:$0xff] }
 0x4b8   : > { %9124 = vst [vmem:[%s13866_s18 + $0x40] sm:$0xff] %v11330_v63  ;;  %v13905_v30 = vpop.f32.mrf.mxu1  ;;  %11343 = vtanh.f32 %v7658_v15  ;;  %v7660_v0 = vadd.f32 %v7659_v54, %v7547_v49  ;;  %10195 = vmatpush3.bf16.msra.mxu1 %v11264_v38  ;;  %v11273_v40 = vld [vmem:[#allocation12 + $0x1d8] ss:$28 sps:$4 sm:$0xff]   ;;  %v15491_v49 = vld [vmem:[#allocation44_spill] sm:$0xff] }
 0x4b9   : > { %v11332_v61 = vpop.eup %11331  ;;  %v7663_v10 = vpop.f32.mrf.mxu0  ;;  %8340 = vmatmul.mubr.bf16.gmra.mxu0 %v15488_v35  ;;  %10196 = vmatprep.subr.bf16.mxu1 %v11268_v45  ;;  %v15490_v41 = vld [vmem:[#allocation121_spill] sm:$0xff] }
 0x4ba   : > { %9130 = vst [vmem:[%s13866_s18 + $0x70] sm:$0xff] %v11332_v61  ;;  %v13912_v63 = vpop.f32.mrf.mxu1  ;;  %v7553_v15 = vadd.f32 %v15490_v41, %v7440_v2  ;;  %11345 = vtanh.f32 %v7660_v0  ;;  %v7664_v38 = vadd.f32 %v7663_v10, %v7551_v3  ;;  %8516 = vmatpush1.bf16.msra.mxu0 %v11229_v51  ;;  %8349 = vmatprep.mubr.bf16.mxu0 %v15491_v49  ;;  %v11232_v54 = vld [vmem:[#allocation12 + $0xa90] ss:$28 sps:$4 sm:$0xff]   ;;  %v15492_v61 = vld [vmem:[#allocation87_spill] sm:$0xff]  ;;  %v11274_v41 = vld [vmem:[#allocation12 + $0x18] ss:$28 sps:$4 sm:$0xff]  }
 0x4bb   : > { %v11334_v4 = vpop.eup %11333  ;;  %v7335_v11 = vadd.f32 %v15492_v61, %v13783_v33  ;;  %8453 = vmatmul.mubr.bf16.gmra.mxu1 %v15493_v36  ;;  %v7665_v45 = vpop.f32.mrf.mxu0  ;;  %8517 = vmatprep.subr.bf16.mxu0 %v11234_v9  ;;  %v15494_v2 = vld [vmem:[#allocation109_spill] sm:$0xff]  ;;  %v7555_v51 = vadd.f32 %v13730_v21, %v7442_v58  ;;  %v11284_v9 = vld [vmem:[#allocation12 + $0xa60] ss:$28 sps:$4 sm:$0xff]  }
 0x4bc   : > { %9131 = vst [vmem:[%s13866_s18 + $0x78] sm:$0xff] %v11334_v4  ;;  %v13922_v23 = vpop.f32.mrf.mxu1  ;;  %v7444_v0 = vadd.f32 %v15494_v2, %v7331_v43  ;;  %11347 = vtanh.f32 %v7664_v38  ;;  %v15495_v3 = vld [vmem:[#allocation57_spill] sm:$0xff]  ;;  %v7666_v10 = vadd.f32 %v7665_v45, %v7553_v15  ;;  %10197 = vmatpush3.bf16.msra.mxu1 %v11269_v8  ;;  %v15496_v4 = vld [vmem:[#allocation88_spill] sm:$0xff]  ;;  %v15498_v43 = vld [vmem:[#allocation111_spill] sm:$0xff] }
 0x4bd   : > { %v11336_v13 = vpop.eup %11335  ;;  %8462 = vmatprep.mubr.bf16.mxu1 %v15495_v3  ;;  %v7337_v61 = vadd.f32 %v15496_v4, %v13788_v55  ;;  %v7667_v36 = vpop.f32.mrf.mxu0  ;;  %10198 = vmatprep.subr.bf16.mxu1 %v11273_v40  ;;  %v7448_v2 = vadd.f32 %v15498_v43, %v7335_v11  ;;  %v15499_v21 = vld [vmem:[#allocation123_spill] sm:$0xff]  ;;  %v11235_v8 = vld [vmem:[#allocation12 + $0xdd8] ss:$28 sps:$4 sm:$0xff]   ;;  %v15502_v3 = vld [vmem:[#allocation112_spill] sm:$0xff] }
 0x4be   : > { %9137 = vst [vmem:[%s13866_s18 + $0xa8] sm:$0xff] %v11336_v13  ;;  %v13930_v49 = vpop.f32.mrf.mxu1  ;;  %v7557_v58 = vadd.f32 %v15499_v21, %v7444_v0  ;;  %11349 = vtanh.f32 %v7666_v10  ;;  %v7668_v38 = vadd.f32 %v7667_v36, %v7555_v51  ;;  %8518 = vmatpush1.bf16.msra.mxu0 %v11232_v54  ;;  %v15500_v15 = vld [vmem:[#allocation89_spill] sm:$0xff]  ;;  %v11242_v40 = vld [vmem:[#allocation12 + $0xda4] ss:$28 sps:$4 sm:$0xff]   ;;  %v15504_v54 = vld [vmem:[#allocation90_spill] sm:$0xff] }
 0x4bf   : > { %15497 = vst [vmem:[#allocation95_spill] sm:$0xff] %v13930_v49  ;;  %v11338_v35 = vpop.eup %11337  ;;  %v7339_v45 = vadd.f32 %v15500_v15, %v13783_v33  ;;  %v7669_v4 = vpop.f32.mrf.mxu0  ;;  %8519 = vmatprep.subr.bf16.mxu0 %v11237_v24  ;;  %v7450_v49 = vadd.f32 %v15502_v3, %v7337_v61  ;;  %v7561_v11 = vadd.f32 %v15503_v20, %v7448_v2  ;;  %v15507_v21 = vld [vmem:[#allocation113_spill] sm:$0xff]  ;;  %v15508_v3 = vld [vmem:[#allocation47_spill] sm:$0xff] }
 0x4c0   : > { %9138 = vst [vmem:[%s13866_s18 + $0xb0] sm:$0xff] %v11338_v35  ;;  %v13937_v13 = vpop.f32.mrf.mxu1  ;;  %11351 = vtanh.f32 %v7668_v38  ;;  %v7670_v0 = vadd.f32 %v7669_v4, %v7557_v58  ;;  %10199 = vmatpush3.bf16.msra.mxu1 %v11274_v41  ;;  %v7341_v51 = vadd.f32 %v15504_v54, %v13788_v55  ;;  %v15506_v35 = vld [vmem:[#allocation45_spill] sm:$0xff]  ;;  %v11240_v41 = vld [vmem:[#allocation12 + $0xda0] ss:$28 sps:$4 sm:$0xff]   ;;  %v15514_v54 = vld [vmem:[#allocation92_spill] sm:$0xff] }
 0x4c1   : > { %15501 = vst [vmem:[#allocation81_spill] sm:$0xff] %v13937_v13  ;;  %v11340_v36 = vpop.eup %11339  ;;  %v7673_v10 = vpop.f32.mrf.mxu0  ;;  %8350 = vmatmul.mubr.bf16.gmra.mxu0 %v15506_v35  ;;  %10312 = vmatprep.subr.bf16.mxu1 %v11284_v9  ;;  %v7452_v24 = vadd.f32 %v15507_v21, %v7339_v45  ;;  %v7563_v15 = vadd.f32 %v13743_v42, %v7450_v49  ;;  %v15509_v2 = vld [vmem:[#allocation91_spill] sm:$0xff]  ;;  %v15510_v38 = vld [vmem:[#allocation58_spill] sm:$0xff]  ;;  %v11247_v42 = vld [vmem:[#allocation12 + $0xd6c] ss:$28 sps:$4 sm:$0xff]  }
 0x4c2   : > { %v13943_v43 = vpop.f32.mrf.mxu1  ;;  %9144 = vst [vmem:[%s13866_s18 + $0xe0] sm:$0xff] %v11340_v36  ;;  %11353 = vtanh.f32 %v7670_v0  ;;  %v7674_v20 = vadd.f32 %v7673_v10, %v7561_v11  ;;  %8520 = vmatpush2.bf16.msra.mxu0 %v11235_v8  ;;  %8359 = vmatprep.mubr.bf16.mxu0 %v15508_v3  ;;  %v7345_v58 = vadd.f32 %v15509_v2, %v13783_v33  ;;  %v15512_v49 = vld [vmem:[#allocation114_spill] sm:$0xff]  ;;  %v15513_v8 = vld [vmem:[#allocation59_spill] sm:$0xff] }
 0x4c3   : > { %15505 = vst [vmem:[#allocation97_spill] sm:$0xff] %v13943_v43  ;;  %v11342_v61 = vpop.eup %11341  ;;  %8463 = vmatmul.mubr.bf16.gmra.mxu1 %v15510_v38  ;;  %v7675_v4 = vpop.f32.mrf.mxu0  ;;  %8521 = vmatprep.subr.bf16.mxu0 %v11242_v40  ;;  %v7454_v45 = vadd.f32 %v15512_v49, %v7341_v51  ;;  %v7565_v11 = vadd.f32 %v13746_v46, %v7452_v24  ;;  %v15516_v38 = vld [vmem:[#allocation115_spill] sm:$0xff]  ;;  %v11252_v49 = vld [vmem:[#allocation12 + $0xd34] ss:$28 sps:$4 sm:$0xff]  }
 0x4c4   : > { %v13953_v9 = vpop.f32.mrf.mxu1  ;;  %9145 = vst [vmem:[%s13866_s18 + $0xe8] sm:$0xff] %v11342_v61  ;;  %11355 = vtanh.f32 %v7674_v20  ;;  %8472 = vmatprep.mubr.bf16.mxu1 %v15513_v8  ;;  %v7676_v0 = vadd.f32 %v7675_v4, %v7563_v15  ;;  %v7347_v10 = vadd.f32 %v15514_v54, %v13788_v55  ;;  %v7458_v40 = vadd.f32 %v15516_v38, %v7345_v58  ;;  %v11245_v51 = vld [vmem:[#allocation12 + $0xd68] ss:$28 sps:$4 sm:$0xff]   ;;  %v15517_v15 = vld [vmem:[#allocation93_spill] sm:$0xff]  ;;  %v11307_v43 = vld [vmem:[#allocation12 + $0xde0] ss:$28 sps:$4 sm:$0xff]  }
 0x4c5   : > { %15511 = vst [vmem:[#allocation82_spill] sm:$0xff] %v13953_v9  ;;  %v11344_v36 = vpop.eup %11343  ;;  %v7677_v21 = vpop.f32.mrf.mxu0  ;;  %v7567_v3 = vadd.f32 %v13750_v56, %v7454_v45  ;;  %v7349_v20 = vadd.f32 %v15517_v15, %v13783_v33  ;;  %v15519_v54 = vld [vmem:[#allocation117_spill] sm:$0xff] }
 0x4c6   : > { %v13961_v2 = vpop.f32.mrf.mxu1  ;;  %9151 = vst [vmem:[%s13866_s18 + $0x118] sm:$0xff] %v11344_v36  ;;  %11357 = vtanh.f32 %v7676_v0  ;;  %v7678_v46 = vadd.f32 %v7677_v21, %v7565_v11  ;;  %8522 = vmatpush2.bf16.msra.mxu0 %v11240_v41  ;;  %v7460_v8 = vadd.f32 %v15519_v54, %v7347_v10  ;;  %v7571_v58 = vadd.f32 %v13752_v17, %v7458_v40  ;;  %v15520_v41 = vld [vmem:[#allocation94_spill] sm:$0xff]  ;;  %v15522_v36 = vld [vmem:[#allocation48_spill] sm:$0xff]  ;;  %v15524_v10 = vld [vmem:[#allocation49_spill] sm:$0xff] }
 0x4c7   : > { %15515 = vst [vmem:[#allocation34_spill] sm:$0xff] %v13961_v2  ;;  %v11346_v24 = vpop.eup %11345  ;;  %v7679_v61 = vpop.f32.mrf.mxu0  ;;  %8523 = vmatprep.subr.bf16.mxu0 %v11247_v42  ;;  %v7351_v45 = vadd.f32 %v15520_v41, %v13788_v55  ;;  %v15523_v21 = vld [vmem:[#allocation120_spill] sm:$0xff]  ;;  %v15580_v2 = vld [vmem:[#allocation73_spill] sm:$0xff] }
 0x4c8   : > { %v13968_v4 = vpop.f32.mrf.mxu1  ;;  %9152 = vst [vmem:[%s13866_s18 + $0x120] sm:$0xff] %v11346_v24  ;;  %11359 = vtanh.f32 %v7678_v46  ;;  %v7680_v56 = vadd.f32 %v7679_v61, %v7567_v3  ;;  %v7462_v15 = vadd.f32 %v15523_v21, %v7349_v20  ;;  %v7573_v42 = vadd.f32 %v13759_v39, %v7460_v8  ;;  %v11250_v3 = vld [vmem:[#allocation12 + $0xd30] ss:$28 sps:$4 sm:$0xff]   ;;  %v11257_v39 = vld [vmem:[#allocation12 + $0xcfc] ss:$28 sps:$4 sm:$0xff]  }
 0x4c9   : > { %15518 = vst [vmem:[#allocation99_spill] sm:$0xff] %v13968_v4  ;;  %v11348_v38 = vpop.eup %11347  ;;  %v7683_v11 = vpop.f32.mrf.mxu0  ;;  %8360 = vmatmul.mubr.bf16.gmra.mxu0 %v15522_v36  ;;  %v15525_v46 = vld [vmem:[#allocation96_spill] sm:$0xff]  ;;  %v15528_v8 = vld [vmem:[#allocation122_spill] sm:$0xff]  ;;  %v15533_v36 = vld [vmem:[#allocation129_spill] sm:$0xff] }
 0x4ca   : > { %v13975_v0 = vpop.f32.mrf.mxu1  ;;  %9158 = vst [vmem:[%s13866_s18 + $0x150] sm:$0xff] %v11348_v38  ;;  %11361 = vtanh.f32 %v7680_v56  ;;  %v7684_v17 = vadd.f32 %v7683_v11, %v7571_v58  ;;  %8524 = vmatpush2.bf16.msra.mxu0 %v11245_v51  ;;  %8369 = vmatprep.mubr.bf16.mxu0 %v15524_v10  ;;  %v7355_v24 = vadd.f32 %v15525_v46, %v13783_v33  ;;  %v15526_v61 = vld [vmem:[#allocation60_spill] sm:$0xff]  ;;  %v15529_v51 = vld [vmem:[#allocation61_spill] sm:$0xff]  ;;  %v15530_v11 = vld [vmem:[#allocation98_spill] sm:$0xff] }
 0x4cb   : > { %15521 = vst [vmem:[#allocation40_spill] sm:$0xff] %v13975_v0  ;;  %v11350_v40 = vpop.eup %11349  ;;  %8473 = vmatmul.mubr.bf16.gmra.mxu1 %v15526_v61  ;;  %v7685_v54 = vpop.f32.mrf.mxu0  ;;  %8525 = vmatprep.subr.bf16.mxu0 %v11252_v49  ;;  %v7464_v20 = vadd.f32 %v15528_v8, %v7351_v45  ;;  %v7575_v58 = vadd.f32 %v13762_v44, %v7462_v15  ;;  %v15532_v10 = vld [vmem:[#allocation125_spill] sm:$0xff]  ;;  %v11262_v8 = vld [vmem:[#allocation12 + $0xcc4] ss:$28 sps:$4 sm:$0xff]  }
 0x4cc   : > { %v13985_v41 = vpop.f32.mrf.mxu1  ;;  %9159 = vst [vmem:[%s13866_s18 + $0x158] sm:$0xff] %v11350_v40  ;;  %11363 = vtanh.f32 %v7684_v17  ;;  %8482 = vmatprep.mubr.bf16.mxu1 %v15529_v51  ;;  %v7686_v56 = vadd.f32 %v7685_v54, %v7573_v42  ;;  %v7357_v21 = vadd.f32 %v15530_v11, %v13788_v55  ;;  %v7468_v49 = vadd.f32 %v15532_v10, %v7355_v24  ;;  %v11255_v45 = vld [vmem:[#allocation12 + $0xcf8] ss:$28 sps:$4 sm:$0xff]   ;;  %v15534_v42 = vld [vmem:[#allocation100_spill] sm:$0xff] }
 0x4cd   : > { %15527 = vst [vmem:[#allocation83_spill] sm:$0xff] %v13985_v41  ;;  %v11352_v38 = vpop.eup %11351  ;;  %v7687_v46 = vpop.f32.mrf.mxu0  ;;  %v7577_v41 = vadd.f32 %v15533_v36, %v7464_v20  ;;  %v7359_v17 = vadd.f32 %v15534_v42, %v13783_v33  ;;  %v15536_v11 = vld [vmem:[#allocation126_spill] sm:$0xff]  ;;  %v15541_v42 = vld [vmem:[#allocation127_spill] sm:$0xff]  ;;  %v15581_v9 = vld [vmem:[#allocation25_spill] sm:$0xff] }
 0x4ce   : > { %v13993_v61 = vpop.f32.mrf.mxu1  ;;  %9165 = vst [vmem:[%s13866_s18 + $0x188] sm:$0xff] %v11352_v38  ;;  %11365 = vtanh.f32 %v7686_v56  ;;  %v7688_v44 = vadd.f32 %v7687_v46, %v7575_v58  ;;  %8526 = vmatpush2.bf16.msra.mxu0 %v11250_v3  ;;  %v7470_v51 = vadd.f32 %v15536_v11, %v7357_v21  ;;  %v15537_v10 = vld [vmem:[#allocation130_spill] sm:$0xff] }
 0x4cf   : > { %15531 = vst [vmem:[#allocation54_spill] sm:$0xff] %v13993_v61  ;;  %v11354_v15 = vpop.eup %11353  ;;  %v7689_v40 = vpop.f32.mrf.mxu0  ;;  %8527 = vmatprep.subr.bf16.mxu0 %v11257_v39  ;;  %v7581_v24 = vadd.f32 %v15537_v10, %v7468_v49  ;;  %v15538_v3 = vld [vmem:[#allocation102_spill] sm:$0xff]  ;;  %v15542_v39 = vld [vmem:[#allocation132_spill] sm:$0xff]  ;;  %v15543_v49 = vld [vmem:[#allocation51_spill] sm:$0xff] }
 0x4d0   : > { %v14000_v54 = vpop.f32.mrf.mxu1  ;;  %9166 = vst [vmem:[%s13866_s18 + $0x190] sm:$0xff] %v11354_v15  ;;  %11367 = vtanh.f32 %v7688_v44  ;;  %v7690_v36 = vadd.f32 %v7689_v40, %v7577_v41  ;;  %v7361_v58 = vadd.f32 %v15538_v3, %v13788_v55  ;;  %v15540_v46 = vld [vmem:[#allocation50_spill] sm:$0xff]  ;;  %v7583_v61 = vadd.f32 %v15542_v39, %v7470_v51  ;;  %v15544_v15 = vld [vmem:[#allocation104_spill] sm:$0xff] }
 0x4d1   : > { %15535 = vst [vmem:[#allocation101_spill] sm:$0xff] %v14000_v54  ;;  %v11356_v20 = vpop.eup %11355  ;;  %v7693_v56 = vpop.f32.mrf.mxu0  ;;  %8370 = vmatmul.mubr.bf16.gmra.mxu0 %v15540_v46  ;;  %v7472_v54 = vadd.f32 %v15541_v42, %v7359_v17  ;;  %v11260_v41 = vld [vmem:[#allocation12 + $0xcc0] ss:$28 sps:$4 sm:$0xff]   ;;  %v7365_v40 = vadd.f32 %v15544_v15, %v13783_v33  ;;  %v11267_v51 = vld [vmem:[#allocation12 + $0xc8c] ss:$28 sps:$4 sm:$0xff]  }
 0x4d2   : > { %v14007_v38 = vpop.f32.mrf.mxu1  ;;  %9172 = vst [vmem:[%s13866_s18 + $0x1c0] sm:$0xff] %v11356_v20  ;;  %11369 = vtanh.f32 %v7690_v36  ;;  %v7694_v21 = vadd.f32 %v7693_v56, %v7581_v24  ;;  %8528 = vmatpush2.bf16.msra.mxu0 %v11255_v45  ;;  %8379 = vmatprep.mubr.bf16.mxu0 %v15543_v49  ;;  %v15545_v11 = vld [vmem:[#allocation62_spill] sm:$0xff]  ;;  %v15547_v17 = vld [vmem:[#allocation128_spill] sm:$0xff]  ;;  %v15548_v45 = vld [vmem:[#allocation63_spill] sm:$0xff] }
 0x4d3   : > { %15539 = vst [vmem:[#allocation116_spill] sm:$0xff] %v14007_v38  ;;  %v11358_v44 = vpop.eup %11357  ;;  %8483 = vmatmul.mubr.bf16.gmra.mxu1 %v15545_v11  ;;  %v7695_v10 = vpop.f32.mrf.mxu0  ;;  %8529 = vmatprep.subr.bf16.mxu0 %v11262_v8  ;;  %v7474_v20 = vadd.f32 %v15547_v17, %v7361_v58  ;;  %v7585_v24 = vadd.f32 %v13778_v27, %v7472_v54  ;;  %v15549_v42 = vld [vmem:[#allocation106_spill] sm:$0xff]  ;;  %v15551_v49 = vld [vmem:[#allocation131_spill] sm:$0xff]  ;;  %v11272_v17 = vld [vmem:[#allocation12 + $0xc54] ss:$28 sps:$4 sm:$0xff]  }
 0x4d4   : > { %v14017_v3 = vpop.f32.mrf.mxu1  ;;  %9173 = vst [vmem:[%s13866_s18 + $0x1c8] sm:$0xff] %v11358_v44  ;;  %11371 = vtanh.f32 %v7694_v21  ;;  %8492 = vmatprep.mubr.bf16.mxu1 %v15548_v45  ;;  %v7696_v36 = vadd.f32 %v7695_v10, %v7583_v61  ;;  %v7367_v39 = vadd.f32 %v15549_v42, %v13788_v55  ;;  %v7478_v8 = vadd.f32 %v15551_v49, %v7365_v40  ;;  %v11265_v54 = vld [vmem:[#allocation12 + $0xc88] ss:$28 sps:$4 sm:$0xff]   ;;  %v11303_v38 = vld [vmem:[#allocation12 + $0x910] ss:$28 sps:$4 sm:$0xff]  }
 0x4d5   : > { %15546 = vst [vmem:[#allocation84_spill] sm:$0xff] %v14017_v3  ;;  %v11360_v56 = vpop.eup %11359  ;;  %v7697_v15 = vpop.f32.mrf.mxu0  ;;  %v7587_v46 = vadd.f32 %v13785_v62, %v7474_v20  ;;  %v15552_v61 = vld [vmem:[#allocation108_spill] sm:$0xff]  ;;  %v11305_v4 = vld [vmem:[#allocation12 + $0x8d8] ss:$28 sps:$4 sm:$0xff]  }
 0x4d6   : > { %v14025_v11 = vpop.f32.mrf.mxu1  ;;  %9179 = vst [vmem:[%s13866_s18 + $0x1f8] sm:$0xff] %v11360_v56  ;;  %11373 = vtanh.f32 %v7696_v36  ;;  %v7698_v27 = vadd.f32 %v7697_v15, %v7585_v24  ;;  %8530 = vmatpush2.bf16.msra.mxu0 %v11260_v41  ;;  %v7369_v21 = vadd.f32 %v15552_v61, %v13783_v33  ;;  %v7480_v42 = vadd.f32 %v13780_v60, %v7367_v39  ;;  %v15554_v41 = vld [vmem:[#allocation110_spill] sm:$0xff]  ;;  %v15556_v33 = vld [vmem:[#allocation52_spill] sm:$0xff] }
 0x4d7   : > { %15550 = vst [vmem:[#allocation103_spill] sm:$0xff] %v14025_v11  ;;  %v11362_v58 = vpop.eup %11361  ;;  %v7699_v44 = vpop.f32.mrf.mxu0  ;;  %8531 = vmatprep.subr.bf16.mxu0 %v11267_v51  ;;  %v7591_v49 = vadd.f32 %v13790_v32, %v7478_v8  ;;  %v7371_v20 = vadd.f32 %v15554_v41, %v13788_v55  ;;  %v15557_v51 = vld [vmem:[#allocation21_spill] sm:$0xff]  ;;  %v15559_v8 = vld [vmem:[#allocation64_spill] sm:$0xff]  ;;  %v15576_v11 = vld [vmem:[#allocation27_spill] sm:$0xff] }
 0x4d8   : > { %v14032_v10 = vpop.f32.mrf.mxu1  ;;  %9180 = vst [vmem:[%s13866_s18 + $0x200] sm:$0xff] %v11362_v58  ;;  %11375 = vtanh.f32 %v7698_v27  ;;  %v7700_v62 = vadd.f32 %v7699_v44, %v7587_v46  ;;  %v7482_v56 = vadd.f32 %v13793_v29, %v7369_v21  ;;  %v7593_v15 = vadd.f32 %v15557_v51, %v7480_v42  ;;  %v15558_v32 = vld [vmem:[#allocation65_spill] sm:$0xff]  ;;  %v11275_v58 = vld [vmem:[#allocation12 + $0x6e0] ss:$28 sps:$4 sm:$0xff]  }
 0x4d9   : > { %15553 = vst [vmem:[#allocation118_spill] sm:$0xff] %v14032_v10  ;;  %v11364_v40 = vpop.eup %11363  ;;  %v7703_v24 = vpop.f32.mrf.mxu0  ;;  %8380 = vmatmul.mubr.bf16.gmra.mxu0 %v15556_v33  ;;  %v11270_v46 = vld [vmem:[#allocation12 + $0xc50] ss:$28 sps:$4 sm:$0xff]   ;;  %v15562_v21 = vld [vmem:[#allocation22_spill] sm:$0xff]  ;;  %v15563_v42 = vld [vmem:[#allocation35_spill] sm:$0xff] }
 0x4da   : > { %v14039_v36 = vpop.f32.mrf.mxu1  ;;  %9186 = vst [vmem:[%s13866_s18 + $0x230] sm:$0xff] %v11364_v40  ;;  %11377 = vtanh.f32 %v7700_v62  ;;  %v7704_v60 = vadd.f32 %v7703_v24, %v7591_v49  ;;  %8532 = vmatpush2.bf16.msra.mxu0 %v11265_v54  ;;  %8535 = vmatprep.mubr.bf16.mxu0 %v15558_v32  ;;  %v15561_v29 = vld [vmem:[#allocation133_spill] sm:$0xff]  ;;  %v7595_v44 = vadd.f32 %v15562_v21, %v7482_v56  ;;  %v15567_v21 = vld [vmem:[#allocation67_spill] sm:$0xff]  ;;  %v15572_v32 = vld [vmem:[#allocation38_spill] sm:$0xff] }
 0x4db   : > { %15555 = vst [vmem:[#allocation85_spill] sm:$0xff] %v14039_v36  ;;  %v11366_v39 = vpop.eup %11365  ;;  %8493 = vmatmul.mubr.bf16.gmra.mxu1 %v15559_v8  ;;  %v7705_v55 = vpop.f32.mrf.mxu0  ;;  %8533 = vmatprep.subr.bf16.mxu0 %v11272_v17  ;;  %v7484_v61 = vadd.f32 %v15561_v29, %v7371_v20  ;;  %v11276_v20 = vld [vmem:[#allocation12 + $0x520] ss:$28 sps:$4 sm:$0xff]   ;;  %v15571_v8 = vld [vmem:[#allocation69_spill] sm:$0xff]  ;;  %v11290_v10 = vld [vmem:[#allocation12 + $0x408] ss:$28 sps:$4 sm:$0xff]  }
 0x4dc   : > { %v14047_v27 = vpop.f32.mrf.mxu1  ;;  %9187 = vst [vmem:[%s13866_s18 + $0x238] sm:$0xff] %v11366_v39  ;;  %11379 = vtanh.f32 %v7704_v60  ;;  %8648 = vmatprep.mubr.bf16.mxu1 %v15563_v42  ;;  %v7706_v54 = vadd.f32 %v7705_v55, %v7593_v15  ;;  %v11277_v60 = vld [vmem:[#allocation12 + $0x6a8] ss:$28 sps:$4 sm:$0xff]   ;;  %v11286_v39 = vld [vmem:[#allocation12 + $0x8a0] ss:$28 sps:$4 sm:$0xff]  }
 0x4dd   : > { %15560 = vst [vmem:[#allocation105_spill] sm:$0xff] %v14047_v27  ;;  %v11368_v49 = vpop.eup %11367  ;;  %v7707_v62 = vpop.f32.mrf.mxu0  ;;  %v7597_v41 = vadd.f32 %v13813_v47, %v7484_v61  ;;  %v15566_v47 = vld [vmem:[#allocation66_spill] sm:$0xff]  ;;  %v11287_v61 = vld [vmem:[#allocation12 + $0xa28] ss:$28 sps:$4 sm:$0xff]  }
 0x4de   : > { %v14053_v40 = vpop.f32.mrf.mxu1  ;;  %9193 = vst [vmem:[%s13866_s18 + $0x268] sm:$0xff] %v11368_v49  ;;  %11381 = vtanh.f32 %v7706_v54  ;;  %v7708_v17 = vadd.f32 %v7707_v62, %v7595_v44  ;;  %8534 = vmatpush2.bf16.msra.mxu0 %v11270_v46  ;;  %v15568_v42 = vld [vmem:[#allocation36_spill] sm:$0xff]  ;;  %v15569_v62 = vld [vmem:[#allocation37_spill] sm:$0xff]  ;;  %v11283_v33 = vld [vmem:[#allocation12 + $0x600] ss:$28 sps:$4 sm:$0xff]  }
 0x4df   : > { %15564 = vst [vmem:[#allocation119_spill] sm:$0xff] %v14053_v40  ;;  %v11370_v24 = vpop.eup %11369  ;;  %v7709_v56 = vpop.f32.mrf.mxu0  ;;  %10248 = vmatprep.subr.bf16.mxu0 %v11275_v58  ;;  %v11278_v58 = vld [vmem:[#allocation12 + $0x4e8] ss:$28 sps:$4 sm:$0xff]   ;;  %v11279_v49 = vld [vmem:[#allocation12 + $0x670] ss:$28 sps:$4 sm:$0xff]   ;;  %v15574_v36 = vld [vmem:[#allocation70_spill] sm:$0xff] }
 0x4e0   : > { %v14057_v51 = vpop.f32.mrf.mxu1  ;;  %9194 = vst [vmem:[%s13866_s18 + $0x270] sm:$0xff] %v11370_v24  ;;  %11383 = vtanh.f32 %v7708_v17  ;;  %v7710_v15 = vadd.f32 %v7709_v56, %v7597_v41  ;;  %v11288_v17 = vld [vmem:[#allocation12 + $0x868] ss:$28 sps:$4 sm:$0xff]   ;;  %v11291_v56 = vld [vmem:[#allocation12 + $0x9f0] ss:$28 sps:$4 sm:$0xff]  }
 0x4e1   : > { %15565 = vst [vmem:[#allocation86_spill] sm:$0xff] %v14057_v51  ;;  %v11372_v55 = vpop.eup %11371  ;;  %v14060_v29 = vpop.f32.mrf.mxu0  ;;  %8536 = vmatmul.mubr.bf16.vlgmr.msra.gmra.mxu0 %v15566_v47  ;;  %v11293_v47 = vld [vmem:[#allocation12 + $0x9b8] ss:$28 sps:$4 sm:$0xff]  }
 0x4e2   : > { %9200 = vst [vmem:[%s13866_s18 + $0x2a0] sm:$0xff] %v11372_v55  ;;  %11385 = vtanh.f32 %v7710_v15  ;;  %v14064_v46 = vpop.f32.mrf.mxu1  ;;  %10249 = vmatpush3.bf16.msra.mxu0 %v11276_v20  ;;  %8545 = vmatprep.mubr.bf16.mxu0 %v15567_v21  ;;  %v15573_v51 = vld [vmem:[#allocation26_spill] sm:$0xff] }
 0x4e3   : > { %v11374_v44 = vpop.eup %11373  ;;  %8649 = vmatmul.mubr.bf16.vlgmr.msra.gmra.mxu1 %v15568_v42  ;;  %v14068_v54 = vpop.f32.mrf.mxu0  ;;  %10250 = vmatprep.subr.bf16.mxu0 %v11277_v60  ;;  %v11280_v60 = vld [vmem:[#allocation12 + $0x4b0] ss:$28 sps:$4 sm:$0xff]   ;;  %v11281_v42 = vld [vmem:[#allocation12 + $0x638] ss:$28 sps:$4 sm:$0xff]  }
 0x4e4   : > { %9201 = vst [vmem:[%s13866_s18 + $0x2a8] sm:$0xff] %v11374_v44  ;;  %8656 = vmatprep.mubr.bf16.mxu1 %v15569_v62  ;;  %v14072_v41 = vpop.f32.mrf.mxu1  ;;  %10313 = vmatpush3.bf16.msra.mxu1 %v11286_v39  ;;  %v11292_v39 = vld [vmem:[#allocation12 + $0x830] ss:$28 sps:$4 sm:$0xff]  }
 0x4e5   : > { %v11376_v20 = vpop.eup %11375  ;;  %v14074_v24 = vpop.f32.mrf.mxu0  ;;  %10314 = vmatprep.subr.bf16.mxu1 %v11287_v61 }
 0x4e6   : > { %9207 = vst [vmem:[%s13866_s18 + $0x2d8] sm:$0xff] %v11376_v20  ;;  %v14077_v15 = vpop.f32.mrf.mxu1  ;;  %10251 = vmatpush3.bf16.msra.mxu0 %v11278_v58  ;;  %v15570_v20 = vld [vmem:[#allocation68_spill] sm:$0xff] }
 0x4e7   : > { %v11378_v55 = vpop.eup %11377  ;;  %v14079_v44 = vpop.f32.mrf.mxu0  ;;  %10252 = vmatprep.subr.bf16.mxu0 %v11279_v49  ;;  %v11282_v49 = vld [vmem:[#allocation12 + $0x478] ss:$28 sps:$4 sm:$0xff]  }
 0x4e8   : > { %9208 = vst [vmem:[%s13866_s18 + $0x2e0] sm:$0xff] %v11378_v55  ;;  %v14082_v62 = vpop.f32.mrf.mxu1  ;;  %10315 = vmatpush3.bf16.msra.mxu1 %v11288_v17 }
 0x4e9   : > { %v11380_v21 = vpop.eup %11379  ;;  %v14084_v61 = vpop.f32.mrf.mxu0  ;;  %8546 = vmatmul.mubr.bf16.gmra.mxu0 %v15570_v20  ;;  %10316 = vmatprep.subr.bf16.mxu1 %v11291_v56 }
 0x4ea   : > { %9214 = vst [vmem:[%s13866_s18 + $0x310] sm:$0xff] %v11380_v21  ;;  %v14088_v58 = vpop.f32.mrf.mxu1  ;;  %8555 = vmatprep.mubr.bf16.mxu0 %v15571_v8  ;;  %10253 = vmatpush3.bf16.msra.mxu0 %v11280_v60  ;;  %v11294_v21 = vld [vmem:[#allocation12 + $0x7f8] ss:$28 sps:$4 sm:$0xff]   ;;  %v11297_v60 = vld [vmem:[#allocation12 + $0x980] ss:$28 sps:$4 sm:$0xff]  }
 0x4eb   : > { %v11382_v55 = vpop.eup %11381  ;;  %8657 = vmatmul.mubr.bf16.gmra.mxu1 %v15572_v32  ;;  %v14092_v17 = vpop.f32.mrf.mxu0  ;;  %10254 = vmatprep.subr.bf16.mxu0 %v11281_v42  ;;  %v11285_v32 = vld [vmem:[#allocation12 + $0x440] ss:$28 sps:$4 sm:$0xff]  }
 0x4ec   : > { %9215 = vst [vmem:[%s13866_s18 + $0x318] sm:$0xff] %v11382_v55  ;;  %8664 = vmatprep.mubr.bf16.mxu1 %v15573_v51  ;;  %v14096_v56 = vpop.f32.mrf.mxu1  ;;  %10317 = vmatpush3.bf16.msra.mxu1 %v11292_v39  ;;  %v11289_v51 = vld [vmem:[#allocation12 + $0x5c8] ss:$28 sps:$4 sm:$0xff]   ;;  %v11298_v39 = vld [vmem:[#allocation12 + $0x7c0] ss:$28 sps:$4 sm:$0xff]  }
 0x4ed   : > { %v11384_v20 = vpop.eup %11383  ;;  %v14098_v8 = vpop.f32.mrf.mxu0  ;;  %10318 = vmatprep.subr.bf16.mxu1 %v11293_v47  ;;  %v11299_v47 = vld [vmem:[#allocation12 + $0x948] ss:$28 sps:$4 sm:$0xff]  }
 0x4ee   : > { %9221 = vst [vmem:[%s13866_s18 + $0x348] sm:$0xff] %v11384_v20  ;;  %v14101_v40 = vpop.f32.mrf.mxu1  ;;  %10255 = vmatpush3.bf16.msra.mxu0 %v11282_v49  ;;  %v15575_v49 = vld [vmem:[#allocation71_spill] sm:$0xff] }
 0x4ef   : > { %v11386_v42 = vpop.eup %11385  ;;  %v14103_v45 = vpop.f32.mrf.mxu0  ;;  %10256 = vmatprep.subr.bf16.mxu0 %v11283_v33 }
 0x4f0   : > { %9222 = vst [vmem:[%s13866_s18 + $0x350] sm:$0xff] %v11386_v42  ;;  %v14106_v55 = vpop.f32.mrf.mxu1  ;;  %10319 = vmatpush3.bf16.msra.mxu1 %v11294_v21  ;;  %v11295_v42 = vld [vmem:[#allocation12 + $0x590] ss:$28 sps:$4 sm:$0xff]  }
 0x4f1   : > { %v14108_v27 = vpop.f32.mrf.mxu0  ;;  %8556 = vmatmul.mubr.bf16.gmra.mxu0 %v15574_v36  ;;  %10320 = vmatprep.subr.bf16.mxu1 %v11297_v60  ;;  %v15577_v21 = vld [vmem:[#allocation28_spill] sm:$0xff] }
 0x4f2   : > { %v14111_v20 = vpop.f32.mrf.mxu1  ;;  %8565 = vmatprep.mubr.bf16.mxu0 %v15575_v49  ;;  %10257 = vmatpush3.bf16.msra.mxu0 %v11285_v32  ;;  %v11300_v36 = vld [vmem:[#allocation12 + $0x788] ss:$28 sps:$4 sm:$0xff]   ;;  %v11296_v32 = vld [vmem:[#allocation12 + $0x3d0] ss:$28 sps:$4 sm:$0xff]  }
 0x4f3   : > { %8665 = vmatmul.mubr.bf16.gmra.mxu1 %v15576_v11  ;;  %v14115_v33 = vpop.f32.mrf.mxu0  ;;  %10258 = vmatprep.subr.bf16.mxu0 %v11289_v51  ;;  %v11301_v11 = vld [vmem:[#allocation12 + $0x558] ss:$28 sps:$4 sm:$0xff]  }
 0x4f4   : > { %8672 = vmatprep.mubr.bf16.mxu1 %v15577_v21  ;;  %v14118_v3 = vpop.f32.mrf.mxu1  ;;  %10321 = vmatpush3.bf16.msra.mxu1 %v11298_v39  ;;  %v11304_v21 = vld [vmem:[#allocation12 + $0x750] ss:$28 sps:$4 sm:$0xff]  }
 0x4f5   : > { %v14120_v60 = vpop.f32.mrf.mxu0  ;;  %10322 = vmatprep.subr.bf16.mxu1 %v11299_v47  ;;  %v15578_v39 = vld [vmem:[#allocation72_spill] sm:$0xff] }
 0x4f6   : > { %v14122_v35 = vpop.f32.mrf.mxu1  ;;  %10259 = vmatpush3.bf16.msra.mxu0 %v11290_v10  ;;  %v11302_v10 = vld [vmem:[#allocation12 + $0x398] ss:$28 sps:$4 sm:$0xff]  }
 0x4f7   : > { %v14124_v49 = vpop.f32.mrf.mxu0  ;;  %10260 = vmatprep.subr.bf16.mxu0 %v11295_v42 }
 0x4f8   : > { %v14126_v51 = vpop.f32.mrf.mxu1  ;;  %10323 = vmatpush3.bf16.msra.mxu1 %v11300_v36  ;;  %v15582_v36 = vld [vmem:[#allocation29_spill] sm:$0xff] }
 0x4f9   : > { %v14128_v0 = vpop.f32.mrf.mxu0  ;;  %8566 = vmatmul.mubr.bf16.gmra.mxu0 %v15578_v39  ;;  %10324 = vmatprep.subr.bf16.mxu1 %v11303_v38  ;;  %v11306_v39 = vld [vmem:[#allocation12 + $0x718] ss:$28 sps:$4 sm:$0xff]  }
 0x4fa   : > { %v14131_v47 = vpop.f32.mrf.mxu1  ;;  %8575 = vmatprep.mubr.bf16.mxu0 %v15580_v2  ;;  %10261 = vmatpush3.bf16.msra.mxu0 %v11296_v32  ;;  %v15589_v2 = vld [vmem:[#allocation74_spill] sm:$0xff] }
 0x4fb   : > { %15579 = vst [vmem:[#allocation107_spill] sm:$0xff] %v14131_v47  ;;  %8673 = vmatmul.mubr.bf16.gmra.mxu1 %v15581_v9  ;;  %v14135_v42 = vpop.f32.mrf.mxu0  ;;  %10262 = vmatprep.subr.bf16.mxu0 %v11301_v11 }
 0x4fc   : > { %8680 = vmatprep.mubr.bf16.mxu1 %v15582_v36  ;;  %v14138_v13 = vpop.f32.mrf.mxu1  ;;  %10325 = vmatpush3.bf16.msra.mxu1 %v11304_v21  ;;  %v15591_v21 = vld [vmem:[#allocation75_spill] sm:$0xff] }
 0x4fd   : > { %15583 = vst [vmem:[#allocation121_spill] sm:$0xff] %v14138_v13  ;;  %v14140_v38 = vpop.f32.mrf.mxu0  ;;  %10326 = vmatprep.subr.bf16.mxu1 %v11305_v4  ;;  %v15592_v13 = vld [vmem:[#allocation31_spill] sm:$0xff] }
 0x4fe   : > { %15584 = vst [vmem:[#allocation87_spill] sm:$0xff] %v14140_v38  ;;  %v14142_v47 = vpop.f32.mrf.mxu1  ;;  %10263 = vmatpush3.bf16.msra.mxu0 %v11302_v10  ;;  %v15594_v10 = vld [vmem:[#allocation32_spill] sm:$0xff] }
 0x4ff   : > { %15585 = vst [vmem:[#allocation109_spill] sm:$0xff] %v14142_v47  ;;  %v14144_v32 = vpop.f32.mrf.mxu0  ;;  %10376 = vmatprep.subr.bf16.mxu0 %v11307_v43  ;;  %v11309_v38 = vld [vmem:[#allocation12 + $0xda8] ss:$28 sps:$4 sm:$0xff]  }
 0x500   : > { %15586 = vst [vmem:[#allocation88_spill] sm:$0xff] %v14144_v32  ;;  %v14146_v9 = vpop.f32.mrf.mxu1  ;;  %10327 = vmatpush3.bf16.msra.mxu1 %v11306_v39 }
 0x501   : > { %15587 = vst [vmem:[#allocation111_spill] sm:$0xff] %v14146_v9  ;;  %v14148_v11 = vpop.f32.mrf.mxu0  ;;  %8576 = vmatmul.mubr.bf16.gmra.mxu0 %v15589_v2  ;;  %10440 = vmatprep.subr.bf16.mxu1 %v11307_v43 }
 0x502   : > { %15588 = vst [vmem:[#allocation123_spill] sm:$0xff] %v14148_v11  ;;  %v14151_v36 = vpop.f32.mrf.mxu1  ;;  %8585 = vmatprep.mubr.bf16.mxu0 %v15591_v21 }
 0x503   : > { %15590 = vst [vmem:[#allocation89_spill] sm:$0xff] %v14151_v36  ;;  %8681 = vmatmul.mubr.bf16.gmra.mxu1 %v15592_v13  ;;  %v14155_v4 = vpop.f32.mrf.mxu0  ;;  %v15601_v36 = vld [vmem:[#allocation76_spill] sm:$0xff]  ;;  %v15603_v13 = vld [vmem:[#allocation77_spill] sm:$0xff] }
 0x504   : > { %15593 = vst [vmem:[#allocation112_spill] sm:$0xff] %v14155_v4  ;;  %8688 = vmatprep.mubr.bf16.mxu1 %v15594_v10  ;;  %v14158_v47 = vpop.f32.mrf.mxu1  ;;  %v15604_v4 = vld [vmem:[#allocation33_spill] sm:$0xff] }
 0x505   : > { %15595 = vst [vmem:[#allocation124_spill] sm:$0xff] %v14158_v47  ;;  %v14160_v32 = vpop.f32.mrf.mxu0  ;;  %v15606_v47 = vld [vmem:[#allocation39_spill] sm:$0xff] }
 0x506   : > { %15596 = vst [vmem:[#allocation90_spill] sm:$0xff] %v14160_v32  ;;  %v14162_v39 = vpop.f32.mrf.mxu1 }
 0x507   : > { %15597 = vst [vmem:[#allocation113_spill] sm:$0xff] %v14162_v39  ;;  %v14164_v9 = vpop.f32.mrf.mxu0 }
 0x508   : > { %15598 = vst [vmem:[#allocation91_spill] sm:$0xff] %v14164_v9  ;;  %v14166_v2 = vpop.f32.mrf.mxu1 }
 0x509   : > { %15599 = vst [vmem:[#allocation114_spill] sm:$0xff] %v14166_v2  ;;  %v14168_v43 = vpop.f32.mrf.mxu0  ;;  %8586 = vmatmul.mubr.bf16.gmra.mxu0 %v15601_v36 }
 0x50a   : > { %15600 = vst [vmem:[#allocation92_spill] sm:$0xff] %v14168_v43  ;;  %v14171_v21 = vpop.f32.mrf.mxu1  ;;  %8595 = vmatprep.mubr.bf16.mxu0 %v15603_v13 }
 0x50b   : > { %15602 = vst [vmem:[#allocation115_spill] sm:$0xff] %v14171_v21  ;;  %8689 = vmatmul.mubr.bf16.gmra.mxu1 %v15604_v4  ;;  %v14175_v10 = vpop.f32.mrf.mxu0  ;;  %v15613_v21 = vld [vmem:[#allocation78_spill] sm:$0xff]  ;;  %v15615_v4 = vld [vmem:[#allocation79_spill] sm:$0xff] }
 0x50c   : > { %15605 = vst [vmem:[#allocation93_spill] sm:$0xff] %v14175_v10  ;;  %8696 = vmatprep.mubr.bf16.mxu1 %v15606_v47  ;;  %v14178_v32 = vpop.f32.mrf.mxu1  ;;  %v15616_v10 = vld [vmem:[#allocation42_spill] sm:$0xff] }
 0x50d   : > { %15607 = vst [vmem:[#allocation117_spill] sm:$0xff] %v14178_v32  ;;  %v14180_v39 = vpop.f32.mrf.mxu0  ;;  %v15618_v32 = vld [vmem:[#allocation43_spill] sm:$0xff] }
 0x50e   : > { %15608 = vst [vmem:[#allocation94_spill] sm:$0xff] %v14180_v39  ;;  %v14182_v9 = vpop.f32.mrf.mxu1 }
 0x50f   : > { %15609 = vst [vmem:[#allocation120_spill] sm:$0xff] %v14182_v9  ;;  %v14184_v2 = vpop.f32.mrf.mxu0 }
 0x510   : > { %15610 = vst [vmem:[#allocation96_spill] sm:$0xff] %v14184_v2  ;;  %v14186_v43 = vpop.f32.mrf.mxu1  ;;  %v14202_v2 = vld [vmem:[#allocation13] sm:$0xff] }
 0x511   : > { %15611 = vst [vmem:[#allocation122_spill] sm:$0xff] %v14186_v43  ;;  %v14188_v36 = vpop.f32.mrf.mxu0  ;;  %8596 = vmatmul.mubr.bf16.gmra.mxu0 %v15613_v21  ;;  %15621 = vst [vmem:[#allocation130_spill] sm:$0xff] %v14202_v2  ;;  %v15622_v43 = vld [vmem:[#allocation23_spill] sm:$0xff] }
 0x512   : > { %15612 = vst [vmem:[#allocation98_spill] sm:$0xff] %v14188_v36  ;;  %v14191_v13 = vpop.f32.mrf.mxu1  ;;  %8605 = vmatprep.mubr.bf16.mxu0 %v15615_v4  ;;  %v14206_v36 = vrot.slane %v14202_v2, %v15622_v43  ;;  %v15625_v4 = vld [vmem:[#allocation24_spill] sm:$0xff]  ;;  %v15630_v43 = vld [vmem:[#allocation30_spill] sm:$0xff] }
 0x513   : > { %15614 = vst [vmem:[#allocation125_spill] sm:$0xff] %v14191_v13  ;;  %8697 = vmatmul.mubr.bf16.gmra.mxu1 %v15616_v10  ;;  %v14195_v47 = vpop.f32.mrf.mxu0  ;;  %v14214_v10 = vrot.slane %v14202_v2, %v15625_v4 }
 0x514   : > { %15617 = vst [vmem:[#allocation129_spill] sm:$0xff] %v14195_v47  ;;  %8704 = vmatprep.mubr.bf16.mxu1 %v15618_v32  ;;  %v14198_v39 = vpop.f32.mrf.mxu1 }
 0x515   : > { %15619 = vst [vmem:[#allocation100_spill] sm:$0xff] %v14198_v39  ;;  %v14200_v9 = vpop.f32.mrf.mxu0  ;;  %v15628_v39 = vld [vmem:[#allocation80_spill] sm:$0xff]  ;;  %v7749_v4 = vadd.f32 %v13828_v59, %v14214_v10  ;;  %v7753_v59 = vadd.f32 %v13841_v12, %v14214_v10 }
 0x516   : > { %15620 = vst [vmem:[#allocation126_spill] sm:$0xff] %v14200_v9  ;;  %v14208_v21 = vpop.f32.mrf.mxu1  ;;  %v7747_v9 = vadd.f32 %v13819_v53, %v14206_v36  ;;  %v7751_v53 = vadd.f32 %v13835_v28, %v14206_v36  ;;  %v7757_v28 = vadd.f32 %v13847_v5, %v14206_v36  ;;  %v11310_v12 = vld [vmem:[#allocation12 + $0xbe8] ss:$28 sps:$4 sm:$0xff]  }
 0x517   : > { %15623 = vst [vmem:[#allocation102_spill] sm:$0xff] %v14208_v21  ;;  %v14210_v13 = vpop.f32.mrf.mxu0  ;;  %v15631_v21 = vld [vmem:[#allocation46_spill] sm:$0xff] }
 0x518   : > { %15624 = vst [vmem:[#allocation127_spill] sm:$0xff] %v14210_v13  ;;  %v14216_v47 = vpop.f32.mrf.mxu1  ;;  %v7860_v2 = vadd.f32 %v14060_v29, %v7747_v9  ;;  %v7864_v9 = vadd.f32 %v14074_v24, %v7751_v53  ;;  %v11311_v24 = vld [vmem:[#allocation12 + $0xd70] ss:$28 sps:$4 sm:$0xff]  }
 0x519   : > { %15626 = vst [vmem:[#allocation132_spill] sm:$0xff] %v14216_v47  ;;  %v14218_v32 = vpop.f32.mrf.mxu0  ;;  %8606 = vmatmul.mubr.bf16.gmra.mxu0 %v15628_v39  ;;  %v15633_v47 = vld [vmem:[#allocation53_spill] sm:$0xff] }
 0x51a   : > { %15627 = vst [vmem:[#allocation104_spill] sm:$0xff] %v14218_v32  ;;  %v14223_v11 = vpop.f32.mrf.mxu1  ;;  %8745 = vmatprep.mubr.bf16.mxu0 %v15630_v43  ;;  %v7862_v43 = vadd.f32 %v14068_v54, %v7749_v4  ;;  %v7973_v29 = vadd.f32 %v14064_v46, %v7860_v2  ;;  %v7866_v4 = vadd.f32 %v14079_v44, %v7753_v59 }
 0x51b   : > { %15629 = vst [vmem:[#allocation128_spill] sm:$0xff] %v14223_v11  ;;  %8705 = vmatmul.mubr.bf16.gmra.mxu1 %v15631_v21  ;;  %v14227_v13 = vpop.f32.mrf.mxu0  ;;  %v11308_v21 = vld [vmem:[#allocation12 + $0xc20] ss:$28 sps:$4 sm:$0xff]   ;;  %v7759_v2 = vadd.f32 %v13855_v18, %v14214_v10 }
 0x51c   : > { %15632 = vst [vmem:[#allocation106_spill] sm:$0xff] %v14227_v13  ;;  %8842 = vmatprep.mubr.bf16.mxu1 %v15633_v47  ;;  %v14233_v32 = vpop.f32.mrf.mxu1  ;;  %v7975_v54 = vadd.f32 %v14072_v41, %v7862_v43  ;;  %v7870_v41 = vadd.f32 %v14084_v61, %v7757_v28  ;;  %v11312_v61 = vld [vmem:[#allocation12 + $0xbb0] ss:$28 sps:$4 sm:$0xff]   ;;  %v7769_v28 = vadd.f32 %v13890_v19, %v14214_v10 }
 0x51d   : > { %15634 = vst [vmem:[#allocation131_spill] sm:$0xff] %v14233_v32  ;;  %v14235_v39 = vpop.f32.mrf.mxu0  ;;  %v7872_v53 = vadd.f32 %v14092_v17, %v7759_v2  ;;  %v7767_v17 = vadd.f32 %v13880_v6, %v14206_v36 }
 0x51e   : > { %v14240_v11 = vpop.f32.mrf.mxu1  ;;  %v7882_v2 = vadd.f32 %v14115_v33, %v7769_v28  ;;  %v15639_v28 = vld [vmem:[#allocation107_spill] sm:$0xff] }
 0x51f   : > { %15635 = vst [vmem:[#allocation108_spill] sm:$0xff] %v14240_v11  ;;  %v14242_v13 = vpop.f32.mrf.mxu0 }
 0x520   : > { %v14248_v47 = vpop.f32.mrf.mxu1 }
 0x521   : > { %v8085_v32 = vpop.f32.mrf.mxu0  ;;  %8746 = vmatmul.mubr.bf16.vlgmr.msra.gmra.mxu0 %v13111_v50  ;;  %v7977_v50 = vadd.f32 %v14077_v15, %v7864_v9 }
 0x522   : > { %v8086_v11 = vadd.f32 %v8085_v32, %v7973_v29  ;;  %10377 = vmatpush3.bf16.msra.mxu0 %v11308_v21  ;;  %8753 = vmatprep.mubr.bf16.mxu0 %v13146_v37  ;;  %v7761_v37 = vadd.f32 %v13861_v14, %v14206_v36  ;;  %v11313_v14 = vld [vmem:[#allocation12 + $0xd38] ss:$28 sps:$4 sm:$0xff]  }
 0x523   : > { %v14258_v46 = vpop.f32.mrf.mxu1  ;;  %8843 = vmatmul.mubr.bf16.vlgmr.msra.gmra.mxu1 %v13365_v48  ;;  %v8087_v5 = vpop.f32.mrf.mxu0  ;;  %10378 = vmatprep.subr.bf16.mxu0 %v11309_v38  ;;  %v7979_v48 = vadd.f32 %v14082_v62, %v7866_v4  ;;  %v7771_v4 = vadd.f32 %v13898_v26, %v14206_v36  ;;  %v11317_v26 = vld [vmem:[#allocation12 + $0xcc8] ss:$28 sps:$4 sm:$0xff]  }
 0x524   : > { %11387 = vtanh.f32 %v8086_v11  ;;  %8850 = vmatprep.mubr.bf16.mxu1 %v13374_v34  ;;  %v8088_v44 = vadd.f32 %v8087_v5, %v7975_v54  ;;  %10448 = vmatpush3.bf16.msra.mxu1 %v11308_v21  ;;  %v7763_v34 = vadd.f32 %v13871_v7, %v14214_v10  ;;  %v7983_v21 = vadd.f32 %v14088_v58, %v7870_v41 }
 0x525   : > { %v14266_v18 = vpop.f32.mrf.mxu1  ;;  %v8089_v32 = vpop.f32.mrf.mxu0  ;;  %10441 = vmatprep.subr.bf16.mxu1 %v11309_v38  ;;  %v7874_v38 = vadd.f32 %v14098_v8, %v7761_v37  ;;  %v7985_v7 = vadd.f32 %v14096_v56, %v7872_v53  ;;  %v11314_v8 = vld [vmem:[#allocation12 + $0xb78] ss:$28 sps:$4 sm:$0xff]   ;;  %v7884_v41 = vadd.f32 %v14120_v60, %v7771_v4  ;;  %v11318_v60 = vld [vmem:[#allocation12 + $0xb08] ss:$28 sps:$4 sm:$0xff]  }
 0x526   : > { %11389 = vtanh.f32 %v8088_v44  ;;  %v8090_v15 = vadd.f32 %v8089_v32, %v7977_v50  ;;  %10379 = vmatpush3.bf16.msra.mxu0 %v11310_v12  ;;  %v7876_v9 = vadd.f32 %v14103_v45, %v7763_v34  ;;  %v7880_v45 = vadd.f32 %v14108_v27, %v7767_v17  ;;  %v11316_v27 = vld [vmem:[#allocation12 + $0xb40] ss:$28 sps:$4 sm:$0xff]  }
 0x527   : > { %v14272_v11 = vpop.f32.mrf.mxu1  ;;  %v8091_v43 = vpop.f32.mrf.mxu0  ;;  %10380 = vmatprep.subr.bf16.mxu0 %v11311_v24  ;;  %v7987_v56 = vadd.f32 %v14101_v40, %v7874_v38  ;;  %v7777_v44 = vadd.f32 %v13912_v63, %v14206_v36  ;;  %v7995_v32 = vadd.f32 %v14118_v3, %v7882_v2  ;;  %v7779_v63 = vadd.f32 %v13922_v23, %v14214_v10  ;;  %v11319_v3 = vld [vmem:[#allocation12 + $0xc90] ss:$28 sps:$4 sm:$0xff]   ;;  %v15637_v23 = vld [vmem:[#allocation95_spill] sm:$0xff] }
 0x528   : > { %11391 = vtanh.f32 %v8090_v15  ;;  %v8092_v62 = vadd.f32 %v8091_v43, %v7979_v48  ;;  %10449 = vmatpush3.bf16.msra.mxu1 %v11310_v12  ;;  %v7993_v50 = vadd.f32 %v14111_v20, %v7880_v45  ;;  %v15641_v45 = vld [vmem:[#allocation97_spill] sm:$0xff] }
 0x529   : > { %v14278_v59 = vpop.f32.mrf.mxu1  ;;  %v8095_v29 = vpop.f32.mrf.mxu0  ;;  %8754 = vmatmul.mubr.bf16.gmra.mxu0 %v13167_v22  ;;  %10442 = vmatprep.subr.bf16.mxu1 %v11311_v24  ;;  %v11315_v22 = vld [vmem:[#allocation12 + $0xd00] ss:$28 sps:$4 sm:$0xff]   ;;  %v15643_v2 = vld [vmem:[#allocation121_spill] sm:$0xff] }
 0x52a   : > { %11393 = vtanh.f32 %v8092_v62  ;;  %v8096_v58 = vadd.f32 %v8095_v29, %v7983_v21  ;;  %8761 = vmatprep.mubr.bf16.mxu0 %v13202_v57  ;;  %10381 = vmatpush3.bf16.msra.mxu0 %v11312_v61  ;;  %v11320_v62 = vld [vmem:[#allocation12 + $0xad0] ss:$28 sps:$4 sm:$0xff]  }
 0x52b   : > { %v14286_v6 = vpop.f32.mrf.mxu1  ;;  %8851 = vmatmul.mubr.bf16.gmra.mxu1 %v13376_v31  ;;  %v8097_v54 = vpop.f32.mrf.mxu0  ;;  %10382 = vmatprep.subr.bf16.mxu0 %v11313_v14  ;;  %v7989_v31 = vadd.f32 %v14106_v55, %v7876_v9  ;;  %v15638_v29 = vld [vmem:[#allocation81_spill] sm:$0xff] }
 0x52c   : > { %11395 = vtanh.f32 %v8096_v58  ;;  %8858 = vmatprep.mubr.bf16.mxu1 %v13383_v52  ;;  %v8098_v57 = vadd.f32 %v8097_v54, %v7985_v7  ;;  %10450 = vmatpush3.bf16.msra.mxu1 %v11312_v61  ;;  %v7773_v52 = vadd.f32 %v13905_v30, %v14214_v10  ;;  %v7890_v61 = vadd.f32 %v14128_v0, %v7777_v44 }
 0x52d   : > { %v14294_v19 = vpop.f32.mrf.mxu1  ;;  %v8099_v12 = vpop.f32.mrf.mxu0  ;;  %10443 = vmatprep.subr.bf16.mxu1 %v11313_v14  ;;  %v7781_v14 = vadd.f32 %v15637_v23, %v14206_v36  ;;  %v7783_v7 = vadd.f32 %v15638_v29, %v14214_v10 }
 0x52e   : > { %11397 = vtanh.f32 %v8098_v57  ;;  %v8100_v40 = vadd.f32 %v8099_v12, %v7987_v56  ;;  %10383 = vmatpush3.bf16.msra.mxu0 %v11314_v8  ;;  %v7886_v48 = vadd.f32 %v14124_v49, %v7773_v52  ;;  %v7997_v49 = vadd.f32 %v14122_v35, %v7884_v41 }
 0x52f   : > { %v14300_v5 = vpop.f32.mrf.mxu1  ;;  %v8101_v24 = vpop.f32.mrf.mxu0  ;;  %10384 = vmatprep.subr.bf16.mxu0 %v11315_v22  ;;  %v7892_v35 = vadd.f32 %v14135_v42, %v7779_v63  ;;  %v8003_v54 = vadd.f32 %v15639_v28, %v7890_v61  ;;  %v7787_v57 = vadd.f32 %v15641_v45, %v14206_v36  ;;  %v15650_v63 = vld [vmem:[#allocation57_spill] sm:$0xff]  ;;  %v15656_v28 = vld [vmem:[#allocation90_spill] sm:$0xff] }
 0x530   : > { %11399 = vtanh.f32 %v8100_v40  ;;  %v8102_v55 = vadd.f32 %v8101_v24, %v7989_v31  ;;  %10451 = vmatpush3.bf16.msra.mxu1 %v11314_v8  ;;  %v7999_v38 = vadd.f32 %v14126_v51, %v7886_v48  ;;  %v11321_v8 = vld [vmem:[#allocation12 + $0xc58] ss:$28 sps:$4 sm:$0xff]   ;;  %v15640_v51 = vld [vmem:[#allocation87_spill] sm:$0xff] }
 0x531   : > { %v11388_v33 = vpop.eup %11387  ;;  %v14306_v37 = vpop.f32.mrf.mxu1  ;;  %8762 = vmatmul.mubr.bf16.gmra.mxu0 %v15473_v1  ;;  %10444 = vmatprep.subr.bf16.mxu1 %v11315_v22  ;;  %v7894_v22 = vadd.f32 %v15640_v51, %v7781_v14  ;;  %v15642_v31 = vld [vmem:[#allocation41_spill] sm:$0xff]  ;;  %v8005_v40 = vadd.f32 %v15643_v2, %v7892_v35  ;;  %v15653_v14 = vld [vmem:[#allocation112_spill] sm:$0xff]  ;;  %v15660_v2 = vld [vmem:[#allocation91_spill] sm:$0xff] }
 0x532   : > { %v8105_v30 = vpop.f32.mrf.mxu0  ;;  %9118 = vst [vmem:[%s13866_s18 + $0x10] sm:$0xff] %v11388_v33  ;;  %11401 = vtanh.f32 %v8102_v55  ;;  %8769 = vmatprep.mubr.bf16.mxu0 %v15475_v25  ;;  %10385 = vmatpush3.bf16.msra.mxu0 %v11316_v27  ;;  %v15636_v25 = vld [vmem:[#allocation55_spill] sm:$0xff]  ;;  %v15646_v55 = vld [vmem:[#allocation82_spill] sm:$0xff]  ;;  %v15648_v48 = vld [vmem:[#allocation109_spill] sm:$0xff] }
 0x533   : > { %v8106_v20 = vadd.f32 %v8105_v30, %v7993_v50  ;;  %v11390_v53 = vpop.eup %11389  ;;  %v14315_v15 = vpop.f32.mrf.mxu1  ;;  %8859 = vmatmul.mubr.bf16.gmra.mxu1 %v15477_v16  ;;  %10386 = vmatprep.subr.bf16.mxu0 %v11317_v26  ;;  %v11322_v50 = vld [vmem:[#allocation12 + $0xa98] ss:$28 sps:$4 sm:$0xff]   ;;  %v7789_v33 = vadd.f32 %v15646_v55, %v14214_v10  ;;  %v15647_v30 = vld [vmem:[#allocation56_spill] sm:$0xff] }
 0x534   : > { %v8107_v1 = vpop.f32.mrf.mxu0  ;;  %9119 = vst [vmem:[%s13866_s18 + $0x18] sm:$0xff] %v11390_v53  ;;  %8866 = vmatprep.mubr.bf16.mxu1 %v15636_v25  ;;  %10452 = vmatpush3.bf16.msra.mxu1 %v11316_v27  ;;  %v15644_v27 = vld [vmem:[#allocation88_spill] sm:$0xff]  ;;  %v15663_v55 = vld [vmem:[#allocation58_spill] sm:$0xff] }
 0x535   : > { %11403 = vtanh.f32 %v8106_v20  ;;  %v8108_v34 = vadd.f32 %v8107_v1, %v7995_v32  ;;  %v11392_v43 = vpop.eup %11391  ;;  %v14324_v21 = vpop.f32.mrf.mxu1  ;;  %10445 = vmatprep.subr.bf16.mxu1 %v11317_v26  ;;  %v7896_v52 = vadd.f32 %v15644_v27, %v7783_v7  ;;  %v15645_v26 = vld [vmem:[#allocation44_spill] sm:$0xff]  ;;  %v8007_v20 = vadd.f32 %v15648_v48, %v7894_v22  ;;  %v15655_v7 = vld [vmem:[#allocation89_spill] sm:$0xff] }
 0x536   : > { %v8109_v16 = vpop.f32.mrf.mxu0  ;;  %9125 = vst [vmem:[%s13866_s18 + $0x48] sm:$0xff] %v11392_v43  ;;  %10387 = vmatpush3.bf16.msra.mxu0 %v11318_v60  ;;  %v15652_v43 = vld [vmem:[#allocation111_spill] sm:$0xff]  ;;  %v15657_v22 = vld [vmem:[#allocation40_spill] sm:$0xff] }
 0x537   : > { %11405 = vtanh.f32 %v8108_v34  ;;  %v8110_v0 = vadd.f32 %v8109_v16, %v7997_v49  ;;  %v11394_v17 = vpop.eup %11393  ;;  %v14331_v9 = vpop.f32.mrf.mxu1  ;;  %10388 = vmatprep.subr.bf16.mxu0 %v11319_v3  ;;  %v15651_v49 = vld [vmem:[#allocation34_spill] sm:$0xff]  ;;  %v8009_v23 = vadd.f32 %v15652_v43, %v7896_v52  ;;  %v7902_v16 = vadd.f32 %v15653_v14, %v7789_v33  ;;  %v15661_v52 = vld [vmem:[#allocation47_spill] sm:$0xff]  ;;  %v15665_v48 = vld [vmem:[#allocation92_spill] sm:$0xff] }
 0x538   : > { %v8111_v58 = vpop.f32.mrf.mxu0  ;;  %9126 = vst [vmem:[%s13866_s18 + $0x50] sm:$0xff] %v11394_v17  ;;  %10453 = vmatpush3.bf16.msra.mxu1 %v11318_v60  ;;  %v15649_v60 = vld [vmem:[#allocation123_spill] sm:$0xff]  ;;  %v7791_v61 = vadd.f32 %v15651_v49, %v14206_v36 }
 0x539   : > { %11407 = vtanh.f32 %v8110_v0  ;;  %v8112_v42 = vadd.f32 %v8111_v58, %v7999_v38  ;;  %v11396_v56 = vpop.eup %11395  ;;  %v14338_v4 = vpop.f32.mrf.mxu1  ;;  %8770 = vmatmul.mubr.bf16.gmra.mxu0 %v15642_v31  ;;  %10446 = vmatprep.subr.bf16.mxu1 %v11319_v3  ;;  %v7900_v53 = vadd.f32 %v15649_v60, %v7787_v57  ;;  %v15654_v0 = vld [vmem:[#allocation99_spill] sm:$0xff]  ;;  %v15658_v57 = vld [vmem:[#allocation45_spill] sm:$0xff] }
 0x53a   : > { %v8115_v12 = vpop.f32.mrf.mxu0  ;;  %9132 = vst [vmem:[%s13866_s18 + $0x80] sm:$0xff] %v11396_v56  ;;  %8777 = vmatprep.mubr.bf16.mxu0 %v15645_v26  ;;  %10389 = vmatpush3.bf16.msra.mxu0 %v11320_v62  ;;  %v15662_v26 = vld [vmem:[#allocation83_spill] sm:$0xff] }
 0x53b   : > { %11409 = vtanh.f32 %v8112_v42  ;;  %v8116_v24 = vadd.f32 %v8115_v12, %v8003_v54  ;;  %v11398_v41 = vpop.eup %11397  ;;  %v14347_v44 = vpop.f32.mrf.mxu1  ;;  %8867 = vmatmul.mubr.bf16.gmra.mxu1 %v15647_v30  ;;  %10390 = vmatprep.subr.bf16.mxu0 %v11321_v8  ;;  %v8013_v58 = vadd.f32 %v15655_v7, %v7900_v53  ;;  %v7797_v42 = vadd.f32 %v15657_v22, %v14206_v36  ;;  %v15659_v12 = vld [vmem:[#allocation124_spill] sm:$0xff]  ;;  %v15664_v30 = vld [vmem:[#allocation113_spill] sm:$0xff]  ;;  %v15666_v60 = vld [vmem:[#allocation59_spill] sm:$0xff] }
 0x53c   : > { %v8117_v32 = vpop.f32.mrf.mxu0  ;;  %9133 = vst [vmem:[%s13866_s18 + $0x88] sm:$0xff] %v11398_v41  ;;  %8874 = vmatprep.mubr.bf16.mxu1 %v15650_v63  ;;  %10454 = vmatpush3.bf16.msra.mxu1 %v11320_v62  ;;  %v7793_v62 = vadd.f32 %v15654_v0, %v14214_v10  ;;  %v8015_v31 = vadd.f32 %v15659_v12, %v7902_v16  ;;  %v15671_v7 = vld [vmem:[#allocation115_spill] sm:$0xff]  ;;  %v15673_v22 = vld [vmem:[#allocation116_spill] sm:$0xff] }
 0x53d   : > { %11411 = vtanh.f32 %v8116_v24  ;;  %v8118_v1 = vadd.f32 %v8117_v32, %v8005_v40  ;;  %v11400_v3 = vpop.eup %11399  ;;  %v14356_v25 = vpop.f32.mrf.mxu1  ;;  %10447 = vmatprep.subr.bf16.mxu1 %v11321_v8  ;;  %v7904_v8 = vadd.f32 %v15656_v28, %v7791_v61  ;;  %v15672_v28 = vld [vmem:[#allocation94_spill] sm:$0xff]  ;;  %v15675_v12 = vld [vmem:[#allocation48_spill] sm:$0xff] }
 0x53e   : > { %v8119_v34 = vpop.f32.mrf.mxu0  ;;  %9139 = vst [vmem:[%s13866_s18 + $0xb8] sm:$0xff] %v11400_v3  ;;  %10391 = vmatpush3.bf16.msra.mxu0 %v11322_v50  ;;  %v7906_v40 = vadd.f32 %v15660_v2, %v7793_v62 }
 0x53f   : > { %11413 = vtanh.f32 %v8118_v1  ;;  %v8120_v38 = vadd.f32 %v8119_v34, %v8007_v20  ;;  %v11402_v35 = vpop.eup %11401  ;;  %v14363_v17 = vpop.f32.mrf.mxu1  ;;  %v8017_v32 = vadd.f32 %v15664_v30, %v7904_v8  ;;  %v7910_v20 = vadd.f32 %v15665_v48, %v7797_v42  ;;  %v15667_v1 = vld [vmem:[#allocation54_spill] sm:$0xff]  ;;  %v15681_v30 = vld [vmem:[#allocation60_spill] sm:$0xff] }
 0x540   : > { %v8121_v29 = vpop.f32.mrf.mxu0  ;;  %9140 = vst [vmem:[%s13866_s18 + $0xc0] sm:$0xff] %v11402_v35  ;;  %10455 = vmatpush3.bf16.msra.mxu1 %v11322_v50  ;;  %v7799_v50 = vadd.f32 %v15662_v26, %v14214_v10  ;;  %v7801_v3 = vadd.f32 %v15667_v1, %v14206_v36  ;;  %v15668_v34 = vld [vmem:[#allocation114_spill] sm:$0xff]  ;;  %v15670_v35 = vld [vmem:[#allocation101_spill] sm:$0xff]  ;;  %v7807_v42 = vadd.f32 %v15673_v22, %v14206_v36  ;;  %v15682_v48 = vld [vmem:[#allocation120_spill] sm:$0xff] }
 0x541   : > { %11415 = vtanh.f32 %v8120_v38  ;;  %v8122_v54 = vadd.f32 %v8121_v29, %v8009_v23  ;;  %v14370_v56 = vpop.f32.mrf.mxu1  ;;  %8778 = vmatmul.mubr.bf16.gmra.mxu0 %v15658_v57  ;;  %v8019_v43 = vadd.f32 %v15668_v34, %v7906_v40  ;;  %v15669_v23 = vld [vmem:[#allocation93_spill] sm:$0xff]  ;;  %v7803_v0 = vadd.f32 %v15670_v35, %v14214_v10  ;;  %v15677_v40 = vld [vmem:[#allocation96_spill] sm:$0xff]  ;;  %v15692_v22 = vld [vmem:[#allocation126_spill] sm:$0xff] }
 0x542   : > { %v11404_v51 = vpop.eup %11403  ;;  %v8125_v45 = vpop.f32.mrf.mxu0  ;;  %8785 = vmatprep.mubr.bf16.mxu0 %v15661_v52  ;;  %v7912_v14 = vadd.f32 %v15669_v23, %v7799_v50  ;;  %v7914_v8 = vadd.f32 %v15672_v28, %v7801_v3  ;;  %v15679_v50 = vld [vmem:[#allocation84_spill] sm:$0xff] }
 0x543   : > { %9146 = vst [vmem:[%s13866_s18 + $0xf0] sm:$0xff] %v11404_v51  ;;  %11417 = vtanh.f32 %v8122_v54  ;;  %v8126_v27 = vadd.f32 %v8125_v45, %v8013_v58  ;;  %v14379_v41 = vpop.f32.mrf.mxu1  ;;  %8875 = vmatmul.mubr.bf16.gmra.mxu1 %v15663_v55  ;;  %v8023_v58 = vadd.f32 %v15671_v7, %v7910_v20  ;;  %v7809_v55 = vadd.f32 %v15679_v50, %v14214_v10  ;;  %v15689_v7 = vld [vmem:[#allocation118_spill] sm:$0xff]  ;;  %v15697_v50 = vld [vmem:[#allocation127_spill] sm:$0xff] }
 0x544   : > { %v11406_v24 = vpop.eup %11405  ;;  %v8127_v33 = vpop.f32.mrf.mxu0  ;;  %8882 = vmatprep.mubr.bf16.mxu1 %v15666_v60  ;;  %v8027_v20 = vadd.f32 %v15682_v48, %v7914_v8  ;;  %v15683_v60 = vld [vmem:[#allocation98_spill] sm:$0xff] }
 0x545   : > { %9147 = vst [vmem:[%s13866_s18 + $0xf8] sm:$0xff] %v11406_v24  ;;  %11419 = vtanh.f32 %v8126_v27  ;;  %v8128_v53 = vadd.f32 %v8127_v33, %v8015_v31  ;;  %v14388_v49 = vpop.f32.mrf.mxu1  ;;  %v15676_v31 = vld [vmem:[#allocation117_spill] sm:$0xff]  ;;  %v7916_v27 = vadd.f32 %v15677_v40, %v7803_v0 }
 0x546   : > { %v11408_v63 = vpop.eup %11407  ;;  %v8129_v61 = vpop.f32.mrf.mxu0  ;;  %v8025_v2 = vadd.f32 %v15676_v31, %v7912_v14  ;;  %v15678_v24 = vld [vmem:[#allocation49_spill] sm:$0xff]  ;;  %v15687_v14 = vld [vmem:[#allocation122_spill] sm:$0xff] }
 0x547   : > { %9153 = vst [vmem:[%s13866_s18 + $0x128] sm:$0xff] %v11408_v63  ;;  %11421 = vtanh.f32 %v8128_v53  ;;  %v8130_v16 = vadd.f32 %v8129_v61, %v8017_v32  ;;  %v14395_v62 = vpop.f32.mrf.mxu1  ;;  %v7920_v53 = vadd.f32 %v15683_v60, %v7807_v42  ;;  %v15684_v63 = vld [vmem:[#allocation61_spill] sm:$0xff]  ;;  %v15685_v61 = vld [vmem:[#allocation103_spill] sm:$0xff] }
 0x548   : > { %v11410_v38 = vpop.eup %11409  ;;  %v8131_v29 = vpop.f32.mrf.mxu0  ;;  %v7811_v34 = vadd.f32 %v15685_v61, %v14206_v36  ;;  %v15693_v31 = vld [vmem:[#allocation85_spill] sm:$0xff] }
 0x549   : > { %9154 = vst [vmem:[%s13866_s18 + $0x130] sm:$0xff] %v11410_v38  ;;  %11423 = vtanh.f32 %v8130_v16  ;;  %v8132_v54 = vadd.f32 %v8131_v29, %v8019_v43  ;;  %v14402_v45 = vpop.f32.mrf.mxu1  ;;  %8786 = vmatmul.mubr.bf16.gmra.mxu0 %v15675_v12  ;;  %v8029_v16 = vadd.f32 %v15687_v14, %v7916_v27  ;;  %v15688_v38 = vld [vmem:[#allocation129_spill] sm:$0xff]  ;;  %v15704_v14 = vld [vmem:[#allocation63_spill] sm:$0xff] }
 0x54a   : > { %v11412_v51 = vpop.eup %11411  ;;  %15674 = vst [vmem:[#allocation110_spill] sm:$0xff] %v14402_v45  ;;  %v8135_v57 = vpop.f32.mrf.mxu0  ;;  %8793 = vmatprep.mubr.bf16.mxu0 %v15678_v24  ;;  %v7922_v35 = vadd.f32 %v15688_v38, %v7809_v55  ;;  %v7924_v42 = vadd.f32 %v15692_v22, %v7811_v34  ;;  %v15696_v24 = vld [vmem:[#allocation100_spill] sm:$0xff] }
 0x54b   : > { %9160 = vst [vmem:[%s13866_s18 + $0x160] sm:$0xff] %v11412_v51  ;;  %11425 = vtanh.f32 %v8132_v54  ;;  %v8136_v52 = vadd.f32 %v8135_v57, %v8023_v58  ;;  %v14411_v33 = vpop.f32.mrf.mxu1  ;;  %8883 = vmatmul.mubr.bf16.gmra.mxu1 %v15681_v30  ;;  %v7813_v58 = vadd.f32 %v15689_v7, %v14214_v10  ;;  %v15691_v54 = vld [vmem:[#allocation125_spill] sm:$0xff]  ;;  %v15703_v34 = vld [vmem:[#allocation104_spill] sm:$0xff] }
 0x54c   : > { %v11414_v26 = vpop.eup %11413  ;;  %15680 = vst [vmem:[#allocation21_spill] sm:$0xff] %v14411_v33  ;;  %v8137_v32 = vpop.f32.mrf.mxu0  ;;  %8890 = vmatprep.mubr.bf16.mxu1 %v15684_v63  ;;  %v8033_v51 = vadd.f32 %v15691_v54, %v7920_v53  ;;  %v15701_v63 = vld [vmem:[#allocation62_spill] sm:$0xff]  ;;  %v15744_v33 = vld [vmem:[#allocation76_spill] sm:$0xff] }
 0x54d   : > { %9161 = vst [vmem:[%s13866_s18 + $0x168] sm:$0xff] %v11414_v26  ;;  %11427 = vtanh.f32 %v8136_v52  ;;  %v8138_v1 = vadd.f32 %v8137_v32, %v8025_v2  ;;  %v14420_v43 = vpop.f32.mrf.mxu1  ;;  %v7817_v2 = vadd.f32 %v15693_v31, %v14206_v36  ;;  %v15695_v52 = vld [vmem:[#allocation50_spill] sm:$0xff]  ;;  %v8035_v26 = vadd.f32 %v15696_v24, %v7922_v35  ;;  %v15698_v32 = vld [vmem:[#allocation51_spill] sm:$0xff] }
 0x54e   : > { %v11416_v3 = vpop.eup %11415  ;;  %15686 = vst [vmem:[#allocation133_spill] sm:$0xff] %v14420_v43  ;;  %v8139_v23 = vpop.f32.mrf.mxu0  ;;  %v7926_v55 = vadd.f32 %v15697_v50, %v7813_v58  ;;  %v15705_v35 = vld [vmem:[#allocation119_spill] sm:$0xff]  ;;  %v15707_v58 = vld [vmem:[#allocation132_spill] sm:$0xff]  ;;  %v15708_v54 = vld [vmem:[#allocation106_spill] sm:$0xff] }
 0x54f   : > { %9167 = vst [vmem:[%s13866_s18 + $0x198] sm:$0xff] %v11416_v3  ;;  %11429 = vtanh.f32 %v8138_v1  ;;  %v8140_v0 = vadd.f32 %v8139_v23, %v8027_v20  ;;  %v14427_v28 = vpop.f32.mrf.mxu1  ;;  %v15699_v20 = vld [vmem:[#allocation105_spill] sm:$0xff]  ;;  %v15702_v3 = vld [vmem:[#allocation102_spill] sm:$0xff]  ;;  %v7930_v23 = vadd.f32 %v15703_v34, %v7817_v2 }
 0x550   : > { %v11418_v29 = vpop.eup %11417  ;;  %15690 = vst [vmem:[#allocation22_spill] sm:$0xff] %v14427_v28  ;;  %v8141_v8 = vpop.f32.mrf.mxu0  ;;  %v7819_v60 = vadd.f32 %v15699_v20, %v14214_v10  ;;  %v8037_v61 = vadd.f32 %v15702_v3, %v7924_v42 }
 0x551   : > { %9168 = vst [vmem:[%s13866_s18 + $0x1a0] sm:$0xff] %v11418_v29  ;;  %11431 = vtanh.f32 %v8140_v0  ;;  %v8142_v57 = vadd.f32 %v8141_v8, %v8029_v16  ;;  %v14434_v40 = vpop.f32.mrf.mxu1  ;;  %8794 = vmatmul.mubr.bf16.gmra.mxu0 %v15695_v52  ;;  %v7821_v0 = vadd.f32 %v15705_v35, %v14206_v36  ;;  %v8039_v8 = vadd.f32 %v15707_v58, %v7926_v55 }
 0x552   : > { %v11420_v12 = vpop.eup %11419  ;;  %15694 = vst [vmem:[#allocation35_spill] sm:$0xff] %v14434_v40  ;;  %v8145_v27 = vpop.f32.mrf.mxu0  ;;  %8801 = vmatprep.mubr.bf16.mxu0 %v15698_v32  ;;  %v15714_v32 = vld [vmem:[#allocation131_spill] sm:$0xff] }
 0x553   : > { %9174 = vst [vmem:[%s13866_s18 + $0x1d0] sm:$0xff] %v11420_v12  ;;  %11433 = vtanh.f32 %v8142_v57  ;;  %v8146_v30 = vadd.f32 %v8145_v27, %v8033_v51  ;;  %v14443_v53 = vpop.f32.mrf.mxu1  ;;  %8891 = vmatmul.mubr.bf16.gmra.mxu1 %v15701_v63  ;;  %v7932_v51 = vadd.f32 %v15708_v54, %v7819_v60  ;;  %v15709_v57 = vld [vmem:[#allocation86_spill] sm:$0xff]  ;;  %v15711_v27 = vld [vmem:[#allocation128_spill] sm:$0xff]  ;;  %v7934_v52 = vadd.f32 %v14235_v39, %v7821_v0  ;;  %v15715_v60 = vld [vmem:[#allocation65_spill] sm:$0xff] }
 0x554   : > { %v11422_v48 = vpop.eup %11421  ;;  %15700 = vst [vmem:[#allocation36_spill] sm:$0xff] %v14443_v53  ;;  %v8147_v1 = vpop.f32.mrf.mxu0  ;;  %8898 = vmatprep.mubr.bf16.mxu1 %v15704_v14  ;;  %v7823_v12 = vadd.f32 %v15709_v57, %v14214_v10  ;;  %v8043_v36 = vadd.f32 %v15711_v27, %v7930_v23  ;;  %v15719_v23 = vld [vmem:[#allocation77_spill] sm:$0xff]  ;;  %v15723_v57 = vld [vmem:[#allocation66_spill] sm:$0xff] }
 0x555   : > { %9175 = vst [vmem:[%s13866_s18 + $0x1d8] sm:$0xff] %v11422_v48  ;;  %11435 = vtanh.f32 %v8146_v30  ;;  %v8148_v16 = vadd.f32 %v8147_v1, %v8035_v26  ;;  %v14452_v29 = vpop.f32.mrf.mxu1  ;;  %v15713_v30 = vld [vmem:[#allocation52_spill] sm:$0xff]  ;;  %v8045_v48 = vadd.f32 %v15714_v32, %v7932_v51  ;;  %v15725_v27 = vld [vmem:[#allocation78_spill] sm:$0xff] }
 0x556   : > { %v11424_v38 = vpop.eup %11423  ;;  %15706 = vst [vmem:[#allocation37_spill] sm:$0xff] %v14452_v29  ;;  %v8149_v7 = vpop.f32.mrf.mxu0  ;;  %v7936_v10 = vadd.f32 %v14242_v13, %v7823_v12  ;;  %v15717_v1 = vld [vmem:[#allocation64_spill] sm:$0xff] }
 0x557   : > { %9181 = vst [vmem:[%s13866_s18 + $0x208] sm:$0xff] %v11424_v38  ;;  %11437 = vtanh.f32 %v8148_v16  ;;  %v8150_v22 = vadd.f32 %v8149_v7, %v8037_v61  ;;  %v14459_v31 = vpop.f32.mrf.mxu1  ;;  %v15718_v61 = vld [vmem:[#allocation108_spill] sm:$0xff] }
 0x558   : > { %v11426_v42 = vpop.eup %11425  ;;  %15710 = vst [vmem:[#allocation38_spill] sm:$0xff] %v14459_v31  ;;  %v8151_v2 = vpop.f32.mrf.mxu0  ;;  %v8047_v34 = vadd.f32 %v15718_v61, %v7934_v52  ;;  %v8049_v35 = vadd.f32 %v14248_v47, %v7936_v10  ;;  %v15724_v47 = vld [vmem:[#allocation67_spill] sm:$0xff] }
 0x559   : > { %9182 = vst [vmem:[%s13866_s18 + $0x210] sm:$0xff] %v11426_v42  ;;  %11439 = vtanh.f32 %v8150_v22  ;;  %v8152_v24 = vadd.f32 %v8151_v2, %v8039_v8  ;;  %v14464_v50 = vpop.f32.mrf.mxu1  ;;  %8802 = vmatmul.mubr.bf16.gmra.mxu0 %v15713_v30  ;;  %v15726_v52 = vld [vmem:[#allocation79_spill] sm:$0xff] }
 0x55a   : > { %v11428_v26 = vpop.eup %11427  ;;  %15712 = vst [vmem:[#allocation26_spill] sm:$0xff] %v14464_v50  ;;  %v8155_v55 = vpop.f32.mrf.mxu0  ;;  %8939 = vmatprep.mubr.bf16.mxu0 %v15715_v60 }
 0x55b   : > { %9188 = vst [vmem:[%s13866_s18 + $0x240] sm:$0xff] %v11428_v26  ;;  %11441 = vtanh.f32 %v8152_v24  ;;  %v8156_v20 = vadd.f32 %v8155_v55, %v8043_v36  ;;  %v14471_v63 = vpop.f32.mrf.mxu1  ;;  %8899 = vmatmul.mubr.bf16.gmra.mxu1 %v15717_v1  ;;  %v15728_v1 = vld [vmem:[#allocation69_spill] sm:$0xff] }
 0x55c   : > { %v11430_v39 = vpop.eup %11429  ;;  %15716 = vst [vmem:[#allocation27_spill] sm:$0xff] %v14471_v63  ;;  %v8157_v3 = vpop.f32.mrf.mxu0  ;;  %8987 = vmatprep.mubr.bf16.mxu1 %v15719_v23  ;;  %v15735_v63 = vld [vmem:[#allocation74_spill] sm:$0xff] }
 0x55d   : > { %9189 = vst [vmem:[%s13866_s18 + $0x248] sm:$0xff] %v11430_v39  ;;  %11443 = vtanh.f32 %v8156_v20  ;;  %v8158_v13 = vadd.f32 %v8157_v3, %v8045_v48  ;;  %v14477_v16 = vpop.f32.mrf.mxu1  ;;  %v15727_v39 = vld [vmem:[#allocation68_spill] sm:$0xff] }
 0x55e   : > { %v11432_v14 = vpop.eup %11431  ;;  %15720 = vst [vmem:[#allocation28_spill] sm:$0xff] %v14477_v16  ;;  %v8159_v38 = vpop.f32.mrf.mxu0 }
 0x55f   : > { %9195 = vst [vmem:[%s13866_s18 + $0x278] sm:$0xff] %v11432_v14  ;;  %11445 = vtanh.f32 %v8158_v13  ;;  %v8160_v0 = vadd.f32 %v8159_v38, %v8047_v34  ;;  %v14481_v58 = vpop.f32.mrf.mxu1  ;;  %v15729_v34 = vld [vmem:[#allocation80_spill] sm:$0xff] }
 0x560   : > { %v11434_v7 = vpop.eup %11433  ;;  %15721 = vst [vmem:[#allocation25_spill] sm:$0xff] %v14481_v58  ;;  %v8161_v8 = vpop.f32.mrf.mxu0 }
 0x561   : > { %9196 = vst [vmem:[%s13866_s18 + $0x280] sm:$0xff] %v11434_v7  ;;  %11447 = vtanh.f32 %v8160_v0  ;;  %v8162_v54 = vadd.f32 %v8161_v8, %v8049_v35  ;;  %v14484_v22 = vpop.f32.mrf.mxu1  ;;  %8940 = vmatmul.mubr.bf16.vlgmr.msra.gmra.mxu0 %v15723_v57  ;;  %v15731_v57 = vld [vmem:[#allocation71_spill] sm:$0xff] }
 0x562   : > { %v11436_v51 = vpop.eup %11435  ;;  %15722 = vst [vmem:[#allocation29_spill] sm:$0xff] %v14484_v22  ;;  %v14486_v42 = vpop.f32.mrf.mxu0  ;;  %8947 = vmatprep.mubr.bf16.mxu0 %v15724_v47 }
 0x563   : > { %9202 = vst [vmem:[%s13866_s18 + $0x2b0] sm:$0xff] %v11436_v51  ;;  %11449 = vtanh.f32 %v8162_v54  ;;  %v14491_v2 = vpop.f32.mrf.mxu1  ;;  %8988 = vmatmul.mubr.bf16.vlgmr.msra.gmra.mxu1 %v15725_v27  ;;  %v15730_v51 = vld [vmem:[#allocation70_spill] sm:$0xff] }
 0x564   : > { %v11438_v12 = vpop.eup %11437  ;;  %v14494_v36 = vpop.f32.mrf.mxu0  ;;  %8995 = vmatprep.mubr.bf16.mxu1 %v15726_v52 }
 0x565   : > { %9203 = vst [vmem:[%s13866_s18 + $0x2b8] sm:$0xff] %v11438_v12  ;;  %v14498_v26 = vpop.f32.mrf.mxu1 }
 0x566   : > { %v11440_v24 = vpop.eup %11439  ;;  %v14500_v55 = vpop.f32.mrf.mxu0 }
 0x567   : > { %9209 = vst [vmem:[%s13866_s18 + $0x2e8] sm:$0xff] %v11440_v24  ;;  %v14503_v32 = vpop.f32.mrf.mxu1 }
 0x568   : > { %v11442_v30 = vpop.eup %11441  ;;  %v14505_v48 = vpop.f32.mrf.mxu0 }
 0x569   : > { %9210 = vst [vmem:[%s13866_s18 + $0x2f0] sm:$0xff] %v11442_v30  ;;  %v14508_v20 = vpop.f32.mrf.mxu1  ;;  %8948 = vmatmul.mubr.bf16.gmra.mxu0 %v15727_v39 }
 0x56a   : > { %v11444_v10 = vpop.eup %11443  ;;  %v14510_v60 = vpop.f32.mrf.mxu0  ;;  %8955 = vmatprep.mubr.bf16.mxu0 %v15728_v1  ;;  %v15732_v1 = vld [vmem:[#allocation72_spill] sm:$0xff] }
 0x56b   : > { %9216 = vst [vmem:[%s13866_s18 + $0x320] sm:$0xff] %v11444_v10  ;;  %v14515_v61 = vpop.f32.mrf.mxu1  ;;  %8996 = vmatmul.mubr.bf16.gmra.mxu1 %v15729_v34 }
 0x56c   : > { %v11446_v3 = vpop.eup %11445  ;;  %v14518_v23 = vpop.f32.mrf.mxu0 }
 0x56d   : > { %9217 = vst [vmem:[%s13866_s18 + $0x328] sm:$0xff] %v11446_v3  ;;  %v14521_v14 = vpop.f32.mrf.mxu1  ;;  %v15733_v3 = vld [vmem:[#allocation73_spill] sm:$0xff] }
 0x56e   : > { %v11448_v13 = vpop.eup %11447  ;;  %v14523_v38 = vpop.f32.mrf.mxu0 }
 0x56f   : > { %9223 = vst [vmem:[%s13866_s18 + $0x358] sm:$0xff] %v11448_v13  ;;  %v14526_v0 = vpop.f32.mrf.mxu1 }
 0x570   : > { %v11450_v35 = vpop.eup %11449  ;;  %v14528_v7 = vpop.f32.mrf.mxu0 }
 0x571   : > { %9224 = vst [vmem:[%s13866_s18 + $0x360] sm:$0xff] %v11450_v35  ;;  %v14531_v8 = vpop.f32.mrf.mxu1  ;;  %8956 = vmatmul.mubr.bf16.gmra.mxu0 %v15730_v51 }
 0x572   : > { %v14533_v54 = vpop.f32.mrf.mxu0  ;;  %8963 = vmatprep.mubr.bf16.mxu0 %v15731_v57 }
 0x573   : > { %v14537_v47 = vpop.f32.mrf.mxu1 }
 0x574   : > { %v14539_v12 = vpop.f32.mrf.mxu0 }
 0x575   : > { %v14541_v27 = vpop.f32.mrf.mxu1 }
 0x576   : > { %v14543_v52 = vpop.f32.mrf.mxu0 }
 0x577   : > { %v14545_v24 = vpop.f32.mrf.mxu1 }
 0x578   : > { %v14547_v30 = vpop.f32.mrf.mxu0 }
 0x579   : > { %v14549_v10 = vpop.f32.mrf.mxu1  ;;  %8964 = vmatmul.mubr.bf16.gmra.mxu0 %v15732_v1  ;;  %v15736_v1 = vld [vmem:[#allocation75_spill] sm:$0xff] }
 0x57a   : > { %v14551_v39 = vpop.f32.mrf.mxu0  ;;  %8971 = vmatprep.mubr.bf16.mxu0 %v15733_v3 }
 0x57b   : > { %v14555_v34 = vpop.f32.mrf.mxu1 }
 0x57c   : > { %v14557_v13 = vpop.f32.mrf.mxu0 }
 0x57d   : > { %v14559_v35 = vpop.f32.mrf.mxu1 }
 0x57e   : > { %v14561_v51 = vpop.f32.mrf.mxu0 }
 0x57f   : > { %v14563_v57 = vpop.f32.mrf.mxu1 }
 0x580   : > { %v14565_v22 = vpop.f32.mrf.mxu0 }
 0x581   : > { %v14567_v58 = vpop.f32.mrf.mxu1  ;;  %8972 = vmatmul.mubr.bf16.gmra.mxu0 %v15735_v63 }
 0x582   : > { %15734 = vst [vmem:[#allocation31_spill] sm:$0xff] %v14567_v58  ;;  %v14569_v16 = vpop.f32.mrf.mxu0  ;;  %8979 = vmatprep.mubr.bf16.mxu0 %v15736_v1  ;;  %v15759_v58 = vld [vmem:[#allocation130_spill] sm:$0xff] }
 0x583   : > { %v14573_v3 = vpop.f32.mrf.mxu1 }
 0x584   : > { %15737 = vst [vmem:[#allocation32_spill] sm:$0xff] %v14573_v3  ;;  %v14575_v50 = vpop.f32.mrf.mxu0 }
 0x585   : > { %v14577_v31 = vpop.f32.mrf.mxu1 }
 0x586   : > { %15738 = vst [vmem:[#allocation33_spill] sm:$0xff] %v14577_v31  ;;  %v14579_v29 = vpop.f32.mrf.mxu0 }
 0x587   : > { %15739 = vst [vmem:[#allocation39_spill] sm:$0xff] %v14579_v29  ;;  %v14581_v53 = vpop.f32.mrf.mxu1 }
 0x588   : > { %15740 = vst [vmem:[#allocation42_spill] sm:$0xff] %v14581_v53  ;;  %v14583_v40 = vpop.f32.mrf.mxu0 }
 0x589   : > { %15741 = vst [vmem:[#allocation43_spill] sm:$0xff] %v14583_v40  ;;  %v14585_v28 = vpop.f32.mrf.mxu1  ;;  %8980 = vmatmul.mubr.bf16.gmra.mxu0 %v15744_v33 }
 0x58a   : > { %15742 = vst [vmem:[#allocation23_spill] sm:$0xff] %v14585_v28  ;;  %v14587_v43 = vpop.f32.mrf.mxu0 }
 0x58b   : > { %15743 = vst [vmem:[#allocation24_spill] sm:$0xff] %v14587_v43  ;;  %v14590_v63 = vpop.f32.mrf.mxu1 }
 0x58c   : > { %15745 = vst [vmem:[#allocation30_spill] sm:$0xff] %v14590_v63  ;;  %v14592_v1 = vpop.f32.mrf.mxu0 }
 0x58d   : > { %15746 = vst [vmem:[#allocation46_spill] sm:$0xff] %v14592_v1  ;;  %v14594_v3 = vpop.f32.mrf.mxu1  ;;  %v15757_v1 = vld [vmem:[#allocation20_spill] sm:$0xff] }
 0x58e   : > { %15747 = vst [vmem:[#allocation53_spill] sm:$0xff] %v14594_v3  ;;  %v14596_v45 = vpop.f32.mrf.mxu0  ;;  %v15758_v3 = vsub.s32 4, %v15757_v1 }
 0x58f   : > { %15748 = vst [vmem:[#allocation55_spill] sm:$0xff] %v14596_v45  ;;  %v14598_v31 = vpop.f32.mrf.mxu1 }
 0x590   : > { %15749 = vst [vmem:[#allocation95_spill] sm:$0xff] %v14598_v31  ;;  %v14600_v29 = vpop.f32.mrf.mxu0  ;;  %v14617_v45 = vrot.slane %v15759_v58, %v15758_v3 }
 0x591   : > { %15750 = vst [vmem:[#allocation81_spill] sm:$0xff] %v14600_v29  ;;  %v14602_v53 = vpop.f32.mrf.mxu1 }
 0x592   : > { %15751 = vst [vmem:[#allocation107_spill] sm:$0xff] %v14602_v53  ;;  %v14604_v40 = vpop.f32.mrf.mxu0  ;;  %v15762_v53 = vsub.s32 5, %v15757_v1 }
 0x593   : > { %15752 = vst [vmem:[#allocation87_spill] sm:$0xff] %v14604_v40  ;;  %v14606_v28 = vpop.f32.mrf.mxu1 }
 0x594   : > { %15753 = vst [vmem:[#allocation97_spill] sm:$0xff] %v14606_v28  ;;  %v14608_v43 = vpop.f32.mrf.mxu0  ;;  %v14626_v40 = vrot.slane %v15759_v58, %v15762_v53  ;;  %v8203_v58 = vadd.f32 %v14272_v11, %v14617_v45 }
 0x595   : > { %15754 = vst [vmem:[#allocation41_spill] sm:$0xff] %v14608_v43  ;;  %v14610_v33 = vpop.f32.mrf.mxu1 }
 0x596   : > { %15755 = vst [vmem:[#allocation121_spill] sm:$0xff] %v14610_v33  ;;  %v14612_v63 = vpop.f32.mrf.mxu0  ;;  %v8199_v33 = vadd.f32 %v14258_v46, %v14617_v45 }
 0x597   : > { %15756 = vst [vmem:[#allocation88_spill] sm:$0xff] %v14612_v63  ;;  %v14619_v31 = vpop.f32.mrf.mxu1 }
 0x598   : > { %15760 = vst [vmem:[#allocation44_spill] sm:$0xff] %v14619_v31  ;;  %v14621_v29 = vpop.f32.mrf.mxu0  ;;  %v8201_v31 = vadd.f32 %v14266_v18, %v14626_v40 }
 0x599   : > { %15761 = vst [vmem:[#allocation82_spill] sm:$0xff] %v14621_v29  ;;  %v14628_v28 = vpop.f32.mrf.mxu1  ;;  %v8312_v29 = vadd.f32 %v14486_v42, %v8199_v33  ;;  %v8316_v42 = vadd.f32 %v14500_v55, %v8203_v58  ;;  %v8213_v58 = vadd.f32 %v14300_v5, %v14617_v45 }
 0x59a   : > { %15763 = vst [vmem:[#allocation56_spill] sm:$0xff] %v14628_v28  ;;  %v14630_v43 = vpop.f32.mrf.mxu0  ;;  %v8314_v28 = vadd.f32 %v14494_v36, %v8201_v31 }
 0x59b   : > { %15764 = vst [vmem:[#allocation109_spill] sm:$0xff] %v14630_v43  ;;  %v14634_v63 = vpop.f32.mrf.mxu1  ;;  %v8425_v18 = vadd.f32 %v14491_v2, %v8312_v29  ;;  %v8429_v29 = vadd.f32 %v14503_v32, %v8316_v42  ;;  %v8215_v32 = vadd.f32 %v14306_v37, %v14626_v40 }
 0x59c   : > { %15765 = vst [vmem:[#allocation123_spill] sm:$0xff] %v14634_v63  ;;  %v14636_v3 = vpop.f32.mrf.mxu0  ;;  %v8205_v63 = vadd.f32 %v14278_v59, %v14626_v40  ;;  %v8427_v11 = vadd.f32 %v14498_v26, %v8314_v28 }
 0x59d   : > { %v14641_v1 = vpop.f32.mrf.mxu1  ;;  %v8328_v42 = vadd.f32 %v14528_v7, %v8215_v32 }
 0x59e   : > { %15766 = vst [vmem:[#allocation57_spill] sm:$0xff] %v14641_v1  ;;  %v14643_v53 = vpop.f32.mrf.mxu0  ;;  %v8318_v31 = vadd.f32 %v14505_v48, %v8205_v63 }
 0x59f   : > { %15767 = vst [vmem:[#allocation34_spill] sm:$0xff] %v14643_v53  ;;  %v14648_v43 = vpop.f32.mrf.mxu1  ;;  %v8209_v53 = vadd.f32 %v14286_v6, %v14617_v45 }
 0x5a0   : > { %15768 = vst [vmem:[#allocation111_spill] sm:$0xff] %v14648_v43  ;;  %v14650_v46 = vpop.f32.mrf.mxu0  ;;  %v8211_v43 = vadd.f32 %v14294_v19, %v14626_v40  ;;  %v8431_v48 = vadd.f32 %v14508_v20, %v8318_v31 }
 0x5a1   : > { %15769 = vst [vmem:[#allocation112_spill] sm:$0xff] %v14650_v46  ;;  %v14656_v33 = vpop.f32.mrf.mxu1  ;;  %v8322_v2 = vadd.f32 %v14510_v60, %v8209_v53 }
 0x5a2   : > { %v8537_v1 = vpop.f32.mrf.mxu0  ;;  %v8324_v6 = vadd.f32 %v14518_v23, %v8211_v43  ;;  %v8219_v43 = vadd.f32 %v14315_v15, %v14617_v45 }
 0x5a3   : > { %v8538_v36 = vadd.f32 %v8537_v1, %v8425_v18  ;;  %v10200_v46 = vpop.f32.mrf.mxu1  ;;  %v8435_v53 = vadd.f32 %v14515_v61, %v8322_v2  ;;  %v8326_v18 = vadd.f32 %v14523_v38, %v8213_v58  ;;  %v8221_v61 = vadd.f32 %v14324_v21, %v14626_v40 }
 0x5a4   : > { %v8539_v59 = vpop.f32.mrf.mxu0  ;;  %v8437_v20 = vadd.f32 %v14521_v14, %v8324_v6  ;;  %v8223_v14 = vadd.f32 %v14331_v9, %v14617_v45 }
 0x5a5   : > { %11451 = vtanh.f32 %v8538_v36  ;;  %v8540_v55 = vadd.f32 %v8539_v59, %v8427_v11  ;;  %v10201_v28 = vpop.f32.mrf.mxu1  ;;  %v8439_v36 = vadd.f32 %v14526_v0, %v8326_v18  ;;  %v8332_v59 = vadd.f32 %v14533_v54, %v8219_v43 }
 0x5a6   : > { %v8541_v26 = vpop.f32.mrf.mxu0  ;;  %v14670_v63 = vadd.f32 %v10201_v28, %v10200_v46  ;;  %v8334_v7 = vadd.f32 %v14539_v12, %v8221_v61  ;;  %v8225_v0 = vadd.f32 %v14338_v4, %v14626_v40  ;;  %v8336_v9 = vadd.f32 %v14543_v52, %v8223_v14 }
 0x5a7   : > { %11453 = vtanh.f32 %v8540_v55  ;;  %v8542_v19 = vadd.f32 %v8541_v26, %v8429_v29  ;;  %v10203_v1 = vpop.f32.mrf.mxu1  ;;  %v8441_v55 = vadd.f32 %v14531_v8, %v8328_v42  ;;  %v8445_v28 = vadd.f32 %v14537_v47, %v8332_v59 }
 0x5a8   : > { %v8543_v60 = vpop.f32.mrf.mxu0  ;;  %v8229_v8 = vadd.f32 %v14347_v44, %v14617_v45  ;;  %v8449_v44 = vadd.f32 %v14545_v24, %v8336_v9  ;;  %v8233_v43 = vadd.f32 %v14363_v17, %v14617_v45  ;;  %v15770_v9 = vld [vmem:[#allocation31_spill] sm:$0xff] }
 0x5a9   : > { %11455 = vtanh.f32 %v8542_v19  ;;  %v8544_v5 = vadd.f32 %v8543_v60, %v8431_v48  ;;  %v10204_v23 = vpop.f32.mrf.mxu1  ;;  %v8447_v48 = vadd.f32 %v14541_v27, %v8334_v7  ;;  %v8231_v60 = vadd.f32 %v14356_v25, %v14626_v40 }
 0x5aa   : > { %v8547_v46 = vpop.f32.mrf.mxu0  ;;  %v14680_v11 = vadd.f32 %v10204_v23, %v10203_v1  ;;  %v8338_v1 = vadd.f32 %v14547_v30, %v8225_v0  ;;  %v8342_v27 = vadd.f32 %v14551_v39, %v8229_v8  ;;  %v8243_v0 = vadd.f32 %v14395_v62, %v14617_v45 }
 0x5ab   : > { %11457 = vtanh.f32 %v8544_v5  ;;  %v8548_v37 = vadd.f32 %v8547_v46, %v8435_v53  ;;  %v10206_v31 = vpop.f32.mrf.mxu1 }
 0x5ac   : > { %v8549_v38 = vpop.f32.mrf.mxu0  ;;  %v8451_v25 = vadd.f32 %v14549_v10, %v8338_v1  ;;  %v8455_v17 = vadd.f32 %v14555_v34, %v8342_v27  ;;  %v15773_v1 = vld [vmem:[#allocation39_spill] sm:$0xff] }
 0x5ad   : > { %11459 = vtanh.f32 %v8548_v37  ;;  %v8550_v15 = vadd.f32 %v8549_v38, %v8437_v20  ;;  %v10207_v29 = vpop.f32.mrf.mxu1  ;;  %v8344_v20 = vadd.f32 %v14557_v13, %v8231_v60  ;;  %v8235_v37 = vadd.f32 %v14370_v56, %v14626_v40  ;;  %v15774_v60 = vld [vmem:[#allocation21_spill] sm:$0xff] }
 0x5ae   : > { %v8551_v2 = vpop.f32.mrf.mxu0  ;;  %v14690_v21 = vadd.f32 %v10207_v29, %v10206_v31  ;;  %v8346_v13 = vadd.f32 %v14561_v51, %v8233_v43  ;;  %v8241_v29 = vadd.f32 %v14388_v49, %v14626_v40 }
 0x5af   : > { %11461 = vtanh.f32 %v8550_v15  ;;  %v8552_v58 = vadd.f32 %v8551_v2, %v8439_v36  ;;  %v10209_v54 = vpop.f32.mrf.mxu1  ;;  %v8239_v36 = vadd.f32 %v14379_v41, %v14617_v45  ;;  %v8457_v59 = vadd.f32 %v14559_v35, %v8344_v20 }
 0x5b0   : > { %v8553_v6 = vpop.f32.mrf.mxu0  ;;  %v8348_v56 = vadd.f32 %v14565_v22, %v8235_v37  ;;  %v8459_v41 = vadd.f32 %v14563_v57, %v8346_v13 }
 0x5b1   : > { %11463 = vtanh.f32 %v8552_v58  ;;  %v8554_v12 = vadd.f32 %v8553_v6, %v8441_v55  ;;  %v10210_v19 = vpop.f32.mrf.mxu1  ;;  %v8352_v35 = vadd.f32 %v14569_v16, %v8239_v36  ;;  %v15781_v36 = vld [vmem:[#allocation22_spill] sm:$0xff] }
 0x5b2   : > { %v11452_v26 = vpop.eup %11451  ;;  %v8557_v32 = vpop.f32.mrf.mxu0  ;;  %v14701_v4 = vadd.f32 %v10210_v19, %v10209_v54  ;;  %v8354_v54 = vadd.f32 %v14575_v50, %v8241_v29  ;;  %v8461_v49 = vadd.f32 %v15770_v9, %v8348_v56  ;;  %v8356_v50 = vadd.f32 %v15773_v1, %v8243_v0 }
 0x5b3   : > { %9120 = vst [vmem:[%s13866_s18 + $0x20] sm:$0xff] %v11452_v26  ;;  %11465 = vtanh.f32 %v8554_v12  ;;  %v8558_v47 = vadd.f32 %v8557_v32, %v8445_v28  ;;  %v10212_v53 = vpop.f32.mrf.mxu1  ;;  %v15771_v26 = vld [vmem:[#allocation110_spill] sm:$0xff]  ;;  %v15772_v32 = vld [vmem:[#allocation32_spill] sm:$0xff] }
 0x5b4   : > { %v11454_v52 = vpop.eup %11453  ;;  %v8559_v18 = vpop.f32.mrf.mxu0  ;;  %v8245_v8 = vadd.f32 %v15771_v26, %v14626_v40  ;;  %v8465_v62 = vadd.f32 %v15772_v32, %v8352_v35  ;;  %v15785_v35 = vld [vmem:[#allocation35_spill] sm:$0xff] }
 0x5b5   : > { %9121 = vst [vmem:[%s13866_s18 + $0x28] sm:$0xff] %v11454_v52  ;;  %11467 = vtanh.f32 %v8558_v47  ;;  %v8560_v5 = vadd.f32 %v8559_v18, %v8447_v48  ;;  %v10213_v23 = vpop.f32.mrf.mxu1  ;;  %v15775_v18 = vld [vmem:[#allocation33_spill] sm:$0xff] }
 0x5b6   : > { %v11456_v30 = vpop.eup %11455  ;;  %v8561_v46 = vpop.f32.mrf.mxu0  ;;  %v14713_v42 = vadd.f32 %v10213_v23, %v10212_v53  ;;  %v8249_v53 = vadd.f32 %v15774_v60, %v14617_v45  ;;  %v15792_v60 = vld [vmem:[#allocation37_spill] sm:$0xff] }
 0x5b7   : > { %9127 = vst [vmem:[%s13866_s18 + $0x58] sm:$0xff] %v11456_v30  ;;  %11469 = vtanh.f32 %v8560_v5  ;;  %v8562_v24 = vadd.f32 %v8561_v46, %v8449_v44  ;;  %v10215_v61 = vpop.f32.mrf.mxu1  ;;  %v8467_v44 = vadd.f32 %v15775_v18, %v8354_v54  ;;  %v15776_v30 = vld [vmem:[#allocation43_spill] sm:$0xff]  ;;  %v15786_v54 = vld [vmem:[#allocation30_spill] sm:$0xff] }
 0x5b8   : > { %v11458_v39 = vpop.eup %11457  ;;  %v8563_v31 = vpop.f32.mrf.mxu0  ;;  %v8358_v43 = vadd.f32 %v15776_v30, %v8245_v8  ;;  %v15789_v8 = vld [vmem:[#allocation53_spill] sm:$0xff]  ;;  %v15794_v30 = vld [vmem:[#allocation87_spill] sm:$0xff] }
 0x5b9   : > { %9128 = vst [vmem:[%s13866_s18 + $0x60] sm:$0xff] %v11458_v39  ;;  %11471 = vtanh.f32 %v8562_v24  ;;  %v8564_v38 = vadd.f32 %v8563_v31, %v8451_v25  ;;  %v10216_v15 = vpop.f32.mrf.mxu1  ;;  %v15778_v25 = vld [vmem:[#allocation133_spill] sm:$0xff] }
 0x5ba   : > { %v11460_v10 = vpop.eup %11459  ;;  %v8567_v14 = vpop.f32.mrf.mxu0  ;;  %v14725_v7 = vadd.f32 %v10216_v15, %v10215_v61  ;;  %v8251_v24 = vadd.f32 %v15778_v25, %v14626_v40  ;;  %v15779_v61 = vld [vmem:[#allocation42_spill] sm:$0xff] }
 0x5bb   : > { %9134 = vst [vmem:[%s13866_s18 + $0x90] sm:$0xff] %v11460_v10  ;;  %11473 = vtanh.f32 %v8564_v38  ;;  %v8568_v34 = vadd.f32 %v8567_v14, %v8455_v17  ;;  %v10218_v2 = vpop.f32.mrf.mxu1  ;;  %v8469_v31 = vadd.f32 %v15779_v61, %v8356_v50  ;;  %v15780_v17 = vld [vmem:[#allocation24_spill] sm:$0xff]  ;;  %v15782_v15 = vld [vmem:[#allocation46_spill] sm:$0xff] }
 0x5bc   : > { %v11462_v51 = vpop.eup %11461  ;;  %v8569_v55 = vpop.f32.mrf.mxu0  ;;  %v8362_v13 = vadd.f32 %v15780_v17, %v8249_v53  ;;  %v8364_v14 = vadd.f32 %v15782_v15, %v8251_v24  ;;  %v8261_v53 = vadd.f32 %v15792_v60, %v14626_v40  ;;  %v15795_v25 = vld [vmem:[#allocation38_spill] sm:$0xff]  ;;  %v15797_v17 = vld [vmem:[#allocation107_spill] sm:$0xff] }
 0x5bd   : > { %9135 = vst [vmem:[%s13866_s18 + $0x98] sm:$0xff] %v11462_v51  ;;  %11475 = vtanh.f32 %v8568_v34  ;;  %v8570_v58 = vadd.f32 %v8569_v55, %v8457_v59  ;;  %v10219_v6 = vpop.f32.mrf.mxu1  ;;  %v8253_v59 = vadd.f32 %v15781_v36, %v14617_v45  ;;  %v15783_v51 = vld [vmem:[#allocation23_spill] sm:$0xff]  ;;  %v8263_v24 = vadd.f32 %v15795_v25, %v14617_v45 }
 0x5be   : > { %v11464_v22 = vpop.eup %11463  ;;  %v8571_v28 = vpop.f32.mrf.mxu0  ;;  %v14737_v12 = vadd.f32 %v10219_v6, %v10218_v2  ;;  %v8471_v29 = vadd.f32 %v15783_v51, %v8358_v43  ;;  %v8475_v6 = vadd.f32 %v15786_v54, %v8362_v13 }
 0x5bf   : > { %9141 = vst [vmem:[%s13866_s18 + $0xc8] sm:$0xff] %v11464_v22  ;;  %11477 = vtanh.f32 %v8570_v58  ;;  %v8572_v57 = vadd.f32 %v8571_v28, %v8459_v41  ;;  %v10221_v48 = vpop.f32.mrf.mxu1  ;;  %v8255_v58 = vadd.f32 %v15785_v35, %v14626_v40  ;;  %v15787_v28 = vld [vmem:[#allocation55_spill] sm:$0xff] }
 0x5c0   : > { %v11466_v16 = vpop.eup %11465  ;;  %v8573_v19 = vpop.f32.mrf.mxu0  ;;  %v8366_v9 = vadd.f32 %v15787_v28, %v8253_v59  ;;  %v15799_v59 = vld [vmem:[#allocation26_spill] sm:$0xff] }
 0x5c1   : > { %9142 = vst [vmem:[%s13866_s18 + $0xd0] sm:$0xff] %v11466_v16  ;;  %11479 = vtanh.f32 %v8572_v57  ;;  %v8574_v47 = vadd.f32 %v8573_v19, %v8461_v49  ;;  %v10222_v27 = vpop.f32.mrf.mxu1  ;;  %v15788_v16 = vld [vmem:[#allocation36_spill] sm:$0xff]  ;;  %v8265_v15 = vadd.f32 %v15799_v59, %v14626_v40  ;;  %v15814_v59 = vld [vmem:[#allocation57_spill] sm:$0xff] }
 0x5c2   : > { %v11468_v52 = vpop.eup %11467  ;;  %v8577_v5 = vpop.f32.mrf.mxu0  ;;  %v14749_v20 = vadd.f32 %v10222_v27, %v10221_v48  ;;  %v8259_v26 = vadd.f32 %v15788_v16, %v14617_v45  ;;  %v8477_v48 = vadd.f32 %v15789_v8, %v8364_v14  ;;  %v15793_v27 = vld [vmem:[#allocation95_spill] sm:$0xff]  ;;  %v15806_v8 = vld [vmem:[#allocation28_spill] sm:$0xff] }
 0x5c3   : > { %9148 = vst [vmem:[%s13866_s18 + $0x100] sm:$0xff] %v11468_v52  ;;  %11481 = vtanh.f32 %v8574_v47  ;;  %v8578_v23 = vadd.f32 %v8577_v5, %v8465_v62  ;;  %v10224_v39 = vpop.f32.mrf.mxu1  ;;  %v15790_v62 = vld [vmem:[#allocation81_spill] sm:$0xff]  ;;  %v8479_v5 = vadd.f32 %v15793_v27, %v8366_v9  ;;  %v15804_v9 = vld [vmem:[#allocation82_spill] sm:$0xff] }
 0x5c4   : > { %15777 = vst [vmem:[#allocation99_spill] sm:$0xff] %v14749_v20  ;;  %v11470_v46 = vpop.eup %11469  ;;  %v8579_v37 = vpop.f32.mrf.mxu0  ;;  %v8368_v1 = vadd.f32 %v15790_v62, %v8255_v58  ;;  %v8372_v43 = vadd.f32 %v15794_v30, %v8259_v26  ;;  %v15802_v58 = vld [vmem:[#allocation27_spill] sm:$0xff]  ;;  %v15807_v62 = vld [vmem:[#allocation44_spill] sm:$0xff] }
 0x5c5   : > { %9149 = vst [vmem:[%s13866_s18 + $0x108] sm:$0xff] %v11470_v46  ;;  %11483 = vtanh.f32 %v8578_v23  ;;  %v8580_v38 = vadd.f32 %v8579_v37, %v8467_v44  ;;  %v10225_v56 = vpop.f32.mrf.mxu1 }
 0x5c6   : > { %v11472_v10 = vpop.eup %11471  ;;  %v8581_v34 = vpop.f32.mrf.mxu0  ;;  %v14761_v2 = vadd.f32 %v10225_v56, %v10224_v39  ;;  %v15796_v39 = vld [vmem:[#allocation41_spill] sm:$0xff]  ;;  %v8481_v13 = vadd.f32 %v15797_v17, %v8368_v1  ;;  %v15812_v17 = vld [vmem:[#allocation123_spill] sm:$0xff] }
 0x5c7   : > { %9155 = vst [vmem:[%s13866_s18 + $0x138] sm:$0xff] %v11472_v10  ;;  %11485 = vtanh.f32 %v8580_v38  ;;  %v8582_v55 = vadd.f32 %v8581_v34, %v8469_v31  ;;  %v10227_v22 = vpop.f32.mrf.mxu1  ;;  %v8374_v37 = vadd.f32 %v15796_v39, %v8261_v53  ;;  %v15800_v34 = vld [vmem:[#allocation97_spill] sm:$0xff] }
 0x5c8   : > { %15784 = vst [vmem:[#allocation89_spill] sm:$0xff] %v14761_v2  ;;  %v11474_v41 = vpop.eup %11473  ;;  %v8583_v0 = vpop.f32.mrf.mxu0  ;;  %v8485_v51 = vadd.f32 %v15800_v34, %v8372_v43  ;;  %v15810_v43 = vld [vmem:[#allocation56_spill] sm:$0xff]  ;;  %v15811_v39 = vld [vmem:[#allocation29_spill] sm:$0xff] }
 0x5c9   : > { %9156 = vst [vmem:[%s13866_s18 + $0x140] sm:$0xff] %v11474_v41  ;;  %11487 = vtanh.f32 %v8582_v55  ;;  %v8584_v49 = vadd.f32 %v8583_v0, %v8471_v29  ;;  %v10228_v19 = vpop.f32.mrf.mxu1  ;;  %v15801_v29 = vld [vmem:[#allocation88_spill] sm:$0xff]  ;;  %v15803_v0 = vld [vmem:[#allocation121_spill] sm:$0xff] }
 0x5ca   : > { %v11476_v57 = vpop.eup %11475  ;;  %v8587_v32 = vpop.f32.mrf.mxu0  ;;  %v14773_v50 = vadd.f32 %v10228_v19, %v10227_v22  ;;  %v8376_v55 = vadd.f32 %v15801_v29, %v8263_v24  ;;  %v8269_v22 = vadd.f32 %v15802_v58, %v14617_v45  ;;  %v8487_v54 = vadd.f32 %v15803_v0, %v8374_v37  ;;  %v15815_v34 = vld [vmem:[#allocation112_spill] sm:$0xff]  ;;  %v15816_v58 = vld [vmem:[#allocation111_spill] sm:$0xff] }
 0x5cb   : > { %9162 = vst [vmem:[%s13866_s18 + $0x170] sm:$0xff] %v11476_v57  ;;  %11489 = vtanh.f32 %v8584_v49  ;;  %v8588_v47 = vadd.f32 %v8587_v32, %v8475_v6  ;;  %v10230_v18 = vpop.f32.mrf.mxu1  ;;  %v8378_v49 = vadd.f32 %v15804_v9, %v8265_v15  ;;  %v8275_v37 = vadd.f32 %v15811_v39, %v14626_v40 }
 0x5cc   : > { %15791 = vst [vmem:[#allocation90_spill] sm:$0xff] %v14773_v50  ;;  %v11478_v52 = vpop.eup %11477  ;;  %v8589_v44 = vpop.f32.mrf.mxu0  ;;  %v8489_v1 = vadd.f32 %v15807_v62, %v8376_v55 }
 0x5cd   : > { %9163 = vst [vmem:[%s13866_s18 + $0x178] sm:$0xff] %v11478_v52  ;;  %11491 = vtanh.f32 %v8588_v47  ;;  %v8590_v23 = vadd.f32 %v8589_v44, %v8477_v48  ;;  %v10231_v61 = vpop.f32.mrf.mxu1  ;;  %v8271_v48 = vadd.f32 %v15806_v8, %v14626_v40  ;;  %v15808_v47 = vld [vmem:[#allocation109_spill] sm:$0xff] }
 0x5ce   : > { %v11480_v46 = vpop.eup %11479  ;;  %v8591_v31 = vpop.f32.mrf.mxu0  ;;  %v14785_v38 = vadd.f32 %v10231_v61, %v10230_v18  ;;  %v8382_v52 = vadd.f32 %v15808_v47, %v8269_v22  ;;  %v15809_v18 = vld [vmem:[#allocation25_spill] sm:$0xff] }
 0x5cf   : > { %9169 = vst [vmem:[%s13866_s18 + $0x1a8] sm:$0xff] %v11480_v46  ;;  %11493 = vtanh.f32 %v8590_v23  ;;  %v8592_v10 = vadd.f32 %v8591_v31, %v8479_v5  ;;  %v10233_v14 = vpop.f32.mrf.mxu1  ;;  %v8273_v44 = vadd.f32 %v15809_v18, %v14617_v45  ;;  %v8384_v27 = vadd.f32 %v14636_v3, %v8271_v48 }
 0x5d0   : > { %15798 = vst [vmem:[#allocation40_spill] sm:$0xff] %v14785_v38  ;;  %v11482_v36 = vpop.eup %11481  ;;  %v8593_v56 = vpop.f32.mrf.mxu0  ;;  %v8491_v23 = vadd.f32 %v15810_v43, %v8378_v49  ;;  %v8495_v45 = vadd.f32 %v15812_v17, %v8382_v52 }
 0x5d1   : > { %9170 = vst [vmem:[%s13866_s18 + $0x1b0] sm:$0xff] %v11482_v36  ;;  %11495 = vtanh.f32 %v8592_v10  ;;  %v8594_v41 = vadd.f32 %v8593_v56, %v8481_v13  ;;  %v10234_v6 = vpop.f32.mrf.mxu1  ;;  %v15813_v13 = vld [vmem:[#allocation34_spill] sm:$0xff]  ;;  %v8497_v15 = vadd.f32 %v15814_v59, %v8384_v27 }
 0x5d2   : > { %v11484_v35 = vpop.eup %11483  ;;  %v8597_v28 = vpop.f32.mrf.mxu0  ;;  %v14797_v57 = vadd.f32 %v10234_v6, %v10233_v14  ;;  %v8386_v3 = vadd.f32 %v15813_v13, %v8273_v44 }
 0x5d3   : > { %9176 = vst [vmem:[%s13866_s18 + $0x1e0] sm:$0xff] %v11484_v35  ;;  %11497 = vtanh.f32 %v8594_v41  ;;  %v8598_v16 = vadd.f32 %v8597_v28, %v8485_v51  ;;  %v10236_v19 = vpop.f32.mrf.mxu1  ;;  %v8388_v51 = vadd.f32 %v15815_v34, %v8275_v37 }
 0x5d4   : > { %15805 = vst [vmem:[#allocation45_spill] sm:$0xff] %v14797_v57  ;;  %v11486_v26 = vpop.eup %11485  ;;  %v8599_v32 = vpop.f32.mrf.mxu0  ;;  %v8499_v22 = vadd.f32 %v15816_v58, %v8386_v3 }
 0x5d5   : > { %9177 = vst [vmem:[%s13866_s18 + $0x1e8] sm:$0xff] %v11486_v26  ;;  %11499 = vtanh.f32 %v8598_v16  ;;  %v8600_v60 = vadd.f32 %v8599_v32, %v8487_v54  ;;  %v10237_v5 = vpop.f32.mrf.mxu1  ;;  %v8501_v9 = vadd.f32 %v14656_v33, %v8388_v51 }
 0x5d6   : > { %v11488_v53 = vpop.eup %11487  ;;  %v8601_v30 = vpop.f32.mrf.mxu0  ;;  %v14809_v46 = vadd.f32 %v10237_v5, %v10236_v19 }
 0x5d7   : > { %9183 = vst [vmem:[%s13866_s18 + $0x218] sm:$0xff] %v11488_v53  ;;  %11501 = vtanh.f32 %v8600_v60  ;;  %v8602_v25 = vadd.f32 %v8601_v30, %v8489_v1  ;;  %v10239_v61 = vpop.f32.mrf.mxu1 }
 0x5d8   : > { %v11490_v24 = vpop.eup %11489  ;;  %v8603_v31 = vpop.f32.mrf.mxu0 }
 0x5d9   : > { %9184 = vst [vmem:[%s13866_s18 + $0x220] sm:$0xff] %v11490_v24  ;;  %11503 = vtanh.f32 %v8602_v25  ;;  %v8604_v10 = vadd.f32 %v8603_v31, %v8491_v23  ;;  %v10240_v14 = vpop.f32.mrf.mxu1 }
 0x5da   : > { %v11492_v36 = vpop.eup %11491  ;;  %v8607_v56 = vpop.f32.mrf.mxu0  ;;  %v14819_v40 = vadd.f32 %v10240_v14, %v10239_v61 }
 0x5db   : > { %9190 = vst [vmem:[%s13866_s18 + $0x250] sm:$0xff] %v11492_v36  ;;  %11505 = vtanh.f32 %v8604_v10  ;;  %v8608_v29 = vadd.f32 %v8607_v56, %v8495_v45  ;;  %v10242_v41 = vpop.f32.mrf.mxu1 }
 0x5dc   : > { %v11494_v55 = vpop.eup %11493  ;;  %v8609_v35 = vpop.f32.mrf.mxu0 }
 0x5dd   : > { %9191 = vst [vmem:[%s13866_s18 + $0x258] sm:$0xff] %v11494_v55  ;;  %11507 = vtanh.f32 %v8608_v29  ;;  %v8610_v0 = vadd.f32 %v8609_v35, %v8497_v15  ;;  %v10243_v6 = vpop.f32.mrf.mxu1 }
 0x5de   : > { %v11496_v54 = vpop.eup %11495  ;;  %v8611_v28 = vpop.f32.mrf.mxu0  ;;  %v14825_v49 = vadd.f32 %v10243_v6, %v10242_v41 }
 0x5df   : > { %9197 = vst [vmem:[%s13866_s18 + $0x288] sm:$0xff] %v11496_v54  ;;  %11509 = vtanh.f32 %v8610_v0  ;;  %v8612_v16 = vadd.f32 %v8611_v28, %v8499_v22  ;;  %v10245_v8 = vpop.f32.mrf.mxu1 }
 0x5e0   : > { %v11498_v26 = vpop.eup %11497  ;;  %v8613_v48 = vpop.f32.mrf.mxu0 }
 0x5e1   : > { %9198 = vst [vmem:[%s13866_s18 + $0x290] sm:$0xff] %v11498_v26  ;;  %11511 = vtanh.f32 %v8612_v16  ;;  %v8614_v19 = vadd.f32 %v8613_v48, %v8501_v9  ;;  %v10246_v62 = vpop.f32.mrf.mxu1 }
 0x5e2   : > { %v11500_v32 = vpop.eup %11499  ;;  %v14828_v1 = vpop.f32.mrf.mxu0  ;;  %v14831_v33 = vadd.f32 %v10246_v62, %v10245_v8 }
 0x5e3   : > { %9204 = vst [vmem:[%s13866_s18 + $0x2c0] sm:$0xff] %v11500_v32  ;;  %11513 = vtanh.f32 %v8614_v19  ;;  %v14833_v52 = vpop.f32.mrf.mxu1 }
 0x5e4   : > { %v11502_v47 = vpop.eup %11501  ;;  %v14835_v60 = vpop.f32.mrf.mxu0 }
 0x5e5   : > { %9205 = vst [vmem:[%s13866_s18 + $0x2c8] sm:$0xff] %v11502_v47  ;;  %v14838_v18 = vpop.f32.mrf.mxu1 }
 0x5e6   : > { %v11504_v53 = vpop.eup %11503  ;;  %v14840_v44 = vpop.f32.mrf.mxu0 }
 0x5e7   : > { %9211 = vst [vmem:[%s13866_s18 + $0x2f8] sm:$0xff] %v11504_v53  ;;  %v14843_v5 = vpop.f32.mrf.mxu1 }
 0x5e8   : > { %v11506_v27 = vpop.eup %11505  ;;  %v14845_v30 = vpop.f32.mrf.mxu0 }
 0x5e9   : > { %9212 = vst [vmem:[%s13866_s18 + $0x300] sm:$0xff] %v11506_v27  ;;  %v14848_v23 = vpop.f32.mrf.mxu1 }
 0x5ea   : > { %v11508_v43 = vpop.eup %11507  ;;  %v14850_v25 = vpop.f32.mrf.mxu0 }
 0x5eb   : > { %9218 = vst [vmem:[%s13866_s18 + $0x330] sm:$0xff] %v11508_v43  ;;  %v14853_v39 = vpop.f32.mrf.mxu1 }
 0x5ec   : > { %v11510_v24 = vpop.eup %11509  ;;  %v14855_v37 = vpop.f32.mrf.mxu0 }
 0x5ed   : > { %9219 = vst [vmem:[%s13866_s18 + $0x338] sm:$0xff] %v11510_v24  ;;  %v14858_v31 = vpop.f32.mrf.mxu1 }
 0x5ee   : > { %v11512_v61 = vpop.eup %11511  ;;  %v14860_v17 = vpop.f32.mrf.mxu0 }
 0x5ef   : > { %9225 = vst [vmem:[%s13866_s18 + $0x368] sm:$0xff] %v11512_v61  ;;  %v14863_v13 = vpop.f32.mrf.mxu1 }
 0x5f0   : > { %v11514_v45 = vpop.eup %11513  ;;  %v14865_v3 = vpop.f32.mrf.mxu0 }
 0x5f1   : > { %9226 = vst [vmem:[%s13866_s18 + $0x370] sm:$0xff] %v11514_v45  ;;  %v14868_v10 = vpop.f32.mrf.mxu1 }
 0x5f2   : > { %v14870_v36 = vpop.f32.mrf.mxu0 }
 0x5f3   : > { %v14872_v59 = vpop.f32.mrf.mxu1 }
 0x5f4   : > { %v14874_v15 = vpop.f32.mrf.mxu0 }
 0x5f5   : > { %v14876_v14 = vpop.f32.mrf.mxu1 }
 0x5f6   : > { %v14878_v56 = vpop.f32.mrf.mxu0 }
 0x5f7   : > { %v14880_v34 = vpop.f32.mrf.mxu1 }
 0x5f8   : > { %v14882_v51 = vpop.f32.mrf.mxu0 }
 0x5f9   : > { %v14884_v29 = vpop.f32.mrf.mxu1 }
 0x5fa   : > { %v14886_v55 = vpop.f32.mrf.mxu0 }
 0x5fb   : > { %v14888_v41 = vpop.f32.mrf.mxu1 }
 0x5fc   : > { %15817 = vst [vmem:[#allocation124_spill] sm:$0xff] %v14888_v41  ;;  %v14890_v35 = vpop.f32.mrf.mxu0 }
 0x5fd   : > { %v14892_v58 = vpop.f32.mrf.mxu1 }
 0x5fe   : > { %15818 = vst [vmem:[#allocation91_spill] sm:$0xff] %v14892_v58  ;;  %v14894_v22 = vpop.f32.mrf.mxu0 }
 0x5ff   : > { %15819 = vst [vmem:[#allocation47_spill] sm:$0xff] %v14894_v22  ;;  %v14896_v0 = vpop.f32.mrf.mxu1 }
 0x600   : > { %15820 = vst [vmem:[#allocation83_spill] sm:$0xff] %v14896_v0  ;;  %v14898_v54 = vpop.f32.mrf.mxu0 }
 0x601   : > { %15821 = vst [vmem:[#allocation58_spill] sm:$0xff] %v14898_v54  ;;  %v14900_v6 = vpop.f32.mrf.mxu1 }
 0x602   : > { %15822 = vst [vmem:[#allocation113_spill] sm:$0xff] %v14900_v6  ;;  %v14902_v28 = vpop.f32.mrf.mxu0 }
 0x603   : > { %15823 = vst [vmem:[#allocation92_spill] sm:$0xff] %v14902_v28  ;;  %v14904_v9 = vpop.f32.mrf.mxu1 }
 0x604   : > { %15824 = vst [vmem:[#allocation59_spill] sm:$0xff] %v14904_v9  ;;  %v14906_v16 = vpop.f32.mrf.mxu0 }
 0x605   : > { %15825 = vst [vmem:[#allocation54_spill] sm:$0xff] %v14906_v16  ;;  %v14908_v26 = vpop.f32.mrf.mxu1  ;;  %v10269_v16 = vadd.f32 %v14845_v30, %v14840_v44 }
 0x606   : > { %15826 = vst [vmem:[#allocation114_spill] sm:$0xff] %v14908_v26  ;;  %v14910_v8 = vpop.f32.mrf.mxu0 }
 0x607   : > { %15827 = vst [vmem:[#allocation93_spill] sm:$0xff] %v14910_v8  ;;  %v14912_v48 = vpop.f32.mrf.mxu1 }
 0x608   : > { %15828 = vst [vmem:[#allocation101_spill] sm:$0xff] %v14912_v48  ;;  %v14914_v19 = vpop.f32.mrf.mxu0 }
 0x609   : > { %15829 = vst [vmem:[#allocation115_spill] sm:$0xff] %v14914_v19  ;;  %v14916_v32 = vpop.f32.mrf.mxu1  ;;  %v15839_v19 = vld [vmem:[#allocation20_spill] sm:$0xff] }
 0x60a   : > { %15830 = vst [vmem:[#allocation94_spill] sm:$0xff] %v14916_v32  ;;  %v14918_v62 = vpop.f32.mrf.mxu0 }
 0x60b   : > { %15831 = vst [vmem:[#allocation116_spill] sm:$0xff] %v14918_v62  ;;  %v14920_v47 = vpop.f32.mrf.mxu1 }
 0x60c   : > { %15832 = vst [vmem:[#allocation48_spill] sm:$0xff] %v14920_v47  ;;  %v14922_v53 = vpop.f32.mrf.mxu0 }
 0x60d   : > { %15833 = vst [vmem:[#allocation117_spill] sm:$0xff] %v14922_v53  ;;  %v14924_v27 = vpop.f32.mrf.mxu1  ;;  %v11549_v53 = vld [vmem:[#allocation13] sm:$0xff] }
 0x60e   : > { %15834 = vst [vmem:[#allocation96_spill] sm:$0xff] %v14924_v27  ;;  %v14926_v43 = vpop.f32.mrf.mxu0  ;;  %v15840_v27 = vsub.s32 6, %v15839_v19 }
 0x60f   : > { %15835 = vst [vmem:[#allocation49_spill] sm:$0xff] %v14926_v43  ;;  %v14928_v24 = vpop.f32.mrf.mxu1 }
 0x610   : > { %15836 = vst [vmem:[#allocation84_spill] sm:$0xff] %v14928_v24  ;;  %v14930_v61 = vpop.f32.mrf.mxu0  ;;  %v14936_v8 = vrot.slane %v11549_v53, %v15840_v27 }
 0x611   : > { %15837 = vst [vmem:[#allocation60_spill] sm:$0xff] %v14930_v61  ;;  %v14932_v45 = vpop.f32.mrf.mxu1  ;;  %v10266_v61 = vadd.f32 %v14835_v60, %v14828_v1 }
 0x612   : > { %15838 = vst [vmem:[#allocation120_spill] sm:$0xff] %v14932_v45  ;;  %v10300_v57 = vpop.f32.mrf.mxu0  ;;  %v8651_v0 = vadd.f32 %v14670_v63, %v14936_v8  ;;  %v8699_v19 = vadd.f32 %v14809_v46, %v14936_v8  ;;  %v8654_v27 = vadd.f32 %v14680_v11, %v14936_v8  ;;  %v10330_v63 = vadd.f32 %v14838_v18, %v14833_v52 }
 0x613   : > { %v10364_v38 = vpop.f32.mrf.mxu1  ;;  %v8702_v44 = vadd.f32 %v14819_v40, %v14936_v8  ;;  %v10272_v46 = vadd.f32 %v14855_v37, %v14850_v25 }
 0x614   : > { %v10301_v48 = vpop.f32.mrf.mxu0  ;;  %v8748_v53 = vadd.f32 %v10266_v61, %v8651_v0  ;;  %v8751_v30 = vadd.f32 %v10269_v16, %v8654_v27  ;;  %v10278_v27 = vadd.f32 %v14874_v15, %v14870_v36 }
 0x615   : > { %v10365_v32 = vpop.f32.mrf.mxu1  ;;  %v10302_v2 = vadd.f32 %v10301_v48, %v10300_v57 }
 0x616   : > { %v10303_v26 = vpop.f32.mrf.mxu0  ;;  %v8845_v54 = vadd.f32 %v10330_v63, %v8748_v53  ;;  %v10366_v0 = vadd.f32 %v10365_v32, %v10364_v38  ;;  %v10275_v38 = vadd.f32 %v14865_v3, %v14860_v17 }
 0x617   : > { %v10367_v62 = vpop.f32.mrf.mxu1  ;;  %v8796_v57 = vadd.f32 %v10302_v2, %v8699_v19  ;;  %v8659_v2 = vadd.f32 %v14690_v21, %v14936_v8  ;;  %v8707_v19 = vadd.f32 %v14825_v49, %v14936_v8  ;;  %v8662_v21 = vadd.f32 %v14701_v4, %v14936_v8 }
 0x618   : > { %v10304_v9 = vpop.f32.mrf.mxu0 }
 0x619   : > { %v10368_v47 = vpop.f32.mrf.mxu1  ;;  %v10305_v1 = vadd.f32 %v10304_v9, %v10303_v26  ;;  %v10333_v9 = vadd.f32 %v14848_v23, %v14843_v5  ;;  %v8893_v40 = vadd.f32 %v10366_v0, %v8796_v57  ;;  %v8756_v23 = vadd.f32 %v10272_v46, %v8659_v2 }
 0x61a   : > { %v10306_v50 = vpop.f32.mrf.mxu0  ;;  %v10369_v25 = vadd.f32 %v10368_v47, %v10367_v62  ;;  %v8710_v62 = vadd.f32 %v14831_v33, %v14936_v8  ;;  %v8759_v47 = vadd.f32 %v10275_v38, %v8662_v21  ;;  %v15843_v21 = vld [vmem:[#allocation124_spill] sm:$0xff] }
 0x61b   : > { %v10370_v43 = vpop.f32.mrf.mxu1  ;;  %v8799_v26 = vadd.f32 %v10305_v1, %v8702_v44  ;;  %v8848_v53 = vadd.f32 %v10333_v9, %v8751_v30 }
 0x61c   : > { %v10307_v24 = vpop.f32.mrf.mxu0 }
 0x61d   : > { %v10371_v45 = vpop.f32.mrf.mxu1  ;;  %v10308_v61 = vadd.f32 %v10307_v24, %v10306_v50 }
 0x61e   : > { %v10309_v6 = vpop.f32.mrf.mxu0  ;;  %v10372_v1 = vadd.f32 %v10371_v45, %v10370_v43  ;;  %v10281_v45 = vadd.f32 %v14882_v51, %v14878_v56 }
 0x61f   : > { %v14944_v28 = vpop.f32.mrf.mxu1 }
 0x620   : > { %v10310_v20 = vpop.f32.mrf.mxu0 }
 0x621   : > { %v14950_v60 = vpop.f32.mrf.mxu1  ;;  %v10311_v24 = vadd.f32 %v10310_v20, %v10309_v6  ;;  %v8667_v20 = vadd.f32 %v14713_v42, %v14936_v8  ;;  %v10339_v6 = vadd.f32 %v14868_v10, %v14863_v13  ;;  %v8670_v10 = vadd.f32 %v14725_v7, %v14936_v8 }
 0x622   : > { %v10392_v58 = vpop.f32.mrf.mxu0  ;;  %v10375_v42 = vadd.f32 %v14950_v60, %v14944_v28  ;;  %v10284_v28 = vadd.f32 %v14890_v35, %v14886_v55 }
 0x623   : > { %v10428_v48 = vpop.f32.mrf.mxu1  ;;  %v8856_v15 = vadd.f32 %v10339_v6, %v8759_v47  ;;  %v8764_v43 = vadd.f32 %v10278_v27, %v8667_v20  ;;  %v15847_v47 = vld [vmem:[#allocation54_spill] sm:$0xff]  ;;  %v15850_v20 = vld [vmem:[#allocation113_spill] sm:$0xff] }
 0x624   : > { %v10393_v41 = vpop.f32.mrf.mxu0 }
 0x625   : > { %v10394_v11 = vadd.f32 %v10393_v41, %v10392_v58  ;;  %v10429_v22 = vpop.f32.mrf.mxu1  ;;  %v10336_v58 = vadd.f32 %v14858_v31, %v14853_v39 }
 0x626   : > { %v10395_v52 = vpop.f32.mrf.mxu0  ;;  %v10430_v16 = vadd.f32 %v10429_v22, %v10428_v48  ;;  %v8896_v22 = vadd.f32 %v10369_v25, %v8799_v26  ;;  %v8807_v48 = vadd.f32 %v10311_v24, %v8710_v62  ;;  %v10342_v26 = vadd.f32 %v14876_v14, %v14872_v59  ;;  %v15846_v62 = vld [vmem:[#allocation92_spill] sm:$0xff] }
 0x627   : > { %v8942_v18 = vadd.f32 %v10394_v11, %v8845_v54  ;;  %v10431_v37 = vpop.f32.mrf.mxu1  ;;  %v8804_v54 = vadd.f32 %v10308_v61, %v8707_v19  ;;  %v8853_v57 = vadd.f32 %v10336_v58, %v8756_v23  ;;  %v8675_v59 = vadd.f32 %v14737_v12, %v14936_v8  ;;  %v15842_v23 = vld [vmem:[#allocation58_spill] sm:$0xff]  ;;  %v15844_v58 = vld [vmem:[#allocation91_spill] sm:$0xff] }
 0x628   : > { %v10396_v5 = vpop.f32.mrf.mxu0  ;;  %v8990_v50 = vadd.f32 %v10430_v16, %v8893_v40  ;;  %v8904_v2 = vadd.f32 %v10375_v42, %v8807_v48  ;;  %v8861_v40 = vadd.f32 %v10342_v26, %v8764_v43  ;;  %v10290_v27 = vadd.f32 %v15847_v47, %v15846_v62  ;;  %v15852_v48 = vld [vmem:[#allocation115_spill] sm:$0xff] }
 0x629   : > { %11515 = vtanh.f32 %v8942_v18  ;;  %v10397_v41 = vadd.f32 %v10396_v5, %v10395_v52  ;;  %v10432_v49 = vpop.f32.mrf.mxu1  ;;  %v8901_v44 = vadd.f32 %v10372_v1, %v8804_v54  ;;  %v8767_v18 = vadd.f32 %v10281_v45, %v8670_v10  ;;  %v15841_v5 = vld [vmem:[#allocation47_spill] sm:$0xff]  ;;  %v15855_v10 = vld [vmem:[#allocation114_spill] sm:$0xff] }
 0x62a   : > { %v10398_v32 = vpop.f32.mrf.mxu0  ;;  %11517 = vtanh.f32 %v8990_v50  ;;  %v10433_v3 = vadd.f32 %v10432_v49, %v10431_v37  ;;  %v8772_v55 = vadd.f32 %v10284_v28, %v8675_v59  ;;  %v10287_v50 = vadd.f32 %v15842_v23, %v15841_v5  ;;  %v15857_v28 = vld [vmem:[#allocation117_spill] sm:$0xff]  ;;  %v15862_v23 = vld [vmem:[#allocation60_spill] sm:$0xff] }
 0x62b   : > { %v8945_v17 = vadd.f32 %v10397_v41, %v8848_v53  ;;  %v10434_v4 = vpop.f32.mrf.mxu1  ;;  %v10345_v53 = vadd.f32 %v14884_v29, %v14880_v34  ;;  %v15845_v29 = vld [vmem:[#allocation99_spill] sm:$0xff]  ;;  %v15861_v5 = vld [vmem:[#allocation49_spill] sm:$0xff] }
 0x62c   : > { %v10399_v63 = vpop.f32.mrf.mxu0  ;;  %v8993_v39 = vadd.f32 %v10433_v3, %v8896_v22  ;;  %v10348_v22 = vadd.f32 %v15844_v58, %v15843_v21  ;;  %v8678_v54 = vadd.f32 %v15845_v29, %v14936_v8  ;;  %v15863_v58 = vld [vmem:[#allocation45_spill] sm:$0xff]  ;;  %v15865_v29 = vld [vmem:[#allocation96_spill] sm:$0xff] }
 0x62d   : > { %11519 = vtanh.f32 %v8945_v17  ;;  %v10400_v31 = vadd.f32 %v10399_v63, %v10398_v32  ;;  %v10435_v30 = vpop.f32.mrf.mxu1  ;;  %v8864_v37 = vadd.f32 %v10345_v53, %v8767_v18  ;;  %v15860_v53 = vld [vmem:[#allocation40_spill] sm:$0xff] }
 0x62e   : > { %v10401_v33 = vpop.f32.mrf.mxu0  ;;  %11521 = vtanh.f32 %v8993_v39  ;;  %v10436_v36 = vadd.f32 %v10435_v30, %v10434_v4  ;;  %v8869_v24 = vadd.f32 %v10348_v22, %v8772_v55  ;;  %v8775_v3 = vadd.f32 %v10287_v50, %v8678_v54 }
 0x62f   : > { %v8950_v46 = vadd.f32 %v10400_v31, %v8853_v57  ;;  %v10437_v0 = vpop.f32.mrf.mxu1  ;;  %v15848_v57 = vld [vmem:[#allocation89_spill] sm:$0xff]  ;;  %v15849_v31 = vld [vmem:[#allocation83_spill] sm:$0xff]  ;;  %v10299_v50 = vadd.f32 %v15862_v23, %v15861_v5  ;;  %v8694_v22 = vadd.f32 %v15863_v58, %v14936_v8 }
 0x630   : > { %v10402_v11 = vpop.f32.mrf.mxu0  ;;  %v8998_v9 = vadd.f32 %v10436_v36, %v8901_v44  ;;  %v8683_v39 = vadd.f32 %v15848_v57, %v14936_v8  ;;  %v10351_v6 = vadd.f32 %v15850_v20, %v15849_v31 }
 0x631   : > { %11523 = vtanh.f32 %v8950_v46  ;;  %v10403_v13 = vadd.f32 %v10402_v11, %v10401_v33  ;;  %v10438_v61 = vpop.f32.mrf.mxu1  ;;  %v15851_v33 = vld [vmem:[#allocation93_spill] sm:$0xff]  ;;  %v15853_v11 = vld [vmem:[#allocation90_spill] sm:$0xff] }
 0x632   : > { %v10404_v52 = vpop.f32.mrf.mxu0  ;;  %11525 = vtanh.f32 %v8998_v9  ;;  %v10439_v51 = vadd.f32 %v10438_v61, %v10437_v0  ;;  %v10293_v46 = vadd.f32 %v15852_v48, %v15851_v33  ;;  %v8780_v43 = vadd.f32 %v10290_v27, %v8683_v39  ;;  %v15866_v27 = vld [vmem:[#allocation84_spill] sm:$0xff] }
 0x633   : > { %v8953_v56 = vadd.f32 %v10403_v13, %v8856_v15  ;;  %v8872_v15 = vadd.f32 %v10351_v6, %v8775_v3  ;;  %v8686_v42 = vadd.f32 %v15853_v11, %v14936_v8  ;;  %v15854_v13 = vld [vmem:[#allocation59_spill] sm:$0xff] }
 0x634   : > { %v10405_v60 = vpop.f32.mrf.mxu0  ;;  %v9001_v16 = vadd.f32 %v10439_v51, %v8904_v2  ;;  %v10354_v26 = vadd.f32 %v15855_v10, %v15854_v13 }
 0x635   : > { %11527 = vtanh.f32 %v8953_v56  ;;  %v10406_v7 = vadd.f32 %v10405_v60, %v10404_v52  ;;  %v8783_v2 = vadd.f32 %v10293_v46, %v8686_v42 }
 0x636   : > { %v11516_v19 = vpop.eup %11515  ;;  %v10407_v14 = vpop.f32.mrf.mxu0  ;;  %11529 = vtanh.f32 %v9001_v16  ;;  %v8877_v51 = vadd.f32 %v10354_v26, %v8780_v43 }
 0x637   : > { %9122 = vst [vmem:[%s13866_s18 + $0x30] sm:$0xff] %v11516_v19  ;;  %v8958_v38 = vadd.f32 %v10406_v7, %v8861_v40  ;;  %v11518_v25 = vpop.eup %11517  ;;  %v15856_v40 = vld [vmem:[#allocation116_spill] sm:$0xff]  ;;  %v15858_v7 = vld [vmem:[#allocation101_spill] sm:$0xff]  ;;  %v15859_v19 = vld [vmem:[#allocation94_spill] sm:$0xff] }
 0x638   : > { %v10408_v35 = vpop.f32.mrf.mxu0  ;;  %9206 = vst [vmem:[%s13866_s18 + $0x2d0] sm:$0xff] %v11518_v25  ;;  %v10296_v60 = vadd.f32 %v15857_v28, %v15856_v40  ;;  %v10357_v59 = vadd.f32 %v15859_v19, %v15858_v7 }
 0x639   : > { %11531 = vtanh.f32 %v8958_v38  ;;  %v10409_v41 = vadd.f32 %v10408_v35, %v10407_v14  ;;  %v8691_v38 = vadd.f32 %v15860_v53, %v14936_v8 }
 0x63a   : > { %v11520_v12 = vpop.eup %11519  ;;  %v10410_v34 = vpop.f32.mrf.mxu0  ;;  %v8880_v55 = vadd.f32 %v10357_v59, %v8783_v2 }
 0x63b   : > { %9129 = vst [vmem:[%s13866_s18 + $0x68] sm:$0xff] %v11520_v12  ;;  %v8961_v49 = vadd.f32 %v10409_v41, %v8864_v37  ;;  %v11522_v32 = vpop.eup %11521  ;;  %v8788_v37 = vadd.f32 %v10296_v60, %v8691_v38 }
 0x63c   : > { %v10411_v17 = vpop.f32.mrf.mxu0  ;;  %9213 = vst [vmem:[%s13866_s18 + $0x308] sm:$0xff] %v11522_v32 }
 0x63d   : > { %11533 = vtanh.f32 %v8961_v49  ;;  %v10412_v1 = vadd.f32 %v10411_v17, %v10410_v34  ;;  %v15864_v34 = vld [vmem:[#allocation48_spill] sm:$0xff]  ;;  %v8791_v17 = vadd.f32 %v10299_v50, %v8694_v22 }
 0x63e   : > { %v11524_v4 = vpop.eup %11523  ;;  %v10413_v63 = vpop.f32.mrf.mxu0  ;;  %v10360_v54 = vadd.f32 %v15865_v29, %v15864_v34 }
 0x63f   : > { %9136 = vst [vmem:[%s13866_s18 + $0xa0] sm:$0xff] %v11524_v4  ;;  %v8966_v44 = vadd.f32 %v10412_v1, %v8869_v24  ;;  %v11526_v30 = vpop.eup %11525  ;;  %v15867_v1 = vld [vmem:[#allocation120_spill] sm:$0xff] }
 0x640   : > { %v10414_v36 = vpop.f32.mrf.mxu0  ;;  %9220 = vst [vmem:[%s13866_s18 + $0x340] sm:$0xff] %v11526_v30  ;;  %v8885_v24 = vadd.f32 %v10360_v54, %v8788_v37  ;;  %v10363_v4 = vadd.f32 %v15867_v1, %v15866_v27 }
 0x641   : > { %11535 = vtanh.f32 %v8966_v44  ;;  %v10415_v45 = vadd.f32 %v10414_v36, %v10413_v63 }
 0x642   : > { %v11528_v0 = vpop.eup %11527  ;;  %v10416_v9 = vpop.f32.mrf.mxu0  ;;  %v8888_v57 = vadd.f32 %v10363_v4, %v8791_v17 }
 0x643   : > { %9143 = vst [vmem:[%s13866_s18 + $0xd8] sm:$0xff] %v11528_v0  ;;  %v8969_v61 = vadd.f32 %v10415_v45, %v8872_v15  ;;  %v11530_v52 = vpop.eup %11529 }
 0x644   : > { %v10417_v56 = vpop.f32.mrf.mxu0  ;;  %9227 = vst [vmem:[%s13866_s18 + $0x378] sm:$0xff] %v11530_v52 }
 0x645   : > { %11537 = vtanh.f32 %v8969_v61  ;;  %v10418_v18 = vadd.f32 %v10417_v56, %v10416_v9 }
 0x646   : > { %v11532_v16 = vpop.eup %11531  ;;  %v10419_v14 = vpop.f32.mrf.mxu0 }
 0x647   : > { %9150 = vst [vmem:[%s13866_s18 + $0x110] sm:$0xff] %v11532_v16  ;;  %v8974_v25 = vadd.f32 %v10418_v18, %v8877_v51 }
 0x648   : > { %v10420_v35 = vpop.f32.mrf.mxu0 }
 0x649   : > { %11539 = vtanh.f32 %v8974_v25  ;;  %v10421_v41 = vadd.f32 %v10420_v35, %v10419_v14 }
 0x64a   : > { %v11534_v12 = vpop.eup %11533  ;;  %v10422_v21 = vpop.f32.mrf.mxu0 }
 0x64b   : > { %9157 = vst [vmem:[%s13866_s18 + $0x148] sm:$0xff] %v11534_v12  ;;  %v8977_v49 = vadd.f32 %v10421_v41, %v8880_v55 }
 0x64c   : > { %v10423_v32 = vpop.f32.mrf.mxu0 }
 0x64d   : > { %11541 = vtanh.f32 %v8977_v49  ;;  %v10424_v3 = vadd.f32 %v10423_v32, %v10422_v21 }
 0x64e   : > { %v11536_v62 = vpop.eup %11535  ;;  %v10425_v47 = vpop.f32.mrf.mxu0 }
 0x64f   : > { %9164 = vst [vmem:[%s13866_s18 + $0x180] sm:$0xff] %v11536_v62  ;;  %v8982_v8 = vadd.f32 %v10424_v3, %v8885_v24 }
 0x650   : > { %v10426_v63 = vpop.f32.mrf.mxu0 }
 0x651   : > { %11543 = vtanh.f32 %v8982_v8  ;;  %v10427_v39 = vadd.f32 %v10426_v63, %v10425_v47 }
 0x652   : > { %v11538_v31 = vpop.eup %11537 }
 0x653   : > { %9171 = vst [vmem:[%s13866_s18 + $0x1b8] sm:$0xff] %v11538_v31  ;;  %v8985_v20 = vadd.f32 %v10427_v39, %v8888_v57 }
 0x655   : > { %11545 = vtanh.f32 %v8985_v20 }
 0x656   : > { %v11540_v6 = vpop.eup %11539 }
 0x657   : > { %9178 = vst [vmem:[%s13866_s18 + $0x1f0] sm:$0xff] %v11540_v6 }
 0x65a   : > { %v11542_v44 = vpop.eup %11541 }
 0x65b   : > { %9185 = vst [vmem:[%s13866_s18 + $0x228] sm:$0xff] %v11542_v44 }
 0x65e   : > { %v11544_v30 = vpop.eup %11543 }
 0x65f   : > { %9192 = vst [vmem:[%s13866_s18 + $0x260] sm:$0xff] %v11544_v30 }
 0x662   : > { %v11546_v33 = vpop.eup %11545 }
 0x663   : > { %9199 = vst [vmem:[%s13866_s18 + $0x298] sm:$0xff] %v11546_v33 }
 0x664 PF: > { %s24_s30 = sadd.s32 1, %s11784_s30  }
 0x665   : > { %p21_p6 = scmp.ge.s32.totalorder %s24_s30, 4  }
 0x667   :  { %23 = sbr.rel (!%p21_p6) target bundleno = 5 (0x5), region = 119 }
 0x66c   :  { %9252 = vsyncpa [#allocation3], 1 }
 0x66d   :  { %9254 = vsyncpa [#allocation3 + $0x1], 1 }
 0x66e   :  { %9255 = vsyncpa [#allocation5], 1 }
 0x66f   :  { %9256 = vsyncpa [#allocation8], 1 }
 0x670   :  { %9257 = vsyncpa [#allocation11], 1 }
 0x671   :  { %9258 = vsyncpa [#allocation14], 1 }

</bundles_post_ra>
